<compile_context>
chip_gen: v7x
topology: tpu7x:2x2x1
jax: 0.10.0
libtpu: 0.0.40
codegen_flags: <defaults>
</compile_context>

<pallas_src>
import functools

import jax
import jax.numpy as jnp
from jax.experimental import pallas as pl
from jax.experimental.pallas import tpu as pltpu

EPS = 1e-5
TILE_N_TARGET = 512  # safe for v7x's 64 MiB VMEM; v6e/v5e could go ~2x larger


def _pick_tile(n, target=TILE_N_TARGET):
    """Largest multiple of 16 that divides n and is <= target; else full n."""
    if n <= target:
        return n
    t = (target // 16) * 16
    while t >= 16:
        if n % t == 0:
            return t
        t -= 16
    return n  # fall back to a full-N block (no point-axis tiling)


def _cparams(semantics):
    return pltpu.CompilerParams(
        dimension_semantics=semantics,
        vmem_limit_bytes=48 * 1024 * 1024,
    )


# ------------------------- BlockSpec helpers (2-D grid (b, n)) -------------------------

def _act_spec(tile, c):
    return pl.BlockSpec((1, tile, c), lambda b, n: (b, n, 0))


def _perbatch_spec(shape):
    zeros = (0,) * (len(shape) - 1)
    return pl.BlockSpec(shape, lambda b, n, _z=zeros: (b,) + _z)


def _const_spec(shape):
    zeros = (0,) * len(shape)
    return pl.BlockSpec(shape, lambda b, n, _z=zeros: _z)


def _layer_specs(layer):
    cin, cout = layer["w"].shape
    return [_const_spec((cin, cout)), _const_spec((1, cout))]


def _layer_args(layer):
    return (layer["w"].astype(jnp.bfloat16), layer["b"])


# ----------------------------------- kernel bodies -----------------------------------

def _mm(a, w, b):
    """bf16 MXU matmul with f32 accumulation + (BN-folded) bias, all f32 afterwards."""
    return jnp.dot(a.astype(jnp.bfloat16), w, preferred_element_type=jnp.float32) + b


def _mm_relu(a, w, b):
    return jnp.maximum(_mm(a, w, b), 0.0)


def _accumulate_max(gmax_ref, tile_max):
    n = pl.program_id(1)

    @pl.when(n == 0)
    def _():
        gmax_ref[0] = tile_max

    @pl.when(n != 0)
    def _():
        gmax_ref[0] = jnp.maximum(gmax_ref[0], tile_max)


def _stn_conv_max_kernel(x_ref, w1, b1, w2, b2, w3, b3, gmax_ref):
    """STN conv1->conv2->conv3 (all +BN+ReLU) fused with max over the point axis."""
    a = _mm_relu(x_ref[0], w1[...], b1[...])
    a = _mm_relu(a, w2[...], b2[...])
    a = _mm_relu(a, w3[...], b3[...])                 # (T, 1024) f32, never stored
    _accumulate_max(gmax_ref, jnp.max(a, axis=0, keepdims=True))


def _fc_stack_kernel(g_ref, w1, b1, w2, b2, w3, b3, o_ref):
    """STN fc1(+BN+ReLU) -> fc2(+BN+ReLU) -> fc3 (+identity folded into b3)."""
    a = _mm_relu(g_ref[...], w1[...], b1[...])
    a = _mm_relu(a, w2[...], b2[...])
    o_ref[...] = _mm(a, w3[...], b3[...]).astype(o_ref.dtype)


def _conv1_fstn_max_kernel(x_ref, wb_ref, b1_ref,
                           fw1, fb1, fw2, fb2, fw3, fb3, gmax_ref):
    """Encoder conv1 (input transform folded into per-batch weight wb) fused with the
    feature-STN conv stack + running max.  h never leaves the kernel."""
    h = _mm_relu(x_ref[0], wb_ref[0], b1_ref[...])    # (T, 64) f32
    a = _mm_relu(h, fw1[...], fb1[...])
    a = _mm_relu(a, fw2[...], fb2[...])
    a = _mm_relu(a, fw3[...], fb3[...])               # (T, 1024), never stored
    _accumulate_max(gmax_ref, jnp.max(a, axis=0, keepdims=True))


def _enc_max_kernel(x_ref, wb_ref, b1_ref, w2b_ref, b2_ref, w3, b3, gmax_ref):
    """Recompute h from x, then conv2 (trans_feat folded into per-batch w2b) + conv3
    (BN, no ReLU) + global max.  Neither h nor pointfeat is written to HBM."""
    h = _mm_relu(x_ref[0], wb_ref[0], b1_ref[...])    # (T, 64)
    a = _mm_relu(h, w2b_ref[0], b2_ref[...])          # (T, 128)
    a = _mm(a, w3[...], b3[...])                      # (T, 1024), conv3: no ReLU
    _accumulate_max(gmax_ref, jnp.max(a, axis=0, keepdims=True))


def _head_kernel(x_ref, wb_ref, b1e_ref, w1pb_ref, bias1_ref,
                 w2, b2, w3, b3, w4, b4, o_ref):
    """Segmentation head conv1-4 + log_softmax.  The global-feature contribution to
    conv1 arrives as a per-batch bias; the point-feature stream is recomputed from x."""
    h = _mm_relu(x_ref[0], wb_ref[0], b1e_ref[...])   # (T, 64)   encoder conv1
    y = _mm_relu(h, w1pb_ref[0], bias1_ref[0])        # (T, 512)  head conv1
    y = _mm_relu(y, w2[...], b2[...])                 # (T, 256)
    y = _mm_relu(y, w3[...], b3[...])                 # (T, 128)
    y = _mm(y, w4[...], b4[...])                      # (T, K)
    m = jnp.max(y, axis=-1, keepdims=True)
    s = y - m
    lse = jnp.log(jnp.sum(jnp.exp(s), axis=-1, keepdims=True))
    o_ref[0] = (s - lse).astype(o_ref.dtype)
    # TODO(synk): emit (num_class, TILE_N) directly (lane-dense along N) once an in-kernel
    # (T, K)->(K, T) transpose of a K<8 tensor is worth the lowering risk; the final
    # (B,N,K)->(B,K,N) transpose is done in JAX on a tiny array.


# ----------------------------------- kernel wrappers -----------------------------------

def stn_conv_max(x, p, tile):
    B, N, cin = x.shape
    return pl.pallas_call(
        _stn_conv_max_kernel,
        out_shape=jax.ShapeDtypeStruct((B, 1, 1024), jnp.float32),
        grid=(B, N // tile),
        in_specs=[_act_spec(tile, cin)]
        + _layer_specs(p["c1"]) + _layer_specs(p["c2"]) + _layer_specs(p["c3"]),
        out_specs=_perbatch_spec((1, 1, 1024)),
        compiler_params=_cparams(("parallel", "arbitrary")),
    )(x, *_layer_args(p["c1"]), *_layer_args(p["c2"]), *_layer_args(p["c3"]))


def stn_fc(g, p, k):
    """g: (B, 1024) -> (B, k, k); identity matrix folded into the fc3 bias."""
    B, cg = g.shape
    kk = k * k
    b3 = p["f3"]["b"] + jnp.eye(k, dtype=jnp.float32).reshape(1, kk)

    def fullspec(shape):
        zeros = (0,) * len(shape)
        return pl.BlockSpec(shape, lambda i, _z=zeros: _z)

    w1, w2, w3 = p["f1"]["w"], p["f2"]["w"], p["f3"]["w"]
    out = pl.pallas_call(
        _fc_stack_kernel,
        out_shape=jax.ShapeDtypeStruct((B, kk), jnp.float32),
        grid=(1,),
        in_specs=[fullspec((B, cg)),
                  fullspec(w1.shape), fullspec((1, w1.shape[1])),
                  fullspec(w2.shape), fullspec((1, w2.shape[1])),
                  fullspec(w3.shape), fullspec((1, kk))],
        out_specs=fullspec((B, kk)),
        compiler_params=_cparams(("arbitrary",)),
    )(g,
      w1.astype(jnp.bfloat16), p["f1"]["b"],
      w2.astype(jnp.bfloat16), p["f2"]["b"],
      w3.astype(jnp.bfloat16), b3)
    return out.reshape(B, k, k)


def conv1_fstn_max(x, wb, b1, fstn, tile):
    B, N, cin = x.shape
    return pl.pallas_call(
        _conv1_fstn_max_kernel,
        out_shape=jax.ShapeDtypeStruct((B, 1, 1024), jnp.float32),
        grid=(B, N // tile),
        in_specs=[_act_spec(tile, cin),
                  _perbatch_spec((1, cin, 64)),
                  _const_spec((1, 64))]
        + _layer_specs(fstn["c1"]) + _layer_specs(fstn["c2"]) + _layer_specs(fstn["c3"]),
        out_specs=_perbatch_spec((1, 1, 1024)),
        compiler_params=_cparams(("parallel", "arbitrary")),
    )(x, wb, b1,
      *_layer_args(fstn["c1"]), *_layer_args(fstn["c2"]), *_layer_args(fstn["c3"]))


def enc_max(x, wb, b1, w2b, enc, tile):
    B, N, cin = x.shape
    return pl.pallas_call(
        _enc_max_kernel,
        out_shape=jax.ShapeDtypeStruct((B, 1, 1024), jnp.float32),
        grid=(B, N // tile),
        in_specs=[_act_spec(tile, cin),
                  _perbatch_spec((1, cin, 64)),
                  _const_spec((1, 64)),
                  _perbatch_spec((1, 64, 128)),
                  _const_spec((1, 128))]
        + _layer_specs(enc["c3"]),
        out_specs=_perbatch_spec((1, 1, 1024)),
        compiler_params=_cparams(("parallel", "arbitrary")),
    )(x, wb, b1, w2b, enc["c2"]["b"], *_layer_args(enc["c3"]))


def seg_head(x, wb, b1e, w1pb, bias1, hp, num_class, tile):
    B, N, cin = x.shape
    return pl.pallas_call(
        _head_kernel,
        out_shape=jax.ShapeDtypeStruct((B, N, num_class), jnp.float32),
        grid=(B, N // tile),
        in_specs=[_act_spec(tile, cin),
                  _perbatch_spec((1, cin, 64)),
                  _const_spec((1, 64)),
                  _perbatch_spec((1, 64, 512)),
                  _perbatch_spec((1, 1, 512))]
        + _layer_specs(hp["c2"]) + _layer_specs(hp["c3"])
        + [_const_spec((128, num_class)), _const_spec((1, num_class))],
        out_specs=_act_spec(tile, num_class),
        compiler_params=_cparams(("parallel", "parallel")),
    )(x, wb, b1e, w1pb, bias1,
      *_layer_args(hp["c2"]), *_layer_args(hp["c3"]),
      hp["c4"]["w"].astype(jnp.bfloat16), hp["c4"]["b"])


# ---------------------- deterministic parameter setup ----------------------

def _init_linear(key, cin, cout, std=0.05):
    kw, kb = jax.random.split(key)
    w = std * jax.random.normal(kw, (cin, cout), jnp.float32)
    b = std * jax.random.normal(kb, (cout,), jnp.float32)
    return w, b


def make_layer(key, cin, cout, bn=True):
    """Conv/Linear (+ inference-mode BN folded into the weight and a per-channel shift)."""
    k1, k2 = jax.random.split(key)
    w, b = _init_linear(k1, cin, cout)
    if not bn:
        return {"w": w, "b": b.reshape(1, cout)}
    kg, kb2, km, kv = jax.random.split(k2, 4)
    gamma = 1.0 + 0.1 * jax.random.normal(kg, (cout,), jnp.float32)
    beta = 0.1 * jax.random.normal(kb2, (cout,), jnp.float32)
    mean = 0.1 * jax.random.normal(km, (cout,), jnp.float32)
    var = 0.9 + 0.2 * jax.random.uniform(kv, (cout,), jnp.float32)
    scale = gamma / jnp.sqrt(var + EPS)
    shift = beta - mean * scale + b * scale
    return {"w": w * scale[None, :], "b": shift.reshape(1, cout)}


def init_params(key, num_class):
    keys = iter(jax.random.split(key, 32))
    return {
        "stn": {  # STN3d
            "c1": make_layer(next(keys), 3, 64),
            "c2": make_layer(next(keys), 64, 128),
            "c3": make_layer(next(keys), 128, 1024),
            "f1": make_layer(next(keys), 1024, 512),
            "f2": make_layer(next(keys), 512, 256),
            "f3": make_layer(next(keys), 256, 9, bn=False),
        },
        "fstn": {  # STNkd, k=64
            "c1": make_layer(next(keys), 64, 64),
            "c2": make_layer(next(keys), 64, 128),
            "c3": make_layer(next(keys), 128, 1024),
            "f1": make_layer(next(keys), 1024, 512),
            "f2": make_layer(next(keys), 512, 256),
            "f3": make_layer(next(keys), 256, 64 * 64, bn=False),
        },
        "enc": {  # PointNetEncoder convs
            "c1": make_layer(next(keys), 3, 64),
            "c2": make_layer(next(keys), 64, 128),
            "c3": make_layer(next(keys), 128, 1024),
        },
        "head": {  # segmentation head
            "c1": make_layer(next(keys), 1088, 512),
            "c2": make_layer(next(keys), 512, 256),
            "c3": make_layer(next(keys), 256, 128),
            "c4": make_layer(next(keys), 128, num_class, bn=False),
        },
    }


# ------------------------------- forward pass ------------------------------

def pointnet_forward(x, params, num_class, tile_n=None):
    """x: (B, N, 3) -> (B, num_class, N), matching the PyTorch POINTNET module."""
    B, N, _ = x.shape
    tile = tile_n if tile_n is not None else _pick_tile(N)
    assert N % tile == 0, "point axis must be an exact multiple of the tile size"

    stn, fstn, enc, hp = params["stn"], params["fstn"], params["enc"], params["head"]

    # --- STN3d: fused conv stack + max, then fused fc stack (identity folded in)
    g3 = stn_conv_max(x, stn, tile).reshape(B, 1024)
    trans = stn_fc(g3, stn, 3)                                          # (B, 3, 3)

    # --- encoder conv1 with the 3x3 transform folded into a per-batch weight,
    #     fused with the feature-STN conv stack + max
    wb = jnp.einsum("bij,jo->bio", trans, enc["c1"]["w"]).astype(jnp.bfloat16)   # (B,3,64)
    g_fstn = conv1_fstn_max(x, wb, enc["c1"]["b"], fstn, tile)
    trans_feat = stn_fc(g_fstn.reshape(B, 1024), fstn, 64)              # (B, 64, 64)

    # --- fold the 64x64 feature transform into conv2 and head-conv1's point part
    w2b = jnp.einsum("bij,jo->bio", trans_feat, enc["c2"]["w"]).astype(jnp.bfloat16)
    w1pb = jnp.einsum("bij,jo->bio", trans_feat, hp["c1"]["w"][1024:]).astype(jnp.bfloat16)

    # --- conv2 + conv3 + global max (conv1 recomputed in-kernel; no (B,N,64) HBM traffic)
    gfeat = enc_max(x, wb, enc["c1"]["b"], w2b, enc, tile).reshape(B, 1024)

    # --- head: global feature folded into a per-batch bias for conv1
    #     (concat([global, pointfeat]) @ W1 == pointfeat @ W1[1024:] + gfeat @ W1[:1024])
    bias1 = gfeat @ hp["c1"]["w"][:1024] + hp["c1"]["b"]                # (B, 512)
    y = seg_head(x, wb, enc["c1"]["b"], w1pb, bias1.reshape(B, 1, 512),
                 hp, num_class, tile)                                   # (B, N, K)

    return jnp.transpose(y, (0, 2, 1))                                  # (B, K, N)


# ------------------------- pure-JAX reference (same precision) -------------------------

def _jmm(a, w, b, relu=True):
    y = jnp.dot(a.astype(jnp.bfloat16), w.astype(jnp.bfloat16),
                preferred_element_type=jnp.float32) + b
    return jnp.maximum(y, 0.0) if relu else y


def _jbmm(a, w, b, relu=True):
    y = jnp.einsum("bni,bio->bno", a.astype(jnp.bfloat16), w.astype(jnp.bfloat16),
                   preferred_element_type=jnp.float32) + b
    return jnp.maximum(y, 0.0) if relu else y


def pointnet_reference(x, params, num_class):
    B, N, _ = x.shape
    stn, fstn, enc, hp = params["stn"], params["fstn"], params["enc"], params["head"]

    def stn_trans(feat, p, k):
        a = _jmm(feat, p["c1"]["w"], p["c1"]["b"])
        a = _jmm(a, p["c2"]["w"], p["c2"]["b"])
        a = _jmm(a, p["c3"]["w"], p["c3"]["b"])
        g = jnp.max(a, axis=1)
        a = _jmm(g, p["f1"]["w"], p["f1"]["b"])
        a = _jmm(a, p["f2"]["w"], p["f2"]["b"])
        b3 = p["f3"]["b"] + jnp.eye(k, dtype=jnp.float32).reshape(1, k * k)
        return _jmm(a, p["f3"]["w"], b3, relu=False).reshape(B, k, k)

    trans = stn_trans(x, stn, 3)
    wb = jnp.einsum("bij,jo->bio", trans, enc["c1"]["w"])
    h = _jbmm(x, wb, enc["c1"]["b"])                                    # (B, N, 64)
    trans_feat = stn_trans(h, fstn, 64)
    w2b = jnp.einsum("bij,jo->bio", trans_feat, enc["c2"]["w"])
    a = _jbmm(h, w2b, enc["c2"]["b"])
    a = _jmm(a, enc["c3"]["w"], enc["c3"]["b"], relu=False)
    gfeat = jnp.max(a, axis=1)                                          # (B, 1024)
    w1pb = jnp.einsum("bij,jo->bio", trans_feat, hp["c1"]["w"][1024:])
    bias1 = gfeat @ hp["c1"]["w"][:1024] + hp["c1"]["b"]
    y = _jbmm(h, w1pb, bias1[:, None, :])
    y = _jmm(y, hp["c2"]["w"], hp["c2"]["b"])
    y = _jmm(y, hp["c3"]["w"], hp["c3"]["b"])
    y = _jmm(y, hp["c4"]["w"], hp["c4"]["b"], relu=False)
    y = jax.nn.log_softmax(y, axis=-1)
    return jnp.transpose(y, (0, 2, 1))


# ----------------------------------- main -----------------------------------

if __name__ == "__main__":
    num_class = 5
    B, N = 2, 128
    TILE = 64  # small test tile so the max-accumulator path runs with >1 tile per batch

    key = jax.random.PRNGKey(0)
    kx, kp = jax.random.split(key)
    x = jax.random.normal(kx, (B, N, 3), jnp.float32)
    params = init_params(kp, num_class)

    fwd = jax.jit(functools.partial(pointnet_forward, num_class=num_class, tile_n=TILE))
    out = jax.block_until_ready(fwd(x, params))

    assert out.shape == (B, num_class, N), out.shape
    assert bool(jnp.all(jnp.isfinite(out)))
    # log_softmax sanity: per-point probabilities sum to 1
    probs = jnp.exp(out).sum(axis=1)
    assert bool(jnp.allclose(probs, 1.0, atol=1e-3))

    # pure-JAX reference with the same fold structure / matmul precision
    ref = jax.jit(functools.partial(pointnet_reference, num_class=num_class))(x, params)
    max_err = float(jnp.max(jnp.abs(out - ref)))
    assert max_err < 5e-2, f"max |pallas - ref| = {max_err}"
    print("KERNEL_OK")
</pallas_src>

<mosaic_0001>
module attributes {stable_mosaic.version = 11 : i64} {
  func.func @_stn_conv_max_kernel(%arg0: i32, %arg1: i32, %arg2: memref<1x64x3xf32, #tpu.memory_space<vmem>>, %arg3: memref<3x64xbf16, #tpu.memory_space<vmem>>, %arg4: memref<1x64xf32, #tpu.memory_space<vmem>>, %arg5: memref<64x128xbf16, #tpu.memory_space<vmem>>, %arg6: memref<1x128xf32, #tpu.memory_space<vmem>>, %arg7: memref<128x1024xbf16, #tpu.memory_space<vmem>>, %arg8: memref<1x1024xf32, #tpu.memory_space<vmem>>, %arg9: memref<1x1x1024xf32, #tpu.memory_space<vmem>>) attributes {dimension_semantics = [#tpu.dimension_semantics<parallel>, #tpu.dimension_semantics<arbitrary>], iteration_bounds = array<i64: 2, 2>, scalar_prefetch = 0 : i64, scratch_operands = 0 : i64, tpu.core_type = #tpu.core_type<tc>, window_params = [{transform_indices = @transform_0, window_bounds = array<i64: 1, 64, 3>}, {pipeline_mode = #tpu.pipeline_mode<synchronous>, transform_indices = @transform_1, window_bounds = array<i64: 3, 64>}, {pipeline_mode = #tpu.pipeline_mode<synchronous>, transform_indices = @transform_2, window_bounds = array<i64: 1, 64>}, {pipeline_mode = #tpu.pipeline_mode<synchronous>, transform_indices = @transform_3, window_bounds = array<i64: 64, 128>}, {pipeline_mode = #tpu.pipeline_mode<synchronous>, transform_indices = @transform_4, window_bounds = array<i64: 1, 128>}, {pipeline_mode = #tpu.pipeline_mode<synchronous>, transform_indices = @transform_5, window_bounds = array<i64: 128, 1024>}, {pipeline_mode = #tpu.pipeline_mode<synchronous>, transform_indices = @transform_6, window_bounds = array<i64: 1, 1024>}, {transform_indices = @transform_7, window_bounds = array<i64: 1, 1, 1024>}]} {
    %c0 = arith.constant 0 : index
    %c0_0 = arith.constant 0 : index
    %c0_1 = arith.constant 0 : index
    %0 = vector.load %arg2[%c0, %c0_0, %c0_1] : memref<1x64x3xf32, #tpu.memory_space<vmem>>, vector<1x64x3xf32>
    %1 = vector.shape_cast %0 : vector<1x64x3xf32> to vector<64x3xf32>
    %c0_2 = arith.constant 0 : index
    %c0_3 = arith.constant 0 : index
    %2 = vector.load %arg3[%c0_2, %c0_3] : memref<3x64xbf16, #tpu.memory_space<vmem>>, vector<3x64xbf16>
    %c0_4 = arith.constant 0 : index
    %c0_5 = arith.constant 0 : index
    %3 = vector.load %arg4[%c0_4, %c0_5] : memref<1x64xf32, #tpu.memory_space<vmem>>, vector<1x64xf32>
    %4 = arith.truncf %1 : vector<64x3xf32> to vector<64x3xbf16>
    %cst = arith.constant dense<0.000000e+00> : vector<64x64xf32>
    %5 = tpu.matmul %4, %2, %cst {dimension_numbers = #tpu.dot_dimension_numbers<[1], [0], [0], [1], [0, 0, 1, 1], [], []>} : vector<64x3xbf16>, vector<3x64xbf16>, vector<64x64xf32> -> vector<64x64xf32>
    %6 = vector.broadcast %3 : vector<1x64xf32> to vector<64x64xf32>
    %7 = arith.addf %5, %6 : vector<64x64xf32>
    %cst_6 = arith.constant 0.000000e+00 : f32
    %8 = vector.broadcast %cst_6 : f32 to vector<64x64xf32>
    %9 = arith.maximumf %7, %8 : vector<64x64xf32>
    %c0_7 = arith.constant 0 : index
    %c0_8 = arith.constant 0 : index
    %10 = vector.load %arg5[%c0_7, %c0_8] : memref<64x128xbf16, #tpu.memory_space<vmem>>, vector<64x128xbf16>
    %c0_9 = arith.constant 0 : index
    %c0_10 = arith.constant 0 : index
    %11 = vector.load %arg6[%c0_9, %c0_10] : memref<1x128xf32, #tpu.memory_space<vmem>>, vector<1x128xf32>
    %12 = arith.truncf %9 : vector<64x64xf32> to vector<64x64xbf16>
    %cst_11 = arith.constant dense<0.000000e+00> : vector<64x128xf32>
    %13 = tpu.matmul %12, %10, %cst_11 {dimension_numbers = #tpu.dot_dimension_numbers<[1], [0], [0], [1], [0, 0, 1, 1], [], []>} : vector<64x64xbf16>, vector<64x128xbf16>, vector<64x128xf32> -> vector<64x128xf32>
    %14 = vector.broadcast %11 : vector<1x128xf32> to vector<64x128xf32>
    %15 = arith.addf %13, %14 : vector<64x128xf32>
    %cst_12 = arith.constant 0.000000e+00 : f32
    %16 = vector.broadcast %cst_12 : f32 to vector<64x128xf32>
    %17 = arith.maximumf %15, %16 : vector<64x128xf32>
    %c0_13 = arith.constant 0 : index
    %c0_14 = arith.constant 0 : index
    %18 = vector.load %arg7[%c0_13, %c0_14] : memref<128x1024xbf16, #tpu.memory_space<vmem>>, vector<128x1024xbf16>
    %c0_15 = arith.constant 0 : index
    %c0_16 = arith.constant 0 : index
    %19 = vector.load %arg8[%c0_15, %c0_16] : memref<1x1024xf32, #tpu.memory_space<vmem>>, vector<1x1024xf32>
    %20 = arith.truncf %17 : vector<64x128xf32> to vector<64x128xbf16>
    %cst_17 = arith.constant dense<0.000000e+00> : vector<64x1024xf32>
    %21 = tpu.matmul %20, %18, %cst_17 {dimension_numbers = #tpu.dot_dimension_numbers<[1], [0], [0], [1], [0, 0, 1, 1], [], []>} : vector<64x128xbf16>, vector<128x1024xbf16>, vector<64x1024xf32> -> vector<64x1024xf32>
    %22 = vector.broadcast %19 : vector<1x1024xf32> to vector<64x1024xf32>
    %23 = arith.addf %21, %22 : vector<64x1024xf32>
    %cst_18 = arith.constant 0.000000e+00 : f32
    %24 = vector.broadcast %cst_18 : f32 to vector<64x1024xf32>
    %25 = arith.maximumf %23, %24 : vector<64x1024xf32>
    %cst_19 = arith.constant dense<0xFF800000> : vector<1024xf32>
    %26 = vector.multi_reduction <maximumf>, %25, %cst_19 [0] : vector<64x1024xf32> to vector<1024xf32>
    %27 = vector.shape_cast %26 : vector<1024xf32> to vector<1x1024xf32>
    %c0_i32 = arith.constant 0 : i32
    %28 = arith.cmpi eq, %arg1, %c0_i32 : i32
    %29 = arith.extui %28 : i1 to i32
    %c0_i32_20 = arith.constant 0 : i32
    %30 = arith.cmpi ne, %29, %c0_i32_20 : i32
    scf.if %30 {
      %c0_23 = arith.constant 0 : index
      %c0_24 = arith.constant 0 : index
      %c0_25 = arith.constant 0 : index
      %34 = vector.load %arg9[%c0_23, %c0_24, %c0_25] : memref<1x1x1024xf32, #tpu.memory_space<vmem>>, vector<1x1x1024xf32>
      %35 = vector.shape_cast %34 : vector<1x1x1024xf32> to vector<1x1024xf32>
      %36 = vector.shape_cast %27 : vector<1x1024xf32> to vector<1x1x1024xf32>
      tpu.vector_store %arg9[%c0_23, %c0_24, %c0_25], %36 {strides = array<i32>} : memref<1x1x1024xf32, #tpu.memory_space<vmem>>, vector<1x1x1024xf32>,
    } else {
    }
    %c0_i32_21 = arith.constant 0 : i32
    %31 = arith.cmpi ne, %arg1, %c0_i32_21 : i32
    %32 = arith.extui %31 : i1 to i32
    %c0_i32_22 = arith.constant 0 : i32
    %33 = arith.cmpi ne, %32, %c0_i32_22 : i32
    scf.if %33 {
      %c0_23 = arith.constant 0 : index
      %c0_24 = arith.constant 0 : index
      %c0_25 = arith.constant 0 : index
      %34 = vector.load %arg9[%c0_23, %c0_24, %c0_25] : memref<1x1x1024xf32, #tpu.memory_space<vmem>>, vector<1x1x1024xf32>
      %35 = vector.shape_cast %34 : vector<1x1x1024xf32> to vector<1x1024xf32>
      %36 = arith.maximumf %35, %27 : vector<1x1024xf32>
      %c0_26 = arith.constant 0 : index
      %c0_27 = arith.constant 0 : index
      %c0_28 = arith.constant 0 : index
      %37 = vector.load %arg9[%c0_26, %c0_27, %c0_28] : memref<1x1x1024xf32, #tpu.memory_space<vmem>>, vector<1x1x1024xf32>
      %38 = vector.shape_cast %37 : vector<1x1x1024xf32> to vector<1x1024xf32>
      %39 = vector.shape_cast %36 : vector<1x1024xf32> to vector<1x1x1024xf32>
      tpu.vector_store %arg9[%c0_26, %c0_27, %c0_28], %39 {strides = array<i32>} : memref<1x1x1024xf32, #tpu.memory_space<vmem>>, vector<1x1x1024xf32>,
    } else {
    }
    return
  }
  func.func @transform_0(%arg0: i32, %arg1: i32) -> (i32, i32, i32) {
    %c0_i32 = arith.constant 0 : i32
    %c0_i32_0 = arith.constant 0 : i32
    return %arg0, %arg1, %c0_i32 : i32, i32, i32
  }
  func.func @transform_1(%arg0: i32, %arg1: i32) -> (i32, i32) {
    %c0_i32 = arith.constant 0 : i32
    %c0_i32_0 = arith.constant 0 : i32
    %c0_i32_1 = arith.constant 0 : i32
    return %c0_i32, %c0_i32_0 : i32, i32
  }
  func.func @transform_2(%arg0: i32, %arg1: i32) -> (i32, i32) {
    %c0_i32 = arith.constant 0 : i32
    %c0_i32_0 = arith.constant 0 : i32
    %c0_i32_1 = arith.constant 0 : i32
    return %c0_i32, %c0_i32_0 : i32, i32
  }
  func.func @transform_3(%arg0: i32, %arg1: i32) -> (i32, i32) {
    %c0_i32 = arith.constant 0 : i32
    %c0_i32_0 = arith.constant 0 : i32
    %c0_i32_1 = arith.constant 0 : i32
    return %c0_i32, %c0_i32_0 : i32, i32
  }
  func.func @transform_4(%arg0: i32, %arg1: i32) -> (i32, i32) {
    %c0_i32 = arith.constant 0 : i32
    %c0_i32_0 = arith.constant 0 : i32
    %c0_i32_1 = arith.constant 0 : i32
    return %c0_i32, %c0_i32_0 : i32, i32
  }
  func.func @transform_5(%arg0: i32, %arg1: i32) -> (i32, i32) {
    %c0_i32 = arith.constant 0 : i32
    %c0_i32_0 = arith.constant 0 : i32
    %c0_i32_1 = arith.constant 0 : i32
    return %c0_i32, %c0_i32_0 : i32, i32
  }
  func.func @transform_6(%arg0: i32, %arg1: i32) -> (i32, i32) {
    %c0_i32 = arith.constant 0 : i32
    %c0_i32_0 = arith.constant 0 : i32
    %c0_i32_1 = arith.constant 0 : i32
    return %c0_i32, %c0_i32_0 : i32, i32
  }
  func.func @transform_7(%arg0: i32, %arg1: i32) -> (i32, i32, i32) {
    %c0_i32 = arith.constant 0 : i32
    %c0_i32_0 = arith.constant 0 : i32
    %c0_i32_1 = arith.constant 0 : i32
    return %arg0, %c0_i32, %c0_i32_0 : i32, i32, i32
  }
}

module attributes {stable_mosaic.version = 11 : i64} {
  func.func @_fc_stack_kernel(%arg0: i32, %arg1: memref<2x1024xf32, #tpu.memory_space<vmem>>, %arg2: memref<1024x512xbf16, #tpu.memory_space<vmem>>, %arg3: memref<1x512xf32, #tpu.memory_space<vmem>>, %arg4: memref<512x256xbf16, #tpu.memory_space<vmem>>, %arg5: memref<1x256xf32, #tpu.memory_space<vmem>>, %arg6: memref<256x9xbf16, #tpu.memory_space<vmem>>, %arg7: memref<1x9xf32, #tpu.memory_space<vmem>>, %arg8: memref<2x9xf32, #tpu.memory_space<vmem>>) attributes {dimension_semantics = [#tpu.dimension_semantics<arbitrary>], iteration_bounds = array<i64: 1>, scalar_prefetch = 0 : i64, scratch_operands = 0 : i64, tpu.core_type = #tpu.core_type<tc>, window_params = [{pipeline_mode = #tpu.pipeline_mode<synchronous>, transform_indices = @transform_0, window_bounds = array<i64: 2, 1024>}, {pipeline_mode = #tpu.pipeline_mode<synchronous>, transform_indices = @transform_1, window_bounds = array<i64: 1024, 512>}, {pipeline_mode = #tpu.pipeline_mode<synchronous>, transform_indices = @transform_2, window_bounds = array<i64: 1, 512>}, {pipeline_mode = #tpu.pipeline_mode<synchronous>, transform_indices = @transform_3, window_bounds = array<i64: 512, 256>}, {pipeline_mode = #tpu.pipeline_mode<synchronous>, transform_indices = @transform_4, window_bounds = array<i64: 1, 256>}, {pipeline_mode = #tpu.pipeline_mode<synchronous>, transform_indices = @transform_5, window_bounds = array<i64: 256, 9>}, {pipeline_mode = #tpu.pipeline_mode<synchronous>, transform_indices = @transform_6, window_bounds = array<i64: 1, 9>}, {pipeline_mode = #tpu.pipeline_mode<synchronous>, transform_indices = @transform_7, window_bounds = array<i64: 2, 9>}]} {
    %c0 = arith.constant 0 : index
    %c0_0 = arith.constant 0 : index
    %0 = vector.load %arg1[%c0, %c0_0] : memref<2x1024xf32, #tpu.memory_space<vmem>>, vector<2x1024xf32>
    %c0_1 = arith.constant 0 : index
    %c0_2 = arith.constant 0 : index
    %1 = vector.load %arg2[%c0_1, %c0_2] : memref<1024x512xbf16, #tpu.memory_space<vmem>>, vector<1024x512xbf16>
    %c0_3 = arith.constant 0 : index
    %c0_4 = arith.constant 0 : index
    %2 = vector.load %arg3[%c0_3, %c0_4] : memref<1x512xf32, #tpu.memory_space<vmem>>, vector<1x512xf32>
    %3 = arith.truncf %0 : vector<2x1024xf32> to vector<2x1024xbf16>
    %cst = arith.constant dense<0.000000e+00> : vector<2x512xf32>
    %4 = tpu.matmul %3, %1, %cst {dimension_numbers = #tpu.dot_dimension_numbers<[1], [0], [0], [1], [0, 0, 1, 1], [], []>} : vector<2x1024xbf16>, vector<1024x512xbf16>, vector<2x512xf32> -> vector<2x512xf32>
    %5 = vector.broadcast %2 : vector<1x512xf32> to vector<2x512xf32>
    %6 = arith.addf %4, %5 : vector<2x512xf32>
    %cst_5 = arith.constant 0.000000e+00 : f32
    %7 = vector.broadcast %cst_5 : f32 to vector<2x512xf32>
    %8 = arith.maximumf %6, %7 : vector<2x512xf32>
    %c0_6 = arith.constant 0 : index
    %c0_7 = arith.constant 0 : index
    %9 = vector.load %arg4[%c0_6, %c0_7] : memref<512x256xbf16, #tpu.memory_space<vmem>>, vector<512x256xbf16>
    %c0_8 = arith.constant 0 : index
    %c0_9 = arith.constant 0 : index
    %10 = vector.load %arg5[%c0_8, %c0_9] : memref<1x256xf32, #tpu.memory_space<vmem>>, vector<1x256xf32>
    %11 = arith.truncf %8 : vector<2x512xf32> to vector<2x512xbf16>
    %cst_10 = arith.constant dense<0.000000e+00> : vector<2x256xf32>
    %12 = tpu.matmul %11, %9, %cst_10 {dimension_numbers = #tpu.dot_dimension_numbers<[1], [0], [0], [1], [0, 0, 1, 1], [], []>} : vector<2x512xbf16>, vector<512x256xbf16>, vector<2x256xf32> -> vector<2x256xf32>
    %13 = vector.broadcast %10 : vector<1x256xf32> to vector<2x256xf32>
    %14 = arith.addf %12, %13 : vector<2x256xf32>
    %cst_11 = arith.constant 0.000000e+00 : f32
    %15 = vector.broadcast %cst_11 : f32 to vector<2x256xf32>
    %16 = arith.maximumf %14, %15 : vector<2x256xf32>
    %c0_12 = arith.constant 0 : index
    %c0_13 = arith.constant 0 : index
    %17 = vector.load %arg6[%c0_12, %c0_13] : memref<256x9xbf16, #tpu.memory_space<vmem>>, vector<256x9xbf16>
    %c0_14 = arith.constant 0 : index
    %c0_15 = arith.constant 0 : index
    %18 = vector.load %arg7[%c0_14, %c0_15] : memref<1x9xf32, #tpu.memory_space<vmem>>, vector<1x9xf32>
    %19 = arith.truncf %16 : vector<2x256xf32> to vector<2x256xbf16>
    %cst_16 = arith.constant dense<0.000000e+00> : vector<2x9xf32>
    %20 = tpu.matmul %19, %17, %cst_16 {dimension_numbers = #tpu.dot_dimension_numbers<[1], [0], [0], [1], [0, 0, 1, 1], [], []>} : vector<2x256xbf16>, vector<256x9xbf16>, vector<2x9xf32> -> vector<2x9xf32>
    %21 = vector.broadcast %18 : vector<1x9xf32> to vector<2x9xf32>
    %22 = arith.addf %20, %21 : vector<2x9xf32>
    %c0_17 = arith.constant 0 : index
    %c0_18 = arith.constant 0 : index
    %23 = vector.load %arg8[%c0_17, %c0_18] : memref<2x9xf32, #tpu.memory_space<vmem>>, vector<2x9xf32>
    tpu.vector_store %arg8[%c0_17, %c0_18], %22 {strides = array<i32>} : memref<2x9xf32, #tpu.memory_space<vmem>>, vector<2x9xf32>,
    return
  }
  func.func @transform_0(%arg0: i32) -> (i32, i32) {
    %c0_i32 = arith.constant 0 : i32
    %c0_i32_0 = arith.constant 0 : i32
    %c0_i32_1 = arith.constant 0 : i32
    return %c0_i32, %c0_i32_0 : i32, i32
  }
  func.func @transform_1(%arg0: i32) -> (i32, i32) {
    %c0_i32 = arith.constant 0 : i32
    %c0_i32_0 = arith.constant 0 : i32
    %c0_i32_1 = arith.constant 0 : i32
    return %c0_i32, %c0_i32_0 : i32, i32
  }
  func.func @transform_2(%arg0: i32) -> (i32, i32) {
    %c0_i32 = arith.constant 0 : i32
    %c0_i32_0 = arith.constant 0 : i32
    %c0_i32_1 = arith.constant 0 : i32
    return %c0_i32, %c0_i32_0 : i32, i32
  }
  func.func @transform_3(%arg0: i32) -> (i32, i32) {
    %c0_i32 = arith.constant 0 : i32
    %c0_i32_0 = arith.constant 0 : i32
    %c0_i32_1 = arith.constant 0 : i32
    return %c0_i32, %c0_i32_0 : i32, i32
  }
  func.func @transform_4(%arg0: i32) -> (i32, i32) {
    %c0_i32 = arith.constant 0 : i32
    %c0_i32_0 = arith.constant 0 : i32
    %c0_i32_1 = arith.constant 0 : i32
    return %c0_i32, %c0_i32_0 : i32, i32
  }
  func.func @transform_5(%arg0: i32) -> (i32, i32) {
    %c0_i32 = arith.constant 0 : i32
    %c0_i32_0 = arith.constant 0 : i32
    %c0_i32_1 = arith.constant 0 : i32
    return %c0_i32, %c0_i32_0 : i32, i32
  }
  func.func @transform_6(%arg0: i32) -> (i32, i32) {
    %c0_i32 = arith.constant 0 : i32
    %c0_i32_0 = arith.constant 0 : i32
    %c0_i32_1 = arith.constant 0 : i32
    return %c0_i32, %c0_i32_0 : i32, i32
  }
  func.func @transform_7(%arg0: i32) -> (i32, i32) {
    %c0_i32 = arith.constant 0 : i32
    %c0_i32_0 = arith.constant 0 : i32
    %c0_i32_1 = arith.constant 0 : i32
    return %c0_i32, %c0_i32_0 : i32, i32
  }
}

module attributes {stable_mosaic.version = 11 : i64} {
  func.func @_conv1_fstn_max_kernel(%arg0: i32, %arg1: i32, %arg2: memref<1x64x3xf32, #tpu.memory_space<vmem>>, %arg3: memref<1x3x64xbf16, #tpu.memory_space<vmem>>, %arg4: memref<1x64xf32, #tpu.memory_space<vmem>>, %arg5: memref<64x64xbf16, #tpu.memory_space<vmem>>, %arg6: memref<1x64xf32, #tpu.memory_space<vmem>>, %arg7: memref<64x128xbf16, #tpu.memory_space<vmem>>, %arg8: memref<1x128xf32, #tpu.memory_space<vmem>>, %arg9: memref<128x1024xbf16, #tpu.memory_space<vmem>>, %arg10: memref<1x1024xf32, #tpu.memory_space<vmem>>, %arg11: memref<1x1x1024xf32, #tpu.memory_space<vmem>>) attributes {dimension_semantics = [#tpu.dimension_semantics<parallel>, #tpu.dimension_semantics<arbitrary>], iteration_bounds = array<i64: 2, 2>, scalar_prefetch = 0 : i64, scratch_operands = 0 : i64, tpu.core_type = #tpu.core_type<tc>, window_params = [{transform_indices = @transform_0, window_bounds = array<i64: 1, 64, 3>}, {transform_indices = @transform_1, window_bounds = array<i64: 1, 3, 64>}, {pipeline_mode = #tpu.pipeline_mode<synchronous>, transform_indices = @transform_2, window_bounds = array<i64: 1, 64>}, {pipeline_mode = #tpu.pipeline_mode<synchronous>, transform_indices = @transform_3, window_bounds = array<i64: 64, 64>}, {pipeline_mode = #tpu.pipeline_mode<synchronous>, transform_indices = @transform_4, window_bounds = array<i64: 1, 64>}, {pipeline_mode = #tpu.pipeline_mode<synchronous>, transform_indices = @transform_5, window_bounds = array<i64: 64, 128>}, {pipeline_mode = #tpu.pipeline_mode<synchronous>, transform_indices = @transform_6, window_bounds = array<i64: 1, 128>}, {pipeline_mode = #tpu.pipeline_mode<synchronous>, transform_indices = @transform_7, window_bounds = array<i64: 128, 1024>}, {pipeline_mode = #tpu.pipeline_mode<synchronous>, transform_indices = @transform_8, window_bounds = array<i64: 1, 1024>}, {transform_indices = @transform_9, window_bounds = array<i64: 1, 1, 1024>}]} {
    %c0 = arith.constant 0 : index
    %c0_0 = arith.constant 0 : index
    %c0_1 = arith.constant 0 : index
    %0 = vector.load %arg2[%c0, %c0_0, %c0_1] : memref<1x64x3xf32, #tpu.memory_space<vmem>>, vector<1x64x3xf32>
    %1 = vector.shape_cast %0 : vector<1x64x3xf32> to vector<64x3xf32>
    %c0_2 = arith.constant 0 : index
    %c0_3 = arith.constant 0 : index
    %c0_4 = arith.constant 0 : index
    %2 = vector.load %arg3[%c0_2, %c0_3, %c0_4] : memref<1x3x64xbf16, #tpu.memory_space<vmem>>, vector<1x3x64xbf16>
    %3 = vector.shape_cast %2 : vector<1x3x64xbf16> to vector<3x64xbf16>
    %c0_5 = arith.constant 0 : index
    %c0_6 = arith.constant 0 : index
    %4 = vector.load %arg4[%c0_5, %c0_6] : memref<1x64xf32, #tpu.memory_space<vmem>>, vector<1x64xf32>
    %5 = arith.truncf %1 : vector<64x3xf32> to vector<64x3xbf16>
    %cst = arith.constant dense<0.000000e+00> : vector<64x64xf32>
    %6 = tpu.matmul %5, %3, %cst {dimension_numbers = #tpu.dot_dimension_numbers<[1], [0], [0], [1], [0, 0, 1, 1], [], []>} : vector<64x3xbf16>, vector<3x64xbf16>, vector<64x64xf32> -> vector<64x64xf32>
    %7 = vector.broadcast %4 : vector<1x64xf32> to vector<64x64xf32>
    %8 = arith.addf %6, %7 : vector<64x64xf32>
    %cst_7 = arith.constant 0.000000e+00 : f32
    %9 = vector.broadcast %cst_7 : f32 to vector<64x64xf32>
    %10 = arith.maximumf %8, %9 : vector<64x64xf32>
    %c0_8 = arith.constant 0 : index
    %c0_9 = arith.constant 0 : index
    %11 = vector.load %arg5[%c0_8, %c0_9] : memref<64x64xbf16, #tpu.memory_space<vmem>>, vector<64x64xbf16>
    %c0_10 = arith.constant 0 : index
    %c0_11 = arith.constant 0 : index
    %12 = vector.load %arg6[%c0_10, %c0_11] : memref<1x64xf32, #tpu.memory_space<vmem>>, vector<1x64xf32>
    %13 = arith.truncf %10 : vector<64x64xf32> to vector<64x64xbf16>
    %cst_12 = arith.constant dense<0.000000e+00> : vector<64x64xf32>
    %14 = tpu.matmul %13, %11, %cst_12 {dimension_numbers = #tpu.dot_dimension_numbers<[1], [0], [0], [1], [0, 0, 1, 1], [], []>} : vector<64x64xbf16>, vector<64x64xbf16>, vector<64x64xf32> -> vector<64x64xf32>
    %15 = vector.broadcast %12 : vector<1x64xf32> to vector<64x64xf32>
    %16 = arith.addf %14, %15 : vector<64x64xf32>
    %cst_13 = arith.constant 0.000000e+00 : f32
    %17 = vector.broadcast %cst_13 : f32 to vector<64x64xf32>
    %18 = arith.maximumf %16, %17 : vector<64x64xf32>
    %c0_14 = arith.constant 0 : index
    %c0_15 = arith.constant 0 : index
    %19 = vector.load %arg7[%c0_14, %c0_15] : memref<64x128xbf16, #tpu.memory_space<vmem>>, vector<64x128xbf16>
    %c0_16 = arith.constant 0 : index
    %c0_17 = arith.constant 0 : index
    %20 = vector.load %arg8[%c0_16, %c0_17] : memref<1x128xf32, #tpu.memory_space<vmem>>, vector<1x128xf32>
    %21 = arith.truncf %18 : vector<64x64xf32> to vector<64x64xbf16>
    %cst_18 = arith.constant dense<0.000000e+00> : vector<64x128xf32>
    %22 = tpu.matmul %21, %19, %cst_18 {dimension_numbers = #tpu.dot_dimension_numbers<[1], [0], [0], [1], [0, 0, 1, 1], [], []>} : vector<64x64xbf16>, vector<64x128xbf16>, vector<64x128xf32> -> vector<64x128xf32>
    %23 = vector.broadcast %20 : vector<1x128xf32> to vector<64x128xf32>
    %24 = arith.addf %22, %23 : vector<64x128xf32>
    %cst_19 = arith.constant 0.000000e+00 : f32
    %25 = vector.broadcast %cst_19 : f32 to vector<64x128xf32>
    %26 = arith.maximumf %24, %25 : vector<64x128xf32>
    %c0_20 = arith.constant 0 : index
    %c0_21 = arith.constant 0 : index
    %27 = vector.load %arg9[%c0_20, %c0_21] : memref<128x1024xbf16, #tpu.memory_space<vmem>>, vector<128x1024xbf16>
    %c0_22 = arith.constant 0 : index
    %c0_23 = arith.constant 0 : index
    %28 = vector.load %arg10[%c0_22, %c0_23] : memref<1x1024xf32, #tpu.memory_space<vmem>>, vector<1x1024xf32>
    %29 = arith.truncf %26 : vector<64x128xf32> to vector<64x128xbf16>
    %cst_24 = arith.constant dense<0.000000e+00> : vector<64x1024xf32>
    %30 = tpu.matmul %29, %27, %cst_24 {dimension_numbers = #tpu.dot_dimension_numbers<[1], [0], [0], [1], [0, 0, 1, 1], [], []>} : vector<64x128xbf16>, vector<128x1024xbf16>, vector<64x1024xf32> -> vector<64x1024xf32>
    %31 = vector.broadcast %28 : vector<1x1024xf32> to vector<64x1024xf32>
    %32 = arith.addf %30, %31 : vector<64x1024xf32>
    %cst_25 = arith.constant 0.000000e+00 : f32
    %33 = vector.broadcast %cst_25 : f32 to vector<64x1024xf32>
    %34 = arith.maximumf %32, %33 : vector<64x1024xf32>
    %cst_26 = arith.constant dense<0xFF800000> : vector<1024xf32>
    %35 = vector.multi_reduction <maximumf>, %34, %cst_26 [0] : vector<64x1024xf32> to vector<1024xf32>
    %36 = vector.shape_cast %35 : vector<1024xf32> to vector<1x1024xf32>
    %c0_i32 = arith.constant 0 : i32
    %37 = arith.cmpi eq, %arg1, %c0_i32 : i32
    %38 = arith.extui %37 : i1 to i32
    %c0_i32_27 = arith.constant 0 : i32
    %39 = arith.cmpi ne, %38, %c0_i32_27 : i32
    scf.if %39 {
      %c0_30 = arith.constant 0 : index
      %c0_31 = arith.constant 0 : index
      %c0_32 = arith.constant 0 : index
      %43 = vector.load %arg11[%c0_30, %c0_31, %c0_32] : memref<1x1x1024xf32, #tpu.memory_space<vmem>>, vector<1x1x1024xf32>
      %44 = vector.shape_cast %43 : vector<1x1x1024xf32> to vector<1x1024xf32>
      %45 = vector.shape_cast %36 : vector<1x1024xf32> to vector<1x1x1024xf32>
      tpu.vector_store %arg11[%c0_30, %c0_31, %c0_32], %45 {strides = array<i32>} : memref<1x1x1024xf32, #tpu.memory_space<vmem>>, vector<1x1x1024xf32>,
    } else {
    }
    %c0_i32_28 = arith.constant 0 : i32
    %40 = arith.cmpi ne, %arg1, %c0_i32_28 : i32
    %41 = arith.extui %40 : i1 to i32
    %c0_i32_29 = arith.constant 0 : i32
    %42 = arith.cmpi ne, %41, %c0_i32_29 : i32
    scf.if %42 {
      %c0_30 = arith.constant 0 : index
      %c0_31 = arith.constant 0 : index
      %c0_32 = arith.constant 0 : index
      %43 = vector.load %arg11[%c0_30, %c0_31, %c0_32] : memref<1x1x1024xf32, #tpu.memory_space<vmem>>, vector<1x1x1024xf32>
      %44 = vector.shape_cast %43 : vector<1x1x1024xf32> to vector<1x1024xf32>
      %45 = arith.maximumf %44, %36 : vector<1x1024xf32>
      %c0_33 = arith.constant 0 : index
      %c0_34 = arith.constant 0 : index
      %c0_35 = arith.constant 0 : index
      %46 = vector.load %arg11[%c0_33, %c0_34, %c0_35] : memref<1x1x1024xf32, #tpu.memory_space<vmem>>, vector<1x1x1024xf32>
      %47 = vector.shape_cast %46 : vector<1x1x1024xf32> to vector<1x1024xf32>
      %48 = vector.shape_cast %45 : vector<1x1024xf32> to vector<1x1x1024xf32>
      tpu.vector_store %arg11[%c0_33, %c0_34, %c0_35], %48 {strides = array<i32>} : memref<1x1x1024xf32, #tpu.memory_space<vmem>>, vector<1x1x1024xf32>,
    } else {
    }
    return
  }
  func.func @transform_0(%arg0: i32, %arg1: i32) -> (i32, i32, i32) {
    %c0_i32 = arith.constant 0 : i32
    %c0_i32_0 = arith.constant 0 : i32
    return %arg0, %arg1, %c0_i32 : i32, i32, i32
  }
  func.func @transform_1(%arg0: i32, %arg1: i32) -> (i32, i32, i32) {
    %c0_i32 = arith.constant 0 : i32
    %c0_i32_0 = arith.constant 0 : i32
    %c0_i32_1 = arith.constant 0 : i32
    return %arg0, %c0_i32, %c0_i32_0 : i32, i32, i32
  }
  func.func @transform_2(%arg0: i32, %arg1: i32) -> (i32, i32) {
    %c0_i32 = arith.constant 0 : i32
    %c0_i32_0 = arith.constant 0 : i32
    %c0_i32_1 = arith.constant 0 : i32
    return %c0_i32, %c0_i32_0 : i32, i32
  }
  func.func @transform_3(%arg0: i32, %arg1: i32) -> (i32, i32) {
    %c0_i32 = arith.constant 0 : i32
    %c0_i32_0 = arith.constant 0 : i32
    %c0_i32_1 = arith.constant 0 : i32
    return %c0_i32, %c0_i32_0 : i32, i32
  }
  func.func @transform_4(%arg0: i32, %arg1: i32) -> (i32, i32) {
    %c0_i32 = arith.constant 0 : i32
    %c0_i32_0 = arith.constant 0 : i32
    %c0_i32_1 = arith.constant 0 : i32
    return %c0_i32, %c0_i32_0 : i32, i32
  }
  func.func @transform_5(%arg0: i32, %arg1: i32) -> (i32, i32) {
    %c0_i32 = arith.constant 0 : i32
    %c0_i32_0 = arith.constant 0 : i32
    %c0_i32_1 = arith.constant 0 : i32
    return %c0_i32, %c0_i32_0 : i32, i32
  }
  func.func @transform_6(%arg0: i32, %arg1: i32) -> (i32, i32) {
    %c0_i32 = arith.constant 0 : i32
    %c0_i32_0 = arith.constant 0 : i32
    %c0_i32_1 = arith.constant 0 : i32
    return %c0_i32, %c0_i32_0 : i32, i32
  }
  func.func @transform_7(%arg0: i32, %arg1: i32) -> (i32, i32) {
    %c0_i32 = arith.constant 0 : i32
    %c0_i32_0 = arith.constant 0 : i32
    %c0_i32_1 = arith.constant 0 : i32
    return %c0_i32, %c0_i32_0 : i32, i32
  }
  func.func @transform_8(%arg0: i32, %arg1: i32) -> (i32, i32) {
    %c0_i32 = arith.constant 0 : i32
    %c0_i32_0 = arith.constant 0 : i32
    %c0_i32_1 = arith.constant 0 : i32
    return %c0_i32, %c0_i32_0 : i32, i32
  }
  func.func @transform_9(%arg0: i32, %arg1: i32) -> (i32, i32, i32) {
    %c0_i32 = arith.constant 0 : i32
    %c0_i32_0 = arith.constant 0 : i32
    %c0_i32_1 = arith.constant 0 : i32
    return %arg0, %c0_i32, %c0_i32_0 : i32, i32, i32
  }
}

module attributes {stable_mosaic.version = 11 : i64} {
  func.func @_fc_stack_kernel(%arg0: i32, %arg1: memref<2x1024xf32, #tpu.memory_space<vmem>>, %arg2: memref<1024x512xbf16, #tpu.memory_space<vmem>>, %arg3: memref<1x512xf32, #tpu.memory_space<vmem>>, %arg4: memref<512x256xbf16, #tpu.memory_space<vmem>>, %arg5: memref<1x256xf32, #tpu.memory_space<vmem>>, %arg6: memref<256x4096xbf16, #tpu.memory_space<vmem>>, %arg7: memref<1x4096xf32, #tpu.memory_space<vmem>>, %arg8: memref<2x4096xf32, #tpu.memory_space<vmem>>) attributes {dimension_semantics = [#tpu.dimension_semantics<arbitrary>], iteration_bounds = array<i64: 1>, scalar_prefetch = 0 : i64, scratch_operands = 0 : i64, tpu.core_type = #tpu.core_type<tc>, window_params = [{pipeline_mode = #tpu.pipeline_mode<synchronous>, transform_indices = @transform_0, window_bounds = array<i64: 2, 1024>}, {pipeline_mode = #tpu.pipeline_mode<synchronous>, transform_indices = @transform_1, window_bounds = array<i64: 1024, 512>}, {pipeline_mode = #tpu.pipeline_mode<synchronous>, transform_indices = @transform_2, window_bounds = array<i64: 1, 512>}, {pipeline_mode = #tpu.pipeline_mode<synchronous>, transform_indices = @transform_3, window_bounds = array<i64: 512, 256>}, {pipeline_mode = #tpu.pipeline_mode<synchronous>, transform_indices = @transform_4, window_bounds = array<i64: 1, 256>}, {pipeline_mode = #tpu.pipeline_mode<synchronous>, transform_indices = @transform_5, window_bounds = array<i64: 256, 4096>}, {pipeline_mode = #tpu.pipeline_mode<synchronous>, transform_indices = @transform_6, window_bounds = array<i64: 1, 4096>}, {pipeline_mode = #tpu.pipeline_mode<synchronous>, transform_indices = @transform_7, window_bounds = array<i64: 2, 4096>}]} {
    %c0 = arith.constant 0 : index
    %c0_0 = arith.constant 0 : index
    %0 = vector.load %arg1[%c0, %c0_0] : memref<2x1024xf32, #tpu.memory_space<vmem>>, vector<2x1024xf32>
    %c0_1 = arith.constant 0 : index
    %c0_2 = arith.constant 0 : index
    %1 = vector.load %arg2[%c0_1, %c0_2] : memref<1024x512xbf16, #tpu.memory_space<vmem>>, vector<1024x512xbf16>
    %c0_3 = arith.constant 0 : index
    %c0_4 = arith.constant 0 : index
    %2 = vector.load %arg3[%c0_3, %c0_4] : memref<1x512xf32, #tpu.memory_space<vmem>>, vector<1x512xf32>
    %3 = arith.truncf %0 : vector<2x1024xf32> to vector<2x1024xbf16>
    %cst = arith.constant dense<0.000000e+00> : vector<2x512xf32>
    %4 = tpu.matmul %3, %1, %cst {dimension_numbers = #tpu.dot_dimension_numbers<[1], [0], [0], [1], [0, 0, 1, 1], [], []>} : vector<2x1024xbf16>, vector<1024x512xbf16>, vector<2x512xf32> -> vector<2x512xf32>
    %5 = vector.broadcast %2 : vector<1x512xf32> to vector<2x512xf32>
    %6 = arith.addf %4, %5 : vector<2x512xf32>
    %cst_5 = arith.constant 0.000000e+00 : f32
    %7 = vector.broadcast %cst_5 : f32 to vector<2x512xf32>
    %8 = arith.maximumf %6, %7 : vector<2x512xf32>
    %c0_6 = arith.constant 0 : index
    %c0_7 = arith.constant 0 : index
    %9 = vector.load %arg4[%c0_6, %c0_7] : memref<512x256xbf16, #tpu.memory_space<vmem>>, vector<512x256xbf16>
    %c0_8 = arith.constant 0 : index
    %c0_9 = arith.constant 0 : index
    %10 = vector.load %arg5[%c0_8, %c0_9] : memref<1x256xf32, #tpu.memory_space<vmem>>, vector<1x256xf32>
    %11 = arith.truncf %8 : vector<2x512xf32> to vector<2x512xbf16>
    %cst_10 = arith.constant dense<0.000000e+00> : vector<2x256xf32>
    %12 = tpu.matmul %11, %9, %cst_10 {dimension_numbers = #tpu.dot_dimension_numbers<[1], [0], [0], [1], [0, 0, 1, 1], [], []>} : vector<2x512xbf16>, vector<512x256xbf16>, vector<2x256xf32> -> vector<2x256xf32>
    %13 = vector.broadcast %10 : vector<1x256xf32> to vector<2x256xf32>
    %14 = arith.addf %12, %13 : vector<2x256xf32>
    %cst_11 = arith.constant 0.000000e+00 : f32
    %15 = vector.broadcast %cst_11 : f32 to vector<2x256xf32>
    %16 = arith.maximumf %14, %15 : vector<2x256xf32>
    %c0_12 = arith.constant 0 : index
    %c0_13 = arith.constant 0 : index
    %17 = vector.load %arg6[%c0_12, %c0_13] : memref<256x4096xbf16, #tpu.memory_space<vmem>>, vector<256x4096xbf16>
    %c0_14 = arith.constant 0 : index
    %c0_15 = arith.constant 0 : index
    %18 = vector.load %arg7[%c0_14, %c0_15] : memref<1x4096xf32, #tpu.memory_space<vmem>>, vector<1x4096xf32>
    %19 = arith.truncf %16 : vector<2x256xf32> to vector<2x256xbf16>
    %cst_16 = arith.constant dense<0.000000e+00> : vector<2x4096xf32>
    %20 = tpu.matmul %19, %17, %cst_16 {dimension_numbers = #tpu.dot_dimension_numbers<[1], [0], [0], [1], [0, 0, 1, 1], [], []>} : vector<2x256xbf16>, vector<256x4096xbf16>, vector<2x4096xf32> -> vector<2x4096xf32>
    %21 = vector.broadcast %18 : vector<1x4096xf32> to vector<2x4096xf32>
    %22 = arith.addf %20, %21 : vector<2x4096xf32>
    %c0_17 = arith.constant 0 : index
    %c0_18 = arith.constant 0 : index
    %23 = vector.load %arg8[%c0_17, %c0_18] : memref<2x4096xf32, #tpu.memory_space<vmem>>, vector<2x4096xf32>
    tpu.vector_store %arg8[%c0_17, %c0_18], %22 {strides = array<i32>} : memref<2x4096xf32, #tpu.memory_space<vmem>>, vector<2x4096xf32>,
    return
  }
  func.func @transform_0(%arg0: i32) -> (i32, i32) {
    %c0_i32 = arith.constant 0 : i32
    %c0_i32_0 = arith.constant 0 : i32
    %c0_i32_1 = arith.constant 0 : i32
    return %c0_i32, %c0_i32_0 : i32, i32
  }
  func.func @transform_1(%arg0: i32) -> (i32, i32) {
    %c0_i32 = arith.constant 0 : i32
    %c0_i32_0 = arith.constant 0 : i32
    %c0_i32_1 = arith.constant 0 : i32
    return %c0_i32, %c0_i32_0 : i32, i32
  }
  func.func @transform_2(%arg0: i32) -> (i32, i32) {
    %c0_i32 = arith.constant 0 : i32
    %c0_i32_0 = arith.constant 0 : i32
    %c0_i32_1 = arith.constant 0 : i32
    return %c0_i32, %c0_i32_0 : i32, i32
  }
  func.func @transform_3(%arg0: i32) -> (i32, i32) {
    %c0_i32 = arith.constant 0 : i32
    %c0_i32_0 = arith.constant 0 : i32
    %c0_i32_1 = arith.constant 0 : i32
    return %c0_i32, %c0_i32_0 : i32, i32
  }
  func.func @transform_4(%arg0: i32) -> (i32, i32) {
    %c0_i32 = arith.constant 0 : i32
    %c0_i32_0 = arith.constant 0 : i32
    %c0_i32_1 = arith.constant 0 : i32
    return %c0_i32, %c0_i32_0 : i32, i32
  }
  func.func @transform_5(%arg0: i32) -> (i32, i32) {
    %c0_i32 = arith.constant 0 : i32
    %c0_i32_0 = arith.constant 0 : i32
    %c0_i32_1 = arith.constant 0 : i32
    return %c0_i32, %c0_i32_0 : i32, i32
  }
  func.func @transform_6(%arg0: i32) -> (i32, i32) {
    %c0_i32 = arith.constant 0 : i32
    %c0_i32_0 = arith.constant 0 : i32
    %c0_i32_1 = arith.constant 0 : i32
    return %c0_i32, %c0_i32_0 : i32, i32
  }
  func.func @transform_7(%arg0: i32) -> (i32, i32) {
    %c0_i32 = arith.constant 0 : i32
    %c0_i32_0 = arith.constant 0 : i32
    %c0_i32_1 = arith.constant 0 : i32
    return %c0_i32, %c0_i32_0 : i32, i32
  }
}

module attributes {stable_mosaic.version = 11 : i64} {
  func.func @_enc_max_kernel(%arg0: i32, %arg1: i32, %arg2: memref<1x64x3xf32, #tpu.memory_space<vmem>>, %arg3: memref<1x3x64xbf16, #tpu.memory_space<vmem>>, %arg4: memref<1x64xf32, #tpu.memory_space<vmem>>, %arg5: memref<1x64x128xbf16, #tpu.memory_space<vmem>>, %arg6: memref<1x128xf32, #tpu.memory_space<vmem>>, %arg7: memref<128x1024xbf16, #tpu.memory_space<vmem>>, %arg8: memref<1x1024xf32, #tpu.memory_space<vmem>>, %arg9: memref<1x1x1024xf32, #tpu.memory_space<vmem>>) attributes {dimension_semantics = [#tpu.dimension_semantics<parallel>, #tpu.dimension_semantics<arbitrary>], iteration_bounds = array<i64: 2, 2>, scalar_prefetch = 0 : i64, scratch_operands = 0 : i64, tpu.core_type = #tpu.core_type<tc>, window_params = [{transform_indices = @transform_0, window_bounds = array<i64: 1, 64, 3>}, {transform_indices = @transform_1, window_bounds = array<i64: 1, 3, 64>}, {pipeline_mode = #tpu.pipeline_mode<synchronous>, transform_indices = @transform_2, window_bounds = array<i64: 1, 64>}, {transform_indices = @transform_3, window_bounds = array<i64: 1, 64, 128>}, {pipeline_mode = #tpu.pipeline_mode<synchronous>, transform_indices = @transform_4, window_bounds = array<i64: 1, 128>}, {pipeline_mode = #tpu.pipeline_mode<synchronous>, transform_indices = @transform_5, window_bounds = array<i64: 128, 1024>}, {pipeline_mode = #tpu.pipeline_mode<synchronous>, transform_indices = @transform_6, window_bounds = array<i64: 1, 1024>}, {transform_indices = @transform_7, window_bounds = array<i64: 1, 1, 1024>}]} {
    %c0 = arith.constant 0 : index
    %c0_0 = arith.constant 0 : index
    %c0_1 = arith.constant 0 : index
    %0 = vector.load %arg2[%c0, %c0_0, %c0_1] : memref<1x64x3xf32, #tpu.memory_space<vmem>>, vector<1x64x3xf32>
    %1 = vector.shape_cast %0 : vector<1x64x3xf32> to vector<64x3xf32>
    %c0_2 = arith.constant 0 : index
    %c0_3 = arith.constant 0 : index
    %c0_4 = arith.constant 0 : index
    %2 = vector.load %arg3[%c0_2, %c0_3, %c0_4] : memref<1x3x64xbf16, #tpu.memory_space<vmem>>, vector<1x3x64xbf16>
    %3 = vector.shape_cast %2 : vector<1x3x64xbf16> to vector<3x64xbf16>
    %c0_5 = arith.constant 0 : index
    %c0_6 = arith.constant 0 : index
    %4 = vector.load %arg4[%c0_5, %c0_6] : memref<1x64xf32, #tpu.memory_space<vmem>>, vector<1x64xf32>
    %5 = arith.truncf %1 : vector<64x3xf32> to vector<64x3xbf16>
    %cst = arith.constant dense<0.000000e+00> : vector<64x64xf32>
    %6 = tpu.matmul %5, %3, %cst {dimension_numbers = #tpu.dot_dimension_numbers<[1], [0], [0], [1], [0, 0, 1, 1], [], []>} : vector<64x3xbf16>, vector<3x64xbf16>, vector<64x64xf32> -> vector<64x64xf32>
    %7 = vector.broadcast %4 : vector<1x64xf32> to vector<64x64xf32>
    %8 = arith.addf %6, %7 : vector<64x64xf32>
    %cst_7 = arith.constant 0.000000e+00 : f32
    %9 = vector.broadcast %cst_7 : f32 to vector<64x64xf32>
    %10 = arith.maximumf %8, %9 : vector<64x64xf32>
    %c0_8 = arith.constant 0 : index
    %c0_9 = arith.constant 0 : index
    %c0_10 = arith.constant 0 : index
    %11 = vector.load %arg5[%c0_8, %c0_9, %c0_10] : memref<1x64x128xbf16, #tpu.memory_space<vmem>>, vector<1x64x128xbf16>
    %12 = vector.shape_cast %11 : vector<1x64x128xbf16> to vector<64x128xbf16>
    %c0_11 = arith.constant 0 : index
    %c0_12 = arith.constant 0 : index
    %13 = vector.load %arg6[%c0_11, %c0_12] : memref<1x128xf32, #tpu.memory_space<vmem>>, vector<1x128xf32>
    %14 = arith.truncf %10 : vector<64x64xf32> to vector<64x64xbf16>
    %cst_13 = arith.constant dense<0.000000e+00> : vector<64x128xf32>
    %15 = tpu.matmul %14, %12, %cst_13 {dimension_numbers = #tpu.dot_dimension_numbers<[1], [0], [0], [1], [0, 0, 1, 1], [], []>} : vector<64x64xbf16>, vector<64x128xbf16>, vector<64x128xf32> -> vector<64x128xf32>
    %16 = vector.broadcast %13 : vector<1x128xf32> to vector<64x128xf32>
    %17 = arith.addf %15, %16 : vector<64x128xf32>
    %cst_14 = arith.constant 0.000000e+00 : f32
    %18 = vector.broadcast %cst_14 : f32 to vector<64x128xf32>
    %19 = arith.maximumf %17, %18 : vector<64x128xf32>
    %c0_15 = arith.constant 0 : index
    %c0_16 = arith.constant 0 : index
    %20 = vector.load %arg7[%c0_15, %c0_16] : memref<128x1024xbf16, #tpu.memory_space<vmem>>, vector<128x1024xbf16>
    %c0_17 = arith.constant 0 : index
    %c0_18 = arith.constant 0 : index
    %21 = vector.load %arg8[%c0_17, %c0_18] : memref<1x1024xf32, #tpu.memory_space<vmem>>, vector<1x1024xf32>
    %22 = arith.truncf %19 : vector<64x128xf32> to vector<64x128xbf16>
    %cst_19 = arith.constant dense<0.000000e+00> : vector<64x1024xf32>
    %23 = tpu.matmul %22, %20, %cst_19 {dimension_numbers = #tpu.dot_dimension_numbers<[1], [0], [0], [1], [0, 0, 1, 1], [], []>} : vector<64x128xbf16>, vector<128x1024xbf16>, vector<64x1024xf32> -> vector<64x1024xf32>
    %24 = vector.broadcast %21 : vector<1x1024xf32> to vector<64x1024xf32>
    %25 = arith.addf %23, %24 : vector<64x1024xf32>
    %cst_20 = arith.constant dense<0xFF800000> : vector<1024xf32>
    %26 = vector.multi_reduction <maximumf>, %25, %cst_20 [0] : vector<64x1024xf32> to vector<1024xf32>
    %27 = vector.shape_cast %26 : vector<1024xf32> to vector<1x1024xf32>
    %c0_i32 = arith.constant 0 : i32
    %28 = arith.cmpi eq, %arg1, %c0_i32 : i32
    %29 = arith.extui %28 : i1 to i32
    %c0_i32_21 = arith.constant 0 : i32
    %30 = arith.cmpi ne, %29, %c0_i32_21 : i32
    scf.if %30 {
      %c0_24 = arith.constant 0 : index
      %c0_25 = arith.constant 0 : index
      %c0_26 = arith.constant 0 : index
      %34 = vector.load %arg9[%c0_24, %c0_25, %c0_26] : memref<1x1x1024xf32, #tpu.memory_space<vmem>>, vector<1x1x1024xf32>
      %35 = vector.shape_cast %34 : vector<1x1x1024xf32> to vector<1x1024xf32>
      %36 = vector.shape_cast %27 : vector<1x1024xf32> to vector<1x1x1024xf32>
      tpu.vector_store %arg9[%c0_24, %c0_25, %c0_26], %36 {strides = array<i32>} : memref<1x1x1024xf32, #tpu.memory_space<vmem>>, vector<1x1x1024xf32>,
    } else {
    }
    %c0_i32_22 = arith.constant 0 : i32
    %31 = arith.cmpi ne, %arg1, %c0_i32_22 : i32
    %32 = arith.extui %31 : i1 to i32
    %c0_i32_23 = arith.constant 0 : i32
    %33 = arith.cmpi ne, %32, %c0_i32_23 : i32
    scf.if %33 {
      %c0_24 = arith.constant 0 : index
      %c0_25 = arith.constant 0 : index
      %c0_26 = arith.constant 0 : index
      %34 = vector.load %arg9[%c0_24, %c0_25, %c0_26] : memref<1x1x1024xf32, #tpu.memory_space<vmem>>, vector<1x1x1024xf32>
      %35 = vector.shape_cast %34 : vector<1x1x1024xf32> to vector<1x1024xf32>
      %36 = arith.maximumf %35, %27 : vector<1x1024xf32>
      %c0_27 = arith.constant 0 : index
      %c0_28 = arith.constant 0 : index
      %c0_29 = arith.constant 0 : index
      %37 = vector.load %arg9[%c0_27, %c0_28, %c0_29] : memref<1x1x1024xf32, #tpu.memory_space<vmem>>, vector<1x1x1024xf32>
      %38 = vector.shape_cast %37 : vector<1x1x1024xf32> to vector<1x1024xf32>
      %39 = vector.shape_cast %36 : vector<1x1024xf32> to vector<1x1x1024xf32>
      tpu.vector_store %arg9[%c0_27, %c0_28, %c0_29], %39 {strides = array<i32>} : memref<1x1x1024xf32, #tpu.memory_space<vmem>>, vector<1x1x1024xf32>,
    } else {
    }
    return
  }
  func.func @transform_0(%arg0: i32, %arg1: i32) -> (i32, i32, i32) {
    %c0_i32 = arith.constant 0 : i32
    %c0_i32_0 = arith.constant 0 : i32
    return %arg0, %arg1, %c0_i32 : i32, i32, i32
  }
  func.func @transform_1(%arg0: i32, %arg1: i32) -> (i32, i32, i32) {
    %c0_i32 = arith.constant 0 : i32
    %c0_i32_0 = arith.constant 0 : i32
    %c0_i32_1 = arith.constant 0 : i32
    return %arg0, %c0_i32, %c0_i32_0 : i32, i32, i32
  }
  func.func @transform_2(%arg0: i32, %arg1: i32) -> (i32, i32) {
    %c0_i32 = arith.constant 0 : i32
    %c0_i32_0 = arith.constant 0 : i32
    %c0_i32_1 = arith.constant 0 : i32
    return %c0_i32, %c0_i32_0 : i32, i32
  }
  func.func @transform_3(%arg0: i32, %arg1: i32) -> (i32, i32, i32) {
    %c0_i32 = arith.constant 0 : i32
    %c0_i32_0 = arith.constant 0 : i32
    %c0_i32_1 = arith.constant 0 : i32
    return %arg0, %c0_i32, %c0_i32_0 : i32, i32, i32
  }
  func.func @transform_4(%arg0: i32, %arg1: i32) -> (i32, i32) {
    %c0_i32 = arith.constant 0 : i32
    %c0_i32_0 = arith.constant 0 : i32
    %c0_i32_1 = arith.constant 0 : i32
    return %c0_i32, %c0_i32_0 : i32, i32
  }
  func.func @transform_5(%arg0: i32, %arg1: i32) -> (i32, i32) {
    %c0_i32 = arith.constant 0 : i32
    %c0_i32_0 = arith.constant 0 : i32
    %c0_i32_1 = arith.constant 0 : i32
    return %c0_i32, %c0_i32_0 : i32, i32
  }
  func.func @transform_6(%arg0: i32, %arg1: i32) -> (i32, i32) {
    %c0_i32 = arith.constant 0 : i32
    %c0_i32_0 = arith.constant 0 : i32
    %c0_i32_1 = arith.constant 0 : i32
    return %c0_i32, %c0_i32_0 : i32, i32
  }
  func.func @transform_7(%arg0: i32, %arg1: i32) -> (i32, i32, i32) {
    %c0_i32 = arith.constant 0 : i32
    %c0_i32_0 = arith.constant 0 : i32
    %c0_i32_1 = arith.constant 0 : i32
    return %arg0, %c0_i32, %c0_i32_0 : i32, i32, i32
  }
}

module attributes {stable_mosaic.version = 11 : i64} {
  func.func @_head_kernel(%arg0: i32, %arg1: i32, %arg2: memref<1x64x3xf32, #tpu.memory_space<vmem>>, %arg3: memref<1x3x64xbf16, #tpu.memory_space<vmem>>, %arg4: memref<1x64xf32, #tpu.memory_space<vmem>>, %arg5: memref<1x64x512xbf16, #tpu.memory_space<vmem>>, %arg6: memref<1x1x512xf32, #tpu.memory_space<vmem>>, %arg7: memref<512x256xbf16, #tpu.memory_space<vmem>>, %arg8: memref<1x256xf32, #tpu.memory_space<vmem>>, %arg9: memref<256x128xbf16, #tpu.memory_space<vmem>>, %arg10: memref<1x128xf32, #tpu.memory_space<vmem>>, %arg11: memref<128x5xbf16, #tpu.memory_space<vmem>>, %arg12: memref<1x5xf32, #tpu.memory_space<vmem>>, %arg13: memref<1x64x5xf32, #tpu.memory_space<vmem>>) attributes {dimension_semantics = [#tpu.dimension_semantics<parallel>, #tpu.dimension_semantics<parallel>], iteration_bounds = array<i64: 2, 2>, scalar_prefetch = 0 : i64, scratch_operands = 0 : i64, tpu.core_type = #tpu.core_type<tc>, window_params = [{transform_indices = @transform_0, window_bounds = array<i64: 1, 64, 3>}, {transform_indices = @transform_1, window_bounds = array<i64: 1, 3, 64>}, {pipeline_mode = #tpu.pipeline_mode<synchronous>, transform_indices = @transform_2, window_bounds = array<i64: 1, 64>}, {transform_indices = @transform_3, window_bounds = array<i64: 1, 64, 512>}, {transform_indices = @transform_4, window_bounds = array<i64: 1, 1, 512>}, {pipeline_mode = #tpu.pipeline_mode<synchronous>, transform_indices = @transform_5, window_bounds = array<i64: 512, 256>}, {pipeline_mode = #tpu.pipeline_mode<synchronous>, transform_indices = @transform_6, window_bounds = array<i64: 1, 256>}, {pipeline_mode = #tpu.pipeline_mode<synchronous>, transform_indices = @transform_7, window_bounds = array<i64: 256, 128>}, {pipeline_mode = #tpu.pipeline_mode<synchronous>, transform_indices = @transform_8, window_bounds = array<i64: 1, 128>}, {pipeline_mode = #tpu.pipeline_mode<synchronous>, transform_indices = @transform_9, window_bounds = array<i64: 128, 5>}, {pipeline_mode = #tpu.pipeline_mode<synchronous>, transform_indices = @transform_10, window_bounds = array<i64: 1, 5>}, {transform_indices = @transform_11, window_bounds = array<i64: 1, 64, 5>}]} {
    %c0 = arith.constant 0 : index
    %c0_0 = arith.constant 0 : index
    %c0_1 = arith.constant 0 : index
    %0 = vector.load %arg2[%c0, %c0_0, %c0_1] : memref<1x64x3xf32, #tpu.memory_space<vmem>>, vector<1x64x3xf32>
    %1 = vector.shape_cast %0 : vector<1x64x3xf32> to vector<64x3xf32>
    %c0_2 = arith.constant 0 : index
    %c0_3 = arith.constant 0 : index
    %c0_4 = arith.constant 0 : index
    %2 = vector.load %arg3[%c0_2, %c0_3, %c0_4] : memref<1x3x64xbf16, #tpu.memory_space<vmem>>, vector<1x3x64xbf16>
    %3 = vector.shape_cast %2 : vector<1x3x64xbf16> to vector<3x64xbf16>
    %c0_5 = arith.constant 0 : index
    %c0_6 = arith.constant 0 : index
    %4 = vector.load %arg4[%c0_5, %c0_6] : memref<1x64xf32, #tpu.memory_space<vmem>>, vector<1x64xf32>
    %5 = arith.truncf %1 : vector<64x3xf32> to vector<64x3xbf16>
    %cst = arith.constant dense<0.000000e+00> : vector<64x64xf32>
    %6 = tpu.matmul %5, %3, %cst {dimension_numbers = #tpu.dot_dimension_numbers<[1], [0], [0], [1], [0, 0, 1, 1], [], []>} : vector<64x3xbf16>, vector<3x64xbf16>, vector<64x64xf32> -> vector<64x64xf32>
    %7 = vector.broadcast %4 : vector<1x64xf32> to vector<64x64xf32>
    %8 = arith.addf %6, %7 : vector<64x64xf32>
    %cst_7 = arith.constant 0.000000e+00 : f32
    %9 = vector.broadcast %cst_7 : f32 to vector<64x64xf32>
    %10 = arith.maximumf %8, %9 : vector<64x64xf32>
    %c0_8 = arith.constant 0 : index
    %c0_9 = arith.constant 0 : index
    %c0_10 = arith.constant 0 : index
    %11 = vector.load %arg5[%c0_8, %c0_9, %c0_10] : memref<1x64x512xbf16, #tpu.memory_space<vmem>>, vector<1x64x512xbf16>
    %12 = vector.shape_cast %11 : vector<1x64x512xbf16> to vector<64x512xbf16>
    %c0_11 = arith.constant 0 : index
    %c0_12 = arith.constant 0 : index
    %c0_13 = arith.constant 0 : index
    %13 = vector.load %arg6[%c0_11, %c0_12, %c0_13] : memref<1x1x512xf32, #tpu.memory_space<vmem>>, vector<1x1x512xf32>
    %14 = vector.shape_cast %13 : vector<1x1x512xf32> to vector<1x512xf32>
    %15 = arith.truncf %10 : vector<64x64xf32> to vector<64x64xbf16>
    %cst_14 = arith.constant dense<0.000000e+00> : vector<64x512xf32>
    %16 = tpu.matmul %15, %12, %cst_14 {dimension_numbers = #tpu.dot_dimension_numbers<[1], [0], [0], [1], [0, 0, 1, 1], [], []>} : vector<64x64xbf16>, vector<64x512xbf16>, vector<64x512xf32> -> vector<64x512xf32>
    %17 = vector.broadcast %14 : vector<1x512xf32> to vector<64x512xf32>
    %18 = arith.addf %16, %17 : vector<64x512xf32>
    %cst_15 = arith.constant 0.000000e+00 : f32
    %19 = vector.broadcast %cst_15 : f32 to vector<64x512xf32>
    %20 = arith.maximumf %18, %19 : vector<64x512xf32>
    %c0_16 = arith.constant 0 : index
    %c0_17 = arith.constant 0 : index
    %21 = vector.load %arg7[%c0_16, %c0_17] : memref<512x256xbf16, #tpu.memory_space<vmem>>, vector<512x256xbf16>
    %c0_18 = arith.constant 0 : index
    %c0_19 = arith.constant 0 : index
    %22 = vector.load %arg8[%c0_18, %c0_19] : memref<1x256xf32, #tpu.memory_space<vmem>>, vector<1x256xf32>
    %23 = arith.truncf %20 : vector<64x512xf32> to vector<64x512xbf16>
    %cst_20 = arith.constant dense<0.000000e+00> : vector<64x256xf32>
    %24 = tpu.matmul %23, %21, %cst_20 {dimension_numbers = #tpu.dot_dimension_numbers<[1], [0], [0], [1], [0, 0, 1, 1], [], []>} : vector<64x512xbf16>, vector<512x256xbf16>, vector<64x256xf32> -> vector<64x256xf32>
    %25 = vector.broadcast %22 : vector<1x256xf32> to vector<64x256xf32>
    %26 = arith.addf %24, %25 : vector<64x256xf32>
    %cst_21 = arith.constant 0.000000e+00 : f32
    %27 = vector.broadcast %cst_21 : f32 to vector<64x256xf32>
    %28 = arith.maximumf %26, %27 : vector<64x256xf32>
    %c0_22 = arith.constant 0 : index
    %c0_23 = arith.constant 0 : index
    %29 = vector.load %arg9[%c0_22, %c0_23] : memref<256x128xbf16, #tpu.memory_space<vmem>>, vector<256x128xbf16>
    %c0_24 = arith.constant 0 : index
    %c0_25 = arith.constant 0 : index
    %30 = vector.load %arg10[%c0_24, %c0_25] : memref<1x128xf32, #tpu.memory_space<vmem>>, vector<1x128xf32>
    %31 = arith.truncf %28 : vector<64x256xf32> to vector<64x256xbf16>
    %cst_26 = arith.constant dense<0.000000e+00> : vector<64x128xf32>
    %32 = tpu.matmul %31, %29, %cst_26 {dimension_numbers = #tpu.dot_dimension_numbers<[1], [0], [0], [1], [0, 0, 1, 1], [], []>} : vector<64x256xbf16>, vector<256x128xbf16>, vector<64x128xf32> -> vector<64x128xf32>
    %33 = vector.broadcast %30 : vector<1x128xf32> to vector<64x128xf32>
    %34 = arith.addf %32, %33 : vector<64x128xf32>
    %cst_27 = arith.constant 0.000000e+00 : f32
    %35 = vector.broadcast %cst_27 : f32 to vector<64x128xf32>
    %36 = arith.maximumf %34, %35 : vector<64x128xf32>
    %c0_28 = arith.constant 0 : index
    %c0_29 = arith.constant 0 : index
    %37 = vector.load %arg11[%c0_28, %c0_29] : memref<128x5xbf16, #tpu.memory_space<vmem>>, vector<128x5xbf16>
    %c0_30 = arith.constant 0 : index
    %c0_31 = arith.constant 0 : index
    %38 = vector.load %arg12[%c0_30, %c0_31] : memref<1x5xf32, #tpu.memory_space<vmem>>, vector<1x5xf32>
    %39 = arith.truncf %36 : vector<64x128xf32> to vector<64x128xbf16>
    %cst_32 = arith.constant dense<0.000000e+00> : vector<64x5xf32>
    %40 = tpu.matmul %39, %37, %cst_32 {dimension_numbers = #tpu.dot_dimension_numbers<[1], [0], [0], [1], [0, 0, 1, 1], [], []>} : vector<64x128xbf16>, vector<128x5xbf16>, vector<64x5xf32> -> vector<64x5xf32>
    %41 = vector.broadcast %38 : vector<1x5xf32> to vector<64x5xf32>
    %42 = arith.addf %40, %41 : vector<64x5xf32>
    %cst_33 = arith.constant dense<0xFF800000> : vector<64xf32>
    %43 = vector.multi_reduction <maximumf>, %42, %cst_33 [1] : vector<64x5xf32> to vector<64xf32>
    %44 = vector.shape_cast %43 : vector<64xf32> to vector<64x1xf32>
    %45 = vector.broadcast %44 : vector<64x1xf32> to vector<64x5xf32>
    %46 = arith.subf %42, %45 : vector<64x5xf32>
    %47 = math.exp %46 : vector<64x5xf32>
    %cst_34 = arith.constant dense<0.000000e+00> : vector<64xf32>
    %48 = vector.multi_reduction <add>, %47, %cst_34 [1] : vector<64x5xf32> to vector<64xf32>
    %49 = vector.shape_cast %48 : vector<64xf32> to vector<64x1xf32>
    %50 = math.log %49 : vector<64x1xf32>
    %51 = vector.broadcast %50 : vector<64x1xf32> to vector<64x5xf32>
    %52 = arith.subf %46, %51 : vector<64x5xf32>
    %c0_35 = arith.constant 0 : index
    %c0_36 = arith.constant 0 : index
    %c0_37 = arith.constant 0 : index
    %53 = vector.load %arg13[%c0_35, %c0_36, %c0_37] : memref<1x64x5xf32, #tpu.memory_space<vmem>>, vector<1x64x5xf32>
    %54 = vector.shape_cast %53 : vector<1x64x5xf32> to vector<64x5xf32>
    %55 = vector.shape_cast %52 : vector<64x5xf32> to vector<1x64x5xf32>
    tpu.vector_store %arg13[%c0_35, %c0_36, %c0_37], %55 {strides = array<i32>} : memref<1x64x5xf32, #tpu.memory_space<vmem>>, vector<1x64x5xf32>,
    return
  }
  func.func @transform_0(%arg0: i32, %arg1: i32) -> (i32, i32, i32) {
    %c0_i32 = arith.constant 0 : i32
    %c0_i32_0 = arith.constant 0 : i32
    return %arg0, %arg1, %c0_i32 : i32, i32, i32
  }
  func.func @transform_1(%arg0: i32, %arg1: i32) -> (i32, i32, i32) {
    %c0_i32 = arith.constant 0 : i32
    %c0_i32_0 = arith.constant 0 : i32
    %c0_i32_1 = arith.constant 0 : i32
    return %arg0, %c0_i32, %c0_i32_0 : i32, i32, i32
  }
  func.func @transform_2(%arg0: i32, %arg1: i32) -> (i32, i32) {
    %c0_i32 = arith.constant 0 : i32
    %c0_i32_0 = arith.constant 0 : i32
    %c0_i32_1 = arith.constant 0 : i32
    return %c0_i32, %c0_i32_0 : i32, i32
  }
  func.func @transform_3(%arg0: i32, %arg1: i32) -> (i32, i32, i32) {
    %c0_i32 = arith.constant 0 : i32
    %c0_i32_0 = arith.constant 0 : i32
    %c0_i32_1 = arith.constant 0 : i32
    return %arg0, %c0_i32, %c0_i32_0 : i32, i32, i32
  }
  func.func @transform_4(%arg0: i32, %arg1: i32) -> (i32, i32, i32) {
    %c0_i32 = arith.constant 0 : i32
    %c0_i32_0 = arith.constant 0 : i32
    %c0_i32_1 = arith.constant 0 : i32
    return %arg0, %c0_i32, %c0_i32_0 : i32, i32, i32
  }
  func.func @transform_5(%arg0: i32, %arg1: i32) -> (i32, i32) {
    %c0_i32 = arith.constant 0 : i32
    %c0_i32_0 = arith.constant 0 : i32
    %c0_i32_1 = arith.constant 0 : i32
    return %c0_i32, %c0_i32_0 : i32, i32
  }
  func.func @transform_6(%arg0: i32, %arg1: i32) -> (i32, i32) {
    %c0_i32 = arith.constant 0 : i32
    %c0_i32_0 = arith.constant 0 : i32
    %c0_i32_1 = arith.constant 0 : i32
    return %c0_i32, %c0_i32_0 : i32, i32
  }
  func.func @transform_7(%arg0: i32, %arg1: i32) -> (i32, i32) {
    %c0_i32 = arith.constant 0 : i32
    %c0_i32_0 = arith.constant 0 : i32
    %c0_i32_1 = arith.constant 0 : i32
    return %c0_i32, %c0_i32_0 : i32, i32
  }
  func.func @transform_8(%arg0: i32, %arg1: i32) -> (i32, i32) {
    %c0_i32 = arith.constant 0 : i32
    %c0_i32_0 = arith.constant 0 : i32
    %c0_i32_1 = arith.constant 0 : i32
    return %c0_i32, %c0_i32_0 : i32, i32
  }
  func.func @transform_9(%arg0: i32, %arg1: i32) -> (i32, i32) {
    %c0_i32 = arith.constant 0 : i32
    %c0_i32_0 = arith.constant 0 : i32
    %c0_i32_1 = arith.constant 0 : i32
    return %c0_i32, %c0_i32_0 : i32, i32
  }
  func.func @transform_10(%arg0: i32, %arg1: i32) -> (i32, i32) {
    %c0_i32 = arith.constant 0 : i32
    %c0_i32_0 = arith.constant 0 : i32
    %c0_i32_1 = arith.constant 0 : i32
    return %c0_i32, %c0_i32_0 : i32, i32
  }
  func.func @transform_11(%arg0: i32, %arg1: i32) -> (i32, i32, i32) {
    %c0_i32 = arith.constant 0 : i32
    %c0_i32_0 = arith.constant 0 : i32
    return %arg0, %arg1, %c0_i32 : i32, i32, i32
  }
}

</mosaic_0001>

<bundles_post_ra>
// kernel: pointnet_forward.6
= control target key start
LH: loop header
LB: loop body
LE: loop exit
PB: predicated region body
PF: predicated region fallthrough
CT: control target
= control target key end

     0   :  { %12 = vsyncpa [#allocation3], 0  ;;  %s2645_s0 = inlined_call_operand.vmem [shape: f32[2,128,3], index: 0, kind: input, shape index: {}]   ;;  %s2646_s1 = inlined_call_operand.vmem [shape: bf16[3,64], index: 1, kind: input, shape index: {}]   ;;  %s2647_s2 = inlined_call_operand.hbm [shape: f32[1,64], index: 2, kind: input, shape index: {}]   ;;  %s2648_s3 = inlined_call_operand.vmem [shape: bf16[64,128], index: 3, kind: input, shape index: {}]   ;;  %s2649_s4 = inlined_call_operand.hbm [shape: f32[1,128], index: 4, kind: input, shape index: {}]   ;;  %s2650_s5 = inlined_call_operand.vmem [shape: bf16[128,1024], index: 5, kind: input, shape index: {}]   ;;  %s2651_s6 = inlined_call_operand.hbm [shape: f32[1,1024], index: 6, kind: input, shape index: {}]   ;;  %s2652_s7 = inlined_call_operand.vmem [shape: f32[2,1,1024], index: 7, kind: output, shape index: {}]  }
   0x1   :  { %13 = vsyncpa [#allocation5], 0  ;;  %s2100_s24 = smov 0   ;;  %s2102_s25 = smov 0  }
   0x2   :  { %s2104_s26 = smov 0   ;;  %s2106_s27 = smov 0  }
   0x3   :  { %s2108_s28 = smov 0  }
   0x4 LB: > { %s2053_s29 = smov [#allocation4]   ;;  %s1706_s8 = sadd.s32 4294967295, %s2051_s28   ;;  %s2051_s28 = sphi %s2108_s28, %s19_s28   ;;  %s2047_s27 = sphi %s2106_s27, %s2669_s27   ;;  %s2043_s26 = sphi %s2104_s26, %s2668_s26   ;;  %s2039_s25 = sphi %s2102_s25, %s2667_s25   ;;  %s2035_s24 = sphi %s2100_s24, %s2666_s24  }
   0x5   : > { %s246_s30 = sshll.u32 %s2053_s29, 4  ;;  %p1708_p0 = scmp.ge.s32.totalorder %s2051_s28, 1  ;;  %s247_s30 = int_to_ptr.vmem [resolvable:$true] %s246_s30 }
   0x6   : > { %p216_p1 = scmp.lt.s32.totalorder %s2051_s28, 5  ;;  %p2128_p2 = scmp.eq.s32.totalorder %s1706_s8, 0 }
   0x7   : > { %s28_s12 = sadd.s32 1, %s2043_s26  ;;  %s1921_s16 = scalar_lea.hbm %s2649_s4, 16 }
   0x8   : > { %s2657_s9 = scalar_select %p2128_p2, 1, 0 }
   0x9   : > { %p2132_p3 = pnand %p1708_p0, %p216_p1  ;;  %p2145_p6 = scmp.ge.s32.totalorder %s28_s12, 2 }
   0xa   : > { %p1922_p7 = scmp.ne.s32.totalorder %s2649_s4, %s1921_s16  ;;  %p1928_p11 = scmp.lt.u32.totalorder %s1921_s16, %s2649_s4 }
   0xb   : > { %s2658_s10 = scalar_select %p2132_p3, 1, 0 }
   0xc   : > { %p1854_p4 = pneg %p2132_p3 }
   0xd   : > { %s2660_s13 = scalar_select %p2145_p6, 1, 0 }
   0xe   : > { %p2140_p5 = pnand %p2128_p2, %p1854_p4 }
  0x10   : > { %p2157_p8 = pneg %p2140_p5 }
  0x12   : > { %p1924_p9 = pnand %p2157_p8, %p1922_p7 }
  0x14   : > { %p1925_p10 = pneg %p1924_p9 }
  0x16   : > { %p1930_p12 = pnand %p1928_p11, %p1925_p10 }
  0x18   : > { %1933 = shalt.err (!%p1930_p12)
}
  0x19   : > { %s1934_s22 = scalar_lea.vmem %s247_s30, 16  ;;  %s1941_s23 = scalar_lea.vmem %s247_s30, 32 }
  0x1a   : > { %p1935_p13 = scmp.ne.s32.totalorder %s247_s30, %s1934_s22  ;;  %p1942_p4 = scmp.lt.s32.totalorder %s247_s30, %s247_s30 }
  0x1b   : > { %p1943_p2 = scmp.lt.s32.totalorder %s1941_s23, %s1934_s22 }
  0x1c   : > { %p1937_p0 = pnand %p1935_p13, %p2157_p8 }
  0x1d   : > { %p1944_p3 = por %p1943_p2, %p1942_p4 }
  0x1e   : > { %p1938_p1 = pneg %p1937_p0 }
  0x20   : > { %p1945_p6 = pnand %p1944_p3, %p1938_p1 }
  0x22   : > { %1948 = shalt.err (!%p1945_p6)
}
  0x23   : > { %1860 = dma.hbm_to_vmem [thread:$0]  (!%p2140_p5), %s2649_s4, 16, %s247_s30, [#allocation5]  }
  0x24   : > { %p2662_p7 = scmp.ne.s32.totalorder %s2660_s13, 0  ;;  %s31_s14 = sadd.s32 1, %s2047_s27 }
  0x25   : > { %s2054_s15 = smov [#allocation2]   ;;  %s1949_s20 = scalar_lea.hbm %s2647_s2, 16 }
  0x26   : > { %s2671_s12 = smov (%p2662_p7, %s28_s12), 0  ;;  %s2673_s14 = smov (!%p2662_p7, %s31_s14), %s2047_s27 }
  0x27   : > { %s232_s16 = sshll.u32 %s2054_s15, 4  ;;  %p1950_p3 = scmp.ne.s32.totalorder %s2647_s2, %s1949_s20  ;;  %s233_s16 = int_to_ptr.vmem [resolvable:$true] %s232_s16 }
  0x28   : > { %p1956_p10 = scmp.lt.u32.totalorder %s1949_s20, %s2647_s2 }
  0x29   : > { %p1952_p6 = pnand %p1950_p3, %p2157_p8 }
  0x2b   : > { %p1953_p9 = pneg %p1952_p6 }
  0x2d   : > { %p1958_p11 = pnand %p1956_p10, %p1953_p9 }
  0x2f   : > { %1961 = shalt.err (!%p1958_p11)
}
  0x30   : > { %s1962_s13 = scalar_lea.vmem %s233_s16, 16  ;;  %s1969_s29 = scalar_lea.vmem %s233_s16, 32 }
  0x31   : > { %p1963_p12 = scmp.ne.s32.totalorder %s233_s16, %s1962_s13  ;;  %p1970_p1 = scmp.lt.s32.totalorder %s233_s16, %s233_s16 }
  0x32   : > { %p1971_p4 = scmp.lt.s32.totalorder %s1969_s29, %s1962_s13 }
  0x33   : > { %p1965_p13 = pnand %p1963_p12, %p2157_p8 }
  0x34   : > { %p1972_p7 = por %p1971_p4, %p1970_p1 }
  0x35   : > { %p1966_p0 = pneg %p1965_p13 }
  0x37   : > { %p1973_p2 = pnand %p1972_p7, %p1966_p0 }
  0x39   : > { %1976 = shalt.err (!%p1973_p2)
}
  0x3a   : > { %1857 = dma.hbm_to_vmem [thread:$0]  (!%p2140_p5), %s2647_s2, 16, %s233_s16, [#allocation3]  }
  0x3b   : > { %p2663_p3 = scmp.ge.s32.totalorder %s2673_s14, 2  ;;  %s2055_s17 = smov [#allocation6]  }
  0x3c   : > { %s260_s18 = sshll.u32 %s2055_s17, 4  ;;  %s1977_s22 = scalar_lea.hbm %s2651_s6, 128  ;;  %s261_s18 = int_to_ptr.vmem [resolvable:$true] %s260_s18 }
  0x3d   : > { %s2675_s14 = smov (%p2663_p3, %s2673_s14), 0  ;;  %p1978_p2 = scmp.ne.s32.totalorder %s2651_s6, %s1977_s22 }
  0x3e   : > { %p1984_p10 = scmp.lt.u32.totalorder %s1977_s22, %s2651_s6 }
  0x3f   : > { %p1980_p6 = pnand %p1978_p2, %p2157_p8 }
  0x41   : > { %p1981_p9 = pneg %p1980_p6 }
  0x43   : > { %p1986_p11 = pnand %p1984_p10, %p1981_p9 }
  0x45   : > { %1989 = shalt.err (!%p1986_p11)
}
  0x46   : > { %s1990_s16 = scalar_lea.vmem %s261_s18, 128  ;;  %p1998_p1 = scmp.lt.s32.totalorder %s261_s18, %s261_s18 }
  0x47   : > { %p1991_p12 = scmp.ne.s32.totalorder %s261_s18, %s1990_s16  ;;  %p1999_p4 = scmp.lt.s32.totalorder %s1990_s16, %s1990_s16 }
  0x49   : > { %p1993_p13 = pnand %p1991_p12, %p2157_p8  ;;  %p2000_p7 = por %p1999_p4, %p1998_p1 }
  0x4b   : > { %p1994_p0 = pneg %p1993_p13 }
  0x4d   : > { %p2001_p3 = pnand %p2000_p7, %p1994_p0 }
  0x4f   : > { %2004 = shalt.err (!%p2001_p3)
}
  0x50   : > { %1863 = dma.hbm_to_vmem [thread:$0]  (!%p2140_p5), %s2651_s6, 128, %s261_s18, [#allocation5]  }
  0x51   : > { %p2664_p2 = scmp.ne.s32.totalorder %s2658_s10, 0 }
  0x52   : > { %p2665_p6 = scmp.ne.s32.totalorder (!%p2664_p2), %s2657_s9, 0 }
  0x53   : > { %286 = sbr.rel (%p2664_p2) target bundleno = 866 (0x362), region = 48 }
  0x5a   : > { %2026 = dma.done.wait (%p2665_p6), [#allocation3], 16  }
  0x5b   : > { %2028 = vsyncadd (%p2665_p6), [#allocation3], 4294967280 }
  0x5c   : > { %2030 = dma.done.wait (%p2665_p6), [#allocation5], 144  }
  0x5d   : > { %2032 = vsyncadd (%p2665_p6), [#allocation5], 4294967152  ;;  %vm377_vm0 = vcmask 1040384   ;;  %s1717_s11 = sshll.u32 %s2035_s24, 3  ;;  %p330_p5 = scmp.lt.s32.totalorder %s2039_s25, 1  ;;  %vm378_vm1 = vcmask 1041408  }
  0x5e   : > { %p332_p8 = scmp.lt.s32.totalorder %s1717_s11, 15  ;;  %v2056_v0 = vmov 65535   ;;  %v352_v3 = vld [vmem:[%s2646_s1] sm:$0x3]  ;;  %vm364_vm2 = vcmask 23552   ;;  %v1918_v15 = vld [vmem:[%s2648_s3 + $0x8] sm:$0xff]  }
  0x5f   : > { %v379_v1 = vsel %vm377_vm0, 4294967295, %v2056_v0  ;;  %s2677_s25 = smov (!%p330_p5, %s2039_s25), 1  ;;  %v1917_v4 = vld [vmem:[%s2648_s3] sm:$0xff]   ;;  %v1919_v19 = vld [vmem:[%s2648_s3 + $0x10] sm:$0xff]   ;;  %v1920_v20 = vld [vmem:[%s2648_s3 + $0x18] sm:$0xff]   ;;  %vm500_vm3 = vcmask 523264  }
  0x60   : > { %s2679_s11 = smov (!%p332_p8, %s1717_s11), 15  ;;  %v380_v2 = vsel %vm378_vm1, %v379_v1, 0  ;;  %s1718_s10 = sshll.u32 %s2677_s25, 4  ;;  %1826 = vmatprep.subr.bf16.mxu1 %v1917_v4  ;;  %v586_v21 = vld [vmem:[%s2650_s5] sm:$0xff]  ;;  %v2269_v23 = vld [vmem:[%s2650_s5 + $0x8] sm:$0xff] }
  0x61   : > { %s1720_s19 = sshll.u32 %s2677_s25, 3  ;;  %s335_s17 = sadd.s32 %s1718_s10, %s2679_s11  ;;  %v382_v5 = vand.u32 %v380_v2, %v352_v3  ;;  %1827 = vmatpush3.bf16.msra.mxu1 %v1917_v4  ;;  %v590_v22 = vld [vmem:[%s2650_s5 + $0x20] sm:$0xff]  ;;  %v2274_v26 = vld [vmem:[%s2650_s5 + $0x28] sm:$0xff] }
  0x62   : > { %s2236_s9 = scalar_lea.vmem %s2652_s7, %s1720_s19  ;;  %s1719_s30 = sshll.u32 %s335_s17, 3  ;;  %1828 = vmatprep.subr.bf16.mxu1 %v1918_v15  ;;  %v1735_v24 = vcombine.low %v586_v21, %v590_v22  ;;  %v1736_v25 = vcombine.high %v586_v21, %v590_v22  ;;  %v594_v27 = vld [vmem:[%s2650_s5 + $0x40] sm:$0xff]  ;;  %v1737_v29 = vcombine.low %v2269_v23, %v2274_v26  ;;  %v1738_v30 = vcombine.high %v2269_v23, %v2274_v26  ;;  %v595_v62 = vld [vmem:[%s2650_s5 + $0x48] sm:$0xff] }
  0x63   : > { %s337_s25 = scalar_lea.vmem %s2645_s0, %s1719_s30  ;;  %1816 = vmatprep.subr.bf16.mxu0 %v382_v5  ;;  %v598_v28 = vld [vmem:[%s2650_s5 + $0x60] sm:$0xff]  ;;  %v599_v63 = vld [vmem:[%s2650_s5 + $0x68] sm:$0xff]  ;;  %p1799_p9 = scmp.ne.s32.totalorder %s2035_s24, 0 }
  0x64   : > { %v344_v6 = vld [vmem:[%s337_s25] sm:$0xff]  ;;  %v345_v7 = vld [vmem:[%s337_s25 + $0x8] sm:$0xff]  ;;  %v346_v8 = vld [vmem:[%s337_s25 + $0x10] sm:$0xff]  ;;  %1817 = vmatpush3.bf16.msra.mxu0 %v382_v5  ;;  %v1744_v31 = vcombine.high %v594_v27, %v598_v28  ;;  %v1743_v34 = vcombine.low %v594_v27, %v598_v28  ;;  %v1746_v5 = vcombine.high %v595_v62, %v599_v63 }
  0x65   : > { %v354_v9 = vpack.c.bf16 %v345_v7, %v344_v6  ;;  %v347_v10 = vld [vmem:[%s337_s25 + $0x18] sm:$0xff]  ;;  %v348_v11 = vld [vmem:[%s337_s25 + $0x20] sm:$0xff]  ;;  %v349_v12 = vld [vmem:[%s337_s25 + $0x28] sm:$0xff]  ;;  %1829 = vmatpush3.bf16.msra.mxu1 %v1918_v15  ;;  %1016 = vmatprep.subr.bf16.mxu0 %v1736_v25  ;;  %v1745_v15 = vcombine.low %v595_v62, %v599_v63 }
  0x66   : > { %v355_v13 = vpack.c.bf16 %v347_v10, %v346_v8  ;;  %v356_v14 = vpack.c.bf16 %v349_v12, %v348_v11  ;;  %v350_v16 = vld [vmem:[%s337_s25 + $0x30] sm:$0xff]  ;;  %v351_v17 = vld [vmem:[%s337_s25 + $0x38] sm:$0xff]  ;;  %1830 = vmatprep.subr.bf16.mxu1 %v1919_v19  ;;  %v602_v32 = vld [vmem:[%s2650_s5 + $0x80] sm:$0xff] }
  0x67   : > { %1818 = vmatprep.mubr.msk.bf16.mxu0 %vm364_vm2, %v354_v9  ;;  %v357_v18 = vpack.c.bf16 %v351_v17, %v350_v16  ;;  %v606_v33 = vld [vmem:[%s2650_s5 + $0xa0] sm:$0xff]  ;;  %v603_v8 = vld [vmem:[%s2650_s5 + $0x88] sm:$0xff] }
  0x68   : > { %1819 = vmatmul.mubr.msk.bf16.vlgmr.msra.gmra.mrb[0].mxu0 %vm364_vm2, %v355_v13  ;;  %v1752_v35 = vcombine.high %v602_v32, %v606_v33  ;;  %v610_v36 = vld [vmem:[%s2650_s5 + $0xc0] sm:$0xff]  ;;  %v1751_v38 = vcombine.low %v602_v32, %v606_v33  ;;  %v607_v9 = vld [vmem:[%s2650_s5 + $0xa8] sm:$0xff] }
  0x69   : > { %1822 = vmatprep.mubr.msk.bf16.mxu0 %vm364_vm2, %v356_v14  ;;  %1831 = vmatpush3.bf16.msra.mxu1 %v1919_v19  ;;  %v614_v37 = vld [vmem:[%s2650_s5 + $0xe0] sm:$0xff]  ;;  %v1754_v17 = vcombine.high %v603_v8, %v607_v9  ;;  %v611_v19 = vld [vmem:[%s2650_s5 + $0xc8] sm:$0xff] }
  0x6a   : > { %1832 = vmatprep.subr.bf16.mxu1 %v1920_v20  ;;  %1017 = vmatpush1.bf16.msra.mxu0 %v1735_v24  ;;  %v1760_v39 = vcombine.high %v610_v36, %v614_v37  ;;  %v618_v40 = vld [vmem:[%s2650_s5 + $0x100] sm:$0xff]  ;;  %v1759_v42 = vcombine.low %v610_v36, %v614_v37  ;;  %v1753_v24 = vcombine.low %v603_v8, %v607_v9  ;;  %v619_v25 = vld [vmem:[%s2650_s5 + $0x108] sm:$0xff]  ;;  %v597_v8 = vld [vmem:[%s2650_s5 + $0x58] sm:$0xff] }
  0x6b   : > { %1018 = vmatprep.subr.bf16.mxu0 %v1744_v31  ;;  %v622_v41 = vld [vmem:[%s2650_s5 + $0x120] sm:$0xff]  ;;  %v623_v26 = vld [vmem:[%s2650_s5 + $0x128] sm:$0xff]  ;;  %v601_v9 = vld [vmem:[%s2650_s5 + $0x78] sm:$0xff] }
  0x6c   : > { %v1768_v43 = vcombine.high %v618_v40, %v622_v41  ;;  %v626_v44 = vld [vmem:[%s2650_s5 + $0x140] sm:$0xff]  ;;  %v1767_v46 = vcombine.low %v618_v40, %v622_v41  ;;  %v1770_v28 = vcombine.high %v619_v25, %v623_v26  ;;  %v1769_v31 = vcombine.low %v619_v25, %v623_v26  ;;  %v635_v36 = vld [vmem:[%s2650_s5 + $0x188] sm:$0xff] }
  0x6d   : > { %1833 = vmatpush3.bf16.msra.mxu1 %v1920_v20  ;;  %v630_v45 = vld [vmem:[%s2650_s5 + $0x160] sm:$0xff]  ;;  %v615_v20 = vld [vmem:[%s2650_s5 + $0xe8] sm:$0xff] }
  0x6e   : > { %1089 = vmatprep.subr.bf16.mxu1 %v1738_v30  ;;  %1019 = vmatpush1.bf16.msra.mxu0 %v1743_v34  ;;  %v1776_v47 = vcombine.high %v626_v44, %v630_v45  ;;  %v1775_v48 = vcombine.low %v626_v44, %v630_v45  ;;  %v1721_v49 = vld [vmem:[#allocation2] ss:$0 sm:$0xff]  ;;  %v1762_v23 = vcombine.high %v611_v19, %v615_v20  ;;  %v631_v30 = vld [vmem:[%s2650_s5 + $0x168] sm:$0xff] }
  0x6f   : > { %1020 = vmatprep.subr.bf16.mxu0 %v1752_v35  ;;  %v1761_v27 = vcombine.low %v611_v19, %v615_v20  ;;  %v634_v34 = vld [vmem:[%s2650_s5 + $0x180] sm:$0xff]  ;;  %v643_v44 = vld [vmem:[%s2650_s5 + $0x1c8] sm:$0xff]  ;;  %v608_v20 = vld [vmem:[%s2650_s5 + $0xb0] sm:$0xff] }
  0x70   : > { %1823 = vmatmul.mubr.msk.bf16.gmra.mrb[4].mxu0 %vm364_vm2, %v357_v18  ;;  %v638_v35 = vld [vmem:[%s2650_s5 + $0x1a0] sm:$0xff] }
  0x71   : > { %v1784_v37 = vcombine.high %v634_v34, %v638_v35 }
  0x72   : > { %1021 = vmatpush1.bf16.msra.mxu0 %v1751_v38  ;;  %v639_v38 = vld [vmem:[%s2650_s5 + $0x1a8] sm:$0xff] }
  0x73   : > { %1022 = vmatprep.subr.bf16.mxu0 %v1760_v39  ;;  %v1783_v39 = vcombine.low %v634_v34, %v638_v35  ;;  %v1785_v40 = vcombine.low %v635_v36, %v639_v38  ;;  %v1786_v41 = vcombine.high %v635_v36, %v639_v38  ;;  %v612_v34 = vld [vmem:[%s2650_s5 + $0xd0] sm:$0xff]  ;;  %v617_v38 = vld [vmem:[%s2650_s5 + $0xf8] sm:$0xff] }
  0x74   : > { %v616_v36 = vld [vmem:[%s2650_s5 + $0xf0] sm:$0xff] }
  0x76   : > { %1023 = vmatpush1.bf16.msra.mxu0 %v1759_v42  ;;  %v642_v42 = vld [vmem:[%s2650_s5 + $0x1c0] sm:$0xff] }
  0x77   : > { %1024 = vmatprep.subr.bf16.mxu0 %v1768_v43  ;;  %v646_v43 = vld [vmem:[%s2650_s5 + $0x1e0] sm:$0xff] }
  0x78   : > { %v1792_v45 = vcombine.high %v642_v42, %v646_v43 }
  0x7a   : > { %1025 = vmatpush1.bf16.msra.mxu0 %v1767_v46  ;;  %v647_v46 = vld [vmem:[%s2650_s5 + $0x1e8] sm:$0xff] }
  0x7b   : > { %1026 = vmatprep.subr.bf16.mxu0 %v1776_v47  ;;  %v1791_v47 = vcombine.low %v642_v42, %v646_v43 }
  0x7e   : > { %1027 = vmatpush1.bf16.msra.mxu0 %v1775_v48  ;;  %v1793_v48 = vcombine.low %v643_v44, %v647_v46 }
  0x7f   : > { %1028 = vmatprep.subr.bf16.mxu0 %v1784_v37  ;;  %v613_v37 = vld [vmem:[%s2650_s5 + $0xd8] sm:$0xff] }
  0x82   : > { %1029 = vmatpush1.bf16.msra.mxu0 %v1783_v39 }
  0x83   : > { %1030 = vmatprep.subr.bf16.mxu0 %v1792_v45  ;;  %v1766_v45 = vcombine.high %v613_v37, %v617_v38 }
  0x86   : > { %1031 = vmatpush1.bf16.msra.mxu0 %v1791_v47  ;;  %v624_v47 = vld [vmem:[%s2650_s5 + $0x130] sm:$0xff] }
 0x13b   : > { %v1820_v50 = vpop.f32.mrb[0].mxu0 }
 0x13c   : > { %v427_v51 = vadd.f32 %v1820_v50, %v1721_v49  ;;  %v418_v52 = vpop.f32.mrb[1].mxu0  ;;  %v588_v50 = vld [vmem:[%s2650_s5 + $0x10] sm:$0xff] }
 0x13d   : > { %v419_v53 = vadd.f32 %v1721_v49, %v418_v52  ;;  %v1821_v54 = vpop.f32.mrb[2].mxu0  ;;  %v589_v52 = vld [vmem:[%s2650_s5 + $0x18] sm:$0xff] }
 0x13e   : > { %v430_v55 = vadd.f32 %v1821_v54, %v1721_v49  ;;  %v421_v56 = vpop.f32.mrb[3].mxu0  ;;  %v451_v58 = vmax.f32 %v427_v51, 0.0  ;;  %v592_v51 = vld [vmem:[%s2650_s5 + $0x30] sm:$0xff]  ;;  %v593_v54 = vld [vmem:[%s2650_s5 + $0x38] sm:$0xff] }
 0x13f   : > { %v422_v57 = vadd.f32 %v1721_v49, %v421_v56  ;;  %v449_v60 = vmax.f32 %v419_v53, 0.0  ;;  %v1740_v53 = vcombine.high %v588_v50, %v592_v51  ;;  %v1739_v56 = vcombine.low %v588_v50, %v592_v51 }
 0x140   : > { %v452_v59 = vmax.f32 %v430_v55, 0.0  ;;  %v2057_v55 = vmov 0   ;;  %v1763_v50 = vcombine.low %v612_v34, %v616_v36  ;;  %v1765_v51 = vcombine.low %v613_v37, %v617_v38 }
 0x141   : > { %v450_v61 = vmax.f32 %v422_v57, 0.0  ;;  %1048 = vmatprep.mubr.bf16.mxu0 %v2057_v55  ;;  %v1741_v57 = vcombine.low %v589_v52, %v593_v54  ;;  %1162 = vmatprep.subr.bf16.mxu0 %v1740_v53 }
 0x142   : > { %v467_v0 = vpack.c.bf16 %v452_v59, %v451_v58  ;;  %v1742_v58 = vcombine.high %v589_v52, %v593_v54  ;;  %v1726_v59 = vld [vmem:[#allocation4] ss:$0 sm:$0xff]  ;;  %v628_v54 = vld [vmem:[%s2650_s5 + $0x150] sm:$0xff] }
 0x143   : > { %v1824_v1 = vpop.f32.mrb[4].mxu0  ;;  %v466_v2 = vpack.c.bf16 %v450_v61, %v449_v60 }
 0x144   : > { %v443_v3 = vadd.f32 %v1824_v1, %v1721_v49  ;;  %v434_v4 = vpop.f32.mrb[5].mxu0 }
 0x145   : > { %v435_v6 = vadd.f32 %v1721_v49, %v434_v4  ;;  %1834 = vmatprep.mubr.msk.bf16.mxu1 %vm500_vm3, %v466_v2  ;;  %v1825_v7 = vpop.f32.mrb[6].mxu0  ;;  %v596_v4 = vld [vmem:[%s2650_s5 + $0x50] sm:$0xff] }
 0x146   : > { %v455_v10 = vmax.f32 %v443_v3, 0.0  ;;  %v446_v11 = vadd.f32 %v1825_v7, %v1721_v49  ;;  %1835 = vmatmul.mubr.msk.bf16.vlgmr.msra.gmra.mrb[0].mxu1 %vm500_vm3, %v467_v0  ;;  %v437_v12 = vpop.f32.mrb[7].mxu0  ;;  %v600_v7 = vld [vmem:[%s2650_s5 + $0x70] sm:$0xff] }
 0x147   : > { %v453_v13 = vmax.f32 %v435_v6, 0.0  ;;  %v438_v14 = vadd.f32 %v1721_v49, %v437_v12  ;;  %1090 = vmatpush1.bf16.msra.mxu1 %v1737_v29  ;;  %v627_v29 = vld [vmem:[%s2650_s5 + $0x148] sm:$0xff]  ;;  %v1794_v49 = vcombine.high %v643_v44, %v647_v46  ;;  %v1764_v44 = vcombine.high %v612_v34, %v616_v36  ;;  %v620_v46 = vld [vmem:[%s2650_s5 + $0x110] sm:$0xff] }
 0x148   : > { %v456_v16 = vmax.f32 %v446_v11, 0.0  ;;  %1091 = vmatprep.subr.bf16.mxu1 %v1746_v5  ;;  %v1778_v32 = vcombine.high %v627_v29, %v631_v30  ;;  %v1777_v33 = vcombine.low %v627_v29, %v631_v30  ;;  %v1749_v29 = vcombine.low %v597_v8, %v601_v9 }
 0x149   : > { %v454_v18 = vmax.f32 %v438_v14, 0.0  ;;  %v1772_v52 = vcombine.high %v620_v46, %v624_v47 }
 0x14a   : > { %v469_v21 = vpack.c.bf16 %v456_v16, %v455_v10  ;;  %v1750_v16 = vcombine.high %v597_v8, %v601_v9  ;;  %v648_v8 = vld [vmem:[%s2650_s5 + $0x1f0] sm:$0xff]  ;;  %v645_v9 = vld [vmem:[%s2650_s5 + $0x1d8] sm:$0xff] }
 0x14b   : > { %v468_v22 = vpack.c.bf16 %v454_v18, %v453_v13  ;;  %1092 = vmatpush1.bf16.msra.mxu1 %v1745_v15  ;;  %v1748_v15 = vcombine.high %v596_v4, %v600_v7 }
 0x14c   : > { %1093 = vmatprep.subr.bf16.mxu1 %v1754_v17  ;;  %v604_v17 = vld [vmem:[%s2650_s5 + $0x90] sm:$0xff] }
 0x14d   : > { %1838 = vmatprep.mubr.msk.bf16.mxu1 %vm500_vm3, %v468_v22  ;;  %v609_v22 = vld [vmem:[%s2650_s5 + $0xb8] sm:$0xff] }
 0x14e   : > { %1839 = vmatmul.mubr.msk.bf16.gmra.mrb[4].mxu1 %vm500_vm3, %v469_v21  ;;  %v605_v21 = vld [vmem:[%s2650_s5 + $0x98] sm:$0xff] }
 0x14f   : > { %1094 = vmatpush1.bf16.msra.mxu1 %v1753_v24  ;;  %1121 = vmatprep.mubr.bf16.mxu1 %v2057_v55  ;;  %v1757_v42 = vcombine.low %v605_v21, %v609_v22 }
 0x150   : > { %1095 = vmatprep.subr.bf16.mxu1 %v1762_v23 }
 0x153   : > { %1096 = vmatpush1.bf16.msra.mxu1 %v1761_v27 }
 0x154   : > { %1097 = vmatprep.subr.bf16.mxu1 %v1770_v28  ;;  %v1747_v28 = vcombine.low %v596_v4, %v600_v7  ;;  %v644_v7 = vld [vmem:[%s2650_s5 + $0x1d0] sm:$0xff] }
 0x157   : > { %1098 = vmatpush1.bf16.msra.mxu1 %v1769_v31 }
 0x158   : > { %1099 = vmatprep.subr.bf16.mxu1 %v1778_v32  ;;  %v1756_v32 = vcombine.high %v604_v17, %v608_v20 }
 0x15b   : > { %1100 = vmatpush1.bf16.msra.mxu1 %v1777_v33  ;;  %v1758_v33 = vcombine.high %v605_v21, %v609_v22  ;;  %v2511_v21 = vld [vmem:[#allocation6] sm:$0xff] }
 0x15c   : > { %1101 = vmatprep.subr.bf16.mxu1 %v1786_v41  ;;  %v1755_v41 = vcombine.low %v604_v17, %v608_v20  ;;  %v1795_v17 = vcombine.low %v644_v7, %v648_v8 }
 0x15f   : > { %1102 = vmatpush1.bf16.msra.mxu1 %v1785_v40 }
 0x160   : > { %1103 = vmatprep.subr.bf16.mxu1 %v1794_v49  ;;  %v625_v49 = vld [vmem:[%s2650_s5 + $0x138] sm:$0xff] }
 0x163   : > { %1104 = vmatpush1.bf16.msra.mxu1 %v1793_v48  ;;  %v621_v48 = vld [vmem:[%s2650_s5 + $0x118] sm:$0xff] }
 0x164   : > { %1235 = vmatprep.subr.bf16.mxu1 %v1742_v58  ;;  %v1774_v53 = vcombine.high %v621_v48, %v625_v49  ;;  %v633_v58 = vld [vmem:[%s2650_s5 + $0x178] sm:$0xff] }
 0x219   : > { %v1836_v60 = vpop.f32.mrb[0].mxu1 }
 0x21a   : > { %v556_v61 = vadd.f32 %v1836_v60, %v1726_v59  ;;  %v547_v62 = vpop.f32.mrb[1].mxu1  ;;  %v1773_v60 = vcombine.low %v621_v48, %v625_v49 }
 0x21b   : > { %v548_v63 = vadd.f32 %v1726_v59, %v547_v62  ;;  %v1837_v0 = vpop.f32.mrb[2].mxu1 }
 0x21c   : > { %v559_v1 = vadd.f32 %v1837_v0, %v1726_v59  ;;  %v550_v2 = vpop.f32.mrb[3].mxu1  ;;  %v580_v5 = vmax.f32 %v556_v61, 0.0  ;;  %v640_v0 = vld [vmem:[%s2650_s5 + $0x1b0] sm:$0xff] }
 0x21d   : > { %v551_v3 = vadd.f32 %v1726_v59, %v550_v2  ;;  %v578_v10 = vmax.f32 %v548_v63, 0.0  ;;  %v636_v63 = vld [vmem:[%s2650_s5 + $0x190] sm:$0xff]  ;;  %v641_v2 = vld [vmem:[%s2650_s5 + $0x1b8] sm:$0xff] }
 0x21e   : > { %v581_v6 = vmax.f32 %v559_v1, 0.0  ;;  %v637_v1 = vld [vmem:[%s2650_s5 + $0x198] sm:$0xff] }
 0x21f   : > { %v579_v11 = vmax.f32 %v551_v3, 0.0 }
 0x220   : > { %v2397_v12 = vpack.c.bf16 %v581_v6, %v580_v5  ;;  %v1788_v5 = vcombine.high %v636_v63, %v640_v0  ;;  %v1790_v6 = vcombine.high %v637_v1, %v641_v2 }
 0x221   : > { %v2399_v13 = vpack.c.bf16 %v579_v11, %v578_v10  ;;  %v1840_v14 = vpop.f32.mrb[4].mxu1  ;;  %v649_v10 = vld [vmem:[%s2650_s5 + $0x1f8] sm:$0xff]  ;;  %v1787_v11 = vcombine.low %v636_v63, %v640_v0 }
 0x222   : > { %v572_v18 = vadd.f32 %v1840_v14, %v1726_v59  ;;  %v563_v19 = vpop.f32.mrb[5].mxu1  ;;  %v1789_v14 = vcombine.low %v637_v1, %v641_v2 }
 0x223   : > { %v564_v24 = vadd.f32 %v1726_v59, %v563_v19  ;;  %1049 = vmatmul.mubr.bf16.vlgmr.msra.gmra.mrb[8].mxu0 %v2399_v13  ;;  %1122 = vmatmul.mubr.bf16.vlgmr.msra.gmra.mrb[8].mxu1 %v2399_v13  ;;  %v1841_v23 = vpop.f32.mrb[6].mxu1 }
 0x224   : > { %v584_v25 = vmax.f32 %v572_v18, 0.0  ;;  %1163 = vmatpush1.bf16.msra.mxu0 %v1739_v56  ;;  %1236 = vmatpush1.bf16.msra.mxu1 %v1741_v57  ;;  %v575_v26 = vadd.f32 %v1841_v23, %v1726_v59  ;;  %v566_v27 = vpop.f32.mrb[7].mxu1  ;;  %v632_v56 = vld [vmem:[%s2650_s5 + $0x170] sm:$0xff]  ;;  %v629_v57 = vld [vmem:[%s2650_s5 + $0x158] sm:$0xff]  ;;  %v1797_v18 = vcombine.low %v645_v9, %v649_v10 }
 0x225   : > { %v582_v30 = vmax.f32 %v564_v24, 0.0  ;;  %v567_v31 = vadd.f32 %v1726_v59, %v566_v27  ;;  %1164 = vmatprep.subr.bf16.mxu0 %v1748_v15  ;;  %1237 = vmatprep.subr.bf16.mxu1 %v1750_v16  ;;  %v1771_v59 = vcombine.low %v620_v46, %v624_v47  ;;  %v1780_v61 = vcombine.high %v628_v54, %v632_v56 }
 0x226   : > { %v585_v35 = vmax.f32 %v575_v26, 0.0  ;;  %1058 = vmatprep.mubr.bf16.mxu0 %v2057_v55  ;;  %1131 = vmatprep.mubr.bf16.mxu1 %v2057_v55  ;;  %v1782_v62 = vcombine.high %v629_v57, %v633_v58  ;;  %v1779_v3 = vcombine.low %v628_v54, %v632_v56  ;;  %v1781_v4 = vcombine.low %v629_v57, %v633_v58 }
 0x227   : > { %v583_v39 = vmax.f32 %v567_v31, 0.0  ;;  %v1796_v15 = vcombine.high %v644_v7, %v648_v8  ;;  %v1798_v16 = vcombine.high %v645_v9, %v649_v10 }
 0x228   : > { %v2429_v40 = vpack.c.bf16 %v585_v35, %v584_v25  ;;  %1165 = vmatpush1.bf16.msra.mxu0 %v1747_v28  ;;  %1238 = vmatpush1.bf16.msra.mxu1 %v1749_v29 }
 0x229   : > { %v2431_v43 = vpack.c.bf16 %v583_v39, %v582_v30  ;;  %1166 = vmatprep.subr.bf16.mxu0 %v1756_v32  ;;  %1239 = vmatprep.subr.bf16.mxu1 %v1758_v33 }
 0x22b   : > { %1059 = vmatmul.mubr.bf16.gmra.mrb[12].mxu0 %v2397_v12  ;;  %1132 = vmatmul.mubr.bf16.gmra.mrb[12].mxu1 %v2397_v12 }
 0x22c   : > { %1167 = vmatpush1.bf16.msra.mxu0 %v1755_v41  ;;  %1240 = vmatpush1.bf16.msra.mxu1 %v1757_v42 }
 0x22d   : > { %1168 = vmatprep.subr.bf16.mxu0 %v1764_v44  ;;  %1241 = vmatprep.subr.bf16.mxu1 %v1766_v45 }
 0x22e   : > { %1068 = vmatprep.mubr.bf16.mxu0 %v2057_v55  ;;  %1141 = vmatprep.mubr.bf16.mxu1 %v2057_v55 }
 0x230   : > { %1169 = vmatpush1.bf16.msra.mxu0 %v1763_v50  ;;  %1242 = vmatpush1.bf16.msra.mxu1 %v1765_v51 }
 0x231   : > { %1170 = vmatprep.subr.bf16.mxu0 %v1772_v52  ;;  %1243 = vmatprep.subr.bf16.mxu1 %v1774_v53 }
 0x233   : > { %1069 = vmatmul.mubr.bf16.gmra.mrb[16].mxu0 %v2431_v43  ;;  %1142 = vmatmul.mubr.bf16.gmra.mrb[16].mxu1 %v2431_v43 }
 0x234   : > { %1171 = vmatpush1.bf16.msra.mxu0 %v1771_v59  ;;  %1244 = vmatpush1.bf16.msra.mxu1 %v1773_v60 }
 0x235   : > { %1172 = vmatprep.subr.bf16.mxu0 %v1780_v61  ;;  %1245 = vmatprep.subr.bf16.mxu1 %v1782_v62 }
 0x236   : > { %1078 = vmatprep.mubr.bf16.mxu0 %v2057_v55  ;;  %1151 = vmatprep.mubr.bf16.mxu1 %v2057_v55 }
 0x238   : > { %1173 = vmatpush1.bf16.msra.mxu0 %v1779_v3  ;;  %1246 = vmatpush1.bf16.msra.mxu1 %v1781_v4 }
 0x239   : > { %1174 = vmatprep.subr.bf16.mxu0 %v1788_v5  ;;  %1247 = vmatprep.subr.bf16.mxu1 %v1790_v6 }
 0x23b   : > { %1079 = vmatmul.mubr.bf16.gmra.mrb[20].mxu0 %v2429_v40  ;;  %1152 = vmatmul.mubr.bf16.gmra.mrb[20].mxu1 %v2429_v40 }
 0x23c   : > { %1175 = vmatpush1.bf16.msra.mxu0 %v1787_v11  ;;  %1248 = vmatpush1.bf16.msra.mxu1 %v1789_v14 }
 0x23d   : > { %1176 = vmatprep.subr.bf16.mxu0 %v1796_v15  ;;  %1249 = vmatprep.subr.bf16.mxu1 %v1798_v16 }
 0x23e   : > { %1194 = vmatprep.mubr.bf16.mxu0 %v2057_v55  ;;  %1267 = vmatprep.mubr.bf16.mxu1 %v2057_v55 }
 0x240   : > { %1177 = vmatpush1.bf16.msra.mxu0 %v1795_v17  ;;  %1250 = vmatpush1.bf16.msra.mxu1 %v1797_v18 }
 0x243   : > { %1195 = vmatmul.mubr.bf16.vlgmr.msra.gmra.mrb[24].mxu0 %v2399_v13  ;;  %1268 = vmatmul.mubr.bf16.vlgmr.msra.gmra.mrb[24].mxu1 %v2399_v13  ;;  %v656_v13 = vlaneseq }
 0x244   : > { %1204 = vmatprep.mubr.bf16.mxu0 %v2057_v55  ;;  %1277 = vmatprep.mubr.bf16.mxu1 %v2057_v55 }
 0x245   : > { %v2507_v19 = vshrl.u32 %v656_v13, 7 }
 0x247   : > { %v666_v20 = vsub.s32 2, %v2507_v19  ;;  %v662_v22 = vsub.s32 1, %v2507_v19  ;;  %v670_v24 = vsub.s32 3, %v2507_v19 }
 0x249   : > { %v2522_v25 = vrot.slane %v2511_v21, %v662_v22  ;;  %v2525_v26 = vrot.slane %v2511_v21, %v670_v24 }
 0x24b   : > { %1205 = vmatmul.mubr.bf16.gmra.mrb[28].mxu0 %v2397_v12  ;;  %1278 = vmatmul.mubr.bf16.gmra.mrb[28].mxu1 %v2397_v12  ;;  %v658_v12 = vsub.s32 0, %v2507_v19 }
 0x24c   : > { %1214 = vmatprep.mubr.bf16.mxu0 %v2057_v55  ;;  %1287 = vmatprep.mubr.bf16.mxu1 %v2057_v55 }
 0x24d   : > { %v2516_v23 = vrot.slane %v2511_v21, %v658_v12 }
 0x253   : > { %1215 = vmatmul.mubr.bf16.gmra.mrb[32].mxu0 %v2431_v43  ;;  %1288 = vmatmul.mubr.bf16.gmra.mrb[32].mxu1 %v2431_v43 }
 0x254   : > { %1224 = vmatprep.mubr.bf16.mxu0 %v2057_v55  ;;  %1297 = vmatprep.mubr.bf16.mxu1 %v2057_v55  ;;  %v2519_v55 = vrot.slane %v2511_v21, %v666_v20 }
 0x25b   : > { %1225 = vmatmul.mubr.bf16.gmra.mrb[36].mxu0 %v2429_v40  ;;  %1298 = vmatmul.mubr.bf16.gmra.mrb[36].mxu1 %v2429_v40 }
 0x2f6   : > { %v1050_v27 = vpop.f32.mrb[8].mxu0  ;;  %v1123_v28 = vpop.f32.mrb[8].mxu1 }
 0x2f7   : > { %v1051_v29 = vadd.f32 %v1050_v27, %v2516_v23  ;;  %v1124_v30 = vadd.f32 %v1123_v28, %v2519_v55  ;;  %v1052_v31 = vpop.f32.mrb[9].mxu0  ;;  %v1125_v32 = vpop.f32.mrb[9].mxu1 }
 0x2f8   : > { %v1053_v33 = vadd.f32 %v1052_v31, %v2522_v25  ;;  %v1126_v34 = vadd.f32 %v1125_v32, %v2525_v26  ;;  %v1054_v35 = vpop.f32.mrb[10].mxu0  ;;  %v1127_v36 = vpop.f32.mrb[10].mxu1 }
 0x2f9   : > { %v1055_v37 = vadd.f32 %v1054_v35, %v2516_v23  ;;  %v1128_v38 = vadd.f32 %v1127_v36, %v2519_v55  ;;  %v1056_v39 = vpop.f32.mrb[11].mxu0  ;;  %v1129_v40 = vpop.f32.mrb[11].mxu1  ;;  %v1308_v43 = vmax.f32 %v1051_v29, 0.0  ;;  %v1310_v44 = vmax.f32 %v1124_v30, 0.0 }
 0x2fa   : > { %v1057_v41 = vadd.f32 %v1056_v39, %v2522_v25  ;;  %v1130_v42 = vadd.f32 %v1129_v40, %v2525_v26  ;;  %v1309_v47 = vmax.f32 %v1053_v33, 0.0  ;;  %v1311_v48 = vmax.f32 %v1126_v34, 0.0 }
 0x2fb   : > { %v1316_v45 = vmax.f32 %v1055_v37, 0.0  ;;  %v1318_v46 = vmax.f32 %v1128_v38, 0.0  ;;  %v674_v35 = vsub.s32 4, %v2507_v19  ;;  %v682_v36 = vsub.s32 6, %v2507_v19 }
 0x2fc   : > { %v1317_v49 = vmax.f32 %v1057_v41, 0.0  ;;  %v1319_v50 = vmax.f32 %v1130_v42, 0.0  ;;  %v678_v41 = vsub.s32 5, %v2507_v19  ;;  %v686_v42 = vsub.s32 7, %v2507_v19 }
 0x2fd   : > { %v1372_v51 = vmax.f32 %v1308_v43, %v1316_v45  ;;  %v1398_v52 = vmax.f32 %v1310_v44, %v1318_v46 }
 0x2fe   : > { %v1385_v53 = vmax.f32 %v1309_v47, %v1317_v49  ;;  %v1411_v54 = vmax.f32 %v1311_v48, %v1319_v50  ;;  %v1060_v56 = vpop.f32.mrb[12].mxu0  ;;  %v1133_v57 = vpop.f32.mrb[12].mxu1 }
 0x2ff   : > { %v1061_v58 = vadd.f32 %v1060_v56, %v2516_v23  ;;  %v1134_v59 = vadd.f32 %v1133_v57, %v2519_v55  ;;  %v1062_v60 = vpop.f32.mrb[13].mxu0  ;;  %v1135_v61 = vpop.f32.mrb[13].mxu1 }
 0x300   : > { %v1063_v62 = vadd.f32 %v1062_v60, %v2522_v25  ;;  %v1136_v63 = vadd.f32 %v1135_v61, %v2525_v26  ;;  %v1064_v0 = vpop.f32.mrb[14].mxu0  ;;  %v1137_v1 = vpop.f32.mrb[14].mxu1 }
 0x301   : > { %v1324_v2 = vmax.f32 %v1061_v58, 0.0  ;;  %v1326_v3 = vmax.f32 %v1134_v59, 0.0  ;;  %v1065_v4 = vadd.f32 %v1064_v0, %v2516_v23  ;;  %v1138_v5 = vadd.f32 %v1137_v1, %v2519_v55  ;;  %v1066_v6 = vpop.f32.mrb[15].mxu0  ;;  %v1139_v7 = vpop.f32.mrb[15].mxu1 }
 0x302   : > { %v1325_v8 = vmax.f32 %v1063_v62, 0.0  ;;  %v1327_v9 = vmax.f32 %v1136_v63, 0.0  ;;  %v1067_v10 = vadd.f32 %v1066_v6, %v2522_v25  ;;  %v1140_v11 = vadd.f32 %v1139_v7, %v2525_v26 }
 0x303   : > { %v1373_v14 = vmax.f32 %v1372_v51, %v1324_v2  ;;  %v1399_v15 = vmax.f32 %v1398_v52, %v1326_v3  ;;  %v1332_v16 = vmax.f32 %v1065_v4, 0.0  ;;  %v1334_v17 = vmax.f32 %v1138_v5, 0.0 }
 0x304   : > { %v1386_v18 = vmax.f32 %v1385_v53, %v1325_v8  ;;  %v1412_v13 = vmax.f32 %v1411_v54, %v1327_v9  ;;  %v1333_v12 = vmax.f32 %v1067_v10, 0.0  ;;  %v1335_v20 = vmax.f32 %v1140_v11, 0.0 }
 0x305   : > { %v1374_v22 = vmax.f32 %v1373_v14, %v1332_v16  ;;  %v1400_v24 = vmax.f32 %v1399_v15, %v1334_v17  ;;  %v2558_v8 = vrot.slane %v2511_v21, %v674_v35  ;;  %v2561_v9 = vrot.slane %v2511_v21, %v682_v36 }
 0x306   : > { %v1387_v27 = vmax.f32 %v1386_v18, %v1333_v12  ;;  %v1413_v28 = vmax.f32 %v1412_v13, %v1335_v20  ;;  %v1070_v29 = vpop.f32.mrb[16].mxu0  ;;  %v1143_v30 = vpop.f32.mrb[16].mxu1  ;;  %v2566_v16 = vrot.slane %v2511_v21, %v678_v41  ;;  %v2569_v17 = vrot.slane %v2511_v21, %v686_v42 }
 0x307   : > { %v1071_v31 = vadd.f32 %v1070_v29, %v2516_v23  ;;  %v1144_v32 = vadd.f32 %v1143_v30, %v2519_v55  ;;  %v1072_v33 = vpop.f32.mrb[17].mxu0  ;;  %v1145_v34 = vpop.f32.mrb[17].mxu1 }
 0x308   : > { %v1073_v37 = vadd.f32 %v1072_v33, %v2522_v25  ;;  %v1146_v38 = vadd.f32 %v1145_v34, %v2525_v26  ;;  %v1074_v39 = vpop.f32.mrb[18].mxu0  ;;  %v1147_v40 = vpop.f32.mrb[18].mxu1 }
 0x309   : > { %v1340_v43 = vmax.f32 %v1071_v31, 0.0  ;;  %v1342_v44 = vmax.f32 %v1144_v32, 0.0  ;;  %v1075_v45 = vadd.f32 %v1074_v39, %v2516_v23  ;;  %v1148_v46 = vadd.f32 %v1147_v40, %v2519_v55  ;;  %v1076_v47 = vpop.f32.mrb[19].mxu0  ;;  %v1149_v48 = vpop.f32.mrb[19].mxu1 }
 0x30a   : > { %v1341_v49 = vmax.f32 %v1073_v37, 0.0  ;;  %v1343_v50 = vmax.f32 %v1146_v38, 0.0  ;;  %v1077_v51 = vadd.f32 %v1076_v47, %v2522_v25  ;;  %v1150_v52 = vadd.f32 %v1149_v48, %v2525_v26 }
 0x30b   : > { %v1375_v53 = vmax.f32 %v1374_v22, %v1340_v43  ;;  %v1401_v54 = vmax.f32 %v1400_v24, %v1342_v44  ;;  %v1348_v56 = vmax.f32 %v1075_v45, 0.0  ;;  %v1350_v57 = vmax.f32 %v1148_v46, 0.0 }
 0x30c   : > { %v1388_v58 = vmax.f32 %v1387_v27, %v1341_v49  ;;  %v1414_v59 = vmax.f32 %v1413_v28, %v1343_v50  ;;  %v1349_v60 = vmax.f32 %v1077_v51, 0.0  ;;  %v1351_v61 = vmax.f32 %v1150_v52, 0.0 }
 0x30d   : > { %v1376_v62 = vmax.f32 %v1375_v53, %v1348_v56  ;;  %v1402_v63 = vmax.f32 %v1401_v54, %v1350_v57 }
 0x30e   : > { %v1389_v0 = vmax.f32 %v1388_v58, %v1349_v60  ;;  %v1415_v1 = vmax.f32 %v1414_v59, %v1351_v61  ;;  %v1080_v2 = vpop.f32.mrb[20].mxu0  ;;  %v1153_v3 = vpop.f32.mrb[20].mxu1 }
 0x30f   : > { %v1081_v4 = vadd.f32 %v1080_v2, %v2516_v23  ;;  %v1154_v5 = vadd.f32 %v1153_v3, %v2519_v55  ;;  %v1082_v6 = vpop.f32.mrb[21].mxu0  ;;  %v1155_v7 = vpop.f32.mrb[21].mxu1 }
 0x310   : > { %v1083_v10 = vadd.f32 %v1082_v6, %v2522_v25  ;;  %v1156_v11 = vadd.f32 %v1155_v7, %v2525_v26  ;;  %v1084_v14 = vpop.f32.mrb[22].mxu0  ;;  %v1157_v15 = vpop.f32.mrb[22].mxu1 }
 0x311   : > { %v1356_v18 = vmax.f32 %v1081_v4, 0.0  ;;  %v1358_v13 = vmax.f32 %v1154_v5, 0.0  ;;  %v1085_v12 = vadd.f32 %v1084_v14, %v2516_v23  ;;  %v1158_v20 = vadd.f32 %v1157_v15, %v2519_v55  ;;  %v1086_v22 = vpop.f32.mrb[23].mxu0  ;;  %v1159_v24 = vpop.f32.mrb[23].mxu1 }
 0x312   : > { %v1357_v27 = vmax.f32 %v1083_v10, 0.0  ;;  %v1359_v28 = vmax.f32 %v1156_v11, 0.0  ;;  %v1087_v29 = vadd.f32 %v1086_v22, %v2522_v25  ;;  %v1160_v30 = vadd.f32 %v1159_v24, %v2525_v26 }
 0x313   : > { %v1377_v31 = vmax.f32 %v1376_v62, %v1356_v18  ;;  %v1403_v32 = vmax.f32 %v1402_v63, %v1358_v13  ;;  %v1364_v33 = vmax.f32 %v1085_v12, 0.0  ;;  %v1366_v34 = vmax.f32 %v1158_v20, 0.0 }
 0x314   : > { %v1390_v21 = vmax.f32 %v1389_v0, %v1357_v27  ;;  %v1416_v35 = vmax.f32 %v1415_v1, %v1359_v28  ;;  %v1365_v36 = vmax.f32 %v1087_v29, 0.0  ;;  %v1367_v37 = vmax.f32 %v1160_v30, 0.0 }
 0x315   : > { %v1378_v38 = vmax.f32 %v1377_v31, %v1364_v33  ;;  %v1404_v23 = vmax.f32 %v1403_v32, %v1366_v34 }
 0x316   : > { %v1391_v39 = vmax.f32 %v1390_v21, %v1365_v36  ;;  %v1417_v55 = vmax.f32 %v1416_v35, %v1367_v37  ;;  %v1196_v40 = vpop.f32.mrb[24].mxu0  ;;  %v1269_v41 = vpop.f32.mrb[24].mxu1 }
 0x317   : > { %v1379_v42 = vrot.slane %v1378_v38, 4  ;;  %v1405_v43 = vrot.slane %v1404_v23, 4  ;;  %v1197_v25 = vadd.f32 %v1196_v40, %v2558_v8  ;;  %v1270_v26 = vadd.f32 %v1269_v41, %v2561_v9  ;;  %v1198_v44 = vpop.f32.mrb[25].mxu0  ;;  %v1271_v45 = vpop.f32.mrb[25].mxu1 }
 0x318   : > { %v1392_v46 = vrot.slane %v1391_v39, 4  ;;  %v1418_v47 = vrot.slane %v1417_v55, 4  ;;  %v1199_v48 = vadd.f32 %v1198_v44, %v2566_v16  ;;  %v1272_v49 = vadd.f32 %v1271_v45, %v2569_v17  ;;  %v1200_v50 = vpop.f32.mrb[26].mxu0  ;;  %v1273_v51 = vpop.f32.mrb[26].mxu1 }
 0x319   : > { %v1380_v52 = vmax.f32 %v1378_v38, %v1379_v42  ;;  %v1406_v53 = vmax.f32 %v1404_v23, %v1405_v43  ;;  %v1312_v54 = vmax.f32 %v1197_v25, 0.0  ;;  %v1314_v56 = vmax.f32 %v1270_v26, 0.0  ;;  %v1202_v57 = vpop.f32.mrb[27].mxu0  ;;  %v1275_v58 = vpop.f32.mrb[27].mxu1 }
 0x31a   : > { %v1393_v59 = vmax.f32 %v1391_v39, %v1392_v46  ;;  %v1419_v60 = vmax.f32 %v1417_v55, %v1418_v47  ;;  %v1313_v61 = vmax.f32 %v1199_v48, 0.0  ;;  %v1315_v62 = vmax.f32 %v1272_v49, 0.0 }
 0x31b   : > { %v1381_v63 = vrot.slane %v1380_v52, 2  ;;  %v1407_v0 = vrot.slane %v1406_v53, 2  ;;  %v1201_v1 = vadd.f32 %v1200_v50, %v2558_v8  ;;  %v1274_v2 = vadd.f32 %v1273_v51, %v2561_v9 }
 0x31c   : > { %v1394_v3 = vrot.slane %v1393_v59, 2  ;;  %v1420_v4 = vrot.slane %v1419_v60, 2  ;;  %v1203_v5 = vadd.f32 %v1202_v57, %v2566_v16  ;;  %v1276_v6 = vadd.f32 %v1275_v58, %v2569_v17 }
 0x31d   : > { %v1382_v7 = vmax.f32 %v1380_v52, %v1381_v63  ;;  %v1408_v10 = vmax.f32 %v1406_v53, %v1407_v0  ;;  %v1320_v11 = vmax.f32 %v1201_v1, 0.0  ;;  %v1322_v14 = vmax.f32 %v1274_v2, 0.0 }
 0x31e   : > { %v1395_v15 = vmax.f32 %v1393_v59, %v1394_v3  ;;  %v1421_v18 = vmax.f32 %v1419_v60, %v1420_v4  ;;  %v1321_v13 = vmax.f32 %v1203_v5, 0.0  ;;  %v1323_v12 = vmax.f32 %v1276_v6, 0.0  ;;  %v1206_v20 = vpop.f32.mrb[28].mxu0  ;;  %v1279_v22 = vpop.f32.mrb[28].mxu1 }
 0x31f   : > { %v1383_v24 = vrot.slane %v1382_v7, 1  ;;  %v1409_v27 = vrot.slane %v1408_v10, 1  ;;  %v1424_v28 = vmax.f32 %v1312_v54, %v1320_v11  ;;  %v1450_v29 = vmax.f32 %v1314_v56, %v1322_v14  ;;  %v1208_v30 = vpop.f32.mrb[29].mxu0  ;;  %v1281_v31 = vpop.f32.mrb[29].mxu1 }
 0x320   : > { %v1396_v32 = vrot.slane %v1395_v15, 1  ;;  %v1422_v33 = vrot.slane %v1421_v18, 1  ;;  %v1437_v34 = vmax.f32 %v1313_v61, %v1321_v13  ;;  %v1463_v21 = vmax.f32 %v1315_v62, %v1323_v12  ;;  %v1210_v35 = vpop.f32.mrb[30].mxu0  ;;  %v1283_v36 = vpop.f32.mrb[30].mxu1 }
 0x321   : > { %v2583_v37 = vmax.f32 %v1382_v7, %v1383_v24  ;;  %v2585_v38 = vmax.f32 %v1408_v10, %v1409_v27  ;;  %v1207_v23 = vadd.f32 %v1206_v20, %v2558_v8  ;;  %v1280_v39 = vadd.f32 %v1279_v22, %v2561_v9  ;;  %v1212_v55 = vpop.f32.mrb[31].mxu0  ;;  %v1285_v40 = vpop.f32.mrb[31].mxu1 }
 0x322   : > { %v2589_v41 = vmax.f32 %v1395_v15, %v1396_v32  ;;  %v2591_v42 = vmax.f32 %v1421_v18, %v1422_v33  ;;  %v1209_v43 = vadd.f32 %v1208_v30, %v2566_v16  ;;  %v1282_v25 = vadd.f32 %v1281_v31, %v2569_v17 }
 0x323   : > { %v1328_v26 = vmax.f32 %v1207_v23, 0.0  ;;  %v1330_v44 = vmax.f32 %v1280_v39, 0.0  ;;  %v1211_v45 = vadd.f32 %v1210_v35, %v2558_v8  ;;  %v1284_v46 = vadd.f32 %v1283_v36, %v2561_v9 }
 0x324   : > { %v1329_v47 = vmax.f32 %v1209_v43, 0.0  ;;  %v1331_v48 = vmax.f32 %v1282_v25, 0.0  ;;  %v1213_v49 = vadd.f32 %v1212_v55, %v2566_v16  ;;  %v1286_v50 = vadd.f32 %v1285_v40, %v2569_v17 }
 0x325   : > { %v1425_v51 = vmax.f32 %v1424_v28, %v1328_v26  ;;  %v1451_v52 = vmax.f32 %v1450_v29, %v1330_v44  ;;  %v1336_v53 = vmax.f32 %v1211_v45, 0.0  ;;  %v1338_v54 = vmax.f32 %v1284_v46, 0.0 }
 0x326   : > { %v1438_v56 = vmax.f32 %v1437_v34, %v1329_v47  ;;  %v1464_v57 = vmax.f32 %v1463_v21, %v1331_v48  ;;  %v1337_v58 = vmax.f32 %v1213_v49, 0.0  ;;  %v1339_v59 = vmax.f32 %v1286_v50, 0.0  ;;  %v1216_v60 = vpop.f32.mrb[32].mxu0  ;;  %v1289_v61 = vpop.f32.mrb[32].mxu1 }
 0x327   : > { %v1426_v62 = vmax.f32 %v1425_v51, %v1336_v53  ;;  %v1452_v63 = vmax.f32 %v1451_v52, %v1338_v54  ;;  %v1217_v0 = vadd.f32 %v1216_v60, %v2558_v8  ;;  %v1290_v1 = vadd.f32 %v1289_v61, %v2561_v9  ;;  %v1218_v2 = vpop.f32.mrb[33].mxu0  ;;  %v1291_v3 = vpop.f32.mrb[33].mxu1 }
 0x328   : > { %v1439_v4 = vmax.f32 %v1438_v56, %v1337_v58  ;;  %v1465_v5 = vmax.f32 %v1464_v57, %v1339_v59  ;;  %v1219_v6 = vadd.f32 %v1218_v2, %v2566_v16  ;;  %v1292_v7 = vadd.f32 %v1291_v3, %v2569_v17  ;;  %v1220_v10 = vpop.f32.mrb[34].mxu0  ;;  %v1293_v11 = vpop.f32.mrb[34].mxu1 }
 0x329   : > { %v1344_v14 = vmax.f32 %v1217_v0, 0.0  ;;  %v1346_v15 = vmax.f32 %v1290_v1, 0.0  ;;  %v1221_v18 = vadd.f32 %v1220_v10, %v2558_v8  ;;  %v1294_v13 = vadd.f32 %v1293_v11, %v2561_v9  ;;  %v1222_v12 = vpop.f32.mrb[35].mxu0  ;;  %v1295_v20 = vpop.f32.mrb[35].mxu1 }
 0x32a   : > { %v1345_v22 = vmax.f32 %v1219_v6, 0.0  ;;  %v1347_v24 = vmax.f32 %v1292_v7, 0.0  ;;  %v1223_v27 = vadd.f32 %v1222_v12, %v2566_v16  ;;  %v1296_v28 = vadd.f32 %v1295_v20, %v2569_v17 }
 0x32b   : > { %v1427_v29 = vmax.f32 %v1426_v62, %v1344_v14  ;;  %v1453_v30 = vmax.f32 %v1452_v63, %v1346_v15  ;;  %v1352_v31 = vmax.f32 %v1221_v18, 0.0  ;;  %v1354_v32 = vmax.f32 %v1294_v13, 0.0 }
 0x32c   : > { %v1440_v33 = vmax.f32 %v1439_v4, %v1345_v22  ;;  %v1466_v34 = vmax.f32 %v1465_v5, %v1347_v24  ;;  %v1353_v21 = vmax.f32 %v1223_v27, 0.0  ;;  %v1355_v35 = vmax.f32 %v1296_v28, 0.0 }
 0x32d   : > { %v1428_v36 = vmax.f32 %v1427_v29, %v1352_v31  ;;  %v1454_v23 = vmax.f32 %v1453_v30, %v1354_v32 }
 0x32e   : > { %v1441_v39 = vmax.f32 %v1440_v33, %v1353_v21  ;;  %v1467_v55 = vmax.f32 %v1466_v34, %v1355_v35  ;;  %v1226_v40 = vpop.f32.mrb[36].mxu0  ;;  %v1299_v43 = vpop.f32.mrb[36].mxu1 }
 0x32f   : > { %v1227_v25 = vadd.f32 %v1226_v40, %v2558_v8  ;;  %v1300_v26 = vadd.f32 %v1299_v43, %v2561_v9  ;;  %v1228_v44 = vpop.f32.mrb[37].mxu0  ;;  %v1301_v45 = vpop.f32.mrb[37].mxu1  ;;  %v1489_v40 = vcombine.low (!%p1799_p9), %v2585_v38, %v2591_v42 }
 0x330   : > { %v1229_v46 = vadd.f32 %v1228_v44, %v2566_v16  ;;  %v1302_v47 = vadd.f32 %v1301_v45, %v2569_v17  ;;  %v1230_v48 = vpop.f32.mrb[38].mxu0  ;;  %v1303_v49 = vpop.f32.mrb[38].mxu1 }
 0x331   : > { %v1360_v50 = vmax.f32 %v1227_v25, 0.0  ;;  %v1362_v51 = vmax.f32 %v1300_v26, 0.0  ;;  %v1231_v52 = vadd.f32 %v1230_v48, %v2558_v8  ;;  %v1304_v53 = vadd.f32 %v1303_v49, %v2561_v9  ;;  %v1232_v54 = vpop.f32.mrb[39].mxu0  ;;  %v1305_v56 = vpop.f32.mrb[39].mxu1 }
 0x332   : > { %v1361_v57 = vmax.f32 %v1229_v46, 0.0  ;;  %v1363_v58 = vmax.f32 %v1302_v47, 0.0  ;;  %v1233_v59 = vadd.f32 %v1232_v54, %v2566_v16  ;;  %v1306_v60 = vadd.f32 %v1305_v56, %v2569_v17 }
 0x333   : > { %v1429_v61 = vmax.f32 %v1428_v36, %v1360_v50  ;;  %v1455_v62 = vmax.f32 %v1454_v23, %v1362_v51  ;;  %v1368_v63 = vmax.f32 %v1231_v52, 0.0  ;;  %v1370_v0 = vmax.f32 %v1304_v53, 0.0 }
 0x334   : > { %v1442_v1 = vmax.f32 %v1441_v39, %v1361_v57  ;;  %v1468_v2 = vmax.f32 %v1467_v55, %v1363_v58  ;;  %v1369_v3 = vmax.f32 %v1233_v59, 0.0  ;;  %v1371_v4 = vmax.f32 %v1306_v60, 0.0 }
 0x335   : > { %v1430_v5 = vmax.f32 %v1429_v61, %v1368_v63  ;;  %v1456_v8 = vmax.f32 %v1455_v62, %v1370_v0  ;;  %v2058_v23 = vmov (!%p1799_p9), 1966171168   ;;  %v1488_v55 = vcombine.low (!%p1799_p9), %v2583_v37, %v2589_v41 }
 0x336   : > { %v1443_v6 = vmax.f32 %v1442_v1, %v1369_v3  ;;  %v1469_v9 = vmax.f32 %v1468_v2, %v1371_v4  ;;  %v1493_v39 = vunpack.c.l.s4 (!%p1799_p9), %v2058_v23 }
 0x337   : > { %v1431_v7 = vrot.slane %v1430_v5, 4  ;;  %v1457_v10 = vrot.slane %v1456_v8, 4 }
 0x338   : > { %v1444_v11 = vrot.slane %v1443_v6, 4  ;;  %v1470_v14 = vrot.slane %v1469_v9, 4  ;;  %v1494_v26 = vunpack.c.0.s8 (!%p1799_p9), %v1493_v39 }
 0x339   : > { %v1432_v15 = vmax.f32 %v1430_v5, %v1431_v7  ;;  %v1458_v16 = vmax.f32 %v1456_v8, %v1457_v10 }
 0x33a   : > { %v1445_v18 = vmax.f32 %v1443_v6, %v1444_v11  ;;  %v1471_v17 = vmax.f32 %v1469_v9, %v1470_v14  ;;  %v1497_v44 = vsub.s32 (!%p1799_p9), %v1494_v26, %v2507_v19 }
 0x33b   : > { %v1433_v13 = vrot.slane %v1432_v15, 2  ;;  %v1459_v12 = vrot.slane %v1458_v16, 2 }
 0x33c   : > { %v1446_v20 = vrot.slane %v1445_v18, 2  ;;  %v1472_v22 = vrot.slane %v1471_v17, 2  ;;  %1479 = sbr.rel (%p1799_p9) target bundleno = 847 (0x34f), region = 64  ;;  %v1498_v45 = vrot.slane (!%p1799_p9), %v1488_v55, %v1497_v44  ;;  %v1505_v46 = vrot.slane (!%p1799_p9), %v1489_v40, %v1497_v44 }
 0x33d   : > { %v1434_v24 = vmax.f32 %v1432_v15, %v1433_v13  ;;  %v1460_v27 = vmax.f32 %v1458_v16, %v1459_v12 }
 0x33e   : > { %v1447_v28 = vmax.f32 %v1445_v18, %v1446_v20  ;;  %v1473_v29 = vmax.f32 %v1471_v17, %v1472_v22  ;;  %v1520_v49 = vcombine.low (!%p1799_p9), %v1498_v45, %v1505_v46 }
 0x33f   : > { %v1435_v30 = vrot.slane %v1434_v24, 1  ;;  %v1461_v31 = vrot.slane %v1460_v27, 1 }
 0x340   : > { %v1448_v32 = vrot.slane %v1447_v28, 1  ;;  %v1474_v33 = vrot.slane %v1473_v29, 1  ;;  %v1528_v51 = vrot.slane (!%p1799_p9), %v1520_v49, %v1497_v44 }
 0x341   : > { %v1436_v34 = vmax.f32 %v1434_v24, %v1435_v30  ;;  %v1462_v21 = vmax.f32 %v1460_v27, %v1461_v31 }
 0x342   : > { %v1449_v35 = vmax.f32 %v1447_v28, %v1448_v32  ;;  %v1475_v36 = vmax.f32 %v1473_v29, %v1474_v33 }
 0x344   : > { %v1490_v43 = vcombine.low %v1436_v34, %v1449_v35  ;;  %v1491_v25 = vcombine.low %v1462_v21, %v1475_v36 }
 0x346   : > { %v1512_v47 = vrot.slane %v1490_v43, %v1497_v44  ;;  %v1519_v48 = vrot.slane %v1491_v25, %v1497_v44 }
 0x348   : > { %v1521_v50 = vcombine.low %v1512_v47, %v1519_v48 }
 0x34a   : > { %v1535_v52 = vrot.slane %v1521_v50, %v1497_v44 }
 0x34c   : > { %v1536_v53 = vcombine.low %v1528_v51, %v1535_v52 }
 0x34e   : > { %1538 = vst [vmem:[%s2236_s9] sm:$0xff] %v1536_v53 }
 0x34f PF: > { %p1800_p10 = scmp.eq.s32.totalorder %s2035_s24, 0 }
 0x350   : > { %v2059_v54 = vmov (!%p1800_p10), 1966171168   ;;  %v1552_v57 = vcombine.low (!%p1800_p10), %v2583_v37, %v2589_v41  ;;  %v1553_v58 = vcombine.low (!%p1800_p10), %v2585_v38, %v2591_v42  ;;  %v1554_v59 = vcombine.low (!%p1800_p10), %v1436_v34, %v1449_v35 }
 0x351   : > { %1542 = sbr.rel (%p1800_p10) target bundleno = 866 (0x362), region = 68  ;;  %v1557_v56 = vunpack.c.l.s4 (!%p1800_p10), %v2059_v54  ;;  %v1555_v60 = vcombine.low (!%p1800_p10), %v1462_v21, %v1475_v36 }
 0x353   : > { %v1558_v61 = vunpack.c.0.s8 (!%p1800_p10), %v1557_v56 }
 0x355   : > { %v1561_v62 = vsub.s32 (!%p1800_p10), %v1558_v61, %v2507_v19  ;;  %v1543_v6 = vld [vmem:[%s2236_s9] sm:$0xff] (!%p1800_p10) }
 0x357   : > { %v1562_v63 = vrot.slane (!%p1800_p10), %v1552_v57, %v1561_v62  ;;  %v1569_v0 = vrot.slane (!%p1800_p10), %v1553_v58, %v1561_v62  ;;  %v1576_v1 = vrot.slane (!%p1800_p10), %v1554_v59, %v1561_v62  ;;  %v1583_v2 = vrot.slane (!%p1800_p10), %v1555_v60, %v1561_v62 }
 0x359   : > { %v1584_v3 = vcombine.low %v1562_v63, %v1569_v0  ;;  %v1585_v4 = vcombine.low %v1576_v1, %v1583_v2 }
 0x35b   : > { %v1592_v5 = vrot.slane %v1584_v3, %v1561_v62  ;;  %v1599_v8 = vrot.slane %v1585_v4, %v1561_v62 }
 0x35d   : > { %v1600_v9 = vcombine.low %v1592_v5, %v1599_v8 }
 0x35f   : > { %v1602_v37 = vmax.f32 %v1543_v6, %v1600_v9 }
 0x361   : > { %1603 = vst [vmem:[%s2236_s9] sm:$0xff] %v1602_v37 }
 0x362 PF: > { %s19_s28 = sadd.s32 1, %s2051_s28   ;;  %s2666_s24 = smov %s2043_s26 }
 0x363   : > { %p16_p11 = scmp.ge.s32.totalorder %s19_s28, 6   ;;  %s2667_s25 = smov %s2047_s27 }
 0x364   : > { %s2668_s26 = smov %s2671_s12  ;;  %s2669_s27 = smov %s2675_s14 }
 0x365   :  { %18 = sbr.rel (!%p16_p11) target bundleno = 4 (0x4), region = 99 }
 0x36c   :  { %1623 = vsyncpa [#allocation3], 1 }
 0x36d   :  { %1625 = vsyncpa [#allocation3 + $0x1], 1 }
 0x36e   :  { %1626 = vsyncpa [#allocation5], 1 }

// kernel: pointnet_forward.8
= control target key start
LH: loop header
LB: loop body
LE: loop exit
PB: predicated region body
PF: predicated region fallthrough
CT: control target
= control target key end

     0   :  { %s2157_s30 = smov 0   ;;  %s2159_s10 = smov 0   ;;  %s2630_s0 = inlined_call_operand.vmem [shape: f32[2,128,3], index: 0, kind: input, shape index: {}]   ;;  %s2631_s1 = inlined_call_operand.vmem [shape: bf16[2,3,64], index: 1, kind: input, shape index: {}]   ;;  %s2632_s2 = inlined_call_operand.vmem [shape: f32[1,64], index: 2, kind: input, shape index: {}]   ;;  %s2633_s3 = inlined_call_operand.vmem [shape: bf16[64,64], index: 3, kind: input, shape index: {}]   ;;  %s2634_s4 = inlined_call_operand.vmem [shape: f32[1,64], index: 4, kind: input, shape index: {}]   ;;  %s2635_s5 = inlined_call_operand.vmem [shape: bf16[64,128], index: 5, kind: input, shape index: {}]   ;;  %s2636_s6 = inlined_call_operand.vmem [shape: f32[1,128], index: 6, kind: input, shape index: {}]   ;;  %s2637_s7 = inlined_call_operand.vmem [shape: bf16[128,1024], index: 7, kind: input, shape index: {}]   ;;  %s2638_s8 = inlined_call_operand.vmem [shape: f32[1,1024], index: 8, kind: input, shape index: {}]   ;;  %s2639_s9 = inlined_call_operand.vmem [shape: f32[2,1,1024], index: 9, kind: output, shape index: {}]  }
   0x1   :  { %s2161_s11 = smov 0   ;;  %s2163_s12 = smov 0  }
   0x2   :  { %s2165_s13 = smov 0  }
   0x3 LB: > { %s28_s14 = sadd.s32 1, %s2093_s11  ;;  %s31_s15 = sadd.s32 1, %s2097_s12  ;;  %s2101_s13 = sphi %s2165_s13, %s19_s13   ;;  %s2097_s12 = sphi %s2163_s12, %s2645_s12   ;;  %s2093_s11 = sphi %s2161_s11, %s2644_s11   ;;  %s2089_s10 = sphi %s2159_s10, %s2643_s10   ;;  %s2085_s30 = sphi %s2157_s30, %s2642_s30  }
   0x4   : > { %p29_p0 = scmp.ge.s32.totalorder %s28_s14, 2  ;;  %p1851_p1 = scmp.ge.s32.totalorder %s2101_s13, 1 }
   0x5   : > { %p315_p2 = scmp.lt.s32.totalorder %s2101_s13, 5 }
   0x6   : > { %s2647_s14 = smov (%p29_p0, %s28_s14), 0  ;;  %s2649_s15 = smov (!%p29_p0, %s31_s15), %s2097_s12 }
   0x7   : > { %p316_p3 = pnand %p1851_p1, %p315_p2  ;;  %p33_p4 = scmp.ge.s32.totalorder %s2649_s15, 2 }
   0x8   : > { %s1852_s16 = sshll.u32 (!%p316_p3), %s2085_s30, 3  ;;  %p359_p5 = scmp.lt.s32.totalorder (!%p316_p3), %s2089_s10, 1  ;;  %vm410_vm0 = vcmask (!%p316_p3), 1040384   ;;  %vm411_vm1 = vcmask (!%p316_p3), 1041408   ;;  %v2103_v0 = vmov (!%p316_p3), 65535   ;;  %v2055_v2 = vld [vmem:[%s2633_s3] sm:$0xff] (!%p316_p3)  }
   0x9   : > { %s2651_s15 = smov (%p33_p4, %s2649_s15), 0  ;;  %319 = sbr.rel (%p316_p3) target bundleno = 1010 (0x3f2), region = 56 }
   0xa   : > { %2640 = sst [smem:[#allocation2_spill]] %s2651_s15  ;;  %p361_p6 = scmp.lt.s32.totalorder (!%p316_p3), %s1852_s16, 15  ;;  %v412_v1 = vsel (!%p316_p3), %vm410_vm0, 4294967295, %v2103_v0  ;;  %v2056_v3 = vld [vmem:[%s2633_s3 + $0x8] sm:$0xff] (!%p316_p3)   ;;  %1979 = vmatprep.subr.bf16.mxu1 (!%p316_p3), %v2055_v2  ;;  %vm397_vm2 = vcmask (!%p316_p3), 23552   ;;  %v2057_v19 = vld [vmem:[%s2633_s3 + $0x10] sm:$0xff] (!%p316_p3)  }
   0xb   : > { %v413_v4 = vsel (!%p316_p3), %vm411_vm1, %v412_v1, 0  ;;  %1980 = vmatpush3.bf16.msra.mxu1 (!%p316_p3), %v2055_v2  ;;  %v2058_v20 = vld [vmem:[%s2633_s3 + $0x18] sm:$0xff] (!%p316_p3)   ;;  %v2059_v21 = vld [vmem:[%s2635_s5] sm:$0xff] (!%p316_p3)   ;;  %v2060_v22 = vld [vmem:[%s2635_s5 + $0x8] sm:$0xff] (!%p316_p3)   ;;  %vm533_vm3 = vcmask (!%p316_p3), 523264   ;;  %p1944_p7 = scmp.ne.s32.totalorder (!%p316_p3), %s2085_s30, 0 }
   0xc   : > { %1981 = vmatprep.subr.bf16.mxu1 (!%p316_p3), %v2056_v3  ;;  %v1857_v23 = vld [vmem:[%s2632_s2] ss:$0 sm:$0xff] (!%p316_p3)  ;;  %v2061_v52 = vld [vmem:[%s2635_s5 + $0x10] sm:$0xff] (!%p316_p3)   ;;  %v2062_v53 = vld [vmem:[%s2635_s5 + $0x18] sm:$0xff] (!%p316_p3)  }
   0xd   : > { %v747_v54 = vld [vmem:[%s2637_s7] sm:$0xff] (!%p316_p3)  ;;  %v2245_v56 = vld [vmem:[%s2637_s7 + $0x8] sm:$0xff] (!%p316_p3) }
   0xe   : > { %v751_v55 = vld [vmem:[%s2637_s7 + $0x20] sm:$0xff] (!%p316_p3)  ;;  %v2250_v59 = vld [vmem:[%s2637_s7 + $0x28] sm:$0xff] (!%p316_p3) }
   0xf   : > { %1982 = vmatpush3.bf16.msra.mxu1 (!%p316_p3), %v2056_v3  ;;  %v1880_v57 = vcombine.low (!%p316_p3), %v747_v54, %v751_v55  ;;  %v1881_v58 = vcombine.high (!%p316_p3), %v747_v54, %v751_v55  ;;  %v755_v60 = vld [vmem:[%s2637_s7 + $0x40] sm:$0xff] (!%p316_p3)  ;;  %v1882_v62 = vcombine.low (!%p316_p3), %v2245_v56, %v2250_v59  ;;  %v1883_v63 = vcombine.high (!%p316_p3), %v2245_v56, %v2250_v59  ;;  %v784_v59 = vld [vmem:[%s2637_s7 + $0x128] sm:$0xff] (!%p316_p3) }
  0x10   : > { %s2653_s10 = smov (!%p359_p5, %s2089_s10), 1  ;;  %s2655_s16 = smov (!%p361_p6, %s1852_s16), 15  ;;  %1983 = vmatprep.subr.bf16.mxu1 %v2057_v19  ;;  %v759_v61 = vld [vmem:[%s2637_s7 + $0x60] sm:$0xff] }
  0x11   : > { %s1853_s21 = sshll.u32 %s2653_s10, 4  ;;  %s1855_s22 = sshll.u32 %s2653_s10, 1  ;;  %v1889_v0 = vcombine.high %v755_v60, %v759_v61  ;;  %v763_v1 = vld [vmem:[%s2637_s7 + $0x80] sm:$0xff]  ;;  %v1888_v3 = vcombine.low %v755_v60, %v759_v61 }
  0x12   : > { %s364_s23 = sadd.s32 %s1853_s21, %s2655_s16  ;;  %s371_s26 = scalar_lea.vmem %s2631_s1, %s1855_s22  ;;  %v767_v2 = vld [vmem:[%s2637_s7 + $0xa0] sm:$0xff] }
  0x13   : > { %s1854_s27 = sshll.u32 %s364_s23, 3  ;;  %s1856_s28 = sshll.u32 %s2653_s10, 3  ;;  %v385_v5 = vld [vmem:[%s371_s26] sm:$0x3]  ;;  %1984 = vmatpush3.bf16.msra.mxu1 %v2057_v19 }
  0x14   : > { %s366_s18 = scalar_lea.vmem %s2630_s0, %s1854_s27  ;;  %s2205_s15 = scalar_lea.vmem %s2639_s9, %s1856_s28  ;;  %v415_v6 = vand.u32 %v413_v4, %v385_v5  ;;  %1985 = vmatprep.subr.bf16.mxu1 %v2058_v20  ;;  %v1897_v4 = vcombine.high %v763_v1, %v767_v2  ;;  %v771_v5 = vld [vmem:[%s2637_s7 + $0xc0] sm:$0xff] }
  0x15   : > { %v377_v7 = vld [vmem:[%s366_s18] sm:$0xff]  ;;  %v378_v8 = vld [vmem:[%s366_s18 + $0x8] sm:$0xff]  ;;  %v379_v9 = vld [vmem:[%s366_s18 + $0x10] sm:$0xff] }
  0x16   : > { %1969 = vmatprep.subr.bf16.mxu0 %v415_v6  ;;  %v387_v10 = vpack.c.bf16 %v378_v8, %v377_v7  ;;  %v380_v11 = vld [vmem:[%s366_s18 + $0x18] sm:$0xff]  ;;  %v381_v12 = vld [vmem:[%s366_s18 + $0x20] sm:$0xff]  ;;  %v382_v13 = vld [vmem:[%s366_s18 + $0x28] sm:$0xff]  ;;  %v1896_v7 = vcombine.low %v763_v1, %v767_v2 }
  0x17   : > { %1970 = vmatpush3.bf16.msra.mxu0 %v415_v6  ;;  %v388_v14 = vpack.c.bf16 %v380_v11, %v379_v9  ;;  %v389_v15 = vpack.c.bf16 %v382_v13, %v381_v12  ;;  %v383_v16 = vld [vmem:[%s366_s18 + $0x30] sm:$0xff]  ;;  %v384_v17 = vld [vmem:[%s366_s18 + $0x38] sm:$0xff]  ;;  %1986 = vmatpush3.bf16.msra.mxu1 %v2058_v20  ;;  %v775_v6 = vld [vmem:[%s2637_s7 + $0xe0] sm:$0xff] }
  0x18   : > { %1971 = vmatprep.mubr.msk.bf16.mxu0 %vm397_vm2, %v387_v10  ;;  %v390_v18 = vpack.c.bf16 %v384_v17, %v383_v16  ;;  %1995 = vmatprep.subr.bf16.mxu0 %v2059_v21  ;;  %v1905_v8 = vcombine.high %v771_v5, %v775_v6  ;;  %v779_v9 = vld [vmem:[%s2637_s7 + $0x100] sm:$0xff]  ;;  %v1904_v11 = vcombine.low %v771_v5, %v775_v6  ;;  %v796_v5 = vld [vmem:[%s2637_s7 + $0x188] sm:$0xff] }
  0x19   : > { %1177 = vmatprep.subr.bf16.mxu1 %v1881_v58  ;;  %v783_v10 = vld [vmem:[%s2637_s7 + $0x120] sm:$0xff]  ;;  %v780_v58 = vld [vmem:[%s2637_s7 + $0x108] sm:$0xff] }
  0x1a   : > { %1972 = vmatmul.mubr.msk.bf16.vlgmr.msra.gmra.mrb[0].mxu0 %vm397_vm2, %v388_v14  ;;  %v1913_v12 = vcombine.high %v779_v9, %v783_v10  ;;  %v787_v13 = vld [vmem:[%s2637_s7 + $0x140] sm:$0xff]  ;;  %v1915_v61 = vcombine.high %v780_v58, %v784_v59 }
  0x1b   : > { %1975 = vmatprep.mubr.msk.bf16.mxu0 %vm397_vm2, %v389_v15  ;;  %1996 = vmatpush3.bf16.msra.mxu0 %v2059_v21  ;;  %v791_v14 = vld [vmem:[%s2637_s7 + $0x160] sm:$0xff]  ;;  %v1912_v15 = vcombine.low %v779_v9, %v783_v10 }
  0x1c   : > { %1997 = vmatprep.subr.bf16.mxu0 %v2060_v22  ;;  %v1921_v16 = vcombine.high %v787_v13, %v791_v14  ;;  %v1920_v17 = vcombine.low %v787_v13, %v791_v14  ;;  %v804_v13 = vld [vmem:[%s2637_s7 + $0x1c8] sm:$0xff] }
  0x1f   : > { %1998 = vmatpush3.bf16.msra.mxu0 %v2060_v22 }
  0x20   : > { %1999 = vmatprep.subr.bf16.mxu0 %v2061_v52 }
  0x22   : > { %1976 = vmatmul.mubr.msk.bf16.gmra.mrb[4].mxu0 %vm397_vm2, %v390_v18  ;;  %v1862_v18 = vld [vmem:[%s2634_s4] ss:$0 sm:$0xff] }
  0x23   : > { %2000 = vmatpush3.bf16.msra.mxu0 %v2061_v52  ;;  %v772_v52 = vld [vmem:[%s2637_s7 + $0xc8] sm:$0xff] }
  0x24   : > { %2001 = vmatprep.subr.bf16.mxu0 %v2062_v53 }
  0x27   : > { %2002 = vmatpush3.bf16.msra.mxu0 %v2062_v53  ;;  %v776_v53 = vld [vmem:[%s2637_s7 + $0xe8] sm:$0xff] }
  0x28   : > { %1250 = vmatprep.subr.bf16.mxu0 %v1883_v63  ;;  %v1907_v56 = vcombine.high %v772_v52, %v776_v53  ;;  %v1906_v60 = vcombine.low %v772_v52, %v776_v53  ;;  %v792_v63 = vld [vmem:[%s2637_s7 + $0x168] sm:$0xff]  ;;  %v769_v53 = vld [vmem:[%s2637_s7 + $0xb0] sm:$0xff] }
  0xed   : > { %v1973_v24 = vpop.f32.mrb[0].mxu0 }
  0xee   : > { %v460_v25 = vadd.f32 %v1973_v24, %v1857_v23  ;;  %v451_v26 = vpop.f32.mrb[1].mxu0 }
  0xef   : > { %v452_v27 = vadd.f32 %v1857_v23, %v451_v26  ;;  %v1974_v28 = vpop.f32.mrb[2].mxu0 }
  0xf0   : > { %v463_v29 = vadd.f32 %v1974_v28, %v1857_v23  ;;  %v454_v30 = vpop.f32.mrb[3].mxu0  ;;  %v484_v32 = vmax.f32 %v460_v25, 0.0 }
  0xf1   : > { %v455_v31 = vadd.f32 %v1857_v23, %v454_v30  ;;  %v482_v34 = vmax.f32 %v452_v27, 0.0 }
  0xf2   : > { %v485_v33 = vmax.f32 %v463_v29, 0.0 }
  0xf3   : > { %v483_v35 = vmax.f32 %v455_v31, 0.0  ;;  %v756_v31 = vld [vmem:[%s2637_s7 + $0x48] sm:$0xff] }
  0xf4   : > { %v500_v36 = vpack.c.bf16 %v485_v33, %v484_v32  ;;  %v760_v32 = vld [vmem:[%s2637_s7 + $0x68] sm:$0xff] }
  0xf5   : > { %v1977_v37 = vpop.f32.mrb[4].mxu0  ;;  %v499_v38 = vpack.c.bf16 %v483_v35, %v482_v34 }
  0xf6   : > { %v476_v39 = vadd.f32 %v1977_v37, %v1857_v23  ;;  %v467_v40 = vpop.f32.mrb[5].mxu0 }
  0xf7   : > { %v468_v41 = vadd.f32 %v1857_v23, %v467_v40  ;;  %v1978_v42 = vpop.f32.mrb[6].mxu0  ;;  %1987 = vmatprep.mubr.msk.bf16.mxu1 %vm533_vm3, %v499_v38  ;;  %v1891_v38 = vcombine.high %v756_v31, %v760_v32 }
  0xf8   : > { %v488_v43 = vmax.f32 %v476_v39, 0.0  ;;  %v479_v44 = vadd.f32 %v1978_v42, %v1857_v23  ;;  %v470_v45 = vpop.f32.mrb[7].mxu0  ;;  %1988 = vmatmul.mubr.msk.bf16.vlgmr.msra.gmra.mrb[0].mxu1 %vm533_vm3, %v500_v36  ;;  %v768_v42 = vld [vmem:[%s2637_s7 + $0xa8] sm:$0xff] }
  0xf9   : > { %v486_v46 = vmax.f32 %v468_v41, 0.0  ;;  %v471_v47 = vadd.f32 %v1857_v23, %v470_v45  ;;  %1178 = vmatpush1.bf16.msra.mxu1 %v1880_v57  ;;  %v764_v41 = vld [vmem:[%s2637_s7 + $0x88] sm:$0xff] }
  0xfa   : > { %v489_v48 = vmax.f32 %v479_v44, 0.0  ;;  %1179 = vmatprep.subr.bf16.mxu1 %v1889_v0  ;;  %v1898_v57 = vcombine.low %v764_v41, %v768_v42  ;;  %v1914_v0 = vcombine.low %v780_v58, %v784_v59 }
  0xfb   : > { %v487_v49 = vmax.f32 %v471_v47, 0.0 }
  0xfc   : > { %v502_v50 = vpack.c.bf16 %v489_v48, %v488_v43  ;;  %v1890_v48 = vcombine.low %v756_v31, %v760_v32 }
  0xfd   : > { %v501_v51 = vpack.c.bf16 %v487_v49, %v486_v46  ;;  %1180 = vmatpush1.bf16.msra.mxu1 %v1888_v3  ;;  %v795_v3 = vld [vmem:[%s2637_s7 + $0x180] sm:$0xff] }
  0xfe   : > { %1181 = vmatprep.subr.bf16.mxu1 %v1897_v4  ;;  %v799_v4 = vld [vmem:[%s2637_s7 + $0x1a0] sm:$0xff] }
  0xff   : > { %1991 = vmatprep.mubr.msk.bf16.mxu1 %vm533_vm3, %v501_v51  ;;  %v1929_v6 = vcombine.high %v795_v3, %v799_v4 }
 0x100   : > { %1992 = vmatmul.mubr.msk.bf16.gmra.mrb[4].mxu1 %vm533_vm3, %v502_v50  ;;  %v1899_v50 = vcombine.high %v764_v41, %v768_v42  ;;  %v758_v41 = vld [vmem:[%s2637_s7 + $0x58] sm:$0xff] }
 0x101   : > { %1182 = vmatpush1.bf16.msra.mxu1 %v1896_v7  ;;  %v800_v7 = vld [vmem:[%s2637_s7 + $0x1a8] sm:$0xff]  ;;  %v762_v42 = vld [vmem:[%s2637_s7 + $0x78] sm:$0xff] }
 0x102   : > { %1183 = vmatprep.subr.bf16.mxu1 %v1905_v8  ;;  %v1928_v8 = vcombine.low %v795_v3, %v799_v4  ;;  %v1930_v9 = vcombine.low %v796_v5, %v800_v7  ;;  %v1931_v10 = vcombine.high %v796_v5, %v800_v7  ;;  %v777_v4 = vld [vmem:[%s2637_s7 + $0xf0] sm:$0xff]  ;;  %v774_v5 = vld [vmem:[%s2637_s7 + $0xd8] sm:$0xff] }
 0x105   : > { %1184 = vmatpush1.bf16.msra.mxu1 %v1904_v11  ;;  %v803_v11 = vld [vmem:[%s2637_s7 + $0x1c0] sm:$0xff] }
 0x106   : > { %1185 = vmatprep.subr.bf16.mxu1 %v1913_v12  ;;  %v807_v12 = vld [vmem:[%s2637_s7 + $0x1e0] sm:$0xff] }
 0x107   : > { %v1937_v14 = vcombine.high %v803_v11, %v807_v12 }
 0x109   : > { %1186 = vmatpush1.bf16.msra.mxu1 %v1912_v15  ;;  %v808_v15 = vld [vmem:[%s2637_s7 + $0x1e8] sm:$0xff] }
 0x10a   : > { %1187 = vmatprep.subr.bf16.mxu1 %v1921_v16  ;;  %v1936_v16 = vcombine.low %v803_v11, %v807_v12 }
 0x10d   : > { %1188 = vmatpush1.bf16.msra.mxu1 %v1920_v17  ;;  %v1938_v17 = vcombine.low %v804_v13, %v808_v15 }
 0x10e   : > { %1189 = vmatprep.subr.bf16.mxu1 %v1929_v6  ;;  %v778_v6 = vld [vmem:[%s2637_s7 + $0xf8] sm:$0xff] }
 0x111   : > { %1190 = vmatpush1.bf16.msra.mxu1 %v1928_v8 }
 0x112   : > { %1191 = vmatprep.subr.bf16.mxu1 %v1937_v14  ;;  %v1911_v14 = vcombine.high %v774_v5, %v778_v6 }
 0x115   : > { %1192 = vmatpush1.bf16.msra.mxu1 %v1936_v16  ;;  %v785_v16 = vld [vmem:[%s2637_s7 + $0x130] sm:$0xff] }
 0x1cb   : > { %v1989_v19 = vpop.f32.mrb[0].mxu1 }
 0x1cc   : > { %v589_v20 = vadd.f32 %v1989_v19, %v1862_v18  ;;  %v580_v21 = vpop.f32.mrb[1].mxu1  ;;  %v749_v19 = vld [vmem:[%s2637_s7 + $0x10] sm:$0xff] }
 0x1cd   : > { %v581_v22 = vadd.f32 %v1862_v18, %v580_v21  ;;  %v1990_v23 = vpop.f32.mrb[2].mxu1  ;;  %v750_v21 = vld [vmem:[%s2637_s7 + $0x18] sm:$0xff] }
 0x1ce   : > { %v592_v24 = vadd.f32 %v1990_v23, %v1862_v18  ;;  %v583_v25 = vpop.f32.mrb[3].mxu1  ;;  %v613_v27 = vmax.f32 %v589_v20, 0.0  ;;  %v753_v20 = vld [vmem:[%s2637_s7 + $0x30] sm:$0xff]  ;;  %v754_v23 = vld [vmem:[%s2637_s7 + $0x38] sm:$0xff] }
 0x1cf   : > { %v584_v26 = vadd.f32 %v1862_v18, %v583_v25  ;;  %v611_v29 = vmax.f32 %v581_v22, 0.0  ;;  %v1885_v22 = vcombine.high %v749_v19, %v753_v20  ;;  %v1884_v25 = vcombine.low %v749_v19, %v753_v20 }
 0x1d0   : > { %v614_v28 = vmax.f32 %v592_v24, 0.0  ;;  %v2104_v24 = vmov 0   ;;  %v1910_v20 = vcombine.low %v774_v5, %v778_v6 }
 0x1d1   : > { %v612_v30 = vmax.f32 %v584_v26, 0.0  ;;  %1209 = vmatprep.mubr.bf16.mxu1 %v2104_v24  ;;  %v1886_v26 = vcombine.low %v750_v21, %v754_v23  ;;  %1323 = vmatprep.subr.bf16.mxu1 %v1885_v22 }
 0x1d2   : > { %v629_v33 = vpack.c.bf16 %v614_v28, %v613_v27  ;;  %v1887_v27 = vcombine.high %v750_v21, %v754_v23  ;;  %v1871_v28 = vld [vmem:[%s2636_s6] ss:$0 sm:$0xff]  ;;  %v789_v23 = vld [vmem:[%s2637_s7 + $0x150] sm:$0xff] }
 0x1d3   : > { %v628_v34 = vpack.c.bf16 %v612_v30, %v611_v29  ;;  %v1993_v35 = vpop.f32.mrb[4].mxu1 }
 0x1d4   : > { %v605_v36 = vadd.f32 %v1993_v35, %v1862_v18  ;;  %v596_v37 = vpop.f32.mrb[5].mxu1 }
 0x1d5   : > { %v597_v39 = vadd.f32 %v1862_v18, %v596_v37  ;;  %v1994_v40 = vpop.f32.mrb[6].mxu1  ;;  %2003 = vmatprep.mubr.msk.bf16.mxu0 %vm533_vm3, %v628_v34  ;;  %v757_v37 = vld [vmem:[%s2637_s7 + $0x50] sm:$0xff] }
 0x1d6   : > { %v617_v43 = vmax.f32 %v605_v36, 0.0  ;;  %v608_v44 = vadd.f32 %v1994_v40, %v1862_v18  ;;  %v599_v45 = vpop.f32.mrb[7].mxu1  ;;  %2004 = vmatmul.mubr.msk.bf16.vlgmr.msra.gmra.mrb[8].mxu0 %vm533_vm3, %v629_v33  ;;  %v761_v40 = vld [vmem:[%s2637_s7 + $0x70] sm:$0xff] }
 0x1d7   : > { %v615_v46 = vmax.f32 %v597_v39, 0.0  ;;  %v600_v47 = vadd.f32 %v1862_v18, %v599_v45  ;;  %1251 = vmatpush1.bf16.msra.mxu0 %v1882_v62  ;;  %v788_v62 = vld [vmem:[%s2637_s7 + $0x148] sm:$0xff]  ;;  %v1939_v18 = vcombine.high %v804_v13, %v808_v15  ;;  %v781_v15 = vld [vmem:[%s2637_s7 + $0x110] sm:$0xff] }
 0x1d8   : > { %v618_v49 = vmax.f32 %v608_v44, 0.0  ;;  %1252 = vmatprep.subr.bf16.mxu0 %v1891_v38  ;;  %v1923_v1 = vcombine.high %v788_v62, %v792_v63  ;;  %v1922_v2 = vcombine.low %v788_v62, %v792_v63  ;;  %v1917_v21 = vcombine.high %v781_v15, %v785_v16 }
 0x1d9   : > { %v616_v51 = vmax.f32 %v600_v47, 0.0 }
 0x1da   : > { %v631_v54 = vpack.c.bf16 %v618_v49, %v617_v43  ;;  %v1895_v49 = vcombine.high %v758_v41, %v762_v42 }
 0x1db   : > { %v630_v55 = vpack.c.bf16 %v616_v51, %v615_v46  ;;  %1253 = vmatpush1.bf16.msra.mxu0 %v1890_v48  ;;  %v1893_v48 = vcombine.high %v757_v37, %v761_v40 }
 0x1dc   : > { %1254 = vmatprep.subr.bf16.mxu0 %v1899_v50  ;;  %v765_v50 = vld [vmem:[%s2637_s7 + $0x90] sm:$0xff] }
 0x1dd   : > { %2007 = vmatprep.mubr.msk.bf16.mxu0 %vm533_vm3, %v630_v55  ;;  %v770_v55 = vld [vmem:[%s2637_s7 + $0xb8] sm:$0xff]  ;;  %v1901_v63 = vcombine.high %v765_v50, %v769_v53 }
 0x1de   : > { %2008 = vmatmul.mubr.msk.bf16.gmra.mrb[12].mxu0 %vm533_vm3, %v631_v54  ;;  %v766_v54 = vld [vmem:[%s2637_s7 + $0x98] sm:$0xff] }
 0x1df   : > { %1255 = vmatpush1.bf16.msra.mxu0 %v1898_v57  ;;  %1282 = vmatprep.mubr.bf16.mxu0 %v2104_v24  ;;  %v1902_v11 = vcombine.low %v766_v54, %v770_v55 }
 0x1e0   : > { %1256 = vmatprep.subr.bf16.mxu0 %v1907_v56 }
 0x1e3   : > { %1257 = vmatpush1.bf16.msra.mxu0 %v1906_v60  ;;  %v1892_v60 = vcombine.low %v757_v37, %v761_v40  ;;  %v805_v40 = vld [vmem:[%s2637_s7 + $0x1d0] sm:$0xff] }
 0x1e4   : > { %1258 = vmatprep.subr.bf16.mxu0 %v1915_v61  ;;  %v1894_v61 = vcombine.low %v758_v41, %v762_v42  ;;  %v809_v41 = vld [vmem:[%s2637_s7 + $0x1f0] sm:$0xff]  ;;  %v806_v42 = vld [vmem:[%s2637_s7 + $0x1d8] sm:$0xff] }
 0x1e7   : > { %1259 = vmatpush1.bf16.msra.mxu0 %v1914_v0  ;;  %v1903_v0 = vcombine.high %v766_v54, %v770_v55  ;;  %v2496_v54 = vld [vmem:[%s2638_s8] sm:$0xff] }
 0x1e8   : > { %1260 = vmatprep.subr.bf16.mxu0 %v1923_v1  ;;  %v773_v1 = vld [vmem:[%s2637_s7 + $0xd0] sm:$0xff] }
 0x1e9   : > { %v1909_v13 = vcombine.high %v773_v1, %v777_v4  ;;  %v1908_v19 = vcombine.low %v773_v1, %v777_v4 }
 0x1eb   : > { %1261 = vmatpush1.bf16.msra.mxu0 %v1922_v2 }
 0x1ec   : > { %1262 = vmatprep.subr.bf16.mxu0 %v1931_v10  ;;  %v1900_v10 = vcombine.low %v765_v50, %v769_v53  ;;  %v1940_v50 = vcombine.low %v805_v40, %v809_v41 }
 0x1ef   : > { %1263 = vmatpush1.bf16.msra.mxu0 %v1930_v9 }
 0x1f0   : > { %1264 = vmatprep.subr.bf16.mxu0 %v1939_v18  ;;  %v786_v18 = vld [vmem:[%s2637_s7 + $0x138] sm:$0xff] }
 0x1f3   : > { %1265 = vmatpush1.bf16.msra.mxu0 %v1938_v17  ;;  %v782_v17 = vld [vmem:[%s2637_s7 + $0x118] sm:$0xff] }
 0x1f4   : > { %1396 = vmatprep.subr.bf16.mxu0 %v1887_v27  ;;  %v1919_v22 = vcombine.high %v782_v17, %v786_v18  ;;  %v794_v27 = vld [vmem:[%s2637_s7 + $0x178] sm:$0xff] }
 0x2a9   : > { %v2005_v29 = vpop.f32.mrb[8].mxu0 }
 0x2aa   : > { %v717_v30 = vadd.f32 %v2005_v29, %v1871_v28  ;;  %v708_v31 = vpop.f32.mrb[9].mxu0  ;;  %v1918_v29 = vcombine.low %v782_v17, %v786_v18 }
 0x2ab   : > { %v709_v32 = vadd.f32 %v1871_v28, %v708_v31  ;;  %v2006_v33 = vpop.f32.mrb[10].mxu0 }
 0x2ac   : > { %v720_v34 = vadd.f32 %v2006_v33, %v1871_v28  ;;  %v711_v35 = vpop.f32.mrb[11].mxu0  ;;  %v741_v38 = vmax.f32 %v717_v30, 0.0  ;;  %v801_v33 = vld [vmem:[%s2637_s7 + $0x1b0] sm:$0xff] }
 0x2ad   : > { %v712_v36 = vadd.f32 %v1871_v28, %v711_v35  ;;  %v739_v43 = vmax.f32 %v709_v32, 0.0  ;;  %v797_v32 = vld [vmem:[%s2637_s7 + $0x190] sm:$0xff]  ;;  %v802_v35 = vld [vmem:[%s2637_s7 + $0x1b8] sm:$0xff] }
 0x2ae   : > { %v742_v39 = vmax.f32 %v720_v34, 0.0  ;;  %v798_v34 = vld [vmem:[%s2637_s7 + $0x198] sm:$0xff] }
 0x2af   : > { %v740_v44 = vmax.f32 %v712_v36, 0.0 }
 0x2b0   : > { %v2379_v45 = vpack.c.bf16 %v742_v39, %v741_v38  ;;  %v1933_v38 = vcombine.high %v797_v32, %v801_v33  ;;  %v1935_v39 = vcombine.high %v798_v34, %v802_v35 }
 0x2b1   : > { %v2381_v46 = vpack.c.bf16 %v740_v44, %v739_v43  ;;  %v2009_v47 = vpop.f32.mrb[12].mxu0  ;;  %v810_v43 = vld [vmem:[%s2637_s7 + $0x1f8] sm:$0xff]  ;;  %v1932_v44 = vcombine.low %v797_v32, %v801_v33 }
 0x2b2   : > { %v733_v51 = vadd.f32 %v2009_v47, %v1871_v28  ;;  %v724_v52 = vpop.f32.mrb[13].mxu0  ;;  %v1934_v47 = vcombine.low %v798_v34, %v802_v35 }
 0x2b3   : > { %v725_v57 = vadd.f32 %v1871_v28, %v724_v52  ;;  %v2010_v56 = vpop.f32.mrb[14].mxu0  ;;  %1210 = vmatmul.mubr.bf16.vlgmr.msra.gmra.mrb[8].mxu1 %v2381_v46  ;;  %1283 = vmatmul.mubr.bf16.vlgmr.msra.gmra.mrb[16].mxu0 %v2381_v46 }
 0x2b4   : > { %v736_v58 = vadd.f32 %v2010_v56, %v1871_v28  ;;  %1324 = vmatpush1.bf16.msra.mxu1 %v1884_v25  ;;  %1397 = vmatpush1.bf16.msra.mxu0 %v1886_v26  ;;  %v727_v59 = vpop.f32.mrb[15].mxu0  ;;  %v745_v2 = vmax.f32 %v733_v51, 0.0  ;;  %v793_v25 = vld [vmem:[%s2637_s7 + $0x170] sm:$0xff]  ;;  %v790_v26 = vld [vmem:[%s2637_s7 + $0x158] sm:$0xff]  ;;  %v1942_v51 = vcombine.low %v806_v42, %v810_v43 }
 0x2b5   : > { %v728_v62 = vadd.f32 %v1871_v28, %v727_v59  ;;  %1325 = vmatprep.subr.bf16.mxu1 %v1893_v48  ;;  %1398 = vmatprep.subr.bf16.mxu0 %v1895_v49  ;;  %v743_v7 = vmax.f32 %v725_v57, 0.0  ;;  %v1916_v28 = vcombine.low %v781_v15, %v785_v16  ;;  %v1925_v30 = vcombine.high %v789_v23, %v793_v25 }
 0x2b6   : > { %v746_v3 = vmax.f32 %v736_v58, 0.0  ;;  %1219 = vmatprep.mubr.bf16.mxu1 %v2104_v24  ;;  %1292 = vmatprep.mubr.bf16.mxu0 %v2104_v24  ;;  %v1927_v31 = vcombine.high %v790_v26, %v794_v27  ;;  %v1924_v36 = vcombine.low %v789_v23, %v793_v25  ;;  %v1926_v37 = vcombine.low %v790_v26, %v794_v27 }
 0x2b7   : > { %v744_v8 = vmax.f32 %v728_v62, 0.0  ;;  %v1941_v48 = vcombine.high %v805_v40, %v809_v41  ;;  %v1943_v49 = vcombine.high %v806_v42, %v810_v43 }
 0x2b8   : > { %v2411_v9 = vpack.c.bf16 %v746_v3, %v745_v2  ;;  %1326 = vmatpush1.bf16.msra.mxu1 %v1892_v60  ;;  %1399 = vmatpush1.bf16.msra.mxu0 %v1894_v61 }
 0x2b9   : > { %v2413_v12 = vpack.c.bf16 %v744_v8, %v743_v7  ;;  %1327 = vmatprep.subr.bf16.mxu1 %v1901_v63  ;;  %1400 = vmatprep.subr.bf16.mxu0 %v1903_v0 }
 0x2bb   : > { %1220 = vmatmul.mubr.bf16.gmra.mrb[12].mxu1 %v2379_v45  ;;  %1293 = vmatmul.mubr.bf16.gmra.mrb[20].mxu0 %v2379_v45 }
 0x2bc   : > { %1328 = vmatpush1.bf16.msra.mxu1 %v1900_v10  ;;  %1401 = vmatpush1.bf16.msra.mxu0 %v1902_v11 }
 0x2bd   : > { %1329 = vmatprep.subr.bf16.mxu1 %v1909_v13  ;;  %1402 = vmatprep.subr.bf16.mxu0 %v1911_v14 }
 0x2be   : > { %1229 = vmatprep.mubr.bf16.mxu1 %v2104_v24  ;;  %1302 = vmatprep.mubr.bf16.mxu0 %v2104_v24 }
 0x2c0   : > { %1330 = vmatpush1.bf16.msra.mxu1 %v1908_v19  ;;  %1403 = vmatpush1.bf16.msra.mxu0 %v1910_v20 }
 0x2c1   : > { %1331 = vmatprep.subr.bf16.mxu1 %v1917_v21  ;;  %1404 = vmatprep.subr.bf16.mxu0 %v1919_v22 }
 0x2c3   : > { %1230 = vmatmul.mubr.bf16.gmra.mrb[16].mxu1 %v2413_v12  ;;  %1303 = vmatmul.mubr.bf16.gmra.mrb[24].mxu0 %v2413_v12 }
 0x2c4   : > { %1332 = vmatpush1.bf16.msra.mxu1 %v1916_v28  ;;  %1405 = vmatpush1.bf16.msra.mxu0 %v1918_v29 }
 0x2c5   : > { %1333 = vmatprep.subr.bf16.mxu1 %v1925_v30  ;;  %1406 = vmatprep.subr.bf16.mxu0 %v1927_v31 }
 0x2c6   : > { %1239 = vmatprep.mubr.bf16.mxu1 %v2104_v24  ;;  %1312 = vmatprep.mubr.bf16.mxu0 %v2104_v24 }
 0x2c8   : > { %1334 = vmatpush1.bf16.msra.mxu1 %v1924_v36  ;;  %1407 = vmatpush1.bf16.msra.mxu0 %v1926_v37 }
 0x2c9   : > { %1335 = vmatprep.subr.bf16.mxu1 %v1933_v38  ;;  %1408 = vmatprep.subr.bf16.mxu0 %v1935_v39 }
 0x2cb   : > { %1240 = vmatmul.mubr.bf16.gmra.mrb[20].mxu1 %v2411_v9  ;;  %1313 = vmatmul.mubr.bf16.gmra.mrb[28].mxu0 %v2411_v9 }
 0x2cc   : > { %1336 = vmatpush1.bf16.msra.mxu1 %v1932_v44  ;;  %1409 = vmatpush1.bf16.msra.mxu0 %v1934_v47 }
 0x2cd   : > { %1337 = vmatprep.subr.bf16.mxu1 %v1941_v48  ;;  %1410 = vmatprep.subr.bf16.mxu0 %v1943_v49 }
 0x2ce   : > { %1355 = vmatprep.mubr.bf16.mxu1 %v2104_v24  ;;  %1428 = vmatprep.mubr.bf16.mxu0 %v2104_v24 }
 0x2d0   : > { %1338 = vmatpush1.bf16.msra.mxu1 %v1940_v50  ;;  %1411 = vmatpush1.bf16.msra.mxu0 %v1942_v51 }
 0x2d3   : > { %1356 = vmatmul.mubr.bf16.vlgmr.msra.gmra.mrb[24].mxu1 %v2381_v46  ;;  %1429 = vmatmul.mubr.bf16.vlgmr.msra.gmra.mrb[32].mxu0 %v2381_v46  ;;  %v817_v46 = vlaneseq }
 0x2d4   : > { %1365 = vmatprep.mubr.bf16.mxu1 %v2104_v24  ;;  %1438 = vmatprep.mubr.bf16.mxu0 %v2104_v24 }
 0x2d5   : > { %v2489_v52 = vshrl.u32 %v817_v46, 7 }
 0x2d7   : > { %v827_v53 = vsub.s32 2, %v2489_v52  ;;  %v823_v55 = vsub.s32 1, %v2489_v52 }
 0x2d9   : > { %v2504_v56 = vrot.slane %v2496_v54, %v827_v53  ;;  %v2507_v58 = vrot.slane %v2496_v54, %v823_v55 }
 0x2db   : > { %1366 = vmatmul.mubr.bf16.gmra.mrb[28].mxu1 %v2379_v45  ;;  %1439 = vmatmul.mubr.bf16.gmra.mrb[36].mxu0 %v2379_v45  ;;  %v819_v45 = vsub.s32 0, %v2489_v52 }
 0x2dc   : > { %1375 = vmatprep.mubr.bf16.mxu1 %v2104_v24  ;;  %1448 = vmatprep.mubr.bf16.mxu0 %v2104_v24 }
 0x2dd   : > { %v2501_v57 = vrot.slane %v2496_v54, %v819_v45 }
 0x2e3   : > { %1376 = vmatmul.mubr.bf16.gmra.mrb[32].mxu1 %v2413_v12  ;;  %1449 = vmatmul.mubr.bf16.gmra.mrb[40].mxu0 %v2413_v12 }
 0x2e4   : > { %1385 = vmatprep.mubr.bf16.mxu1 %v2104_v24  ;;  %1458 = vmatprep.mubr.bf16.mxu0 %v2104_v24  ;;  %v831_v24 = vsub.s32 3, %v2489_v52 }
 0x2e6   : > { %v2510_v59 = vrot.slane %v2496_v54, %v831_v24 }
 0x2eb   : > { %1386 = vmatmul.mubr.bf16.gmra.mrb[36].mxu1 %v2411_v9  ;;  %1459 = vmatmul.mubr.bf16.gmra.mrb[44].mxu0 %v2411_v9 }
 0x386   : > { %v1211_v60 = vpop.f32.mrb[8].mxu1  ;;  %v1284_v61 = vpop.f32.mrb[16].mxu0 }
 0x387   : > { %v1212_v62 = vadd.f32 %v1211_v60, %v2501_v57  ;;  %v1285_v63 = vadd.f32 %v1284_v61, %v2504_v56  ;;  %v1213_v0 = vpop.f32.mrb[9].mxu1  ;;  %v1286_v1 = vpop.f32.mrb[17].mxu0 }
 0x388   : > { %v1214_v2 = vadd.f32 %v1213_v0, %v2507_v58  ;;  %v1287_v3 = vadd.f32 %v1286_v1, %v2510_v59  ;;  %v1215_v4 = vpop.f32.mrb[10].mxu1  ;;  %v1288_v5 = vpop.f32.mrb[18].mxu0 }
 0x389   : > { %v1216_v6 = vadd.f32 %v1215_v4, %v2501_v57  ;;  %v1289_v7 = vadd.f32 %v1288_v5, %v2504_v56  ;;  %v1217_v8 = vpop.f32.mrb[11].mxu1  ;;  %v1290_v9 = vpop.f32.mrb[19].mxu0  ;;  %v1469_v12 = vmax.f32 %v1212_v62, 0.0  ;;  %v1471_v13 = vmax.f32 %v1285_v63, 0.0 }
 0x38a   : > { %v1218_v10 = vadd.f32 %v1217_v8, %v2507_v58  ;;  %v1291_v11 = vadd.f32 %v1290_v9, %v2510_v59  ;;  %v1470_v16 = vmax.f32 %v1214_v2, 0.0  ;;  %v1472_v17 = vmax.f32 %v1287_v3, 0.0 }
 0x38b   : > { %v1477_v14 = vmax.f32 %v1216_v6, 0.0  ;;  %v1479_v15 = vmax.f32 %v1289_v7, 0.0  ;;  %v835_v4 = vsub.s32 4, %v2489_v52  ;;  %v843_v5 = vsub.s32 6, %v2489_v52 }
 0x38c   : > { %v1478_v18 = vmax.f32 %v1218_v10, 0.0  ;;  %v1480_v19 = vmax.f32 %v1291_v11, 0.0  ;;  %v839_v10 = vsub.s32 5, %v2489_v52  ;;  %v847_v11 = vsub.s32 7, %v2489_v52 }
 0x38d   : > { %v1533_v20 = vmax.f32 %v1469_v12, %v1477_v14  ;;  %v1559_v21 = vmax.f32 %v1471_v13, %v1479_v15 }
 0x38e   : > { %v1546_v22 = vmax.f32 %v1470_v16, %v1478_v18  ;;  %v1572_v23 = vmax.f32 %v1472_v17, %v1480_v19  ;;  %v1221_v25 = vpop.f32.mrb[12].mxu1  ;;  %v1294_v26 = vpop.f32.mrb[20].mxu0 }
 0x38f   : > { %v1222_v27 = vadd.f32 %v1221_v25, %v2501_v57  ;;  %v1295_v28 = vadd.f32 %v1294_v26, %v2504_v56  ;;  %v1223_v29 = vpop.f32.mrb[13].mxu1  ;;  %v1296_v30 = vpop.f32.mrb[21].mxu0 }
 0x390   : > { %v1224_v31 = vadd.f32 %v1223_v29, %v2507_v58  ;;  %v1297_v32 = vadd.f32 %v1296_v30, %v2510_v59  ;;  %v1225_v33 = vpop.f32.mrb[14].mxu1  ;;  %v1298_v34 = vpop.f32.mrb[22].mxu0 }
 0x391   : > { %v1485_v35 = vmax.f32 %v1222_v27, 0.0  ;;  %v1487_v36 = vmax.f32 %v1295_v28, 0.0  ;;  %v1226_v37 = vadd.f32 %v1225_v33, %v2501_v57  ;;  %v1299_v38 = vadd.f32 %v1298_v34, %v2504_v56  ;;  %v1227_v39 = vpop.f32.mrb[15].mxu1  ;;  %v1300_v40 = vpop.f32.mrb[23].mxu0 }
 0x392   : > { %v1486_v41 = vmax.f32 %v1224_v31, 0.0  ;;  %v1488_v42 = vmax.f32 %v1297_v32, 0.0  ;;  %v1228_v43 = vadd.f32 %v1227_v39, %v2507_v58  ;;  %v1301_v44 = vadd.f32 %v1300_v40, %v2510_v59 }
 0x393   : > { %v1534_v47 = vmax.f32 %v1533_v20, %v1485_v35  ;;  %v1560_v48 = vmax.f32 %v1559_v21, %v1487_v36  ;;  %v1493_v49 = vmax.f32 %v1226_v37, 0.0  ;;  %v1495_v50 = vmax.f32 %v1299_v38, 0.0 }
 0x394   : > { %v1547_v51 = vmax.f32 %v1546_v22, %v1486_v41  ;;  %v1573_v46 = vmax.f32 %v1572_v23, %v1488_v42  ;;  %v1494_v45 = vmax.f32 %v1228_v43, 0.0  ;;  %v1496_v53 = vmax.f32 %v1301_v44, 0.0 }
 0x395   : > { %v1535_v55 = vmax.f32 %v1534_v47, %v1493_v49  ;;  %v1561_v24 = vmax.f32 %v1560_v48, %v1495_v50  ;;  %v2543_v41 = vrot.slane %v2496_v54, %v835_v4  ;;  %v2546_v42 = vrot.slane %v2496_v54, %v843_v5 }
 0x396   : > { %v1548_v60 = vmax.f32 %v1547_v51, %v1494_v45  ;;  %v1574_v61 = vmax.f32 %v1573_v46, %v1496_v53  ;;  %v1231_v62 = vpop.f32.mrb[16].mxu1  ;;  %v1304_v63 = vpop.f32.mrb[24].mxu0  ;;  %v2551_v49 = vrot.slane %v2496_v54, %v839_v10  ;;  %v2554_v50 = vrot.slane %v2496_v54, %v847_v11 }
 0x397   : > { %v1232_v0 = vadd.f32 %v1231_v62, %v2501_v57  ;;  %v1305_v1 = vadd.f32 %v1304_v63, %v2504_v56  ;;  %v1233_v2 = vpop.f32.mrb[17].mxu1  ;;  %v1306_v3 = vpop.f32.mrb[25].mxu0 }
 0x398   : > { %v1234_v6 = vadd.f32 %v1233_v2, %v2507_v58  ;;  %v1307_v7 = vadd.f32 %v1306_v3, %v2510_v59  ;;  %v1235_v8 = vpop.f32.mrb[18].mxu1  ;;  %v1308_v9 = vpop.f32.mrb[26].mxu0 }
 0x399   : > { %v1501_v12 = vmax.f32 %v1232_v0, 0.0  ;;  %v1503_v13 = vmax.f32 %v1305_v1, 0.0  ;;  %v1236_v14 = vadd.f32 %v1235_v8, %v2501_v57  ;;  %v1309_v15 = vadd.f32 %v1308_v9, %v2504_v56  ;;  %v1237_v16 = vpop.f32.mrb[19].mxu1  ;;  %v1310_v17 = vpop.f32.mrb[27].mxu0 }
 0x39a   : > { %v1502_v18 = vmax.f32 %v1234_v6, 0.0  ;;  %v1504_v19 = vmax.f32 %v1307_v7, 0.0  ;;  %v1238_v20 = vadd.f32 %v1237_v16, %v2507_v58  ;;  %v1311_v21 = vadd.f32 %v1310_v17, %v2510_v59 }
 0x39b   : > { %v1536_v22 = vmax.f32 %v1535_v55, %v1501_v12  ;;  %v1562_v23 = vmax.f32 %v1561_v24, %v1503_v13  ;;  %v1509_v25 = vmax.f32 %v1236_v14, 0.0  ;;  %v1511_v26 = vmax.f32 %v1309_v15, 0.0 }
 0x39c   : > { %v1549_v27 = vmax.f32 %v1548_v60, %v1502_v18  ;;  %v1575_v28 = vmax.f32 %v1574_v61, %v1504_v19  ;;  %v1510_v29 = vmax.f32 %v1238_v20, 0.0  ;;  %v1512_v30 = vmax.f32 %v1311_v21, 0.0 }
 0x39d   : > { %v1537_v31 = vmax.f32 %v1536_v22, %v1509_v25  ;;  %v1563_v32 = vmax.f32 %v1562_v23, %v1511_v26 }
 0x39e   : > { %v1550_v33 = vmax.f32 %v1549_v27, %v1510_v29  ;;  %v1576_v34 = vmax.f32 %v1575_v28, %v1512_v30  ;;  %v1241_v35 = vpop.f32.mrb[20].mxu1  ;;  %v1314_v36 = vpop.f32.mrb[28].mxu0 }
 0x39f   : > { %v1242_v37 = vadd.f32 %v1241_v35, %v2501_v57  ;;  %v1315_v38 = vadd.f32 %v1314_v36, %v2504_v56  ;;  %v1243_v39 = vpop.f32.mrb[21].mxu1  ;;  %v1316_v40 = vpop.f32.mrb[29].mxu0 }
 0x3a0   : > { %v1244_v43 = vadd.f32 %v1243_v39, %v2507_v58  ;;  %v1317_v44 = vadd.f32 %v1316_v40, %v2510_v59  ;;  %v1245_v47 = vpop.f32.mrb[22].mxu1  ;;  %v1318_v48 = vpop.f32.mrb[30].mxu0 }
 0x3a1   : > { %v1517_v51 = vmax.f32 %v1242_v37, 0.0  ;;  %v1519_v46 = vmax.f32 %v1315_v38, 0.0  ;;  %v1246_v45 = vadd.f32 %v1245_v47, %v2501_v57  ;;  %v1319_v53 = vadd.f32 %v1318_v48, %v2504_v56  ;;  %v1247_v55 = vpop.f32.mrb[23].mxu1  ;;  %v1320_v24 = vpop.f32.mrb[31].mxu0 }
 0x3a2   : > { %v1518_v60 = vmax.f32 %v1244_v43, 0.0  ;;  %v1520_v61 = vmax.f32 %v1317_v44, 0.0  ;;  %v1248_v62 = vadd.f32 %v1247_v55, %v2507_v58  ;;  %v1321_v63 = vadd.f32 %v1320_v24, %v2510_v59 }
 0x3a3   : > { %v1538_v0 = vmax.f32 %v1537_v31, %v1517_v51  ;;  %v1564_v1 = vmax.f32 %v1563_v32, %v1519_v46  ;;  %v1525_v2 = vmax.f32 %v1246_v45, 0.0  ;;  %v1527_v3 = vmax.f32 %v1319_v53, 0.0 }
 0x3a4   : > { %v1551_v54 = vmax.f32 %v1550_v33, %v1518_v60  ;;  %v1577_v4 = vmax.f32 %v1576_v34, %v1520_v61  ;;  %v1526_v5 = vmax.f32 %v1248_v62, 0.0  ;;  %v1528_v6 = vmax.f32 %v1321_v63, 0.0 }
 0x3a5   : > { %v1539_v7 = vmax.f32 %v1538_v0, %v1525_v2  ;;  %v1565_v57 = vmax.f32 %v1564_v1, %v1527_v3 }
 0x3a6   : > { %v1552_v8 = vmax.f32 %v1551_v54, %v1526_v5  ;;  %v1578_v56 = vmax.f32 %v1577_v4, %v1528_v6  ;;  %v1357_v9 = vpop.f32.mrb[24].mxu1  ;;  %v1430_v10 = vpop.f32.mrb[32].mxu0 }
 0x3a7   : > { %v1540_v11 = vrot.slane %v1539_v7, 4  ;;  %v1566_v12 = vrot.slane %v1565_v57, 4  ;;  %v1358_v58 = vadd.f32 %v1357_v9, %v2543_v41  ;;  %v1431_v59 = vadd.f32 %v1430_v10, %v2546_v42  ;;  %v1359_v13 = vpop.f32.mrb[25].mxu1  ;;  %v1432_v14 = vpop.f32.mrb[33].mxu0 }
 0x3a8   : > { %v1553_v15 = vrot.slane %v1552_v8, 4  ;;  %v1579_v16 = vrot.slane %v1578_v56, 4  ;;  %v1360_v17 = vadd.f32 %v1359_v13, %v2551_v49  ;;  %v1433_v18 = vadd.f32 %v1432_v14, %v2554_v50  ;;  %v1361_v19 = vpop.f32.mrb[26].mxu1  ;;  %v1434_v20 = vpop.f32.mrb[34].mxu0 }
 0x3a9   : > { %v1541_v21 = vmax.f32 %v1539_v7, %v1540_v11  ;;  %v1567_v22 = vmax.f32 %v1565_v57, %v1566_v12  ;;  %v1473_v23 = vmax.f32 %v1358_v58, 0.0  ;;  %v1475_v25 = vmax.f32 %v1431_v59, 0.0  ;;  %v1363_v26 = vpop.f32.mrb[27].mxu1  ;;  %v1436_v27 = vpop.f32.mrb[35].mxu0 }
 0x3aa   : > { %v1554_v28 = vmax.f32 %v1552_v8, %v1553_v15  ;;  %v1580_v29 = vmax.f32 %v1578_v56, %v1579_v16  ;;  %v1474_v30 = vmax.f32 %v1360_v17, 0.0  ;;  %v1476_v31 = vmax.f32 %v1433_v18, 0.0 }
 0x3ab   : > { %v1542_v32 = vrot.slane %v1541_v21, 2  ;;  %v1568_v33 = vrot.slane %v1567_v22, 2  ;;  %v1362_v34 = vadd.f32 %v1361_v19, %v2543_v41  ;;  %v1435_v35 = vadd.f32 %v1434_v20, %v2546_v42 }
 0x3ac   : > { %v1555_v36 = vrot.slane %v1554_v28, 2  ;;  %v1581_v37 = vrot.slane %v1580_v29, 2  ;;  %v1364_v38 = vadd.f32 %v1363_v26, %v2551_v49  ;;  %v1437_v39 = vadd.f32 %v1436_v27, %v2554_v50 }
 0x3ad   : > { %v1543_v40 = vmax.f32 %v1541_v21, %v1542_v32  ;;  %v1569_v43 = vmax.f32 %v1567_v22, %v1568_v33  ;;  %v1481_v44 = vmax.f32 %v1362_v34, 0.0  ;;  %v1483_v47 = vmax.f32 %v1435_v35, 0.0 }
 0x3ae   : > { %v1556_v48 = vmax.f32 %v1554_v28, %v1555_v36  ;;  %v1582_v51 = vmax.f32 %v1580_v29, %v1581_v37  ;;  %v1482_v46 = vmax.f32 %v1364_v38, 0.0  ;;  %v1484_v45 = vmax.f32 %v1437_v39, 0.0  ;;  %v1367_v53 = vpop.f32.mrb[28].mxu1  ;;  %v1440_v55 = vpop.f32.mrb[36].mxu0 }
 0x3af   : > { %v1544_v24 = vrot.slane %v1543_v40, 1  ;;  %v1570_v60 = vrot.slane %v1569_v43, 1  ;;  %v1585_v61 = vmax.f32 %v1473_v23, %v1481_v44  ;;  %v1611_v62 = vmax.f32 %v1475_v25, %v1483_v47  ;;  %v1369_v63 = vpop.f32.mrb[29].mxu1  ;;  %v1442_v0 = vpop.f32.mrb[37].mxu0 }
 0x3b0   : > { %v1557_v1 = vrot.slane %v1556_v48, 1  ;;  %v1583_v2 = vrot.slane %v1582_v51, 1  ;;  %v1598_v3 = vmax.f32 %v1474_v30, %v1482_v46  ;;  %v1624_v54 = vmax.f32 %v1476_v31, %v1484_v45  ;;  %v1371_v4 = vpop.f32.mrb[30].mxu1  ;;  %v1444_v5 = vpop.f32.mrb[38].mxu0 }
 0x3b1   : > { %v2568_v6 = vmax.f32 %v1543_v40, %v1544_v24  ;;  %v2570_v7 = vmax.f32 %v1569_v43, %v1570_v60  ;;  %v1368_v57 = vadd.f32 %v1367_v53, %v2543_v41  ;;  %v1441_v8 = vadd.f32 %v1440_v55, %v2546_v42  ;;  %v1373_v56 = vpop.f32.mrb[31].mxu1  ;;  %v1446_v9 = vpop.f32.mrb[39].mxu0 }
 0x3b2   : > { %v2574_v10 = vmax.f32 %v1556_v48, %v1557_v1  ;;  %v2576_v11 = vmax.f32 %v1582_v51, %v1583_v2  ;;  %v1370_v12 = vadd.f32 %v1369_v63, %v2551_v49  ;;  %v1443_v58 = vadd.f32 %v1442_v0, %v2554_v50 }
 0x3b3   : > { %v1489_v59 = vmax.f32 %v1368_v57, 0.0  ;;  %v1491_v13 = vmax.f32 %v1441_v8, 0.0  ;;  %v1372_v14 = vadd.f32 %v1371_v4, %v2543_v41  ;;  %v1445_v15 = vadd.f32 %v1444_v5, %v2546_v42 }
 0x3b4   : > { %v1490_v16 = vmax.f32 %v1370_v12, 0.0  ;;  %v1492_v17 = vmax.f32 %v1443_v58, 0.0  ;;  %v1374_v18 = vadd.f32 %v1373_v56, %v2551_v49  ;;  %v1447_v19 = vadd.f32 %v1446_v9, %v2554_v50 }
 0x3b5   : > { %v1586_v20 = vmax.f32 %v1585_v61, %v1489_v59  ;;  %v1612_v21 = vmax.f32 %v1611_v62, %v1491_v13  ;;  %v1497_v22 = vmax.f32 %v1372_v14, 0.0  ;;  %v1499_v23 = vmax.f32 %v1445_v15, 0.0 }
 0x3b6   : > { %v1599_v25 = vmax.f32 %v1598_v3, %v1490_v16  ;;  %v1625_v26 = vmax.f32 %v1624_v54, %v1492_v17  ;;  %v1498_v27 = vmax.f32 %v1374_v18, 0.0  ;;  %v1500_v28 = vmax.f32 %v1447_v19, 0.0  ;;  %v1377_v29 = vpop.f32.mrb[32].mxu1  ;;  %v1450_v30 = vpop.f32.mrb[40].mxu0 }
 0x3b7   : > { %v1587_v31 = vmax.f32 %v1586_v20, %v1497_v22  ;;  %v1613_v32 = vmax.f32 %v1612_v21, %v1499_v23  ;;  %v1378_v33 = vadd.f32 %v1377_v29, %v2543_v41  ;;  %v1451_v34 = vadd.f32 %v1450_v30, %v2546_v42  ;;  %v1379_v35 = vpop.f32.mrb[33].mxu1  ;;  %v1452_v36 = vpop.f32.mrb[41].mxu0 }
 0x3b8   : > { %v1600_v37 = vmax.f32 %v1599_v25, %v1498_v27  ;;  %v1626_v38 = vmax.f32 %v1625_v26, %v1500_v28  ;;  %v1380_v39 = vadd.f32 %v1379_v35, %v2551_v49  ;;  %v1453_v40 = vadd.f32 %v1452_v36, %v2554_v50  ;;  %v1381_v43 = vpop.f32.mrb[34].mxu1  ;;  %v1454_v44 = vpop.f32.mrb[42].mxu0 }
 0x3b9   : > { %v1505_v47 = vmax.f32 %v1378_v33, 0.0  ;;  %v1507_v48 = vmax.f32 %v1451_v34, 0.0  ;;  %v1382_v51 = vadd.f32 %v1381_v43, %v2543_v41  ;;  %v1455_v46 = vadd.f32 %v1454_v44, %v2546_v42  ;;  %v1383_v45 = vpop.f32.mrb[35].mxu1  ;;  %v1456_v53 = vpop.f32.mrb[43].mxu0 }
 0x3ba   : > { %v1506_v55 = vmax.f32 %v1380_v39, 0.0  ;;  %v1508_v24 = vmax.f32 %v1453_v40, 0.0  ;;  %v1384_v60 = vadd.f32 %v1383_v45, %v2551_v49  ;;  %v1457_v61 = vadd.f32 %v1456_v53, %v2554_v50 }
 0x3bb   : > { %v1588_v62 = vmax.f32 %v1587_v31, %v1505_v47  ;;  %v1614_v63 = vmax.f32 %v1613_v32, %v1507_v48  ;;  %v1513_v0 = vmax.f32 %v1382_v51, 0.0  ;;  %v1515_v1 = vmax.f32 %v1455_v46, 0.0 }
 0x3bc   : > { %v1601_v2 = vmax.f32 %v1600_v37, %v1506_v55  ;;  %v1627_v3 = vmax.f32 %v1626_v38, %v1508_v24  ;;  %v1514_v54 = vmax.f32 %v1384_v60, 0.0  ;;  %v1516_v4 = vmax.f32 %v1457_v61, 0.0 }
 0x3bd   : > { %v1589_v5 = vmax.f32 %v1588_v62, %v1513_v0  ;;  %v1615_v57 = vmax.f32 %v1614_v63, %v1515_v1 }
 0x3be   : > { %v1602_v8 = vmax.f32 %v1601_v2, %v1514_v54  ;;  %v1628_v56 = vmax.f32 %v1627_v3, %v1516_v4  ;;  %v1387_v9 = vpop.f32.mrb[36].mxu1  ;;  %v1460_v12 = vpop.f32.mrb[44].mxu0 }
 0x3bf   : > { %v1388_v58 = vadd.f32 %v1387_v9, %v2543_v41  ;;  %v1461_v59 = vadd.f32 %v1460_v12, %v2546_v42  ;;  %v1389_v13 = vpop.f32.mrb[37].mxu1  ;;  %v1462_v14 = vpop.f32.mrb[45].mxu0  ;;  %v1650_v9 = vcombine.low (!%p1944_p7), %v2570_v7, %v2576_v11 }
 0x3c0   : > { %v1390_v15 = vadd.f32 %v1389_v13, %v2551_v49  ;;  %v1463_v16 = vadd.f32 %v1462_v14, %v2554_v50  ;;  %v1391_v17 = vpop.f32.mrb[38].mxu1  ;;  %v1464_v18 = vpop.f32.mrb[46].mxu0 }
 0x3c1   : > { %v1521_v19 = vmax.f32 %v1388_v58, 0.0  ;;  %v1523_v20 = vmax.f32 %v1461_v59, 0.0  ;;  %v1392_v21 = vadd.f32 %v1391_v17, %v2543_v41  ;;  %v1465_v22 = vadd.f32 %v1464_v18, %v2546_v42  ;;  %v1393_v23 = vpop.f32.mrb[39].mxu1  ;;  %v1466_v25 = vpop.f32.mrb[47].mxu0 }
 0x3c2   : > { %v1522_v26 = vmax.f32 %v1390_v15, 0.0  ;;  %v1524_v27 = vmax.f32 %v1463_v16, 0.0  ;;  %v1394_v28 = vadd.f32 %v1393_v23, %v2551_v49  ;;  %v1467_v29 = vadd.f32 %v1466_v25, %v2554_v50 }
 0x3c3   : > { %v1590_v30 = vmax.f32 %v1589_v5, %v1521_v19  ;;  %v1616_v31 = vmax.f32 %v1615_v57, %v1523_v20  ;;  %v1529_v32 = vmax.f32 %v1392_v21, 0.0  ;;  %v1531_v33 = vmax.f32 %v1465_v22, 0.0 }
 0x3c4   : > { %v1603_v34 = vmax.f32 %v1602_v8, %v1522_v26  ;;  %v1629_v35 = vmax.f32 %v1628_v56, %v1524_v27  ;;  %v1530_v36 = vmax.f32 %v1394_v28, 0.0  ;;  %v1532_v37 = vmax.f32 %v1467_v29, 0.0 }
 0x3c5   : > { %v1591_v38 = vmax.f32 %v1590_v30, %v1529_v32  ;;  %v1617_v41 = vmax.f32 %v1616_v31, %v1531_v33  ;;  %v2105_v57 = vmov (!%p1944_p7), 1966171168   ;;  %v1649_v56 = vcombine.low (!%p1944_p7), %v2568_v6, %v2574_v10 }
 0x3c6   : > { %v1604_v39 = vmax.f32 %v1603_v34, %v1530_v36  ;;  %v1630_v42 = vmax.f32 %v1629_v35, %v1532_v37  ;;  %v1654_v8 = vunpack.c.l.s4 (!%p1944_p7), %v2105_v57 }
 0x3c7   : > { %v1592_v40 = vrot.slane %v1591_v38, 4  ;;  %v1618_v43 = vrot.slane %v1617_v41, 4 }
 0x3c8   : > { %v1605_v44 = vrot.slane %v1604_v39, 4  ;;  %v1631_v47 = vrot.slane %v1630_v42, 4  ;;  %v1655_v59 = vunpack.c.0.s8 (!%p1944_p7), %v1654_v8 }
 0x3c9   : > { %v1593_v48 = vmax.f32 %v1591_v38, %v1592_v40  ;;  %v1619_v49 = vmax.f32 %v1617_v41, %v1618_v43 }
 0x3ca   : > { %v1606_v51 = vmax.f32 %v1604_v39, %v1605_v44  ;;  %v1632_v50 = vmax.f32 %v1630_v42, %v1631_v47  ;;  %v1658_v13 = vsub.s32 (!%p1944_p7), %v1655_v59, %v2489_v52 }
 0x3cb   : > { %v1594_v46 = vrot.slane %v1593_v48, 2  ;;  %v1620_v45 = vrot.slane %v1619_v49, 2 }
 0x3cc   : > { %v1607_v53 = vrot.slane %v1606_v51, 2  ;;  %v1633_v55 = vrot.slane %v1632_v50, 2  ;;  %1640 = sbr.rel (%p1944_p7) target bundleno = 991 (0x3df), region = 60  ;;  %v1659_v14 = vrot.slane (!%p1944_p7), %v1649_v56, %v1658_v13  ;;  %v1666_v15 = vrot.slane (!%p1944_p7), %v1650_v9, %v1658_v13 }
 0x3cd   : > { %v1595_v24 = vmax.f32 %v1593_v48, %v1594_v46  ;;  %v1621_v60 = vmax.f32 %v1619_v49, %v1620_v45 }
 0x3ce   : > { %v1608_v61 = vmax.f32 %v1606_v51, %v1607_v53  ;;  %v1634_v62 = vmax.f32 %v1632_v50, %v1633_v55  ;;  %v1681_v18 = vcombine.low (!%p1944_p7), %v1659_v14, %v1666_v15 }
 0x3cf   : > { %v1596_v63 = vrot.slane %v1595_v24, 1  ;;  %v1622_v0 = vrot.slane %v1621_v60, 1 }
 0x3d0   : > { %v1609_v1 = vrot.slane %v1608_v61, 1  ;;  %v1635_v2 = vrot.slane %v1634_v62, 1  ;;  %v1689_v20 = vrot.slane (!%p1944_p7), %v1681_v18, %v1658_v13 }
 0x3d1   : > { %v1597_v3 = vmax.f32 %v1595_v24, %v1596_v63  ;;  %v1623_v54 = vmax.f32 %v1621_v60, %v1622_v0 }
 0x3d2   : > { %v1610_v4 = vmax.f32 %v1608_v61, %v1609_v1  ;;  %v1636_v5 = vmax.f32 %v1634_v62, %v1635_v2 }
 0x3d4   : > { %v1651_v12 = vcombine.low %v1597_v3, %v1610_v4  ;;  %v1652_v58 = vcombine.low %v1623_v54, %v1636_v5 }
 0x3d6   : > { %v1673_v16 = vrot.slane %v1651_v12, %v1658_v13  ;;  %v1680_v17 = vrot.slane %v1652_v58, %v1658_v13 }
 0x3d8   : > { %v1682_v19 = vcombine.low %v1673_v16, %v1680_v17 }
 0x3da   : > { %v1696_v21 = vrot.slane %v1682_v19, %v1658_v13 }
 0x3dc   : > { %v1697_v22 = vcombine.low %v1689_v20, %v1696_v21 }
 0x3de   : > { %1699 = vst [vmem:[%s2205_s15] sm:$0xff] %v1697_v22 }
 0x3df PF: > { %p1945_p8 = scmp.eq.s32.totalorder %s2085_s30, 0 }
 0x3e0   : > { %v2106_v23 = vmov (!%p1945_p8), 1966171168   ;;  %v1713_v26 = vcombine.low (!%p1945_p8), %v2568_v6, %v2574_v10  ;;  %v1714_v27 = vcombine.low (!%p1945_p8), %v2570_v7, %v2576_v11  ;;  %v1715_v28 = vcombine.low (!%p1945_p8), %v1597_v3, %v1610_v4 }
 0x3e1   : > { %1703 = sbr.rel (%p1945_p8) target bundleno = 1010 (0x3f2), region = 64  ;;  %v1718_v25 = vunpack.c.l.s4 (!%p1945_p8), %v2106_v23  ;;  %v1716_v29 = vcombine.low (!%p1945_p8), %v1623_v54, %v1636_v5 }
 0x3e3   : > { %v1719_v30 = vunpack.c.0.s8 (!%p1945_p8), %v1718_v25 }
 0x3e5   : > { %v1722_v31 = vsub.s32 (!%p1945_p8), %v1719_v30, %v2489_v52  ;;  %v1704_v39 = vld [vmem:[%s2205_s15] sm:$0xff] (!%p1945_p8) }
 0x3e7   : > { %v1723_v32 = vrot.slane (!%p1945_p8), %v1713_v26, %v1722_v31  ;;  %v1730_v33 = vrot.slane (!%p1945_p8), %v1714_v27, %v1722_v31  ;;  %v1737_v34 = vrot.slane (!%p1945_p8), %v1715_v28, %v1722_v31  ;;  %v1744_v35 = vrot.slane (!%p1945_p8), %v1716_v29, %v1722_v31 }
 0x3e9   : > { %v1745_v36 = vcombine.low %v1723_v32, %v1730_v33  ;;  %v1746_v37 = vcombine.low %v1737_v34, %v1744_v35 }
 0x3eb   : > { %v1753_v38 = vrot.slane %v1745_v36, %v1722_v31  ;;  %v1760_v41 = vrot.slane %v1746_v37, %v1722_v31 }
 0x3ed   : > { %v1761_v42 = vcombine.low %v1753_v38, %v1760_v41 }
 0x3ef   : > { %v1763_v6 = vmax.f32 %v1704_v39, %v1761_v42 }
 0x3f1   : > { %1764 = vst [vmem:[%s2205_s15] sm:$0xff] %v1763_v6 }
 0x3f2 PF: > { %s19_s13 = sadd.s32 1, %s2101_s13   ;;  %s2641_s19 = sld [smem:[#allocation2_spill]] }
 0x3f3   : > { %p16_p9 = scmp.ge.s32.totalorder %s19_s13, 6   ;;  %s2642_s30 = smov %s2093_s11 }
 0x3f4   : > { %s2643_s10 = smov %s2097_s12  ;;  %s2644_s11 = smov %s2647_s14 }
 0x3f5   :  { %18 = sbr.rel (!%p16_p9) target bundleno = 3 (0x3), region = 97 }
 0x3f8   : > { %s2645_s12 = smov %s2641_s19 }

// kernel: pointnet_forward.7
= control target key start
LH: loop header
LB: loop body
LE: loop exit
PB: predicated region body
PF: predicated region fallthrough
CT: control target
= control target key end

     0   :  { %v3528_v36 = vmov 1983009808   ;;  %v292_v38 = vlaneseq  ;;  %vm2632_vm0 = vcmask 66560   ;;  %s4667_s1 = inlined_call_operand.vmem [shape: bf16[1024,512], index: 1, kind: input, shape index: {}]   ;;  %s4668_s0 = inlined_call_operand.vmem [shape: f32[2,1024], index: 0, kind: input, shape index: {}]   ;;  %s4669_s3 = inlined_call_operand.vmem [shape: bf16[512,256], index: 3, kind: input, shape index: {}]   ;;  %s4670_s2 = inlined_call_operand.vmem [shape: f32[1,512], index: 2, kind: input, shape index: {}]   ;;  %s4671_s5 = inlined_call_operand.vmem [shape: bf16[256,9], index: 5, kind: input, shape index: {}]   ;;  %s4672_s4 = inlined_call_operand.vmem [shape: f32[1,256], index: 4, kind: input, shape index: {}]   ;;  %s4673_s6 = inlined_call_operand.vmem [shape: f32[1,9], index: 6, kind: input, shape index: {}]   ;;  %s4674_s7 = inlined_call_operand.vmem [shape: f32[2,9], index: 7, kind: output, shape index: {}]  }
   0x1   :  { %v3030_v0 = vld [vmem:[%s4667_s1 + $0x4] ss:$16 sps:$4 sm:$0xff]   ;;  %v3034_v2 = vld [vmem:[%s4667_s1] ss:$16 sps:$4 sm:$0xff]   ;;  %v290_v37 = vunpack.c.l.s4 %v3528_v36 }
   0x2   :  { %v3032_v1 = vld [vmem:[%s4667_s1 + $0x204] ss:$16 sps:$4 sm:$0xff]   ;;  %1639 = vmatprep.subr.bf16.mxu1 %v3030_v0  ;;  %v3035_v3 = vld [vmem:[%s4667_s1 + $0x200] ss:$16 sps:$4 sm:$0xff]   ;;  %v3686_v43 = vshrl.u32 %v292_v38, 7 }
   0x3   :  { %1680 = vmatprep.subr.bf16.mxu0 %v3032_v1  ;;  %v3036_v4 = vld [vmem:[%s4667_s1 + $0x24] ss:$16 sps:$4 sm:$0xff]   ;;  %1640 = vmatpush1.bf16.msra.mxu1 %v3034_v2  ;;  %v3040_v6 = vld [vmem:[%s4667_s1 + $0x20] ss:$16 sps:$4 sm:$0xff]   ;;  %v291_v42 = vunpack.c.0.s8 %v290_v37  ;;  %v3157_v37 = vld [vmem:[%s4667_s1 + $0x8c] ss:$16 sps:$4 sm:$0xff]  }
   0x4   :  { %1681 = vmatpush1.bf16.msra.mxu0 %v3035_v3  ;;  %v3038_v5 = vld [vmem:[%s4667_s1 + $0x224] ss:$16 sps:$4 sm:$0xff]   ;;  %1641 = vmatprep.subr.bf16.mxu1 %v3036_v4  ;;  %v3041_v7 = vld [vmem:[%s4667_s1 + $0x220] ss:$16 sps:$4 sm:$0xff]  }
   0x5   :  { %1682 = vmatprep.subr.bf16.mxu0 %v3038_v5  ;;  %v3042_v8 = vld [vmem:[%s4667_s1 + $0x44] ss:$16 sps:$4 sm:$0xff]   ;;  %v3046_v10 = vld [vmem:[%s4667_s1 + $0x40] ss:$16 sps:$4 sm:$0xff]   ;;  %v3704_v49 = vsub.s32 %v291_v42, %v3686_v43 }
   0x6   :  { %v3044_v9 = vld [vmem:[%s4667_s1 + $0x244] ss:$16 sps:$4 sm:$0xff]   ;;  %v3047_v11 = vld [vmem:[%s4667_s1 + $0x240] ss:$16 sps:$4 sm:$0xff]  }
   0x7   :  { %1642 = vmatpush1.bf16.msra.mxu1 %v3040_v6  ;;  %v3048_v12 = vld [vmem:[%s4667_s1 + $0x64] ss:$16 sps:$4 sm:$0xff]   ;;  %v3052_v14 = vld [vmem:[%s4667_s1 + $0x60] ss:$16 sps:$4 sm:$0xff]  }
   0x8   :  { %1683 = vmatpush1.bf16.msra.mxu0 %v3041_v7  ;;  %1643 = vmatprep.subr.bf16.mxu1 %v3042_v8  ;;  %v3050_v13 = vld [vmem:[%s4667_s1 + $0x264] ss:$16 sps:$4 sm:$0xff]   ;;  %v3053_v15 = vld [vmem:[%s4667_s1 + $0x260] ss:$16 sps:$4 sm:$0xff]   ;;  %v3759_v8 = vld [vmem:[%s4668_s0 + $0x8] sm:$0xff] }
   0x9   :  { %1684 = vmatprep.subr.bf16.mxu0 %v3044_v9  ;;  %v3054_v16 = vld [vmem:[%s4667_s1 + $0x84] ss:$16 sps:$4 sm:$0xff]   ;;  %v3058_v18 = vld [vmem:[%s4667_s1 + $0x80] ss:$16 sps:$4 sm:$0xff]  }
   0xa   :  { %v3056_v17 = vld [vmem:[%s4667_s1 + $0x284] ss:$16 sps:$4 sm:$0xff]   ;;  %v3059_v19 = vld [vmem:[%s4667_s1 + $0x280] ss:$16 sps:$4 sm:$0xff]  }
   0xb   :  { %1644 = vmatpush1.bf16.msra.mxu1 %v3046_v10  ;;  %v3060_v20 = vld [vmem:[%s4667_s1 + $0xa4] ss:$16 sps:$4 sm:$0xff]   ;;  %v3064_v22 = vld [vmem:[%s4667_s1 + $0xa0] ss:$16 sps:$4 sm:$0xff]  }
   0xc   :  { %1685 = vmatpush1.bf16.msra.mxu0 %v3047_v11  ;;  %1645 = vmatprep.subr.bf16.mxu1 %v3048_v12  ;;  %v3062_v21 = vld [vmem:[%s4667_s1 + $0x2a4] ss:$16 sps:$4 sm:$0xff]   ;;  %v3065_v23 = vld [vmem:[%s4667_s1 + $0x2a0] ss:$16 sps:$4 sm:$0xff]  }
   0xd   :  { %1686 = vmatprep.subr.bf16.mxu0 %v3050_v13  ;;  %v3066_v24 = vld [vmem:[%s4667_s1 + $0xc4] ss:$16 sps:$4 sm:$0xff]   ;;  %v3070_v26 = vld [vmem:[%s4667_s1 + $0xc0] ss:$16 sps:$4 sm:$0xff]   ;;  %v3775_v13 = vrot.slane %v3759_v8, %v3704_v49 }
   0xe   :  { %v3068_v25 = vld [vmem:[%s4667_s1 + $0x2c4] ss:$16 sps:$4 sm:$0xff]   ;;  %v3071_v27 = vld [vmem:[%s4667_s1 + $0x2c0] ss:$16 sps:$4 sm:$0xff]  }
   0xf   :  { %1646 = vmatpush1.bf16.msra.mxu1 %v3052_v14  ;;  %v3072_v28 = vld [vmem:[%s4667_s1 + $0xe4] ss:$16 sps:$4 sm:$0xff]   ;;  %v3076_v30 = vld [vmem:[%s4667_s1 + $0xe0] ss:$16 sps:$4 sm:$0xff]  }
  0x10   :  { %1687 = vmatpush1.bf16.msra.mxu0 %v3053_v15  ;;  %1647 = vmatprep.subr.bf16.mxu1 %v3054_v16  ;;  %v3074_v29 = vld [vmem:[%s4667_s1 + $0x2e4] ss:$16 sps:$4 sm:$0xff]   ;;  %v3077_v31 = vld [vmem:[%s4667_s1 + $0x2e0] ss:$16 sps:$4 sm:$0xff]  }
  0x11   :  { %1688 = vmatprep.subr.bf16.mxu0 %v3056_v17  ;;  %v3078_v32 = vld [vmem:[%s4667_s1 + $0x104] ss:$16 sps:$4 sm:$0xff]   ;;  %v3082_v34 = vld [vmem:[%s4667_s1 + $0x100] ss:$16 sps:$4 sm:$0xff]   ;;  %v3133_v17 = vld [vmem:[%s4667_s1 + $0xc] ss:$16 sps:$4 sm:$0xff]  }
  0x12   :  { %v3080_v33 = vld [vmem:[%s4667_s1 + $0x304] ss:$16 sps:$4 sm:$0xff]   ;;  %v3083_v35 = vld [vmem:[%s4667_s1 + $0x300] ss:$16 sps:$4 sm:$0xff]  }
  0x13   :  { %1648 = vmatpush1.bf16.msra.mxu1 %v3058_v18  ;;  %v3084_v39 = vld [vmem:[%s4667_s1 + $0x124] ss:$16 sps:$4 sm:$0xff]   ;;  %v3088_v41 = vld [vmem:[%s4667_s1 + $0x120] ss:$16 sps:$4 sm:$0xff]   ;;  %v320_v18 = vcombine.high %v3775_v13, %v3775_v13 }
  0x14   :  { %1689 = vmatpush1.bf16.msra.mxu0 %v3059_v19  ;;  %1649 = vmatprep.subr.bf16.mxu1 %v3060_v20  ;;  %v3086_v40 = vld [vmem:[%s4667_s1 + $0x324] ss:$16 sps:$4 sm:$0xff]   ;;  %v3089_v44 = vld [vmem:[%s4667_s1 + $0x320] ss:$16 sps:$4 sm:$0xff]  }
  0x15   :  { %1690 = vmatprep.subr.bf16.mxu0 %v3062_v21  ;;  %v3090_v45 = vld [vmem:[%s4667_s1 + $0x144] ss:$16 sps:$4 sm:$0xff]   ;;  %v3094_v47 = vld [vmem:[%s4667_s1 + $0x140] ss:$16 sps:$4 sm:$0xff]  }
  0x16   :  { %v3092_v46 = vld [vmem:[%s4667_s1 + $0x344] ss:$16 sps:$4 sm:$0xff]   ;;  %v3095_v48 = vld [vmem:[%s4667_s1 + $0x340] ss:$16 sps:$4 sm:$0xff]  }
  0x17   :  { %1650 = vmatpush1.bf16.msra.mxu1 %v3064_v22  ;;  %v3096_v50 = vld [vmem:[%s4667_s1 + $0x164] ss:$16 sps:$4 sm:$0xff]   ;;  %v3100_v55 = vld [vmem:[%s4667_s1 + $0x160] ss:$16 sps:$4 sm:$0xff]   ;;  %v3131_v22 = vld [vmem:[%s4667_s1 + $0x8] ss:$16 sps:$4 sm:$0xff]  }
  0x18   :  { %1691 = vmatpush1.bf16.msra.mxu0 %v3065_v23  ;;  %1651 = vmatprep.subr.bf16.mxu1 %v3066_v24  ;;  %v3098_v51 = vld [vmem:[%s4667_s1 + $0x364] ss:$16 sps:$4 sm:$0xff]   ;;  %v3101_v56 = vld [vmem:[%s4667_s1 + $0x360] ss:$16 sps:$4 sm:$0xff]   ;;  %v3139_v24 = vld [vmem:[%s4667_s1 + $0x2c] ss:$16 sps:$4 sm:$0xff]  }
  0x19   :  { %1692 = vmatprep.subr.bf16.mxu0 %v3068_v25  ;;  %v27_v52 = vld [vmem:[%s4668_s0] sm:$0xff]  ;;  %v3807_v25 = vpack.c.bf16 %v320_v18, %v320_v18  ;;  %v3217_v18 = vld [vmem:[%s4667_s1 + $0x1cc] ss:$16 sps:$4 sm:$0xff]  }
  0x1a   :  { %v295_v53 = vrot.slane %v27_v52, %v3704_v49  ;;  %v288_v54 = vcombine.high %v27_v52, %v27_v52  ;;  %v3102_v57 = vld [vmem:[%s4667_s1 + $0x184] ss:$16 sps:$4 sm:$0xff]   ;;  %v3106_v63 = vld [vmem:[%s4667_s1 + $0x180] ss:$16 sps:$4 sm:$0xff]  }
  0x1b   :  { %1652 = vmatpush1.bf16.msra.mxu1 %v3070_v26  ;;  %v3104_v58 = vld [vmem:[%s4667_s1 + $0x384] ss:$16 sps:$4 sm:$0xff]   ;;  %v3107_v0 = vld [vmem:[%s4667_s1 + $0x380] ss:$16 sps:$4 sm:$0xff]  }
  0x1c   :  { %1693 = vmatpush1.bf16.msra.mxu0 %v3071_v27  ;;  %1653 = vmatprep.subr.bf16.mxu1 %v3072_v28  ;;  %v303_v59 = vcombine.high %v295_v53, %v295_v53  ;;  %v302_v60 = vrot.slane %v288_v54, %v3704_v49  ;;  %v3108_v1 = vld [vmem:[%s4667_s1 + $0x1a4] ss:$16 sps:$4 sm:$0xff]   ;;  %v3112_v4 = vld [vmem:[%s4667_s1 + $0x1a0] ss:$16 sps:$4 sm:$0xff]   ;;  %v3791_v19 = vpack.c.bf16 %v295_v53, %v295_v53  ;;  %v3137_v27 = vld [vmem:[%s4667_s1 + $0x28] ss:$16 sps:$4 sm:$0xff]  }
  0x1d   :  { %1694 = vmatprep.subr.bf16.mxu0 %v3074_v29  ;;  %v3110_v2 = vld [vmem:[%s4667_s1 + $0x3a4] ss:$16 sps:$4 sm:$0xff]   ;;  %v3113_v5 = vld [vmem:[%s4667_s1 + $0x3a0] ss:$16 sps:$4 sm:$0xff]   ;;  %v3145_v29 = vld [vmem:[%s4667_s1 + $0x4c] ss:$16 sps:$4 sm:$0xff]  }
  0x1e   :  { %v331_v61 = vpack.c.bf16 %v303_v59, %v303_v59  ;;  %v304_v62 = vcombine.high %v302_v60, %v302_v60  ;;  %v3114_v6 = vld [vmem:[%s4667_s1 + $0x1c4] ss:$16 sps:$4 sm:$0xff]   ;;  %v3118_v9 = vld [vmem:[%s4667_s1 + $0x1c0] ss:$16 sps:$4 sm:$0xff]   ;;  %v3793_v20 = vpack.c.bf16 %v302_v60, %v302_v60  ;;  %v3173_v53 = vld [vmem:[%s4667_s1 + $0xe8] ss:$16 sps:$4 sm:$0xff]  }
  0x1f   :  { %1654 = vmatpush1.bf16.msra.mxu1 %v3076_v30  ;;  %v3116_v7 = vld [vmem:[%s4667_s1 + $0x3c4] ss:$16 sps:$4 sm:$0xff]   ;;  %v3119_v10 = vld [vmem:[%s4667_s1 + $0x3c0] ss:$16 sps:$4 sm:$0xff]   ;;  %v3187_v59 = vld [vmem:[%s4667_s1 + $0x12c] ss:$16 sps:$4 sm:$0xff]  }
  0x20   :  { %1695 = vmatpush1.bf16.msra.mxu0 %v3077_v31  ;;  %1655 = vmatprep.subr.bf16.mxu1 %v3078_v32  ;;  %v3741_v3 = vpack.c.bf16 %v304_v62, %v304_v62  ;;  %v3120_v11 = vld [vmem:[%s4667_s1 + $0x1e4] ss:$16 sps:$4 sm:$0xff]   ;;  %v3124_v14 = vld [vmem:[%s4667_s1 + $0x1e0] ss:$16 sps:$4 sm:$0xff]   ;;  %v3143_v31 = vld [vmem:[%s4667_s1 + $0x48] ss:$16 sps:$4 sm:$0xff]  }
  0x21   :  { %1696 = vmatprep.subr.bf16.mxu0 %v3080_v33  ;;  %1671 = vmatprep.mubr.bf16.mxu1 %v331_v61  ;;  %v3122_v12 = vld [vmem:[%s4667_s1 + $0x3e4] ss:$16 sps:$4 sm:$0xff]   ;;  %v3125_v15 = vld [vmem:[%s4667_s1 + $0x3e0] ss:$16 sps:$4 sm:$0xff]   ;;  %v3151_v33 = vld [vmem:[%s4667_s1 + $0x6c] ss:$16 sps:$4 sm:$0xff]  }
  0x22   :  { %1712 = vmatprep.mubr.bf16.mxu0 %v3741_v3  ;;  %v3130_v16 = vld [vmem:[%s4667_s1 + $0x404] ss:$16 sps:$4 sm:$0xff]   ;;  %v3128_v21 = vld [vmem:[%s4667_s1 + $0x400] ss:$16 sps:$4 sm:$0xff]  }
  0x23   :  { %1656 = vmatpush1.bf16.msra.mxu1 %v3082_v34  ;;  %v3136_v23 = vld [vmem:[%s4667_s1 + $0x424] ss:$16 sps:$4 sm:$0xff]   ;;  %v3134_v26 = vld [vmem:[%s4667_s1 + $0x420] ss:$16 sps:$4 sm:$0xff]  }
  0x24   :  { %1697 = vmatpush1.bf16.msra.mxu0 %v3083_v35  ;;  %1657 = vmatprep.subr.bf16.mxu1 %v3084_v39  ;;  %v3142_v28 = vld [vmem:[%s4667_s1 + $0x444] ss:$16 sps:$4 sm:$0xff]   ;;  %v3140_v30 = vld [vmem:[%s4667_s1 + $0x440] ss:$16 sps:$4 sm:$0xff]   ;;  %v3149_v35 = vld [vmem:[%s4667_s1 + $0x68] ss:$16 sps:$4 sm:$0xff]  }
  0x25   :  { %1698 = vmatprep.subr.bf16.mxu0 %v3086_v40  ;;  %v3148_v32 = vld [vmem:[%s4667_s1 + $0x464] ss:$16 sps:$4 sm:$0xff]   ;;  %v3146_v34 = vld [vmem:[%s4667_s1 + $0x460] ss:$16 sps:$4 sm:$0xff]   ;;  %v3155_v39 = vld [vmem:[%s4667_s1 + $0x88] ss:$16 sps:$4 sm:$0xff]  }
  0x26   :  { %v3154_v36 = vld [vmem:[%s4667_s1 + $0x484] ss:$16 sps:$4 sm:$0xff]   ;;  %v3152_v38 = vld [vmem:[%s4667_s1 + $0x480] ss:$16 sps:$4 sm:$0xff]  }
  0x27   :  { %1658 = vmatpush1.bf16.msra.mxu1 %v3088_v41  ;;  %v3160_v40 = vld [vmem:[%s4667_s1 + $0x4a4] ss:$16 sps:$4 sm:$0xff]   ;;  %v3163_v41 = vld [vmem:[%s4667_s1 + $0xac] ss:$16 sps:$4 sm:$0xff]   ;;  %v3158_v42 = vld [vmem:[%s4667_s1 + $0x4a0] ss:$16 sps:$4 sm:$0xff]  }
  0x28   :  { %1699 = vmatpush1.bf16.msra.mxu0 %v3089_v44  ;;  %1659 = vmatprep.subr.bf16.mxu1 %v3090_v45  ;;  %v3161_v44 = vld [vmem:[%s4667_s1 + $0xa8] ss:$16 sps:$4 sm:$0xff]   ;;  %v3166_v45 = vld [vmem:[%s4667_s1 + $0x4c4] ss:$16 sps:$4 sm:$0xff]   ;;  %v3170_v52 = vld [vmem:[%s4667_s1 + $0x4e0] ss:$16 sps:$4 sm:$0xff]  }
  0x29   :  { %1700 = vmatprep.subr.bf16.mxu0 %v3092_v46  ;;  %v3169_v46 = vld [vmem:[%s4667_s1 + $0xcc] ss:$16 sps:$4 sm:$0xff]   ;;  %v3178_v54 = vld [vmem:[%s4667_s1 + $0x504] ss:$16 sps:$4 sm:$0xff]   ;;  %v3182_v60 = vld [vmem:[%s4667_s1 + $0x520] ss:$16 sps:$4 sm:$0xff]  }
  0x2a   :  { %v3190_v62 = vld [vmem:[%s4667_s1 + $0x544] ss:$16 sps:$4 sm:$0xff]  }
  0x2b   :  { %1660 = vmatpush1.bf16.msra.mxu1 %v3094_v47  ;;  %v3164_v47 = vld [vmem:[%s4667_s1 + $0x4c0] ss:$16 sps:$4 sm:$0xff]  }
  0x2c   :  { %1701 = vmatpush1.bf16.msra.mxu0 %v3095_v48  ;;  %1661 = vmatprep.subr.bf16.mxu1 %v3096_v50  ;;  %v3167_v48 = vld [vmem:[%s4667_s1 + $0xc8] ss:$16 sps:$4 sm:$0xff]   ;;  %v3172_v50 = vld [vmem:[%s4667_s1 + $0x4e4] ss:$16 sps:$4 sm:$0xff]  }
  0x2d   :  { %1702 = vmatprep.subr.bf16.mxu0 %v3098_v51  ;;  %v3175_v51 = vld [vmem:[%s4667_s1 + $0xec] ss:$16 sps:$4 sm:$0xff]  }
  0x2f   :  { %1662 = vmatpush1.bf16.msra.mxu1 %v3100_v55  ;;  %v3181_v55 = vld [vmem:[%s4667_s1 + $0x10c] ss:$16 sps:$4 sm:$0xff]  }
  0x30   :  { %1703 = vmatpush1.bf16.msra.mxu0 %v3101_v56  ;;  %1663 = vmatprep.subr.bf16.mxu1 %v3102_v57  ;;  %v3176_v56 = vld [vmem:[%s4667_s1 + $0x500] ss:$16 sps:$4 sm:$0xff]   ;;  %v3179_v57 = vld [vmem:[%s4667_s1 + $0x108] ss:$16 sps:$4 sm:$0xff]  }
  0x31   :  { %1704 = vmatprep.subr.bf16.mxu0 %v3104_v58  ;;  %v3184_v58 = vld [vmem:[%s4667_s1 + $0x524] ss:$16 sps:$4 sm:$0xff]  }
  0x33   :  { %1664 = vmatpush1.bf16.msra.mxu1 %v3106_v63  ;;  %v3193_v63 = vld [vmem:[%s4667_s1 + $0x14c] ss:$16 sps:$4 sm:$0xff]  }
  0x34   :  { %1705 = vmatpush1.bf16.msra.mxu0 %v3107_v0  ;;  %1665 = vmatprep.subr.bf16.mxu1 %v3108_v1  ;;  %v3188_v0 = vld [vmem:[%s4667_s1 + $0x540] ss:$16 sps:$4 sm:$0xff]   ;;  %v3191_v1 = vld [vmem:[%s4667_s1 + $0x148] ss:$16 sps:$4 sm:$0xff]  }
  0x35   :  { %1706 = vmatprep.subr.bf16.mxu0 %v3110_v2  ;;  %v3196_v2 = vld [vmem:[%s4667_s1 + $0x564] ss:$16 sps:$4 sm:$0xff]  }
  0x37   :  { %1666 = vmatpush1.bf16.msra.mxu1 %v3112_v4  ;;  %v3199_v4 = vld [vmem:[%s4667_s1 + $0x16c] ss:$16 sps:$4 sm:$0xff]  }
  0x38   :  { %1707 = vmatpush1.bf16.msra.mxu0 %v3113_v5  ;;  %1667 = vmatprep.subr.bf16.mxu1 %v3114_v6  ;;  %v3194_v5 = vld [vmem:[%s4667_s1 + $0x560] ss:$16 sps:$4 sm:$0xff]   ;;  %v3197_v6 = vld [vmem:[%s4667_s1 + $0x168] ss:$16 sps:$4 sm:$0xff]  }
  0x39   :  { %1708 = vmatprep.subr.bf16.mxu0 %v3116_v7  ;;  %v3202_v7 = vld [vmem:[%s4667_s1 + $0x584] ss:$16 sps:$4 sm:$0xff]  }
  0x3b   :  { %1668 = vmatpush1.bf16.msra.mxu1 %v3118_v9  ;;  %v3205_v9 = vld [vmem:[%s4667_s1 + $0x18c] ss:$16 sps:$4 sm:$0xff]  }
  0x3c   :  { %1709 = vmatpush1.bf16.msra.mxu0 %v3119_v10  ;;  %1669 = vmatprep.subr.bf16.mxu1 %v3120_v11  ;;  %v3200_v10 = vld [vmem:[%s4667_s1 + $0x580] ss:$16 sps:$4 sm:$0xff]   ;;  %v3203_v11 = vld [vmem:[%s4667_s1 + $0x188] ss:$16 sps:$4 sm:$0xff]  }
  0x3d   :  { %1710 = vmatprep.subr.bf16.mxu0 %v3122_v12  ;;  %v3208_v12 = vld [vmem:[%s4667_s1 + $0x5a4] ss:$16 sps:$4 sm:$0xff]  }
  0x3f   :  { %1670 = vmatpush1.bf16.msra.mxu1 %v3124_v14  ;;  %v3211_v14 = vld [vmem:[%s4667_s1 + $0x1ac] ss:$16 sps:$4 sm:$0xff]  }
  0x40   :  { %1711 = vmatpush1.bf16.msra.mxu0 %v3125_v15  ;;  %1803 = vmatprep.subr.bf16.mxu1 %v3133_v17  ;;  %v3206_v15 = vld [vmem:[%s4667_s1 + $0x5a0] ss:$16 sps:$4 sm:$0xff]   ;;  %v3214_v17 = vld [vmem:[%s4667_s1 + $0x5c4] ss:$16 sps:$4 sm:$0xff]  }
  0x41   :  { %1721 = vmatprep.subr.bf16.mxu0 %v3130_v16  ;;  %v3209_v16 = vld [vmem:[%s4667_s1 + $0x1a8] ss:$16 sps:$4 sm:$0xff]  }
  0x42   :  { %1672 = vmatmul.mubr.bf16.vlgmr.msra.gmra.mrb[0].mxu1 %v3791_v19 }
  0x43   :  { %1713 = vmatmul.mubr.bf16.vlgmr.msra.gmra.mrb[0].mxu0 %v3793_v20  ;;  %1804 = vmatpush1.bf16.msra.mxu1 %v3131_v22  ;;  %v3212_v22 = vld [vmem:[%s4667_s1 + $0x5c0] ss:$16 sps:$4 sm:$0xff]  }
  0x44   :  { %1722 = vmatpush1.bf16.msra.mxu0 %v3128_v21  ;;  %1805 = vmatprep.subr.bf16.mxu1 %v3139_v24  ;;  %v305_v21 = vcombine.high %v3759_v8, %v3759_v8  ;;  %v3220_v24 = vld [vmem:[%s4667_s1 + $0x5e4] ss:$16 sps:$4 sm:$0xff]   ;;  %v3223_v8 = vld [vmem:[%s4667_s1 + $0x1ec] ss:$16 sps:$4 sm:$0xff]  }
  0x45   :  { %1723 = vmatprep.subr.bf16.mxu0 %v3136_v23  ;;  %1753 = vmatprep.mubr.bf16.mxu0 %v3807_v25  ;;  %v3215_v23 = vld [vmem:[%s4667_s1 + $0x1c8] ss:$16 sps:$4 sm:$0xff]  }
  0x46   :  { %1835 = vmatprep.mubr.bf16.mxu1 %v331_v61  ;;  %v3185_v61 = vld [vmem:[%s4667_s1 + $0x128] ss:$16 sps:$4 sm:$0xff]  }
  0x47   :  { %1806 = vmatpush1.bf16.msra.mxu1 %v3137_v27  ;;  %v3218_v27 = vld [vmem:[%s4667_s1 + $0x5e0] ss:$16 sps:$4 sm:$0xff]  }
  0x48   :  { %1724 = vmatpush1.bf16.msra.mxu0 %v3134_v26  ;;  %1807 = vmatprep.subr.bf16.mxu1 %v3145_v29  ;;  %v3983_v26 = vrot.slane %v305_v21, %v3704_v49  ;;  %v3226_v29 = vld [vmem:[%s4667_s1 + $0x604] ss:$16 sps:$4 sm:$0xff]   ;;  %v3229_v49 = vld [vmem:[%s4667_s1 + $0x20c] ss:$16 sps:$4 sm:$0xff]   ;;  %v3296_v21 = vld [vmem:[%s4667_s1 + $0x780] ss:$16 sps:$4 sm:$0xff]  }
  0x49   :  { %1725 = vmatprep.subr.bf16.mxu0 %v3142_v28  ;;  %v3221_v28 = vld [vmem:[%s4667_s1 + $0x1e8] ss:$16 sps:$4 sm:$0xff]  }
  0x4b   :  { %1808 = vmatpush1.bf16.msra.mxu1 %v3143_v31  ;;  %v4001_v31 = vpack.c.bf16 %v3775_v13, %v3775_v13  ;;  %v3235_v13 = vld [vmem:[%s4667_s1 + $0x22c] ss:$16 sps:$4 sm:$0xff]  }
  0x4c   :  { %1726 = vmatpush1.bf16.msra.mxu0 %v3140_v30  ;;  %1809 = vmatprep.subr.bf16.mxu1 %v3151_v33  ;;  %v321_v30 = vcombine.high %v3983_v26, %v3983_v26  ;;  %v3227_v33 = vld [vmem:[%s4667_s1 + $0x208] ss:$16 sps:$4 sm:$0xff]  }
  0x4d   :  { %1727 = vmatprep.subr.bf16.mxu0 %v3148_v32  ;;  %v3224_v32 = vld [vmem:[%s4667_s1 + $0x600] ss:$16 sps:$4 sm:$0xff]  }
  0x4f   :  { %1810 = vmatpush1.bf16.msra.mxu1 %v3149_v35  ;;  %v4015_v35 = vpack.c.bf16 %v321_v30, %v321_v30  ;;  %v3311_v30 = vld [vmem:[%s4667_s1 + $0x3c8] ss:$16 sps:$4 sm:$0xff]  }
  0x50   :  { %1728 = vmatpush1.bf16.msra.mxu0 %v3146_v34  ;;  %1811 = vmatprep.subr.bf16.mxu1 %v3157_v37  ;;  %v3232_v34 = vld [vmem:[%s4667_s1 + $0x624] ss:$16 sps:$4 sm:$0xff]   ;;  %v3233_v37 = vld [vmem:[%s4667_s1 + $0x228] ss:$16 sps:$4 sm:$0xff]  }
  0x51   :  { %1729 = vmatprep.subr.bf16.mxu0 %v3154_v36  ;;  %v3230_v36 = vld [vmem:[%s4667_s1 + $0x620] ss:$16 sps:$4 sm:$0xff]  }
  0x53   :  { %1812 = vmatpush1.bf16.msra.mxu1 %v3155_v39  ;;  %v3236_v39 = vld [vmem:[%s4667_s1 + $0x640] ss:$16 sps:$4 sm:$0xff]  }
  0x54   :  { %1730 = vmatpush1.bf16.msra.mxu0 %v3152_v38  ;;  %1813 = vmatprep.subr.bf16.mxu1 %v3163_v41  ;;  %v3238_v38 = vld [vmem:[%s4667_s1 + $0x644] ss:$16 sps:$4 sm:$0xff]  }
  0x55   :  { %1731 = vmatprep.subr.bf16.mxu0 %v3160_v40  ;;  %v3239_v40 = vld [vmem:[%s4667_s1 + $0x248] ss:$16 sps:$4 sm:$0xff]   ;;  %v3244_v41 = vld [vmem:[%s4667_s1 + $0x664] ss:$16 sps:$4 sm:$0xff]  }
  0x57   :  { %1814 = vmatpush1.bf16.msra.mxu1 %v3161_v44  ;;  %v3245_v44 = vld [vmem:[%s4667_s1 + $0x268] ss:$16 sps:$4 sm:$0xff]  }
  0x58   :  { %1732 = vmatpush1.bf16.msra.mxu0 %v3158_v42  ;;  %1815 = vmatprep.subr.bf16.mxu1 %v3169_v46  ;;  %v3242_v42 = vld [vmem:[%s4667_s1 + $0x660] ss:$16 sps:$4 sm:$0xff]   ;;  %v3253_v46 = vld [vmem:[%s4667_s1 + $0x28c] ss:$16 sps:$4 sm:$0xff]  }
  0x59   :  { %1733 = vmatprep.subr.bf16.mxu0 %v3166_v45  ;;  %v3250_v45 = vld [vmem:[%s4667_s1 + $0x684] ss:$16 sps:$4 sm:$0xff]  }
  0x5b   :  { %1816 = vmatpush1.bf16.msra.mxu1 %v3167_v48  ;;  %v3251_v48 = vld [vmem:[%s4667_s1 + $0x288] ss:$16 sps:$4 sm:$0xff]  }
  0x5c   :  { %1734 = vmatpush1.bf16.msra.mxu0 %v3164_v47  ;;  %1817 = vmatprep.subr.bf16.mxu1 %v3175_v51  ;;  %v3248_v47 = vld [vmem:[%s4667_s1 + $0x680] ss:$16 sps:$4 sm:$0xff]   ;;  %v3259_v51 = vld [vmem:[%s4667_s1 + $0x2ac] ss:$16 sps:$4 sm:$0xff]  }
  0x5d   :  { %1735 = vmatprep.subr.bf16.mxu0 %v3172_v50  ;;  %v3256_v50 = vld [vmem:[%s4667_s1 + $0x6a4] ss:$16 sps:$4 sm:$0xff]  }
  0x5f   :  { %1818 = vmatpush1.bf16.msra.mxu1 %v3173_v53  ;;  %v3257_v53 = vld [vmem:[%s4667_s1 + $0x2a8] ss:$16 sps:$4 sm:$0xff]  }
  0x60   :  { %1736 = vmatpush1.bf16.msra.mxu0 %v3170_v52  ;;  %1819 = vmatprep.subr.bf16.mxu1 %v3181_v55  ;;  %v3254_v52 = vld [vmem:[%s4667_s1 + $0x6a0] ss:$16 sps:$4 sm:$0xff]   ;;  %v3265_v55 = vld [vmem:[%s4667_s1 + $0x2cc] ss:$16 sps:$4 sm:$0xff]  }
  0x61   :  { %1737 = vmatprep.subr.bf16.mxu0 %v3178_v54  ;;  %v3262_v54 = vld [vmem:[%s4667_s1 + $0x6c4] ss:$16 sps:$4 sm:$0xff]  }
  0x63   :  { %1820 = vmatpush1.bf16.msra.mxu1 %v3179_v57  ;;  %v3263_v57 = vld [vmem:[%s4667_s1 + $0x2c8] ss:$16 sps:$4 sm:$0xff]  }
  0x64   :  { %1738 = vmatpush1.bf16.msra.mxu0 %v3176_v56  ;;  %1821 = vmatprep.subr.bf16.mxu1 %v3187_v59  ;;  %v3260_v56 = vld [vmem:[%s4667_s1 + $0x6c0] ss:$16 sps:$4 sm:$0xff]   ;;  %v3271_v59 = vld [vmem:[%s4667_s1 + $0x2ec] ss:$16 sps:$4 sm:$0xff]  }
  0x65   :  { %1739 = vmatprep.subr.bf16.mxu0 %v3184_v58  ;;  %v3268_v58 = vld [vmem:[%s4667_s1 + $0x6e4] ss:$16 sps:$4 sm:$0xff]  }
  0x67   :  { %1822 = vmatpush1.bf16.msra.mxu1 %v3185_v61  ;;  %v3269_v61 = vld [vmem:[%s4667_s1 + $0x2e8] ss:$16 sps:$4 sm:$0xff]  }
  0x68   :  { %1740 = vmatpush1.bf16.msra.mxu0 %v3182_v60  ;;  %1823 = vmatprep.subr.bf16.mxu1 %v3193_v63  ;;  %v3266_v60 = vld [vmem:[%s4667_s1 + $0x6e0] ss:$16 sps:$4 sm:$0xff]   ;;  %v3277_v63 = vld [vmem:[%s4667_s1 + $0x30c] ss:$16 sps:$4 sm:$0xff]  }
  0x69   :  { %1741 = vmatprep.subr.bf16.mxu0 %v3190_v62  ;;  %v3274_v62 = vld [vmem:[%s4667_s1 + $0x704] ss:$16 sps:$4 sm:$0xff]  }
  0x6b   :  { %1824 = vmatpush1.bf16.msra.mxu1 %v3191_v1  ;;  %v3275_v1 = vld [vmem:[%s4667_s1 + $0x308] ss:$16 sps:$4 sm:$0xff]  }
  0x6c   :  { %1742 = vmatpush1.bf16.msra.mxu0 %v3188_v0  ;;  %1825 = vmatprep.subr.bf16.mxu1 %v3199_v4  ;;  %v3272_v0 = vld [vmem:[%s4667_s1 + $0x700] ss:$16 sps:$4 sm:$0xff]   ;;  %v3283_v4 = vld [vmem:[%s4667_s1 + $0x32c] ss:$16 sps:$4 sm:$0xff]  }
  0x6d   :  { %1743 = vmatprep.subr.bf16.mxu0 %v3196_v2  ;;  %v3280_v2 = vld [vmem:[%s4667_s1 + $0x724] ss:$16 sps:$4 sm:$0xff]  }
  0x6f   :  { %1826 = vmatpush1.bf16.msra.mxu1 %v3197_v6  ;;  %v3281_v6 = vld [vmem:[%s4667_s1 + $0x328] ss:$16 sps:$4 sm:$0xff]  }
  0x70   :  { %1744 = vmatpush1.bf16.msra.mxu0 %v3194_v5  ;;  %1827 = vmatprep.subr.bf16.mxu1 %v3205_v9  ;;  %v3278_v5 = vld [vmem:[%s4667_s1 + $0x720] ss:$16 sps:$4 sm:$0xff]   ;;  %v3289_v9 = vld [vmem:[%s4667_s1 + $0x34c] ss:$16 sps:$4 sm:$0xff]  }
  0x71   :  { %1745 = vmatprep.subr.bf16.mxu0 %v3202_v7  ;;  %v3286_v7 = vld [vmem:[%s4667_s1 + $0x744] ss:$16 sps:$4 sm:$0xff]  }
  0x73   :  { %1828 = vmatpush1.bf16.msra.mxu1 %v3203_v11  ;;  %v3287_v11 = vld [vmem:[%s4667_s1 + $0x348] ss:$16 sps:$4 sm:$0xff]  }
  0x74   :  { %1746 = vmatpush1.bf16.msra.mxu0 %v3200_v10  ;;  %1829 = vmatprep.subr.bf16.mxu1 %v3211_v14  ;;  %v3284_v10 = vld [vmem:[%s4667_s1 + $0x740] ss:$16 sps:$4 sm:$0xff]   ;;  %v3295_v14 = vld [vmem:[%s4667_s1 + $0x36c] ss:$16 sps:$4 sm:$0xff]  }
  0x75   :  { %1747 = vmatprep.subr.bf16.mxu0 %v3208_v12  ;;  %v3292_v12 = vld [vmem:[%s4667_s1 + $0x764] ss:$16 sps:$4 sm:$0xff]  }
  0x77   :  { %1830 = vmatpush1.bf16.msra.mxu1 %v3209_v16  ;;  %v3293_v16 = vld [vmem:[%s4667_s1 + $0x368] ss:$16 sps:$4 sm:$0xff]  }
  0x78   :  { %1748 = vmatpush1.bf16.msra.mxu0 %v3206_v15  ;;  %1831 = vmatprep.subr.bf16.mxu1 %v3217_v18  ;;  %v3290_v15 = vld [vmem:[%s4667_s1 + $0x760] ss:$16 sps:$4 sm:$0xff]   ;;  %v3301_v18 = vld [vmem:[%s4667_s1 + $0x38c] ss:$16 sps:$4 sm:$0xff]  }
  0x79   :  { %1749 = vmatprep.subr.bf16.mxu0 %v3214_v17  ;;  %v3298_v17 = vld [vmem:[%s4667_s1 + $0x784] ss:$16 sps:$4 sm:$0xff]  }
  0x7b   :  { %1832 = vmatpush1.bf16.msra.mxu1 %v3215_v23  ;;  %v3304_v23 = vld [vmem:[%s4667_s1 + $0x7a4] ss:$16 sps:$4 sm:$0xff]  }
  0x7c   :  { %1750 = vmatpush1.bf16.msra.mxu0 %v3212_v22  ;;  %1833 = vmatprep.subr.bf16.mxu1 %v3223_v8  ;;  %v3299_v22 = vld [vmem:[%s4667_s1 + $0x388] ss:$16 sps:$4 sm:$0xff]   ;;  %v3302_v8 = vld [vmem:[%s4667_s1 + $0x7a0] ss:$16 sps:$4 sm:$0xff]  }
  0x7d   :  { %1751 = vmatprep.subr.bf16.mxu0 %v3220_v24  ;;  %v3307_v24 = vld [vmem:[%s4667_s1 + $0x3ac] ss:$16 sps:$4 sm:$0xff]  }
  0x7f   :  { %1834 = vmatpush1.bf16.msra.mxu1 %v3221_v28  ;;  %v3310_v28 = vld [vmem:[%s4667_s1 + $0x7c4] ss:$16 sps:$4 sm:$0xff]  }
  0x80   :  { %1752 = vmatpush1.bf16.msra.mxu0 %v3218_v27  ;;  %1844 = vmatprep.subr.bf16.mxu1 %v3229_v49  ;;  %v3305_v27 = vld [vmem:[%s4667_s1 + $0x3a8] ss:$16 sps:$4 sm:$0xff]   ;;  %v3308_v49 = vld [vmem:[%s4667_s1 + $0x7c0] ss:$16 sps:$4 sm:$0xff]  }
  0x81   :  { %1762 = vmatprep.subr.bf16.mxu0 %v3226_v29  ;;  %v3313_v29 = vld [vmem:[%s4667_s1 + $0x3cc] ss:$16 sps:$4 sm:$0xff]  }
  0x82   :  { %1836 = vmatmul.mubr.bf16.vlgmr.msra.gmra.mrb[4].mxu1 %v3791_v19  ;;  %v3241_v19 = vld [vmem:[%s4667_s1 + $0x24c] ss:$16 sps:$4 sm:$0xff]  }
  0x83   :  { %1754 = vmatmul.mubr.bf16.vlgmr.msra.gmra.mrb[0].mxu0 %v4001_v31  ;;  %1845 = vmatpush1.bf16.msra.mxu1 %v3227_v33  ;;  %v3319_v33 = vld [vmem:[%s4667_s1 + $0x3ec] ss:$16 sps:$4 sm:$0xff]  }
  0x84   :  { %1763 = vmatpush1.bf16.msra.mxu0 %v3224_v32  ;;  %1846 = vmatprep.subr.bf16.mxu1 %v3235_v13  ;;  %v3316_v32 = vld [vmem:[%s4667_s1 + $0x7e4] ss:$16 sps:$4 sm:$0xff]   ;;  %v3317_v13 = vld [vmem:[%s4667_s1 + $0x3e8] ss:$16 sps:$4 sm:$0xff]  }
  0x85   :  { %1764 = vmatprep.subr.bf16.mxu0 %v3232_v34  ;;  %1794 = vmatprep.mubr.bf16.mxu0 %v4015_v35  ;;  %v3314_v34 = vld [vmem:[%s4667_s1 + $0x7e0] ss:$16 sps:$4 sm:$0xff]  }
  0x86   :  { %1876 = vmatprep.mubr.bf16.mxu1 %v3741_v3  ;;  %v3247_v3 = vld [vmem:[%s4667_s1 + $0x26c] ss:$16 sps:$4 sm:$0xff]  }
  0x87   :  { %1847 = vmatpush1.bf16.msra.mxu1 %v3233_v37  ;;  %v4200_v37 = vpack.c.bf16 %v3983_v26, %v3983_v26  ;;  %v3323_v26 = vld [vmem:[%s4667_s1 + $0x428] ss:$16 sps:$4 sm:$0xff]  }
  0x88   :  { %1765 = vmatpush1.bf16.msra.mxu0 %v3230_v36  ;;  %1848 = vmatprep.subr.bf16.mxu1 %v3241_v19  ;;  %v3322_v36 = vld [vmem:[%s4667_s1 + $0x40c] ss:$16 sps:$4 sm:$0xff]  }
  0x89   :  { %1766 = vmatprep.subr.bf16.mxu0 %v3238_v38  ;;  %v3320_v38 = vld [vmem:[%s4667_s1 + $0x408] ss:$16 sps:$4 sm:$0xff]   ;;  %v3325_v19 = vld [vmem:[%s4667_s1 + $0x42c] ss:$16 sps:$4 sm:$0xff]  }
  0x8b   :  { %1849 = vmatpush1.bf16.msra.mxu1 %v3239_v40  ;;  %v3416_v40 = vld [vmem:[%s4669_s3] ss:$8 sps:$4 sm:$0xff]  }
  0x8c   :  { %1767 = vmatpush1.bf16.msra.mxu0 %v3236_v39  ;;  %1850 = vmatprep.subr.bf16.mxu1 %v3247_v3  ;;  %v3328_v39 = vld [vmem:[%s4667_s1 + $0x44c] ss:$16 sps:$4 sm:$0xff]   ;;  %v3326_v3 = vld [vmem:[%s4667_s1 + $0x448] ss:$16 sps:$4 sm:$0xff]  }
  0x8d   :  { %1768 = vmatprep.subr.bf16.mxu0 %v3244_v41  ;;  %v3421_v41 = vld [vmem:[%s4669_s3 + $0x14] ss:$8 sps:$4 sm:$0xff]  }
  0x8f   :  { %1851 = vmatpush1.bf16.msra.mxu1 %v3245_v44  ;;  %v3424_v44 = vld [vmem:[%s4669_s3 + $0x24] ss:$8 sps:$4 sm:$0xff]  }
  0x90   :  { %1769 = vmatpush1.bf16.msra.mxu0 %v3242_v42  ;;  %1852 = vmatprep.subr.bf16.mxu1 %v3253_v46  ;;  %v3419_v42 = vld [vmem:[%s4669_s3 + $0x10] ss:$8 sps:$4 sm:$0xff]   ;;  %v3334_v46 = vld [vmem:[%s4667_s1 + $0x48c] ss:$16 sps:$4 sm:$0xff]  }
  0x91   :  { %1770 = vmatprep.subr.bf16.mxu0 %v3250_v45  ;;  %v3329_v45 = vld [vmem:[%s4667_s1 + $0x468] ss:$16 sps:$4 sm:$0xff]  }
  0x93   :  { %1853 = vmatpush1.bf16.msra.mxu1 %v3251_v48  ;;  %v3427_v48 = vld [vmem:[%s4669_s3 + $0x34] ss:$8 sps:$4 sm:$0xff]  }
  0x94   :  { %1771 = vmatpush1.bf16.msra.mxu0 %v3248_v47  ;;  %1854 = vmatprep.subr.bf16.mxu1 %v3259_v51  ;;  %v3422_v47 = vld [vmem:[%s4669_s3 + $0x20] ss:$8 sps:$4 sm:$0xff]   ;;  %v3337_v51 = vld [vmem:[%s4667_s1 + $0x4ac] ss:$16 sps:$4 sm:$0xff]  }
  0x95   :  { %1772 = vmatprep.subr.bf16.mxu0 %v3256_v50  ;;  %v3332_v50 = vld [vmem:[%s4667_s1 + $0x488] ss:$16 sps:$4 sm:$0xff]  }
  0x97   :  { %1855 = vmatpush1.bf16.msra.mxu1 %v3257_v53  ;;  %v3430_v53 = vld [vmem:[%s4669_s3 + $0x44] ss:$8 sps:$4 sm:$0xff]  }
  0x98   :  { %1773 = vmatpush1.bf16.msra.mxu0 %v3254_v52  ;;  %1856 = vmatprep.subr.bf16.mxu1 %v3265_v55  ;;  %v3425_v52 = vld [vmem:[%s4669_s3 + $0x30] ss:$8 sps:$4 sm:$0xff]   ;;  %v3340_v55 = vld [vmem:[%s4667_s1 + $0x4cc] ss:$16 sps:$4 sm:$0xff]  }
  0x99   :  { %1774 = vmatprep.subr.bf16.mxu0 %v3262_v54  ;;  %v3335_v54 = vld [vmem:[%s4667_s1 + $0x4a8] ss:$16 sps:$4 sm:$0xff]  }
  0x9b   :  { %1857 = vmatpush1.bf16.msra.mxu1 %v3263_v57  ;;  %v3433_v57 = vld [vmem:[%s4669_s3 + $0x54] ss:$8 sps:$4 sm:$0xff]  }
  0x9c   :  { %1775 = vmatpush1.bf16.msra.mxu0 %v3260_v56  ;;  %1858 = vmatprep.subr.bf16.mxu1 %v3271_v59  ;;  %v3428_v56 = vld [vmem:[%s4669_s3 + $0x40] ss:$8 sps:$4 sm:$0xff]   ;;  %v3431_v59 = vld [vmem:[%s4669_s3 + $0x50] ss:$8 sps:$4 sm:$0xff]  }
  0x9d   :  { %1776 = vmatprep.subr.bf16.mxu0 %v3268_v58  ;;  %v3338_v58 = vld [vmem:[%s4667_s1 + $0x4c8] ss:$16 sps:$4 sm:$0xff]  }
  0x9f   :  { %1859 = vmatpush1.bf16.msra.mxu1 %v3269_v61  ;;  %v3436_v61 = vld [vmem:[%s4669_s3 + $0x64] ss:$8 sps:$4 sm:$0xff]  }
  0xa0   :  { %1777 = vmatpush1.bf16.msra.mxu0 %v3266_v60  ;;  %1860 = vmatprep.subr.bf16.mxu1 %v3277_v63  ;;  %v3343_v60 = vld [vmem:[%s4667_s1 + $0x4ec] ss:$16 sps:$4 sm:$0xff]   ;;  %v3434_v63 = vld [vmem:[%s4669_s3 + $0x60] ss:$8 sps:$4 sm:$0xff]  }
  0xa1   :  { %1778 = vmatprep.subr.bf16.mxu0 %v3274_v62  ;;  %v3341_v62 = vld [vmem:[%s4667_s1 + $0x4e8] ss:$16 sps:$4 sm:$0xff]  }
  0xa3   :  { %1861 = vmatpush1.bf16.msra.mxu1 %v3275_v1  ;;  %v3439_v1 = vld [vmem:[%s4669_s3 + $0x74] ss:$8 sps:$4 sm:$0xff]  }
  0xa4   :  { %1779 = vmatpush1.bf16.msra.mxu0 %v3272_v0  ;;  %1862 = vmatprep.subr.bf16.mxu1 %v3283_v4  ;;  %v3346_v0 = vld [vmem:[%s4667_s1 + $0x50c] ss:$16 sps:$4 sm:$0xff]   ;;  %v3437_v4 = vld [vmem:[%s4669_s3 + $0x70] ss:$8 sps:$4 sm:$0xff]  }
  0xa5   :  { %1780 = vmatprep.subr.bf16.mxu0 %v3280_v2  ;;  %v3344_v2 = vld [vmem:[%s4667_s1 + $0x508] ss:$16 sps:$4 sm:$0xff]  }
  0xa7   :  { %1863 = vmatpush1.bf16.msra.mxu1 %v3281_v6  ;;  %v3442_v6 = vld [vmem:[%s4669_s3 + $0x84] ss:$8 sps:$4 sm:$0xff]  }
  0xa8   :  { %1781 = vmatpush1.bf16.msra.mxu0 %v3278_v5  ;;  %1864 = vmatprep.subr.bf16.mxu1 %v3289_v9  ;;  %v3349_v5 = vld [vmem:[%s4667_s1 + $0x52c] ss:$16 sps:$4 sm:$0xff]   ;;  %v3440_v9 = vld [vmem:[%s4669_s3 + $0x80] ss:$8 sps:$4 sm:$0xff]  }
  0xa9   :  { %1782 = vmatprep.subr.bf16.mxu0 %v3286_v7  ;;  %v3347_v7 = vld [vmem:[%s4667_s1 + $0x528] ss:$16 sps:$4 sm:$0xff]  }
  0xab   :  { %1865 = vmatpush1.bf16.msra.mxu1 %v3287_v11  ;;  %v3445_v11 = vld [vmem:[%s4669_s3 + $0x94] ss:$8 sps:$4 sm:$0xff]  }
  0xac   :  { %1783 = vmatpush1.bf16.msra.mxu0 %v3284_v10  ;;  %1866 = vmatprep.subr.bf16.mxu1 %v3295_v14  ;;  %v3352_v10 = vld [vmem:[%s4667_s1 + $0x54c] ss:$16 sps:$4 sm:$0xff]   ;;  %v3443_v14 = vld [vmem:[%s4669_s3 + $0x90] ss:$8 sps:$4 sm:$0xff]  }
  0xad   :  { %1784 = vmatprep.subr.bf16.mxu0 %v3292_v12  ;;  %v3350_v12 = vld [vmem:[%s4667_s1 + $0x548] ss:$16 sps:$4 sm:$0xff]  }
  0xaf   :  { %1867 = vmatpush1.bf16.msra.mxu1 %v3293_v16  ;;  %v3448_v16 = vld [vmem:[%s4669_s3 + $0xa4] ss:$8 sps:$4 sm:$0xff]  }
  0xb0   :  { %1785 = vmatpush1.bf16.msra.mxu0 %v3290_v15  ;;  %1868 = vmatprep.subr.bf16.mxu1 %v3301_v18  ;;  %v3355_v15 = vld [vmem:[%s4667_s1 + $0x56c] ss:$16 sps:$4 sm:$0xff]   ;;  %v3446_v18 = vld [vmem:[%s4669_s3 + $0xa0] ss:$8 sps:$4 sm:$0xff]  }
  0xb1   :  { %1786 = vmatprep.subr.bf16.mxu0 %v3298_v17  ;;  %v3353_v17 = vld [vmem:[%s4667_s1 + $0x568] ss:$16 sps:$4 sm:$0xff]  }
  0xb3   :  { %1869 = vmatpush1.bf16.msra.mxu1 %v3299_v22  ;;  %v3451_v22 = vld [vmem:[%s4669_s3 + $0xb4] ss:$8 sps:$4 sm:$0xff]  }
  0xb4   :  { %1787 = vmatpush1.bf16.msra.mxu0 %v3296_v21  ;;  %1870 = vmatprep.subr.bf16.mxu1 %v3307_v24  ;;  %v3358_v21 = vld [vmem:[%s4667_s1 + $0x58c] ss:$16 sps:$4 sm:$0xff]   ;;  %v3449_v24 = vld [vmem:[%s4669_s3 + $0xb0] ss:$8 sps:$4 sm:$0xff]  }
  0xb5   :  { %1788 = vmatprep.subr.bf16.mxu0 %v3304_v23  ;;  %v3356_v23 = vld [vmem:[%s4667_s1 + $0x588] ss:$16 sps:$4 sm:$0xff]  }
  0xb7   :  { %1871 = vmatpush1.bf16.msra.mxu1 %v3305_v27  ;;  %v3454_v27 = vld [vmem:[%s4669_s3 + $0xc4] ss:$8 sps:$4 sm:$0xff]  }
  0xb8   :  { %1789 = vmatpush1.bf16.msra.mxu0 %v3302_v8  ;;  %1872 = vmatprep.subr.bf16.mxu1 %v3313_v29  ;;  %v3361_v8 = vld [vmem:[%s4667_s1 + $0x5ac] ss:$16 sps:$4 sm:$0xff]   ;;  %v3452_v29 = vld [vmem:[%s4669_s3 + $0xc0] ss:$8 sps:$4 sm:$0xff]  }
  0xb9   :  { %1790 = vmatprep.subr.bf16.mxu0 %v3310_v28  ;;  %v3359_v28 = vld [vmem:[%s4667_s1 + $0x5a8] ss:$16 sps:$4 sm:$0xff]  }
  0xbb   :  { %1873 = vmatpush1.bf16.msra.mxu1 %v3311_v30  ;;  %v3457_v30 = vld [vmem:[%s4669_s3 + $0xd4] ss:$8 sps:$4 sm:$0xff]  }
  0xbc   :  { %1791 = vmatpush1.bf16.msra.mxu0 %v3308_v49  ;;  %1874 = vmatprep.subr.bf16.mxu1 %v3319_v33  ;;  %v3364_v49 = vld [vmem:[%s4667_s1 + $0x5cc] ss:$16 sps:$4 sm:$0xff]   ;;  %v3455_v33 = vld [vmem:[%s4669_s3 + $0xd0] ss:$8 sps:$4 sm:$0xff]  }
  0xbd   :  { %1792 = vmatprep.subr.bf16.mxu0 %v3316_v32  ;;  %v3362_v32 = vld [vmem:[%s4667_s1 + $0x5c8] ss:$16 sps:$4 sm:$0xff]  }
  0xbf   :  { %1875 = vmatpush1.bf16.msra.mxu1 %v3317_v13  ;;  %v3365_v13 = vld [vmem:[%s4667_s1 + $0x5e8] ss:$16 sps:$4 sm:$0xff]  }
  0xc0   :  { %1793 = vmatpush1.bf16.msra.mxu0 %v3314_v34  ;;  %1885 = vmatprep.subr.bf16.mxu1 %v3322_v36  ;;  %v3367_v34 = vld [vmem:[%s4667_s1 + $0x5ec] ss:$16 sps:$4 sm:$0xff]  }
  0xc1   :  { %v3370_v36 = vld [vmem:[%s4667_s1 + $0x60c] ss:$16 sps:$4 sm:$0xff]  }
  0xc2   :  { %1877 = vmatmul.mubr.bf16.vlgmr.msra.gmra.mrb[4].mxu1 %v3793_v20  ;;  %v3418_v20 = vld [vmem:[%s4669_s3 + $0x4] ss:$8 sps:$4 sm:$0xff]  }
  0xc3   :  { %1795 = vmatmul.mubr.bf16.vlgmr.msra.gmra.mrb[0].mxu0 %v4200_v37  ;;  %1886 = vmatpush1.bf16.msra.mxu1 %v3320_v38  ;;  %v3368_v38 = vld [vmem:[%s4667_s1 + $0x608] ss:$16 sps:$4 sm:$0xff]  }
  0xc4   :  { %1917 = vmatprep.mubr.bf16.mxu1 %v3807_v25  ;;  %1887 = vmatprep.subr.bf16.mxu1 %v3325_v19  ;;  %v3331_v25 = vld [vmem:[%s4667_s1 + $0x46c] ss:$16 sps:$4 sm:$0xff]  }
  0xc5   :  { %2371 = vmatprep.subr.bf16.mxu0 %v3418_v20  ;;  %v3373_v19 = vld [vmem:[%s4667_s1 + $0x62c] ss:$16 sps:$4 sm:$0xff]  }
  0xc6   :  { %2372 = vmatpush1.bf16.msra.mxu0 %v3416_v40  ;;  %v3374_v40 = vld [vmem:[%s4667_s1 + $0x648] ss:$16 sps:$4 sm:$0xff]   ;;  %v3382_v20 = vld [vmem:[%s4667_s1 + $0x68c] ss:$16 sps:$4 sm:$0xff]  }
  0xc7   :  { %1888 = vmatpush1.bf16.msra.mxu1 %v3323_v26  ;;  %2373 = vmatprep.subr.bf16.mxu0 %v3421_v41  ;;  %v3371_v26 = vld [vmem:[%s4667_s1 + $0x628] ss:$16 sps:$4 sm:$0xff]  }
  0xc8   :  { %1889 = vmatprep.subr.bf16.mxu1 %v3328_v39  ;;  %v3376_v39 = vld [vmem:[%s4667_s1 + $0x64c] ss:$16 sps:$4 sm:$0xff]   ;;  %v3380_v41 = vld [vmem:[%s4667_s1 + $0x688] ss:$16 sps:$4 sm:$0xff]  }
  0xca   :  { %2374 = vmatpush1.bf16.msra.mxu0 %v3419_v42  ;;  %v3388_v42 = vld [vmem:[%s4667_s1 + $0x6cc] ss:$16 sps:$4 sm:$0xff]  }
  0xcb   :  { %1890 = vmatpush1.bf16.msra.mxu1 %v3326_v3  ;;  %2375 = vmatprep.subr.bf16.mxu0 %v3424_v44  ;;  %v3385_v3 = vld [vmem:[%s4667_s1 + $0x6ac] ss:$16 sps:$4 sm:$0xff]  }
  0xcc   :  { %1891 = vmatprep.subr.bf16.mxu1 %v3331_v25  ;;  %v3383_v25 = vld [vmem:[%s4667_s1 + $0x6a8] ss:$16 sps:$4 sm:$0xff]   ;;  %v3460_v44 = vld [vmem:[%s4669_s3 + $0xe4] ss:$8 sps:$4 sm:$0xff]  }
  0xce   :  { %2376 = vmatpush1.bf16.msra.mxu0 %v3422_v47 }
  0xcf   :  { %1892 = vmatpush1.bf16.msra.mxu1 %v3329_v45  ;;  %2377 = vmatprep.subr.bf16.mxu0 %v3427_v48 }
  0xd0   :  { %1893 = vmatprep.subr.bf16.mxu1 %v3334_v46  ;;  %v3458_v46 = vld [vmem:[%s4669_s3 + $0xe0] ss:$8 sps:$4 sm:$0xff]  }
  0xd2   :  { %2378 = vmatpush1.bf16.msra.mxu0 %v3425_v52  ;;  %v3391_v52 = vld [vmem:[%s4667_s1 + $0x6ec] ss:$16 sps:$4 sm:$0xff]  }
  0xd3   :  { %1894 = vmatpush1.bf16.msra.mxu1 %v3332_v50  ;;  %2379 = vmatprep.subr.bf16.mxu0 %v3430_v53  ;;  %v3386_v50 = vld [vmem:[%s4667_s1 + $0x6c8] ss:$16 sps:$4 sm:$0xff]   ;;  %v3463_v53 = vld [vmem:[%s4669_s3 + $0xf4] ss:$8 sps:$4 sm:$0xff]  }
  0xd4   :  { %1895 = vmatprep.subr.bf16.mxu1 %v3337_v51 }
  0xd6   :  { %2380 = vmatpush1.bf16.msra.mxu0 %v3428_v56  ;;  %v3394_v56 = vld [vmem:[%s4667_s1 + $0x70c] ss:$16 sps:$4 sm:$0xff]  }
  0xd7   :  { %1896 = vmatpush1.bf16.msra.mxu1 %v3335_v54  ;;  %2381 = vmatprep.subr.bf16.mxu0 %v3433_v57  ;;  %v3461_v54 = vld [vmem:[%s4669_s3 + $0xf0] ss:$8 sps:$4 sm:$0xff]   ;;  %v3466_v57 = vld [vmem:[%s4669_s3 + $0x104] ss:$8 sps:$4 sm:$0xff]  }
  0xd8   :  { %1897 = vmatprep.subr.bf16.mxu1 %v3340_v55  ;;  %v3389_v55 = vld [vmem:[%s4667_s1 + $0x6e8] ss:$16 sps:$4 sm:$0xff]  }
  0xda   :  { %2382 = vmatpush1.bf16.msra.mxu0 %v3431_v59  ;;  %v3397_v59 = vld [vmem:[%s4667_s1 + $0x72c] ss:$16 sps:$4 sm:$0xff]  }
  0xdb   :  { %1898 = vmatpush1.bf16.msra.mxu1 %v3338_v58  ;;  %2383 = vmatprep.subr.bf16.mxu0 %v3436_v61  ;;  %v3392_v58 = vld [vmem:[%s4667_s1 + $0x708] ss:$16 sps:$4 sm:$0xff]   ;;  %v3400_v61 = vld [vmem:[%s4667_s1 + $0x74c] ss:$16 sps:$4 sm:$0xff]  }
  0xdc   :  { %1899 = vmatprep.subr.bf16.mxu1 %v3343_v60  ;;  %v3395_v60 = vld [vmem:[%s4667_s1 + $0x728] ss:$16 sps:$4 sm:$0xff]  }
  0xde   :  { %2384 = vmatpush1.bf16.msra.mxu0 %v3434_v63  ;;  %v3403_v63 = vld [vmem:[%s4667_s1 + $0x76c] ss:$16 sps:$4 sm:$0xff]  }
  0xdf   :  { %1900 = vmatpush1.bf16.msra.mxu1 %v3341_v62  ;;  %2385 = vmatprep.subr.bf16.mxu0 %v3439_v1  ;;  %v3398_v62 = vld [vmem:[%s4667_s1 + $0x748] ss:$16 sps:$4 sm:$0xff]   ;;  %v3406_v1 = vld [vmem:[%s4667_s1 + $0x78c] ss:$16 sps:$4 sm:$0xff]  }
  0xe0   :  { %1901 = vmatprep.subr.bf16.mxu1 %v3346_v0  ;;  %v3401_v0 = vld [vmem:[%s4667_s1 + $0x768] ss:$16 sps:$4 sm:$0xff]  }
  0xe2   :  { %2386 = vmatpush1.bf16.msra.mxu0 %v3437_v4  ;;  %v3409_v4 = vld [vmem:[%s4667_s1 + $0x7ac] ss:$16 sps:$4 sm:$0xff]  }
  0xe3   :  { %1902 = vmatpush1.bf16.msra.mxu1 %v3344_v2  ;;  %2387 = vmatprep.subr.bf16.mxu0 %v3442_v6  ;;  %v3404_v2 = vld [vmem:[%s4667_s1 + $0x788] ss:$16 sps:$4 sm:$0xff]   ;;  %v3412_v6 = vld [vmem:[%s4667_s1 + $0x7cc] ss:$16 sps:$4 sm:$0xff]  }
  0xe4   :  { %1903 = vmatprep.subr.bf16.mxu1 %v3349_v5  ;;  %v3407_v5 = vld [vmem:[%s4667_s1 + $0x7a8] ss:$16 sps:$4 sm:$0xff]  }
  0xe6   :  { %2388 = vmatpush1.bf16.msra.mxu0 %v3440_v9  ;;  %v3415_v9 = vld [vmem:[%s4667_s1 + $0x7ec] ss:$16 sps:$4 sm:$0xff]  }
  0xe7   :  { %1904 = vmatpush1.bf16.msra.mxu1 %v3347_v7  ;;  %2389 = vmatprep.subr.bf16.mxu0 %v3445_v11  ;;  %v3410_v7 = vld [vmem:[%s4667_s1 + $0x7c8] ss:$16 sps:$4 sm:$0xff]   ;;  %v341_v11 = vsub.s32 0, %v3686_v43 }
  0xe8   :  { %1905 = vmatprep.subr.bf16.mxu1 %v3352_v10  ;;  %v3413_v10 = vld [vmem:[%s4667_s1 + $0x7e8] ss:$16 sps:$4 sm:$0xff]  }
  0xea   :  { %2390 = vmatpush1.bf16.msra.mxu0 %v3443_v14  ;;  %v345_v14 = vsub.s32 1, %v3686_v43 }
  0xeb   :  { %1906 = vmatpush1.bf16.msra.mxu1 %v3350_v12  ;;  %2391 = vmatprep.subr.bf16.mxu0 %v3448_v16  ;;  %v4500_v12 = vld [vmem:[%s4670_s2] sm:$0xf] }
  0xec   :  { %1907 = vmatprep.subr.bf16.mxu1 %v3355_v15  ;;  %v342_v15 = vrot.slane %v4500_v12, %v341_v11  ;;  %v346_v16 = vrot.slane %v4500_v12, %v345_v14 }
  0xee   :  { %2392 = vmatpush1.bf16.msra.mxu0 %v3446_v18 }
  0xef   :  { %1908 = vmatpush1.bf16.msra.mxu1 %v3353_v17  ;;  %2393 = vmatprep.subr.bf16.mxu0 %v3451_v22 }
  0xf0   :  { %1909 = vmatprep.subr.bf16.mxu1 %v3358_v21 }
  0xf2   :  { %2394 = vmatpush1.bf16.msra.mxu0 %v3449_v24 }
  0xf3   :  { %1910 = vmatpush1.bf16.msra.mxu1 %v3356_v23  ;;  %2395 = vmatprep.subr.bf16.mxu0 %v3454_v27 }
  0xf4   :  { %1911 = vmatprep.subr.bf16.mxu1 %v3361_v8 }
  0xf6   :  { %2396 = vmatpush1.bf16.msra.mxu0 %v3452_v29 }
  0xf7   :  { %1912 = vmatpush1.bf16.msra.mxu1 %v3359_v28  ;;  %2397 = vmatprep.subr.bf16.mxu0 %v3457_v30 }
  0xf8   :  { %1913 = vmatprep.subr.bf16.mxu1 %v3364_v49  ;;  %v3464_v49 = vld [vmem:[%s4669_s3 + $0x100] ss:$8 sps:$4 sm:$0xff]  }
  0xfa   :  { %2398 = vmatpush1.bf16.msra.mxu0 %v3455_v33  ;;  %v3467_v33 = vld [vmem:[%s4669_s3 + $0x110] ss:$8 sps:$4 sm:$0xff]  }
  0xfb   :  { %1914 = vmatpush1.bf16.msra.mxu1 %v3362_v32  ;;  %2399 = vmatprep.subr.bf16.mxu0 %v3460_v44  ;;  %v3469_v32 = vld [vmem:[%s4669_s3 + $0x114] ss:$8 sps:$4 sm:$0xff]   ;;  %v3520_v44 = vld [vmem:[%s4671_s5 + $0x60] sm:$0xff]  }
  0xfc   :  { %1915 = vmatprep.subr.bf16.mxu1 %v3367_v34  ;;  %v3472_v34 = vld [vmem:[%s4669_s3 + $0x124] ss:$8 sps:$4 sm:$0xff]  }
  0xfe   :  { %2400 = vmatpush1.bf16.msra.mxu0 %v3458_v46  ;;  %v3479_v46 = vld [vmem:[%s4669_s3 + $0x150] ss:$8 sps:$4 sm:$0xff]  }
  0xff   :  { %1916 = vmatpush1.bf16.msra.mxu1 %v3365_v13  ;;  %2401 = vmatprep.subr.bf16.mxu0 %v3463_v53  ;;  %v3512_v13 = vld [vmem:[%s4671_s5 + $0x40] sm:$0xff]   ;;  %v3485_v53 = vld [vmem:[%s4669_s3 + $0x170] ss:$8 sps:$4 sm:$0xff]  }
 0x100   :  { %1926 = vmatprep.subr.bf16.mxu1 %v3370_v36  ;;  %v3513_v36 = vld [vmem:[%s4671_s5] sm:$0xff]  }
 0x102   :  { %1918 = vmatmul.mubr.bf16.vlgmr.msra.gmra.mrb[4].mxu1 %v4001_v31  ;;  %v3379_v31 = vld [vmem:[%s4667_s1 + $0x66c] ss:$16 sps:$4 sm:$0xff]   ;;  %2402 = vmatpush1.bf16.msra.mxu0 %v3461_v54 }
 0x103   :  { %1927 = vmatpush1.bf16.msra.mxu1 %v3368_v38  ;;  %1958 = vmatprep.mubr.bf16.mxu1 %v4015_v35  ;;  %v3377_v35 = vld [vmem:[%s4667_s1 + $0x668] ss:$16 sps:$4 sm:$0xff]   ;;  %v3490_v54 = vld [vmem:[%s4669_s3 + $0x184] ss:$8 sps:$4 sm:$0xff]  }
 0x104   :  { %1928 = vmatprep.subr.bf16.mxu1 %v3373_v19  ;;  %2412 = vmatprep.subr.bf16.mxu0 %v3466_v57  ;;  %v3470_v38 = vld [vmem:[%s4669_s3 + $0x120] ss:$8 sps:$4 sm:$0xff]   ;;  %v3491_v57 = vld [vmem:[%s4669_s3 + $0x190] ss:$8 sps:$4 sm:$0xff]  }
 0x105   :  { %v3514_v19 = vld [vmem:[%s4671_s5 + $0x48] sm:$0xff]  }
 0x107   :  { %1929 = vmatpush1.bf16.msra.mxu1 %v3371_v26  ;;  %v3515_v26 = vld [vmem:[%s4671_s5 + $0x8] sm:$0xff]  }
 0x108   :  { %1930 = vmatprep.subr.bf16.mxu1 %v3376_v39  ;;  %v3516_v39 = vld [vmem:[%s4671_s5 + $0x50] sm:$0xff]  }
 0x10b   :  { %1931 = vmatpush1.bf16.msra.mxu1 %v3374_v40  ;;  %v3475_v40 = vld [vmem:[%s4669_s3 + $0x134] ss:$8 sps:$4 sm:$0xff]  }
 0x10c   :  { %1932 = vmatprep.subr.bf16.mxu1 %v3379_v31  ;;  %v3473_v31 = vld [vmem:[%s4669_s3 + $0x130] ss:$8 sps:$4 sm:$0xff]  }
 0x10f   :  { %1933 = vmatpush1.bf16.msra.mxu1 %v3377_v35  ;;  %v3517_v35 = vld [vmem:[%s4671_s5 + $0x10] sm:$0xff]  }
 0x110   :  { %1934 = vmatprep.subr.bf16.mxu1 %v3382_v20  ;;  %v3518_v20 = vld [vmem:[%s4671_s5 + $0x58] sm:$0xff]  }
 0x113   :  { %1935 = vmatpush1.bf16.msra.mxu1 %v3380_v41  ;;  %v3478_v41 = vld [vmem:[%s4669_s3 + $0x144] ss:$8 sps:$4 sm:$0xff]  }
 0x114   :  { %1936 = vmatprep.subr.bf16.mxu1 %v3385_v3  ;;  %v3476_v3 = vld [vmem:[%s4669_s3 + $0x140] ss:$8 sps:$4 sm:$0xff]  }
 0x115   :  { %v1673_v45 = vpop.f32.mrb[0].mxu1 }
 0x116   :  { %v1675_v47 = vpop.f32.mrb[1].mxu1  ;;  %v1674_v17 = vadd.f32 %v1673_v45, %v342_v15  ;;  %v3521_v45 = vld [vmem:[%s4671_s5 + $0x20] sm:$0xff]  }
 0x117   :  { %v1677_v48 = vpop.f32.mrb[2].mxu1  ;;  %1937 = vmatpush1.bf16.msra.mxu1 %v3383_v25  ;;  %v1676_v18 = vadd.f32 %v1675_v47, %v346_v16  ;;  %v3481_v25 = vld [vmem:[%s4669_s3 + $0x154] ss:$8 sps:$4 sm:$0xff]   ;;  %v3522_v47 = vld [vmem:[%s4671_s5 + $0x68] sm:$0xff]  }
 0x118   :  { %v1678_v51 = vpop.f32.mrb[3].mxu1  ;;  %1938 = vmatprep.subr.bf16.mxu1 %v3388_v42  ;;  %v3519_v42 = vld [vmem:[%s4671_s5 + $0x18] sm:$0xff]   ;;  %v3484_v48 = vld [vmem:[%s4669_s3 + $0x164] ss:$8 sps:$4 sm:$0xff]  }
 0x119   :  { %v3482_v51 = vld [vmem:[%s4669_s3 + $0x160] ss:$8 sps:$4 sm:$0xff]  }
 0x11b   :  { %1939 = vmatpush1.bf16.msra.mxu1 %v3386_v50  ;;  %v3523_v50 = vld [vmem:[%s4671_s5 + $0x28] sm:$0xff]  }
 0x11c   :  { %1940 = vmatprep.subr.bf16.mxu1 %v3391_v52  ;;  %v3487_v52 = vld [vmem:[%s4669_s3 + $0x174] ss:$8 sps:$4 sm:$0xff]  }
 0x11f   :  { %1941 = vmatpush1.bf16.msra.mxu1 %v3389_v55  ;;  %v3488_v55 = vld [vmem:[%s4669_s3 + $0x180] ss:$8 sps:$4 sm:$0xff]  }
 0x120   :  { %1942 = vmatprep.subr.bf16.mxu1 %v3394_v56  ;;  %v3493_v56 = vld [vmem:[%s4669_s3 + $0x194] ss:$8 sps:$4 sm:$0xff]  }
 0x123   :  { %1943 = vmatpush1.bf16.msra.mxu1 %v3392_v58  ;;  %v3496_v58 = vld [vmem:[%s4669_s3 + $0x1a4] ss:$8 sps:$4 sm:$0xff]  }
 0x124   :  { %1944 = vmatprep.subr.bf16.mxu1 %v3397_v59  ;;  %v3494_v59 = vld [vmem:[%s4669_s3 + $0x1a0] ss:$8 sps:$4 sm:$0xff]  }
 0x127   :  { %1945 = vmatpush1.bf16.msra.mxu1 %v3395_v60  ;;  %v3499_v60 = vld [vmem:[%s4669_s3 + $0x1b4] ss:$8 sps:$4 sm:$0xff]  }
 0x128   :  { %1946 = vmatprep.subr.bf16.mxu1 %v3400_v61  ;;  %v3497_v61 = vld [vmem:[%s4669_s3 + $0x1b0] ss:$8 sps:$4 sm:$0xff]  }
 0x12b   :  { %1947 = vmatpush1.bf16.msra.mxu1 %v3398_v62  ;;  %v3502_v62 = vld [vmem:[%s4669_s3 + $0x1c4] ss:$8 sps:$4 sm:$0xff]  }
 0x12c   :  { %1948 = vmatprep.subr.bf16.mxu1 %v3403_v63  ;;  %v3500_v63 = vld [vmem:[%s4669_s3 + $0x1c0] ss:$8 sps:$4 sm:$0xff]  }
 0x12f   :  { %1949 = vmatpush1.bf16.msra.mxu1 %v3401_v0  ;;  %v3505_v0 = vld [vmem:[%s4669_s3 + $0x1d4] ss:$8 sps:$4 sm:$0xff]  }
 0x130   :  { %1950 = vmatprep.subr.bf16.mxu1 %v3406_v1  ;;  %v3503_v1 = vld [vmem:[%s4669_s3 + $0x1d0] ss:$8 sps:$4 sm:$0xff]  }
 0x133   :  { %1951 = vmatpush1.bf16.msra.mxu1 %v3404_v2  ;;  %v3508_v2 = vld [vmem:[%s4669_s3 + $0x1e4] ss:$8 sps:$4 sm:$0xff]  }
 0x134   :  { %1952 = vmatprep.subr.bf16.mxu1 %v3409_v4  ;;  %v3506_v4 = vld [vmem:[%s4669_s3 + $0x1e0] ss:$8 sps:$4 sm:$0xff]  }
 0x137   :  { %1953 = vmatpush1.bf16.msra.mxu1 %v3407_v5  ;;  %v3511_v5 = vld [vmem:[%s4669_s3 + $0x1f4] ss:$8 sps:$4 sm:$0xff]  }
 0x138   :  { %1954 = vmatprep.subr.bf16.mxu1 %v3412_v6  ;;  %v3509_v6 = vld [vmem:[%s4669_s3 + $0x1f0] ss:$8 sps:$4 sm:$0xff]  }
 0x13b   :  { %1955 = vmatpush1.bf16.msra.mxu1 %v3410_v7  ;;  %v349_v7 = vsub.s32 2, %v3686_v43 }
 0x13c   :  { %1956 = vmatprep.subr.bf16.mxu1 %v3415_v9  ;;  %v353_v9 = vsub.s32 3, %v3686_v43 }
 0x13e   :  { %v354_v15 = vrot.slane %v4500_v12, %v353_v9 }
 0x13f   :  { %1957 = vmatpush1.bf16.msra.mxu1 %v3413_v10  ;;  %v350_v10 = vrot.slane %v4500_v12, %v349_v7  ;;  %v3525_v12 = vld [vmem:[%s4671_s5 + $0x30] sm:$0xff]  }
 0x140   :  { %2975 = vmatprep.subr.bf16.mxu1 %v3512_v13 }
 0x142   :  { %1959 = vmatmul.mubr.bf16.vlgmr.msra.gmra.mrb[4].mxu1 %v4200_v37 }
 0x143   :  { %2976 = vmatpush3.bf16.msra.mxu1 %v3513_v36 }
 0x144   :  { %2977 = vmatprep.subr.bf16.mxu1 %v3514_v19 }
 0x147   :  { %2978 = vmatpush3.bf16.msra.mxu1 %v3515_v26 }
 0x148   :  { %2979 = vmatprep.subr.bf16.mxu1 %v3516_v39 }
 0x14b   :  { %2980 = vmatpush3.bf16.msra.mxu1 %v3517_v35 }
 0x14c   :  { %2981 = vmatprep.subr.bf16.mxu1 %v3518_v20 }
 0x14f   :  { %2982 = vmatpush3.bf16.msra.mxu1 %v3519_v42 }
 0x150   :  { %2983 = vmatprep.subr.bf16.mxu1 %v3520_v44 }
 0x153   :  { %2984 = vmatpush3.bf16.msra.mxu1 %v3521_v45 }
 0x154   :  { %2985 = vmatprep.subr.bf16.mxu1 %v3522_v47 }
 0x157   :  { %2986 = vmatpush3.bf16.msra.mxu1 %v3523_v50 }
 0x196   :  { %v1796_v37 = vpop.f32.mrb[0].mxu0 }
 0x197   :  { %v2998_v21 = vadd.f32 %v1796_v37, %v1674_v17  ;;  %v1798_v22 = vpop.f32.mrb[1].mxu0 }
 0x198   :  { %v3000_v23 = vadd.f32 %v1798_v22, %v1676_v18  ;;  %v1800_v24 = vpop.f32.mrb[2].mxu0 }
 0x199   :  { %v1967_v8 = vmax.f32 %v2998_v21, 0.0  ;;  %v1801_v27 = vpop.f32.mrb[3].mxu0 }
 0x19a   :  { %v1968_v28 = vmax.f32 %v3000_v23, 0.0 }
 0x19b   :  { %v2036_v30 = vpack.c.bf16 %v1967_v8, %v1967_v8 }
 0x19c   :  { %v2037_v29 = vpack.c.bf16 %v1968_v28, %v1968_v28  ;;  %v3524_v28 = vld [vmem:[%s4671_s5 + $0x70] sm:$0xff]  }
 0x19d   :  { %2987 = vmatprep.subr.bf16.mxu1 %v3524_v28 }
 0x19e   :  { %2403 = vmatprep.mubr.bf16.mxu0 %v2037_v29  ;;  %2988 = vmatpush3.bf16.msra.mxu1 %v3525_v12  ;;  %v3526_v29 = vld [vmem:[%s4671_s5 + $0x78] sm:$0xff]  }
 0x19f   :  { %2404 = vmatmul.mubr.bf16.vlgmr.msra.gmra.mrb[4].mxu0 %v2036_v30  ;;  %2989 = vmatprep.subr.bf16.mxu1 %v3526_v29  ;;  %v2035_v30 = vld [vmem:[%s4672_s4] sm:$0x3] }
 0x1a0   :  { %2413 = vmatpush1.bf16.msra.mxu0 %v3464_v49  ;;  %v3527_v49 = vld [vmem:[%s4671_s5 + $0x38] sm:$0xff]  }
 0x1a1   :  { %2414 = vmatprep.subr.bf16.mxu0 %v3469_v32  ;;  %v2044_v32 = vrot.slane %v2035_v30, %v341_v11  ;;  %v2958_v11 = vld [vmem:[%s4673_s6] ss:$0 sm:$0xff] }
 0x1a2   :  { %2990 = vmatpush3.bf16.msra.mxu1 %v3527_v49 }
 0x1a4   :  { %2415 = vmatpush1.bf16.msra.mxu0 %v3467_v33  ;;  %v2048_v33 = vrot.slane %v2035_v30, %v345_v14 }
 0x1a5   :  { %2416 = vmatprep.subr.bf16.mxu0 %v3472_v34 }
 0x1a8   :  { %2417 = vmatpush1.bf16.msra.mxu0 %v3470_v38 }
 0x1a9   :  { %2418 = vmatprep.subr.bf16.mxu0 %v3475_v40 }
 0x1ac   :  { %2419 = vmatpush1.bf16.msra.mxu0 %v3473_v31 }
 0x1ad   :  { %2420 = vmatprep.subr.bf16.mxu0 %v3478_v41 }
 0x1b0   :  { %2421 = vmatpush1.bf16.msra.mxu0 %v3476_v3 }
 0x1b1   :  { %2422 = vmatprep.subr.bf16.mxu0 %v3481_v25 }
 0x1b4   :  { %2423 = vmatpush1.bf16.msra.mxu0 %v3479_v46 }
 0x1b5   :  { %2424 = vmatprep.subr.bf16.mxu0 %v3484_v48 }
 0x1b8   :  { %2425 = vmatpush1.bf16.msra.mxu0 %v3482_v51 }
 0x1b9   :  { %2426 = vmatprep.subr.bf16.mxu0 %v3487_v52 }
 0x1bc   :  { %2427 = vmatpush1.bf16.msra.mxu0 %v3485_v53 }
 0x1bd   :  { %2428 = vmatprep.subr.bf16.mxu0 %v3490_v54 }
 0x1c0   :  { %2429 = vmatpush1.bf16.msra.mxu0 %v3488_v55 }
 0x1c1   :  { %2430 = vmatprep.subr.bf16.mxu0 %v3493_v56 }
 0x1c4   :  { %2431 = vmatpush1.bf16.msra.mxu0 %v3491_v57 }
 0x1c5   :  { %2432 = vmatprep.subr.bf16.mxu0 %v3496_v58 }
 0x1c8   :  { %2433 = vmatpush1.bf16.msra.mxu0 %v3494_v59 }
 0x1c9   :  { %2434 = vmatprep.subr.bf16.mxu0 %v3499_v60 }
 0x1cc   :  { %2435 = vmatpush1.bf16.msra.mxu0 %v3497_v61 }
 0x1cd   :  { %2436 = vmatprep.subr.bf16.mxu0 %v3502_v62 }
 0x1d0   :  { %2437 = vmatpush1.bf16.msra.mxu0 %v3500_v63 }
 0x1d1   :  { %2438 = vmatprep.subr.bf16.mxu0 %v3505_v0 }
 0x1d4   :  { %2439 = vmatpush1.bf16.msra.mxu0 %v3503_v1 }
 0x1d5   :  { %2440 = vmatprep.subr.bf16.mxu0 %v3508_v2 }
 0x1d8   :  { %2441 = vmatpush1.bf16.msra.mxu0 %v3506_v4 }
 0x1d9   :  { %2442 = vmatprep.subr.bf16.mxu0 %v3511_v5 }
 0x1dc   :  { %2443 = vmatpush1.bf16.msra.mxu0 %v3509_v6 }
 0x215   :  { %v1960_v16 = vpop.f32.mrb[4].mxu1 }
 0x216   :  { %v3001_v17 = vadd.f32 %v1960_v16, %v350_v10  ;;  %v1962_v18 = vpop.f32.mrb[5].mxu1 }
 0x217   :  { %v3002_v37 = vadd.f32 %v1962_v18, %v354_v15  ;;  %v1964_v21 = vpop.f32.mrb[6].mxu1 }
 0x218   :  { %v1969_v22 = vmax.f32 %v3001_v17, 0.0  ;;  %v1965_v23 = vpop.f32.mrb[7].mxu1 }
 0x219   :  { %v1970_v24 = vmax.f32 %v3002_v37, 0.0 }
 0x21a   :  { %v2038_v27 = vpack.c.bf16 %v1969_v22, %v1969_v22 }
 0x21b   :  { %v2039_v8 = vpack.c.bf16 %v1970_v24, %v1970_v24 }
 0x21d   :  { %2444 = vmatprep.mubr.bf16.mxu0 %v2039_v8 }
 0x21e   :  { %2445 = vmatmul.mubr.bf16.vlgmr.msra.gmra.mrb[4].mxu0 %v2038_v27 }
 0x2f1   :  { %v2446_v34 = vpop.f32.mrb[4].mxu0 }
 0x2f2   :  { %v3003_v13 = vadd.f32 %v2446_v34, %v2044_v32  ;;  %v2448_v36 = vpop.f32.mrb[5].mxu0 }
 0x2f3   :  { %v3004_v38 = vadd.f32 %v2448_v36, %v2048_v33  ;;  %v2450_v19 = vpop.f32.mrb[6].mxu0 }
 0x2f4   :  { %v2453_v26 = vmax.f32 %v3003_v13, 0.0  ;;  %v2451_v39 = vpop.f32.mrb[7].mxu0 }
 0x2f5   :  { %v2454_v40 = vmax.f32 %v3004_v38, 0.0 }
 0x2f6   :  { %v2488_v35 = vpack.c.bf16 %v2453_v26, %v2453_v26 }
 0x2f7   :  { %v2489_v31 = vpack.c.bf16 %v2454_v40, %v2454_v40 }
 0x2f9   :  { %2624 = vmatprep.mubr.bf16.mxu1 %v2489_v31 }
 0x2fa   :  { %2625 = vmatmul.mubr.bf16.vlgmr.msra.gmra.mrb[8].mxu1 %v2488_v35 }
 0x3cd   :  { %v2991_v20 = vpop.f32.mrb[8].mxu1 }
 0x3ce   :  { %v2992_v41 = vpop.f32.mrb[9].mxu1 }
 0x3cf   :  { %v2993_v43 = vadd.f32 %v2992_v41, %v2991_v20  ;;  %v2994_v14 = vpop.f32.mrb[10].mxu1 }
 0x3d0   :  { %v2995_v3 = vpop.f32.mrb[11].mxu1 }
 0x3d1   :  { %v2627_v25 = vadd.f32 %v2993_v43, %v2958_v11 }
 0x3d3   :  { %2633 = vst.msk [vmem:[%s4674_s7] sm:$0x3] %vm2632_vm0, %v2627_v25 }

// kernel: pointnet_forward.10
= control target key start
LH: loop header
LB: loop body
LE: loop exit
PB: predicated region body
PF: predicated region fallthrough
CT: control target
= control target key end

     0   :  { %s1899_s24 = smov 0   ;;  %s1901_s25 = smov 0   ;;  %s2344_s0 = inlined_call_operand.vmem [shape: f32[2,128,3], index: 0, kind: input, shape index: {}]   ;;  %s2345_s1 = inlined_call_operand.vmem [shape: bf16[2,3,64], index: 1, kind: input, shape index: {}]   ;;  %s2346_s2 = inlined_call_operand.vmem [shape: f32[1,64], index: 2, kind: input, shape index: {}]   ;;  %s2347_s3 = inlined_call_operand.vmem [shape: bf16[2,64,128], index: 3, kind: input, shape index: {}]   ;;  %s2348_s4 = inlined_call_operand.vmem [shape: f32[1,128], index: 4, kind: input, shape index: {}]   ;;  %s2349_s5 = inlined_call_operand.vmem [shape: bf16[128,1024], index: 5, kind: input, shape index: {}]   ;;  %s2350_s6 = inlined_call_operand.vmem [shape: f32[1,1024], index: 6, kind: input, shape index: {}]   ;;  %s2351_s7 = inlined_call_operand.vmem [shape: f32[2,1,1024], index: 7, kind: output, shape index: {}]  }
   0x1   :  { %s1903_s26 = smov 0   ;;  %s1905_s27 = smov 0  }
   0x2   :  { %s1907_s28 = smov 0  }
   0x3 LB: > { %s26_s29 = sadd.s32 1, %s1845_s26  ;;  %s29_s30 = sadd.s32 1, %s1849_s27  ;;  %s1853_s28 = sphi %s1907_s28, %s17_s28   ;;  %s1849_s27 = sphi %s1905_s27, %s2355_s27   ;;  %s1845_s26 = sphi %s1903_s26, %s2354_s26   ;;  %s1841_s25 = sphi %s1901_s25, %s2353_s25   ;;  %s1837_s24 = sphi %s1899_s24, %s2352_s24  }
   0x4   : > { %p27_p0 = scmp.ge.s32.totalorder %s26_s29, 2  ;;  %p1637_p1 = scmp.ge.s32.totalorder %s1853_s28, 1 }
   0x5   : > { %p275_p2 = scmp.lt.s32.totalorder %s1853_s28, 5 }
   0x6   : > { %s2357_s29 = smov (%p27_p0, %s26_s29), 0  ;;  %s2359_s30 = smov (!%p27_p0, %s29_s30), %s1849_s27 }
   0x7   : > { %p276_p3 = pnand %p1637_p1, %p275_p2  ;;  %p31_p4 = scmp.ge.s32.totalorder %s2359_s30, 2 }
   0x8   : > { %p320_p5 = scmp.lt.s32.totalorder (!%p276_p3), %s1841_s25, 1  ;;  %vm376_vm0 = vcmask (!%p276_p3), 1040384   ;;  %s1638_s8 = sshll.u32 (!%p276_p3), %s1837_s24, 3  ;;  %vm377_vm1 = vcmask (!%p276_p3), 1041408   ;;  %v1855_v0 = vmov (!%p276_p3), 65535   ;;  %vm363_vm2 = vcmask (!%p276_p3), 23552  }
   0x9   : > { %s2361_s30 = smov (%p31_p4, %s2359_s30), 0  ;;  %279 = sbr.rel (%p276_p3) target bundleno = 786 (0x312), region = 48 }
   0xa   : > { %v378_v1 = vsel (!%p276_p3), %vm376_vm0, 4294967295, %v1855_v0  ;;  %p322_p6 = scmp.lt.s32.totalorder (!%p276_p3), %s1638_s8, 15  ;;  %v585_v21 = vld [vmem:[%s2349_s5] sm:$0xff] (!%p276_p3)  ;;  %v1959_v23 = vld [vmem:[%s2349_s5 + $0x8] sm:$0xff] (!%p276_p3)  ;;  %vm499_vm3 = vcmask (!%p276_p3), 523264   ;;  %p1723_p7 = scmp.ne.s32.totalorder (!%p276_p3), %s1837_s24, 0 }
   0xb   : > { %v379_v2 = vsel (!%p276_p3), %vm377_vm1, %v378_v1, 0  ;;  %v589_v22 = vld [vmem:[%s2349_s5 + $0x20] sm:$0xff] (!%p276_p3)  ;;  %v1964_v26 = vld [vmem:[%s2349_s5 + $0x28] sm:$0xff] (!%p276_p3) }
   0xc   : > { %v1659_v24 = vcombine.low (!%p276_p3), %v585_v21, %v589_v22  ;;  %v1660_v25 = vcombine.high (!%p276_p3), %v585_v21, %v589_v22  ;;  %v593_v27 = vld [vmem:[%s2349_s5 + $0x40] sm:$0xff] (!%p276_p3)  ;;  %v1661_v29 = vcombine.low (!%p276_p3), %v1959_v23, %v1964_v26  ;;  %v1662_v30 = vcombine.high (!%p276_p3), %v1959_v23, %v1964_v26  ;;  %v594_v62 = vld [vmem:[%s2349_s5 + $0x48] sm:$0xff] (!%p276_p3) }
   0xd   : > { %v597_v28 = vld [vmem:[%s2349_s5 + $0x60] sm:$0xff] (!%p276_p3)  ;;  %v598_v63 = vld [vmem:[%s2349_s5 + $0x68] sm:$0xff] (!%p276_p3) }
   0xe   : > { %v1668_v31 = vcombine.high (!%p276_p3), %v593_v27, %v597_v28  ;;  %v601_v32 = vld [vmem:[%s2349_s5 + $0x80] sm:$0xff] (!%p276_p3)  ;;  %v1667_v34 = vcombine.low (!%p276_p3), %v593_v27, %v597_v28  ;;  %v622_v26 = vld [vmem:[%s2349_s5 + $0x128] sm:$0xff] (!%p276_p3) }
   0xf   : > { %v605_v33 = vld [vmem:[%s2349_s5 + $0xa0] sm:$0xff] (!%p276_p3) }
  0x10   : > { %s2363_s25 = smov (!%p320_p5, %s1841_s25), 1  ;;  %s2365_s8 = smov (!%p322_p6, %s1638_s8), 15  ;;  %v1676_v35 = vcombine.high %v601_v32, %v605_v33  ;;  %v609_v36 = vld [vmem:[%s2349_s5 + $0xc0] sm:$0xff]  ;;  %v1675_v38 = vcombine.low %v601_v32, %v605_v33 }
  0x11   : > { %s1639_s9 = sshll.u32 %s2363_s25, 4  ;;  %s1641_s10 = sshll.u32 %s2363_s25, 1  ;;  %v613_v37 = vld [vmem:[%s2349_s5 + $0xe0] sm:$0xff] }
  0x12   : > { %s332_s13 = scalar_lea.vmem %s2345_s1, %s1641_s10  ;;  %s1644_s14 = sshll.u32 %s2363_s25, 3  ;;  %v1684_v39 = vcombine.high %v609_v36, %v613_v37  ;;  %v617_v40 = vld [vmem:[%s2349_s5 + $0x100] sm:$0xff]  ;;  %v1683_v42 = vcombine.low %v609_v36, %v613_v37  ;;  %v634_v36 = vld [vmem:[%s2349_s5 + $0x188] sm:$0xff] }
  0x13   : > { %s1938_s17 = scalar_lea.vmem %s2351_s7, %s1644_s14  ;;  %v351_v3 = vld [vmem:[%s332_s13] sm:$0x3]  ;;  %s325_s18 = sadd.s32 %s1639_s9, %s2365_s8 }
  0x14   : > { %v381_v4 = vand.u32 %v379_v2, %v351_v3  ;;  %s1640_s19 = sshll.u32 %s325_s18, 3  ;;  %s1727_s20 = sshll.u32 %s2363_s25, 5  ;;  %v621_v41 = vld [vmem:[%s2349_s5 + $0x120] sm:$0xff] }
  0x15   : > { %s327_s23 = scalar_lea.vmem %s2344_s0, %s1640_s19  ;;  %s337_s12 = scalar_lea.vmem %s2347_s3, %s1727_s20  ;;  %v1692_v43 = vcombine.high %v617_v40, %v621_v41  ;;  %v625_v44 = vld [vmem:[%s2349_s5 + $0x140] sm:$0xff]  ;;  %v1691_v46 = vcombine.low %v617_v40, %v621_v41 }
  0x16   : > { %1741 = vmatprep.subr.bf16.mxu0 %v381_v4  ;;  %v343_v5 = vld [vmem:[%s327_s23] sm:$0xff]  ;;  %v344_v6 = vld [vmem:[%s327_s23 + $0x8] sm:$0xff]  ;;  %v345_v7 = vld [vmem:[%s327_s23 + $0x10] sm:$0xff] }
  0x17   : > { %1742 = vmatpush3.bf16.msra.mxu0 %v381_v4  ;;  %v353_v8 = vpack.c.bf16 %v344_v6, %v343_v5  ;;  %v346_v9 = vld [vmem:[%s327_s23 + $0x18] sm:$0xff]  ;;  %v347_v10 = vld [vmem:[%s327_s23 + $0x20] sm:$0xff]  ;;  %v348_v11 = vld [vmem:[%s327_s23 + $0x28] sm:$0xff]  ;;  %v1670_v5 = vcombine.high %v594_v62, %v598_v63 }
  0x18   : > { %v354_v12 = vpack.c.bf16 %v346_v9, %v345_v7  ;;  %v355_v13 = vpack.c.bf16 %v348_v11, %v347_v10  ;;  %v349_v14 = vld [vmem:[%s327_s23 + $0x30] sm:$0xff]  ;;  %v350_v15 = vld [vmem:[%s327_s23 + $0x38] sm:$0xff]  ;;  %v1811_v16 = vld [vmem:[%s337_s12] sm:$0xff]   ;;  %1015 = vmatprep.subr.bf16.mxu0 %v1660_v25 }
  0x19   : > { %1743 = vmatprep.mubr.msk.bf16.mxu0 %vm363_vm2, %v353_v8  ;;  %v1812_v17 = vld [vmem:[%s337_s12 + $0x8] sm:$0xff]   ;;  %1751 = vmatprep.subr.bf16.mxu1 %v1811_v16  ;;  %v356_v18 = vpack.c.bf16 %v350_v15, %v349_v14  ;;  %v1813_v19 = vld [vmem:[%s337_s12 + $0x10] sm:$0xff]   ;;  %v1814_v20 = vld [vmem:[%s337_s12 + $0x18] sm:$0xff]   ;;  %v1669_v15 = vcombine.low %v594_v62, %v598_v63 }
  0x1a   : > { %1744 = vmatmul.mubr.msk.bf16.vlgmr.msra.gmra.mrb[0].mxu0 %vm363_vm2, %v354_v12  ;;  %1752 = vmatpush3.bf16.msra.mxu1 %v1811_v16  ;;  %v629_v45 = vld [vmem:[%s2349_s5 + $0x160] sm:$0xff]  ;;  %v602_v8 = vld [vmem:[%s2349_s5 + $0x88] sm:$0xff] }
  0x1b   : > { %1747 = vmatprep.mubr.msk.bf16.mxu0 %vm363_vm2, %v355_v13  ;;  %1753 = vmatprep.subr.bf16.mxu1 %v1812_v17  ;;  %v1700_v47 = vcombine.high %v625_v44, %v629_v45  ;;  %v1699_v48 = vcombine.low %v625_v44, %v629_v45  ;;  %v1645_v49 = vld [vmem:[%s2346_s2] ss:$0 sm:$0xff]  ;;  %v606_v9 = vld [vmem:[%s2349_s5 + $0xa8] sm:$0xff] }
  0x1c   : > { %1016 = vmatpush1.bf16.msra.mxu0 %v1659_v24  ;;  %v1677_v24 = vcombine.low %v602_v8, %v606_v9  ;;  %v618_v25 = vld [vmem:[%s2349_s5 + $0x108] sm:$0xff] }
  0x1d   : > { %1017 = vmatprep.subr.bf16.mxu0 %v1668_v31  ;;  %v1694_v28 = vcombine.high %v618_v25, %v622_v26  ;;  %v1693_v31 = vcombine.low %v618_v25, %v622_v26  ;;  %v642_v44 = vld [vmem:[%s2349_s5 + $0x1c8] sm:$0xff] }
  0x1e   : > { %1754 = vmatpush3.bf16.msra.mxu1 %v1812_v17  ;;  %v1678_v17 = vcombine.high %v602_v8, %v606_v9  ;;  %v596_v8 = vld [vmem:[%s2349_s5 + $0x58] sm:$0xff] }
  0x1f   : > { %1755 = vmatprep.subr.bf16.mxu1 %v1813_v19  ;;  %v600_v9 = vld [vmem:[%s2349_s5 + $0x78] sm:$0xff] }
  0x20   : > { %1018 = vmatpush1.bf16.msra.mxu0 %v1667_v34  ;;  %v633_v34 = vld [vmem:[%s2349_s5 + $0x180] sm:$0xff] }
  0x21   : > { %1019 = vmatprep.subr.bf16.mxu0 %v1676_v35  ;;  %v637_v35 = vld [vmem:[%s2349_s5 + $0x1a0] sm:$0xff] }
  0x22   : > { %1748 = vmatmul.mubr.msk.bf16.gmra.mrb[4].mxu0 %vm363_vm2, %v356_v18  ;;  %1756 = vmatpush3.bf16.msra.mxu1 %v1813_v19  ;;  %v610_v19 = vld [vmem:[%s2349_s5 + $0xc8] sm:$0xff]  ;;  %v1708_v37 = vcombine.high %v633_v34, %v637_v35 }
  0x23   : > { %1757 = vmatprep.subr.bf16.mxu1 %v1814_v20 }
  0x24   : > { %1020 = vmatpush1.bf16.msra.mxu0 %v1675_v38  ;;  %v638_v38 = vld [vmem:[%s2349_s5 + $0x1a8] sm:$0xff] }
  0x25   : > { %1021 = vmatprep.subr.bf16.mxu0 %v1684_v39  ;;  %v1707_v39 = vcombine.low %v633_v34, %v637_v35  ;;  %v1709_v40 = vcombine.low %v634_v36, %v638_v38  ;;  %v1710_v41 = vcombine.high %v634_v36, %v638_v38  ;;  %v611_v34 = vld [vmem:[%s2349_s5 + $0xd0] sm:$0xff]  ;;  %v616_v38 = vld [vmem:[%s2349_s5 + $0xf8] sm:$0xff] }
  0x26   : > { %1758 = vmatpush3.bf16.msra.mxu1 %v1814_v20  ;;  %v614_v20 = vld [vmem:[%s2349_s5 + $0xe8] sm:$0xff]  ;;  %v615_v36 = vld [vmem:[%s2349_s5 + $0xf0] sm:$0xff] }
  0x27   : > { %1088 = vmatprep.subr.bf16.mxu1 %v1662_v30  ;;  %v1686_v23 = vcombine.high %v610_v19, %v614_v20  ;;  %v1685_v27 = vcombine.low %v610_v19, %v614_v20  ;;  %v630_v30 = vld [vmem:[%s2349_s5 + $0x168] sm:$0xff]  ;;  %v607_v20 = vld [vmem:[%s2349_s5 + $0xb0] sm:$0xff] }
  0x28   : > { %1022 = vmatpush1.bf16.msra.mxu0 %v1683_v42  ;;  %v641_v42 = vld [vmem:[%s2349_s5 + $0x1c0] sm:$0xff] }
  0x29   : > { %1023 = vmatprep.subr.bf16.mxu0 %v1692_v43  ;;  %v645_v43 = vld [vmem:[%s2349_s5 + $0x1e0] sm:$0xff] }
  0x2a   : > { %v1716_v45 = vcombine.high %v641_v42, %v645_v43 }
  0x2c   : > { %1024 = vmatpush1.bf16.msra.mxu0 %v1691_v46  ;;  %v646_v46 = vld [vmem:[%s2349_s5 + $0x1e8] sm:$0xff] }
  0x2d   : > { %1025 = vmatprep.subr.bf16.mxu0 %v1700_v47  ;;  %v1715_v47 = vcombine.low %v641_v42, %v645_v43 }
  0x30   : > { %1026 = vmatpush1.bf16.msra.mxu0 %v1699_v48  ;;  %v1717_v48 = vcombine.low %v642_v44, %v646_v46 }
  0x31   : > { %1027 = vmatprep.subr.bf16.mxu0 %v1708_v37  ;;  %v612_v37 = vld [vmem:[%s2349_s5 + $0xd8] sm:$0xff] }
  0x34   : > { %1028 = vmatpush1.bf16.msra.mxu0 %v1707_v39 }
  0x35   : > { %1029 = vmatprep.subr.bf16.mxu0 %v1716_v45  ;;  %v1690_v45 = vcombine.high %v612_v37, %v616_v38 }
  0x38   : > { %1030 = vmatpush1.bf16.msra.mxu0 %v1715_v47  ;;  %v623_v47 = vld [vmem:[%s2349_s5 + $0x130] sm:$0xff] }
  0xed   : > { %v1745_v50 = vpop.f32.mrb[0].mxu0 }
  0xee   : > { %v426_v51 = vadd.f32 %v1745_v50, %v1645_v49  ;;  %v417_v52 = vpop.f32.mrb[1].mxu0  ;;  %v587_v50 = vld [vmem:[%s2349_s5 + $0x10] sm:$0xff] }
  0xef   : > { %v418_v53 = vadd.f32 %v1645_v49, %v417_v52  ;;  %v1746_v54 = vpop.f32.mrb[2].mxu0  ;;  %v588_v52 = vld [vmem:[%s2349_s5 + $0x18] sm:$0xff] }
  0xf0   : > { %v429_v55 = vadd.f32 %v1746_v54, %v1645_v49  ;;  %v420_v56 = vpop.f32.mrb[3].mxu0  ;;  %v450_v58 = vmax.f32 %v426_v51, 0.0  ;;  %v591_v51 = vld [vmem:[%s2349_s5 + $0x30] sm:$0xff]  ;;  %v592_v54 = vld [vmem:[%s2349_s5 + $0x38] sm:$0xff] }
  0xf1   : > { %v421_v57 = vadd.f32 %v1645_v49, %v420_v56  ;;  %v448_v60 = vmax.f32 %v418_v53, 0.0  ;;  %v1664_v53 = vcombine.high %v587_v50, %v591_v51  ;;  %v1663_v56 = vcombine.low %v587_v50, %v591_v51 }
  0xf2   : > { %v451_v59 = vmax.f32 %v429_v55, 0.0  ;;  %v1856_v55 = vmov 0   ;;  %v1687_v50 = vcombine.low %v611_v34, %v615_v36  ;;  %v1689_v51 = vcombine.low %v612_v37, %v616_v38 }
  0xf3   : > { %v449_v61 = vmax.f32 %v421_v57, 0.0  ;;  %1047 = vmatprep.mubr.bf16.mxu0 %v1856_v55  ;;  %v1665_v57 = vcombine.low %v588_v52, %v592_v54  ;;  %1161 = vmatprep.subr.bf16.mxu0 %v1664_v53 }
  0xf4   : > { %v466_v0 = vpack.c.bf16 %v451_v59, %v450_v58  ;;  %v1666_v58 = vcombine.high %v588_v52, %v592_v54  ;;  %v1650_v59 = vld [vmem:[%s2348_s4] ss:$0 sm:$0xff]  ;;  %v627_v54 = vld [vmem:[%s2349_s5 + $0x150] sm:$0xff] }
  0xf5   : > { %v1749_v1 = vpop.f32.mrb[4].mxu0  ;;  %v465_v2 = vpack.c.bf16 %v449_v61, %v448_v60 }
  0xf6   : > { %v442_v3 = vadd.f32 %v1749_v1, %v1645_v49  ;;  %v433_v4 = vpop.f32.mrb[5].mxu0 }
  0xf7   : > { %v434_v6 = vadd.f32 %v1645_v49, %v433_v4  ;;  %1759 = vmatprep.mubr.msk.bf16.mxu1 %vm499_vm3, %v465_v2  ;;  %v1750_v7 = vpop.f32.mrb[6].mxu0  ;;  %v595_v4 = vld [vmem:[%s2349_s5 + $0x50] sm:$0xff] }
  0xf8   : > { %v454_v10 = vmax.f32 %v442_v3, 0.0  ;;  %v445_v11 = vadd.f32 %v1750_v7, %v1645_v49  ;;  %1760 = vmatmul.mubr.msk.bf16.vlgmr.msra.gmra.mrb[0].mxu1 %vm499_vm3, %v466_v0  ;;  %v436_v12 = vpop.f32.mrb[7].mxu0  ;;  %v599_v7 = vld [vmem:[%s2349_s5 + $0x70] sm:$0xff] }
  0xf9   : > { %v452_v13 = vmax.f32 %v434_v6, 0.0  ;;  %v437_v14 = vadd.f32 %v1645_v49, %v436_v12  ;;  %1089 = vmatpush1.bf16.msra.mxu1 %v1661_v29  ;;  %v626_v29 = vld [vmem:[%s2349_s5 + $0x148] sm:$0xff]  ;;  %v1718_v49 = vcombine.high %v642_v44, %v646_v46  ;;  %v1688_v44 = vcombine.high %v611_v34, %v615_v36  ;;  %v619_v46 = vld [vmem:[%s2349_s5 + $0x110] sm:$0xff] }
  0xfa   : > { %v455_v16 = vmax.f32 %v445_v11, 0.0  ;;  %1090 = vmatprep.subr.bf16.mxu1 %v1670_v5  ;;  %v1702_v32 = vcombine.high %v626_v29, %v630_v30  ;;  %v1701_v33 = vcombine.low %v626_v29, %v630_v30  ;;  %v1673_v29 = vcombine.low %v596_v8, %v600_v9 }
  0xfb   : > { %v453_v18 = vmax.f32 %v437_v14, 0.0  ;;  %v1696_v52 = vcombine.high %v619_v46, %v623_v47 }
  0xfc   : > { %v468_v21 = vpack.c.bf16 %v455_v16, %v454_v10  ;;  %v1674_v16 = vcombine.high %v596_v8, %v600_v9  ;;  %v647_v8 = vld [vmem:[%s2349_s5 + $0x1f0] sm:$0xff]  ;;  %v644_v9 = vld [vmem:[%s2349_s5 + $0x1d8] sm:$0xff] }
  0xfd   : > { %v467_v22 = vpack.c.bf16 %v453_v18, %v452_v13  ;;  %1091 = vmatpush1.bf16.msra.mxu1 %v1669_v15  ;;  %v1672_v15 = vcombine.high %v595_v4, %v599_v7 }
  0xfe   : > { %1092 = vmatprep.subr.bf16.mxu1 %v1678_v17  ;;  %v603_v17 = vld [vmem:[%s2349_s5 + $0x90] sm:$0xff] }
  0xff   : > { %1763 = vmatprep.mubr.msk.bf16.mxu1 %vm499_vm3, %v467_v22  ;;  %v608_v22 = vld [vmem:[%s2349_s5 + $0xb8] sm:$0xff] }
 0x100   : > { %1764 = vmatmul.mubr.msk.bf16.gmra.mrb[4].mxu1 %vm499_vm3, %v468_v21  ;;  %v604_v21 = vld [vmem:[%s2349_s5 + $0x98] sm:$0xff] }
 0x101   : > { %1093 = vmatpush1.bf16.msra.mxu1 %v1677_v24  ;;  %1120 = vmatprep.mubr.bf16.mxu1 %v1856_v55  ;;  %v1681_v42 = vcombine.low %v604_v21, %v608_v22 }
 0x102   : > { %1094 = vmatprep.subr.bf16.mxu1 %v1686_v23 }
 0x105   : > { %1095 = vmatpush1.bf16.msra.mxu1 %v1685_v27 }
 0x106   : > { %1096 = vmatprep.subr.bf16.mxu1 %v1694_v28  ;;  %v1671_v28 = vcombine.low %v595_v4, %v599_v7  ;;  %v643_v7 = vld [vmem:[%s2349_s5 + $0x1d0] sm:$0xff] }
 0x109   : > { %1097 = vmatpush1.bf16.msra.mxu1 %v1693_v31 }
 0x10a   : > { %1098 = vmatprep.subr.bf16.mxu1 %v1702_v32  ;;  %v1680_v32 = vcombine.high %v603_v17, %v607_v20 }
 0x10d   : > { %1099 = vmatpush1.bf16.msra.mxu1 %v1701_v33  ;;  %v1682_v33 = vcombine.high %v604_v21, %v608_v22  ;;  %v2210_v21 = vld [vmem:[%s2350_s6] sm:$0xff] }
 0x10e   : > { %1100 = vmatprep.subr.bf16.mxu1 %v1710_v41  ;;  %v1679_v41 = vcombine.low %v603_v17, %v607_v20  ;;  %v1719_v17 = vcombine.low %v643_v7, %v647_v8 }
 0x111   : > { %1101 = vmatpush1.bf16.msra.mxu1 %v1709_v40 }
 0x112   : > { %1102 = vmatprep.subr.bf16.mxu1 %v1718_v49  ;;  %v624_v49 = vld [vmem:[%s2349_s5 + $0x138] sm:$0xff] }
 0x115   : > { %1103 = vmatpush1.bf16.msra.mxu1 %v1717_v48  ;;  %v620_v48 = vld [vmem:[%s2349_s5 + $0x118] sm:$0xff] }
 0x116   : > { %1234 = vmatprep.subr.bf16.mxu1 %v1666_v58  ;;  %v1698_v53 = vcombine.high %v620_v48, %v624_v49  ;;  %v632_v58 = vld [vmem:[%s2349_s5 + $0x178] sm:$0xff] }
 0x1cb   : > { %v1761_v60 = vpop.f32.mrb[0].mxu1 }
 0x1cc   : > { %v555_v61 = vadd.f32 %v1761_v60, %v1650_v59  ;;  %v546_v62 = vpop.f32.mrb[1].mxu1  ;;  %v1697_v60 = vcombine.low %v620_v48, %v624_v49 }
 0x1cd   : > { %v547_v63 = vadd.f32 %v1650_v59, %v546_v62  ;;  %v1762_v0 = vpop.f32.mrb[2].mxu1 }
 0x1ce   : > { %v558_v1 = vadd.f32 %v1762_v0, %v1650_v59  ;;  %v549_v2 = vpop.f32.mrb[3].mxu1  ;;  %v579_v5 = vmax.f32 %v555_v61, 0.0  ;;  %v639_v0 = vld [vmem:[%s2349_s5 + $0x1b0] sm:$0xff] }
 0x1cf   : > { %v550_v3 = vadd.f32 %v1650_v59, %v549_v2  ;;  %v577_v10 = vmax.f32 %v547_v63, 0.0  ;;  %v635_v63 = vld [vmem:[%s2349_s5 + $0x190] sm:$0xff]  ;;  %v640_v2 = vld [vmem:[%s2349_s5 + $0x1b8] sm:$0xff] }
 0x1d0   : > { %v580_v6 = vmax.f32 %v558_v1, 0.0  ;;  %v636_v1 = vld [vmem:[%s2349_s5 + $0x198] sm:$0xff] }
 0x1d1   : > { %v578_v11 = vmax.f32 %v550_v3, 0.0 }
 0x1d2   : > { %v2093_v12 = vpack.c.bf16 %v580_v6, %v579_v5  ;;  %v1712_v5 = vcombine.high %v635_v63, %v639_v0  ;;  %v1714_v6 = vcombine.high %v636_v1, %v640_v2 }
 0x1d3   : > { %v2095_v13 = vpack.c.bf16 %v578_v11, %v577_v10  ;;  %v1765_v14 = vpop.f32.mrb[4].mxu1  ;;  %v648_v10 = vld [vmem:[%s2349_s5 + $0x1f8] sm:$0xff]  ;;  %v1711_v11 = vcombine.low %v635_v63, %v639_v0 }
 0x1d4   : > { %v571_v18 = vadd.f32 %v1765_v14, %v1650_v59  ;;  %v562_v19 = vpop.f32.mrb[5].mxu1  ;;  %v1713_v14 = vcombine.low %v636_v1, %v640_v2 }
 0x1d5   : > { %v563_v24 = vadd.f32 %v1650_v59, %v562_v19  ;;  %1048 = vmatmul.mubr.bf16.vlgmr.msra.gmra.mrb[8].mxu0 %v2095_v13  ;;  %1121 = vmatmul.mubr.bf16.vlgmr.msra.gmra.mrb[8].mxu1 %v2095_v13  ;;  %v1766_v23 = vpop.f32.mrb[6].mxu1 }
 0x1d6   : > { %v583_v25 = vmax.f32 %v571_v18, 0.0  ;;  %1162 = vmatpush1.bf16.msra.mxu0 %v1663_v56  ;;  %1235 = vmatpush1.bf16.msra.mxu1 %v1665_v57  ;;  %v574_v26 = vadd.f32 %v1766_v23, %v1650_v59  ;;  %v565_v27 = vpop.f32.mrb[7].mxu1  ;;  %v631_v56 = vld [vmem:[%s2349_s5 + $0x170] sm:$0xff]  ;;  %v628_v57 = vld [vmem:[%s2349_s5 + $0x158] sm:$0xff]  ;;  %v1721_v18 = vcombine.low %v644_v9, %v648_v10 }
 0x1d7   : > { %v581_v30 = vmax.f32 %v563_v24, 0.0  ;;  %v566_v31 = vadd.f32 %v1650_v59, %v565_v27  ;;  %1163 = vmatprep.subr.bf16.mxu0 %v1672_v15  ;;  %1236 = vmatprep.subr.bf16.mxu1 %v1674_v16  ;;  %v1695_v59 = vcombine.low %v619_v46, %v623_v47  ;;  %v1704_v61 = vcombine.high %v627_v54, %v631_v56 }
 0x1d8   : > { %v584_v35 = vmax.f32 %v574_v26, 0.0  ;;  %1057 = vmatprep.mubr.bf16.mxu0 %v1856_v55  ;;  %1130 = vmatprep.mubr.bf16.mxu1 %v1856_v55  ;;  %v1706_v62 = vcombine.high %v628_v57, %v632_v58  ;;  %v1703_v3 = vcombine.low %v627_v54, %v631_v56  ;;  %v1705_v4 = vcombine.low %v628_v57, %v632_v58 }
 0x1d9   : > { %v582_v39 = vmax.f32 %v566_v31, 0.0  ;;  %v1720_v15 = vcombine.high %v643_v7, %v647_v8  ;;  %v1722_v16 = vcombine.high %v644_v9, %v648_v10 }
 0x1da   : > { %v2125_v40 = vpack.c.bf16 %v584_v35, %v583_v25  ;;  %1164 = vmatpush1.bf16.msra.mxu0 %v1671_v28  ;;  %1237 = vmatpush1.bf16.msra.mxu1 %v1673_v29 }
 0x1db   : > { %v2127_v43 = vpack.c.bf16 %v582_v39, %v581_v30  ;;  %1165 = vmatprep.subr.bf16.mxu0 %v1680_v32  ;;  %1238 = vmatprep.subr.bf16.mxu1 %v1682_v33 }
 0x1dd   : > { %1058 = vmatmul.mubr.bf16.gmra.mrb[12].mxu0 %v2093_v12  ;;  %1131 = vmatmul.mubr.bf16.gmra.mrb[12].mxu1 %v2093_v12 }
 0x1de   : > { %1166 = vmatpush1.bf16.msra.mxu0 %v1679_v41  ;;  %1239 = vmatpush1.bf16.msra.mxu1 %v1681_v42 }
 0x1df   : > { %1167 = vmatprep.subr.bf16.mxu0 %v1688_v44  ;;  %1240 = vmatprep.subr.bf16.mxu1 %v1690_v45 }
 0x1e0   : > { %1067 = vmatprep.mubr.bf16.mxu0 %v1856_v55  ;;  %1140 = vmatprep.mubr.bf16.mxu1 %v1856_v55 }
 0x1e2   : > { %1168 = vmatpush1.bf16.msra.mxu0 %v1687_v50  ;;  %1241 = vmatpush1.bf16.msra.mxu1 %v1689_v51 }
 0x1e3   : > { %1169 = vmatprep.subr.bf16.mxu0 %v1696_v52  ;;  %1242 = vmatprep.subr.bf16.mxu1 %v1698_v53 }
 0x1e5   : > { %1068 = vmatmul.mubr.bf16.gmra.mrb[16].mxu0 %v2127_v43  ;;  %1141 = vmatmul.mubr.bf16.gmra.mrb[16].mxu1 %v2127_v43 }
 0x1e6   : > { %1170 = vmatpush1.bf16.msra.mxu0 %v1695_v59  ;;  %1243 = vmatpush1.bf16.msra.mxu1 %v1697_v60 }
 0x1e7   : > { %1171 = vmatprep.subr.bf16.mxu0 %v1704_v61  ;;  %1244 = vmatprep.subr.bf16.mxu1 %v1706_v62 }
 0x1e8   : > { %1077 = vmatprep.mubr.bf16.mxu0 %v1856_v55  ;;  %1150 = vmatprep.mubr.bf16.mxu1 %v1856_v55 }
 0x1ea   : > { %1172 = vmatpush1.bf16.msra.mxu0 %v1703_v3  ;;  %1245 = vmatpush1.bf16.msra.mxu1 %v1705_v4 }
 0x1eb   : > { %1173 = vmatprep.subr.bf16.mxu0 %v1712_v5  ;;  %1246 = vmatprep.subr.bf16.mxu1 %v1714_v6 }
 0x1ed   : > { %1078 = vmatmul.mubr.bf16.gmra.mrb[20].mxu0 %v2125_v40  ;;  %1151 = vmatmul.mubr.bf16.gmra.mrb[20].mxu1 %v2125_v40 }
 0x1ee   : > { %1174 = vmatpush1.bf16.msra.mxu0 %v1711_v11  ;;  %1247 = vmatpush1.bf16.msra.mxu1 %v1713_v14 }
 0x1ef   : > { %1175 = vmatprep.subr.bf16.mxu0 %v1720_v15  ;;  %1248 = vmatprep.subr.bf16.mxu1 %v1722_v16 }
 0x1f0   : > { %1193 = vmatprep.mubr.bf16.mxu0 %v1856_v55  ;;  %1266 = vmatprep.mubr.bf16.mxu1 %v1856_v55 }
 0x1f2   : > { %1176 = vmatpush1.bf16.msra.mxu0 %v1719_v17  ;;  %1249 = vmatpush1.bf16.msra.mxu1 %v1721_v18 }
 0x1f5   : > { %1194 = vmatmul.mubr.bf16.vlgmr.msra.gmra.mrb[24].mxu0 %v2095_v13  ;;  %1267 = vmatmul.mubr.bf16.vlgmr.msra.gmra.mrb[24].mxu1 %v2095_v13  ;;  %v655_v13 = vlaneseq }
 0x1f6   : > { %1203 = vmatprep.mubr.bf16.mxu0 %v1856_v55  ;;  %1276 = vmatprep.mubr.bf16.mxu1 %v1856_v55 }
 0x1f7   : > { %v2203_v19 = vshrl.u32 %v655_v13, 7 }
 0x1f9   : > { %v665_v20 = vsub.s32 2, %v2203_v19  ;;  %v661_v22 = vsub.s32 1, %v2203_v19 }
 0x1fb   : > { %v2218_v23 = vrot.slane %v2210_v21, %v665_v20  ;;  %v2221_v27 = vrot.slane %v2210_v21, %v661_v22 }
 0x1fd   : > { %1204 = vmatmul.mubr.bf16.gmra.mrb[28].mxu0 %v2093_v12  ;;  %1277 = vmatmul.mubr.bf16.gmra.mrb[28].mxu1 %v2093_v12  ;;  %v657_v12 = vsub.s32 0, %v2203_v19 }
 0x1fe   : > { %1213 = vmatprep.mubr.bf16.mxu0 %v1856_v55  ;;  %1286 = vmatprep.mubr.bf16.mxu1 %v1856_v55 }
 0x1ff   : > { %v2215_v24 = vrot.slane %v2210_v21, %v657_v12 }
 0x205   : > { %1214 = vmatmul.mubr.bf16.gmra.mrb[32].mxu0 %v2127_v43  ;;  %1287 = vmatmul.mubr.bf16.gmra.mrb[32].mxu1 %v2127_v43 }
 0x206   : > { %1223 = vmatprep.mubr.bf16.mxu0 %v1856_v55  ;;  %1296 = vmatprep.mubr.bf16.mxu1 %v1856_v55  ;;  %v669_v55 = vsub.s32 3, %v2203_v19 }
 0x208   : > { %v2224_v28 = vrot.slane %v2210_v21, %v669_v55 }
 0x20d   : > { %1224 = vmatmul.mubr.bf16.gmra.mrb[36].mxu0 %v2125_v40  ;;  %1297 = vmatmul.mubr.bf16.gmra.mrb[36].mxu1 %v2125_v40 }
 0x2a8   : > { %v1049_v25 = vpop.f32.mrb[8].mxu0  ;;  %v1122_v26 = vpop.f32.mrb[8].mxu1 }
 0x2a9   : > { %v1051_v29 = vpop.f32.mrb[9].mxu0  ;;  %v1124_v30 = vpop.f32.mrb[9].mxu1  ;;  %v1050_v33 = vadd.f32 %v1049_v25, %v2215_v24  ;;  %v1123_v34 = vadd.f32 %v1122_v26, %v2218_v23 }
 0x2aa   : > { %v1053_v31 = vpop.f32.mrb[10].mxu0  ;;  %v1126_v32 = vpop.f32.mrb[10].mxu1  ;;  %v1052_v39 = vadd.f32 %v1051_v29, %v2221_v27  ;;  %v1125_v40 = vadd.f32 %v1124_v30, %v2224_v28 }
 0x2ab   : > { %v1054_v35 = vadd.f32 %v1053_v31, %v2215_v24  ;;  %v1127_v36 = vadd.f32 %v1126_v32, %v2218_v23  ;;  %v1055_v37 = vpop.f32.mrb[11].mxu0  ;;  %v1128_v38 = vpop.f32.mrb[11].mxu1 }
 0x2ac   : > { %v1056_v41 = vadd.f32 %v1055_v37, %v2221_v27  ;;  %v1129_v42 = vadd.f32 %v1128_v38, %v2224_v28 }
 0x2ad   : > { %v1307_v43 = vmax.f32 %v1050_v33, %v1054_v35  ;;  %v1333_v44 = vmax.f32 %v1123_v34, %v1127_v36 }
 0x2ae   : > { %v1320_v45 = vmax.f32 %v1052_v39, %v1056_v41  ;;  %v1346_v46 = vmax.f32 %v1125_v40, %v1129_v42 }
 0x2b0   : > { %v1059_v47 = vpop.f32.mrb[12].mxu0  ;;  %v1132_v48 = vpop.f32.mrb[12].mxu1 }
 0x2b1   : > { %v1060_v49 = vadd.f32 %v1059_v47, %v2215_v24  ;;  %v1133_v50 = vadd.f32 %v1132_v48, %v2218_v23  ;;  %v1061_v51 = vpop.f32.mrb[13].mxu0  ;;  %v1134_v52 = vpop.f32.mrb[13].mxu1 }
 0x2b2   : > { %v1062_v53 = vadd.f32 %v1061_v51, %v2221_v27  ;;  %v1135_v54 = vadd.f32 %v1134_v52, %v2224_v28  ;;  %v1063_v56 = vpop.f32.mrb[14].mxu0  ;;  %v1136_v57 = vpop.f32.mrb[14].mxu1 }
 0x2b3   : > { %v1308_v58 = vmax.f32 %v1307_v43, %v1060_v49  ;;  %v1334_v59 = vmax.f32 %v1333_v44, %v1133_v50  ;;  %v1064_v60 = vadd.f32 %v1063_v56, %v2215_v24  ;;  %v1137_v61 = vadd.f32 %v1136_v57, %v2218_v23  ;;  %v1065_v62 = vpop.f32.mrb[15].mxu0  ;;  %v1138_v63 = vpop.f32.mrb[15].mxu1 }
 0x2b4   : > { %v1321_v0 = vmax.f32 %v1320_v45, %v1062_v53  ;;  %v1347_v1 = vmax.f32 %v1346_v46, %v1135_v54  ;;  %v1066_v2 = vadd.f32 %v1065_v62, %v2221_v27  ;;  %v1139_v3 = vadd.f32 %v1138_v63, %v2224_v28 }
 0x2b5   : > { %v1309_v4 = vmax.f32 %v1308_v58, %v1064_v60  ;;  %v1335_v5 = vmax.f32 %v1334_v59, %v1137_v61  ;;  %v673_v43 = vsub.s32 4, %v2203_v19  ;;  %v681_v44 = vsub.s32 6, %v2203_v19 }
 0x2b6   : > { %v1322_v6 = vmax.f32 %v1321_v0, %v1066_v2  ;;  %v1348_v7 = vmax.f32 %v1347_v1, %v1139_v3  ;;  %v677_v49 = vsub.s32 5, %v2203_v19  ;;  %v685_v50 = vsub.s32 7, %v2203_v19 }
 0x2b7   : > { %v2263_v0 = vrot.slane %v2210_v21, %v673_v43  ;;  %v2266_v1 = vrot.slane %v2210_v21, %v681_v44 }
 0x2b8   : > { %v1069_v8 = vpop.f32.mrb[16].mxu0  ;;  %v1142_v9 = vpop.f32.mrb[16].mxu1  ;;  %v2272_v3 = vrot.slane %v2210_v21, %v685_v50 }
 0x2b9   : > { %v1070_v10 = vadd.f32 %v1069_v8, %v2215_v24  ;;  %v1143_v11 = vadd.f32 %v1142_v9, %v2218_v23  ;;  %v1071_v14 = vpop.f32.mrb[17].mxu0  ;;  %v1144_v15 = vpop.f32.mrb[17].mxu1 }
 0x2ba   : > { %v1072_v16 = vadd.f32 %v1071_v14, %v2221_v27  ;;  %v1145_v17 = vadd.f32 %v1144_v15, %v2224_v28  ;;  %v1073_v18 = vpop.f32.mrb[18].mxu0  ;;  %v1146_v13 = vpop.f32.mrb[18].mxu1 }
 0x2bb   : > { %v1310_v12 = vmax.f32 %v1309_v4, %v1070_v10  ;;  %v1336_v20 = vmax.f32 %v1335_v5, %v1143_v11  ;;  %v1074_v22 = vadd.f32 %v1073_v18, %v2215_v24  ;;  %v1147_v55 = vadd.f32 %v1146_v13, %v2218_v23  ;;  %v1075_v25 = vpop.f32.mrb[19].mxu0  ;;  %v1148_v26 = vpop.f32.mrb[19].mxu1 }
 0x2bc   : > { %v1323_v29 = vmax.f32 %v1322_v6, %v1072_v16  ;;  %v1349_v30 = vmax.f32 %v1348_v7, %v1145_v17  ;;  %v1076_v31 = vadd.f32 %v1075_v25, %v2221_v27  ;;  %v1149_v32 = vadd.f32 %v1148_v26, %v2224_v28 }
 0x2bd   : > { %v1311_v33 = vmax.f32 %v1310_v12, %v1074_v22  ;;  %v1337_v34 = vmax.f32 %v1336_v20, %v1147_v55 }
 0x2be   : > { %v1324_v35 = vmax.f32 %v1323_v29, %v1076_v31  ;;  %v1350_v36 = vmax.f32 %v1349_v30, %v1149_v32 }
 0x2c0   : > { %v1079_v37 = vpop.f32.mrb[20].mxu0  ;;  %v1152_v38 = vpop.f32.mrb[20].mxu1 }
 0x2c1   : > { %v1080_v39 = vadd.f32 %v1079_v37, %v2215_v24  ;;  %v1153_v40 = vadd.f32 %v1152_v38, %v2218_v23  ;;  %v1081_v41 = vpop.f32.mrb[21].mxu0  ;;  %v1154_v42 = vpop.f32.mrb[21].mxu1 }
 0x2c2   : > { %v1082_v45 = vadd.f32 %v1081_v41, %v2221_v27  ;;  %v1155_v46 = vadd.f32 %v1154_v42, %v2224_v28  ;;  %v1083_v47 = vpop.f32.mrb[22].mxu0  ;;  %v1156_v48 = vpop.f32.mrb[22].mxu1 }
 0x2c3   : > { %v1312_v51 = vmax.f32 %v1311_v33, %v1080_v39  ;;  %v1338_v52 = vmax.f32 %v1337_v34, %v1153_v40  ;;  %v1084_v53 = vadd.f32 %v1083_v47, %v2215_v24  ;;  %v1157_v54 = vadd.f32 %v1156_v48, %v2218_v23  ;;  %v1085_v56 = vpop.f32.mrb[23].mxu0  ;;  %v1158_v57 = vpop.f32.mrb[23].mxu1 }
 0x2c4   : > { %v1325_v58 = vmax.f32 %v1324_v35, %v1082_v45  ;;  %v1351_v59 = vmax.f32 %v1350_v36, %v1155_v46  ;;  %v1086_v60 = vadd.f32 %v1085_v56, %v2221_v27  ;;  %v1159_v61 = vadd.f32 %v1158_v57, %v2224_v28 }
 0x2c5   : > { %v1313_v62 = vmax.f32 %v1312_v51, %v1084_v53  ;;  %v1339_v63 = vmax.f32 %v1338_v52, %v1157_v54  ;;  %v2269_v23 = vrot.slane %v2210_v21, %v677_v49 }
 0x2c6   : > { %v1326_v2 = vmax.f32 %v1325_v58, %v1086_v60  ;;  %v1352_v24 = vmax.f32 %v1351_v59, %v1159_v61 }
 0x2c7   : > { %v1314_v4 = vrot.slane %v1313_v62, 4  ;;  %v1340_v27 = vrot.slane %v1339_v63, 4 }
 0x2c8   : > { %v1327_v5 = vrot.slane %v1326_v2, 4  ;;  %v1353_v28 = vrot.slane %v1352_v24, 4  ;;  %v1195_v6 = vpop.f32.mrb[24].mxu0  ;;  %v1268_v7 = vpop.f32.mrb[24].mxu1 }
 0x2c9   : > { %v1315_v8 = vmax.f32 %v1313_v62, %v1314_v4  ;;  %v1341_v9 = vmax.f32 %v1339_v63, %v1340_v27  ;;  %v1196_v10 = vadd.f32 %v1195_v6, %v2263_v0  ;;  %v1269_v11 = vadd.f32 %v1268_v7, %v2266_v1  ;;  %v1197_v14 = vpop.f32.mrb[25].mxu0  ;;  %v1270_v15 = vpop.f32.mrb[25].mxu1 }
 0x2ca   : > { %v1328_v16 = vmax.f32 %v1326_v2, %v1327_v5  ;;  %v1354_v17 = vmax.f32 %v1352_v24, %v1353_v28  ;;  %v1198_v18 = vadd.f32 %v1197_v14, %v2269_v23  ;;  %v1271_v21 = vadd.f32 %v1270_v15, %v2272_v3  ;;  %v1199_v13 = vpop.f32.mrb[26].mxu0  ;;  %v1272_v12 = vpop.f32.mrb[26].mxu1 }
 0x2cb   : > { %v1316_v20 = vrot.slane %v1315_v8, 2  ;;  %v1342_v22 = vrot.slane %v1341_v9, 2  ;;  %v1200_v55 = vadd.f32 %v1199_v13, %v2263_v0  ;;  %v1273_v25 = vadd.f32 %v1272_v12, %v2266_v1  ;;  %v1201_v26 = vpop.f32.mrb[27].mxu0  ;;  %v1274_v29 = vpop.f32.mrb[27].mxu1 }
 0x2cc   : > { %v1329_v30 = vrot.slane %v1328_v16, 2  ;;  %v1355_v31 = vrot.slane %v1354_v17, 2  ;;  %v1202_v32 = vadd.f32 %v1201_v26, %v2269_v23  ;;  %v1275_v33 = vadd.f32 %v1274_v29, %v2272_v3 }
 0x2cd   : > { %v1317_v34 = vmax.f32 %v1315_v8, %v1316_v20  ;;  %v1343_v35 = vmax.f32 %v1341_v9, %v1342_v22  ;;  %v1359_v36 = vmax.f32 %v1196_v10, %v1200_v55  ;;  %v1385_v37 = vmax.f32 %v1269_v11, %v1273_v25 }
 0x2ce   : > { %v1330_v38 = vmax.f32 %v1328_v16, %v1329_v30  ;;  %v1356_v39 = vmax.f32 %v1354_v17, %v1355_v31  ;;  %v1372_v40 = vmax.f32 %v1198_v18, %v1202_v32  ;;  %v1398_v41 = vmax.f32 %v1271_v21, %v1275_v33 }
 0x2cf   : > { %v1318_v42 = vrot.slane %v1317_v34, 1  ;;  %v1344_v43 = vrot.slane %v1343_v35, 1 }
 0x2d0   : > { %v1331_v44 = vrot.slane %v1330_v38, 1  ;;  %v1357_v45 = vrot.slane %v1356_v39, 1  ;;  %v1205_v46 = vpop.f32.mrb[28].mxu0  ;;  %v1278_v47 = vpop.f32.mrb[28].mxu1 }
 0x2d1   : > { %v2282_v48 = vmax.f32 %v1317_v34, %v1318_v42  ;;  %v2284_v49 = vmax.f32 %v1343_v35, %v1344_v43  ;;  %v1206_v50 = vadd.f32 %v1205_v46, %v2263_v0  ;;  %v1279_v51 = vadd.f32 %v1278_v47, %v2266_v1  ;;  %v1207_v52 = vpop.f32.mrb[29].mxu0  ;;  %v1280_v53 = vpop.f32.mrb[29].mxu1 }
 0x2d2   : > { %v2288_v54 = vmax.f32 %v1330_v38, %v1331_v44  ;;  %v2290_v56 = vmax.f32 %v1356_v39, %v1357_v45  ;;  %v1208_v57 = vadd.f32 %v1207_v52, %v2269_v23  ;;  %v1281_v58 = vadd.f32 %v1280_v53, %v2272_v3  ;;  %v1209_v59 = vpop.f32.mrb[30].mxu0  ;;  %v1282_v60 = vpop.f32.mrb[30].mxu1 }
 0x2d3   : > { %v1360_v61 = vmax.f32 %v1359_v36, %v1206_v50  ;;  %v1386_v62 = vmax.f32 %v1385_v37, %v1279_v51  ;;  %v1210_v63 = vadd.f32 %v1209_v59, %v2263_v0  ;;  %v1283_v2 = vadd.f32 %v1282_v60, %v2266_v1  ;;  %v1211_v24 = vpop.f32.mrb[31].mxu0  ;;  %v1284_v4 = vpop.f32.mrb[31].mxu1 }
 0x2d4   : > { %v1373_v27 = vmax.f32 %v1372_v40, %v1208_v57  ;;  %v1399_v5 = vmax.f32 %v1398_v41, %v1281_v58  ;;  %v1212_v28 = vadd.f32 %v1211_v24, %v2269_v23  ;;  %v1285_v6 = vadd.f32 %v1284_v4, %v2272_v3 }
 0x2d5   : > { %v1361_v7 = vmax.f32 %v1360_v61, %v1210_v63  ;;  %v1387_v8 = vmax.f32 %v1386_v62, %v1283_v2 }
 0x2d6   : > { %v1374_v9 = vmax.f32 %v1373_v27, %v1212_v28  ;;  %v1400_v10 = vmax.f32 %v1399_v5, %v1285_v6 }
 0x2d8   : > { %v1215_v11 = vpop.f32.mrb[32].mxu0  ;;  %v1288_v14 = vpop.f32.mrb[32].mxu1 }
 0x2d9   : > { %v1216_v15 = vadd.f32 %v1215_v11, %v2263_v0  ;;  %v1289_v16 = vadd.f32 %v1288_v14, %v2266_v1  ;;  %v1217_v17 = vpop.f32.mrb[33].mxu0  ;;  %v1290_v18 = vpop.f32.mrb[33].mxu1 }
 0x2da   : > { %v1218_v21 = vadd.f32 %v1217_v17, %v2269_v23  ;;  %v1291_v13 = vadd.f32 %v1290_v18, %v2272_v3  ;;  %v1219_v12 = vpop.f32.mrb[34].mxu0  ;;  %v1292_v20 = vpop.f32.mrb[34].mxu1 }
 0x2db   : > { %v1362_v22 = vmax.f32 %v1361_v7, %v1216_v15  ;;  %v1388_v55 = vmax.f32 %v1387_v8, %v1289_v16  ;;  %v1220_v25 = vadd.f32 %v1219_v12, %v2263_v0  ;;  %v1293_v26 = vadd.f32 %v1292_v20, %v2266_v1  ;;  %v1221_v29 = vpop.f32.mrb[35].mxu0  ;;  %v1294_v30 = vpop.f32.mrb[35].mxu1 }
 0x2dc   : > { %v1375_v31 = vmax.f32 %v1374_v9, %v1218_v21  ;;  %v1401_v32 = vmax.f32 %v1400_v10, %v1291_v13  ;;  %v1222_v33 = vadd.f32 %v1221_v29, %v2269_v23  ;;  %v1295_v34 = vadd.f32 %v1294_v30, %v2272_v3 }
 0x2dd   : > { %v1363_v35 = vmax.f32 %v1362_v22, %v1220_v25  ;;  %v1389_v36 = vmax.f32 %v1388_v55, %v1293_v26  ;;  %v1857_v26 = vmov (!%p1723_p7), 1966171168   ;;  %v1423_v30 = vcombine.low (!%p1723_p7), %v2282_v48, %v2288_v54 }
 0x2de   : > { %v1376_v37 = vmax.f32 %v1375_v31, %v1222_v33  ;;  %v1402_v38 = vmax.f32 %v1401_v32, %v1295_v34  ;;  %v1428_v29 = vunpack.c.l.s4 (!%p1723_p7), %v1857_v26  ;;  %v1424_v31 = vcombine.low (!%p1723_p7), %v2284_v49, %v2290_v56 }
 0x2e0   : > { %v1225_v39 = vpop.f32.mrb[36].mxu0  ;;  %v1298_v40 = vpop.f32.mrb[36].mxu1  ;;  %v1429_v34 = vunpack.c.0.s8 (!%p1723_p7), %v1428_v29 }
 0x2e1   : > { %v1226_v41 = vadd.f32 %v1225_v39, %v2263_v0  ;;  %v1299_v42 = vadd.f32 %v1298_v40, %v2266_v1  ;;  %v1227_v43 = vpop.f32.mrb[37].mxu0  ;;  %v1300_v44 = vpop.f32.mrb[37].mxu1 }
 0x2e2   : > { %v1228_v45 = vadd.f32 %v1227_v43, %v2269_v23  ;;  %v1301_v46 = vadd.f32 %v1300_v44, %v2272_v3  ;;  %v1229_v47 = vpop.f32.mrb[38].mxu0  ;;  %v1302_v50 = vpop.f32.mrb[38].mxu1 }
 0x2e3   : > { %v1364_v51 = vmax.f32 %v1363_v35, %v1226_v41  ;;  %v1390_v52 = vmax.f32 %v1389_v36, %v1299_v42  ;;  %v1230_v53 = vadd.f32 %v1229_v47, %v2263_v0  ;;  %v1303_v57 = vadd.f32 %v1302_v50, %v2266_v1  ;;  %v1231_v58 = vpop.f32.mrb[39].mxu0  ;;  %v1304_v59 = vpop.f32.mrb[39].mxu1 }
 0x2e4   : > { %v1377_v60 = vmax.f32 %v1376_v37, %v1228_v45  ;;  %v1403_v61 = vmax.f32 %v1402_v38, %v1301_v46  ;;  %v1232_v62 = vadd.f32 %v1231_v58, %v2269_v23  ;;  %v1305_v63 = vadd.f32 %v1304_v59, %v2272_v3 }
 0x2e5   : > { %v1365_v2 = vmax.f32 %v1364_v51, %v1230_v53  ;;  %v1391_v24 = vmax.f32 %v1390_v52, %v1303_v57  ;;  %v1432_v35 = vsub.s32 (!%p1723_p7), %v1429_v34, %v2203_v19 }
 0x2e6   : > { %v1378_v4 = vmax.f32 %v1377_v60, %v1232_v62  ;;  %v1404_v27 = vmax.f32 %v1403_v61, %v1305_v63 }
 0x2e7   : > { %v1366_v5 = vrot.slane %v1365_v2, 4  ;;  %v1392_v28 = vrot.slane %v1391_v24, 4  ;;  %v1433_v36 = vrot.slane (!%p1723_p7), %v1423_v30, %v1432_v35  ;;  %v1440_v37 = vrot.slane (!%p1723_p7), %v1424_v31, %v1432_v35 }
 0x2e8   : > { %v1379_v6 = vrot.slane %v1378_v4, 4  ;;  %v1405_v7 = vrot.slane %v1404_v27, 4 }
 0x2e9   : > { %v1367_v8 = vmax.f32 %v1365_v2, %v1366_v5  ;;  %v1393_v0 = vmax.f32 %v1391_v24, %v1392_v28  ;;  %v1455_v40 = vcombine.low (!%p1723_p7), %v1433_v36, %v1440_v37 }
 0x2ea   : > { %v1380_v9 = vmax.f32 %v1378_v4, %v1379_v6  ;;  %v1406_v1 = vmax.f32 %v1404_v27, %v1405_v7 }
 0x2eb   : > { %v1368_v10 = vrot.slane %v1367_v8, 2  ;;  %v1394_v11 = vrot.slane %v1393_v0, 2  ;;  %v1463_v42 = vrot.slane (!%p1723_p7), %v1455_v40, %v1432_v35 }
 0x2ec   : > { %v1381_v14 = vrot.slane %v1380_v9, 2  ;;  %v1407_v15 = vrot.slane %v1406_v1, 2  ;;  %1414 = sbr.rel (%p1723_p7) target bundleno = 767 (0x2ff), region = 52 }
 0x2ed   : > { %v1369_v16 = vmax.f32 %v1367_v8, %v1368_v10  ;;  %v1395_v23 = vmax.f32 %v1393_v0, %v1394_v11 }
 0x2ee   : > { %v1382_v17 = vmax.f32 %v1380_v9, %v1381_v14  ;;  %v1408_v3 = vmax.f32 %v1406_v1, %v1407_v15 }
 0x2ef   : > { %v1370_v18 = vrot.slane %v1369_v16, 1  ;;  %v1396_v21 = vrot.slane %v1395_v23, 1 }
 0x2f0   : > { %v1383_v13 = vrot.slane %v1382_v17, 1  ;;  %v1409_v12 = vrot.slane %v1408_v3, 1 }
 0x2f1   : > { %v1371_v20 = vmax.f32 %v1369_v16, %v1370_v18  ;;  %v1397_v22 = vmax.f32 %v1395_v23, %v1396_v21 }
 0x2f2   : > { %v1384_v55 = vmax.f32 %v1382_v17, %v1383_v13  ;;  %v1410_v25 = vmax.f32 %v1408_v3, %v1409_v12 }
 0x2f4   : > { %v1425_v32 = vcombine.low %v1371_v20, %v1384_v55  ;;  %v1426_v33 = vcombine.low %v1397_v22, %v1410_v25 }
 0x2f6   : > { %v1447_v38 = vrot.slane %v1425_v32, %v1432_v35  ;;  %v1454_v39 = vrot.slane %v1426_v33, %v1432_v35 }
 0x2f8   : > { %v1456_v41 = vcombine.low %v1447_v38, %v1454_v39 }
 0x2fa   : > { %v1470_v43 = vrot.slane %v1456_v41, %v1432_v35 }
 0x2fc   : > { %v1471_v44 = vcombine.low %v1463_v42, %v1470_v43 }
 0x2fe   : > { %1473 = vst [vmem:[%s1938_s17] sm:$0xff] %v1471_v44 }
 0x2ff PF: > { %p1724_p8 = scmp.eq.s32.totalorder %s1837_s24, 0 }
 0x300   : > { %v1858_v45 = vmov (!%p1724_p8), 1966171168   ;;  %v1487_v47 = vcombine.low (!%p1724_p8), %v2282_v48, %v2288_v54  ;;  %v1488_v50 = vcombine.low (!%p1724_p8), %v2284_v49, %v2290_v56  ;;  %v1489_v51 = vcombine.low (!%p1724_p8), %v1371_v20, %v1384_v55 }
 0x301   : > { %1477 = sbr.rel (%p1724_p8) target bundleno = 786 (0x312), region = 56  ;;  %v1492_v46 = vunpack.c.l.s4 (!%p1724_p8), %v1858_v45  ;;  %v1490_v52 = vcombine.low (!%p1724_p8), %v1397_v22, %v1410_v25 }
 0x303   : > { %v1493_v53 = vunpack.c.0.s8 (!%p1724_p8), %v1492_v46 }
 0x305   : > { %v1496_v57 = vsub.s32 (!%p1724_p8), %v1493_v53, %v2203_v19  ;;  %v1478_v4 = vld [vmem:[%s1938_s17] sm:$0xff] (!%p1724_p8) }
 0x307   : > { %v1497_v58 = vrot.slane (!%p1724_p8), %v1487_v47, %v1496_v57  ;;  %v1504_v59 = vrot.slane (!%p1724_p8), %v1488_v50, %v1496_v57  ;;  %v1511_v60 = vrot.slane (!%p1724_p8), %v1489_v51, %v1496_v57  ;;  %v1518_v61 = vrot.slane (!%p1724_p8), %v1490_v52, %v1496_v57 }
 0x309   : > { %v1519_v62 = vcombine.low %v1497_v58, %v1504_v59  ;;  %v1520_v63 = vcombine.low %v1511_v60, %v1518_v61 }
 0x30b   : > { %v1527_v2 = vrot.slane %v1519_v62, %v1496_v57  ;;  %v1534_v24 = vrot.slane %v1520_v63, %v1496_v57 }
 0x30d   : > { %v1535_v27 = vcombine.low %v1527_v2, %v1534_v24 }
 0x30f   : > { %v1537_v48 = vmax.f32 %v1478_v4, %v1535_v27 }
 0x311   : > { %1538 = vst [vmem:[%s1938_s17] sm:$0xff] %v1537_v48 }
 0x312 PF: > { %s17_s28 = sadd.s32 1, %s1853_s28   ;;  %s2352_s24 = smov %s1845_s26 }
 0x313   : > { %p14_p9 = scmp.ge.s32.totalorder %s17_s28, 6   ;;  %s2353_s25 = smov %s1849_s27 }
 0x314   : > { %s2354_s26 = smov %s2357_s29  ;;  %s2355_s27 = smov %s2361_s30 }
 0x315   :  { %16 = sbr.rel (!%p14_p9) target bundleno = 3 (0x3), region = 92 }

// kernel: pointnet_forward.11
= control target key start
LH: loop header
LB: loop body
LE: loop exit
PB: predicated region body
PF: predicated region fallthrough
CT: control target
= control target key end

     0   :  { %s2648_s17 = smov 0   ;;  %s2650_s18 = smov 0   ;;  %s3171_s0 = inlined_call_operand.vmem [shape: f32[2,128,3], index: 0, kind: input, shape index: {}]   ;;  %s3172_s1 = inlined_call_operand.vmem [shape: bf16[2,3,64], index: 1, kind: input, shape index: {}]   ;;  %s3173_s2 = inlined_call_operand.vmem [shape: f32[1,64], index: 2, kind: input, shape index: {}]   ;;  %s3174_s3 = inlined_call_operand.vmem [shape: bf16[2,64,512], index: 3, kind: input, shape index: {}]   ;;  %s3175_s4 = inlined_call_operand.vmem [shape: f32[2,1,512], index: 4, kind: input, shape index: {}]   ;;  %s3176_s5 = inlined_call_operand.vmem [shape: bf16[512,256], index: 5, kind: input, shape index: {}]   ;;  %s3177_s6 = inlined_call_operand.vmem [shape: f32[1,256], index: 6, kind: input, shape index: {}]   ;;  %s3178_s7 = inlined_call_operand.vmem [shape: bf16[256,128], index: 7, kind: input, shape index: {}]   ;;  %s3179_s8 = inlined_call_operand.vmem [shape: f32[1,128], index: 8, kind: input, shape index: {}]   ;;  %s3180_s9 = inlined_call_operand.vmem [shape: bf16[128,5], index: 9, kind: input, shape index: {}]   ;;  %s3181_s10 = inlined_call_operand.vmem [shape: f32[1,5], index: 10, kind: input, shape index: {}]   ;;  %s3182_s11 = inlined_call_operand.vmem [shape: f32[2,128,5], index: 11, kind: output, shape index: {}]  }
   0x1   :  { %s2652_s19 = smov 0   ;;  %s2654_s20 = smov 0  }
   0x2   :  { %s2656_s21 = smov 0  }
   0x3 LB: > { %s30_s22 = sadd.s32 1, %s2576_s19  ;;  %s33_s23 = sadd.s32 1, %s2580_s20  ;;  %s2584_s21 = sphi %s2656_s21, %s21_s21   ;;  %s2580_s20 = sphi %s2654_s20, %s3188_s20   ;;  %s2576_s19 = sphi %s2652_s19, %s3187_s19   ;;  %s2572_s18 = sphi %s2650_s18, %s3186_s18   ;;  %s2568_s17 = sphi %s2648_s17, %s3185_s17  }
   0x4   : > { %p31_p0 = scmp.ge.s32.totalorder %s30_s22, 2  ;;  %p2072_p1 = scmp.ge.s32.totalorder %s2584_s21, 1 }
   0x5   : > { %p386_p2 = scmp.lt.s32.totalorder %s2584_s21, 5 }
   0x6   : > { %s3190_s22 = smov (%p31_p0, %s30_s22), 0  ;;  %s3192_s23 = smov (!%p31_p0, %s33_s23), %s2580_s20 }
   0x7   : > { %p387_p3 = pnand %p2072_p1, %p386_p2  ;;  %p35_p4 = scmp.ge.s32.totalorder %s3192_s23, 2 }
   0x8   : > { %p448_p5 = scmp.lt.s32.totalorder (!%p387_p3), %s2572_s18, 1  ;;  %vm514_vm0 = vcmask (!%p387_p3), 1040384   ;;  %v616_v0 = vlaneseq (!%p387_p3)  ;;  %vm515_vm1 = vcmask (!%p387_p3), 1041408   ;;  %v2586_v1 = vmov (!%p387_p3), 65535   ;;  %s2073_s24 = sshll.u32 (!%p387_p3), %s2568_s17, 3 }
   0x9   : > { %s3194_s23 = smov (%p35_p4, %s3192_s23), 0  ;;  %390 = sbr.rel (%p387_p3) target bundleno = 1541 (0x605), region = 64 }
   0xa   : > { %3183 = sst [smem:[#allocation2_spill]] %s3194_s23  ;;  %v516_v2 = vsel (!%p387_p3), %vm514_vm0, 4294967295, %v2586_v1  ;;  %v2681_v3 = vshrl.u32 (!%p387_p3), %v616_v0, 7  ;;  %p450_p6 = scmp.lt.s32.totalorder (!%p387_p3), %s2073_s24, 15  ;;  %vm501_vm2 = vcmask (!%p387_p3), 23552   ;;  %v2587_v30 = vmov (!%p387_p3), 0  }
   0xb   : > { %v517_v4 = vsel (!%p387_p3), %vm515_vm1, %v516_v2, 0  ;;  %v2394_v32 = vld [vmem:[%s3176_s5 + $0x4] ss:$8 sps:$4 sm:$0xff] (!%p387_p3)   ;;  %v2396_v33 = vld [vmem:[%s3176_s5] ss:$8 sps:$4 sm:$0xff] (!%p387_p3)   ;;  %vm716_vm3 = vcmask (!%p387_p3), 523264  }
   0xc   : > { %v626_v5 = vsub.s32 (!%p387_p3), 2, %v2681_v3  ;;  %v2397_v34 = vld [vmem:[%s3176_s5 + $0x14] ss:$8 sps:$4 sm:$0xff] (!%p387_p3)   ;;  %1319 = vmatprep.subr.bf16.mxu1 (!%p387_p3), %v2394_v32  ;;  %v2399_v35 = vld [vmem:[%s3176_s5 + $0x10] ss:$8 sps:$4 sm:$0xff] (!%p387_p3)   ;;  %vm1837_vm4 = vcmask (!%p387_p3), 39936  }
   0xd   : > { %1320 = vmatpush1.bf16.msra.mxu1 (!%p387_p3), %v2396_v33  ;;  %v2400_v36 = vld [vmem:[%s3176_s5 + $0x24] ss:$8 sps:$4 sm:$0xff] (!%p387_p3)   ;;  %v2402_v37 = vld [vmem:[%s3176_s5 + $0x20] ss:$8 sps:$4 sm:$0xff] (!%p387_p3)   ;;  %v2403_v38 = vld [vmem:[%s3176_s5 + $0x34] ss:$8 sps:$4 sm:$0xff] (!%p387_p3)  }
   0xe   : > { %1321 = vmatprep.subr.bf16.mxu1 (!%p387_p3), %v2397_v34  ;;  %v2405_v39 = vld [vmem:[%s3176_s5 + $0x30] ss:$8 sps:$4 sm:$0xff] (!%p387_p3)   ;;  %v2406_v40 = vld [vmem:[%s3176_s5 + $0x44] ss:$8 sps:$4 sm:$0xff] (!%p387_p3)   ;;  %v2408_v41 = vld [vmem:[%s3176_s5 + $0x40] ss:$8 sps:$4 sm:$0xff] (!%p387_p3)  }
   0xf   : > { %v2409_v42 = vld [vmem:[%s3176_s5 + $0x54] ss:$8 sps:$4 sm:$0xff] (!%p387_p3)   ;;  %v2411_v43 = vld [vmem:[%s3176_s5 + $0x50] ss:$8 sps:$4 sm:$0xff] (!%p387_p3)   ;;  %v2412_v44 = vld [vmem:[%s3176_s5 + $0x64] ss:$8 sps:$4 sm:$0xff] (!%p387_p3)  }
  0x10   : > { %s3196_s18 = smov (!%p448_p5, %s2572_s18), 1  ;;  %s3198_s24 = smov (!%p450_p6, %s2073_s24), 15  ;;  %v2414_v45 = vld [vmem:[%s3176_s5 + $0x60] ss:$8 sps:$4 sm:$0xff]   ;;  %v2415_v46 = vld [vmem:[%s3176_s5 + $0x74] ss:$8 sps:$4 sm:$0xff]  }
  0x11   : > { %s2076_s25 = sshll.u32 %s3196_s18, 1  ;;  %s2204_s29 = sshll.u32 %s3196_s18, 7  ;;  %1322 = vmatpush1.bf16.msra.mxu1 %v2399_v35  ;;  %v2417_v47 = vld [vmem:[%s3176_s5 + $0x70] ss:$8 sps:$4 sm:$0xff]   ;;  %v2418_v48 = vld [vmem:[%s3176_s5 + $0x84] ss:$8 sps:$4 sm:$0xff]  }
  0x12   : > { %s460_s28 = scalar_lea.vmem %s3172_s1, %s2076_s25  ;;  %s2690_s13 = scalar_lea.vmem %s3174_s3, %s2204_s29  ;;  %1323 = vmatprep.subr.bf16.mxu1 %v2400_v36  ;;  %v2420_v49 = vld [vmem:[%s3176_s5 + $0x80] ss:$8 sps:$4 sm:$0xff]   ;;  %v2421_v50 = vld [vmem:[%s3176_s5 + $0x94] ss:$8 sps:$4 sm:$0xff]   ;;  %v2423_v51 = vld [vmem:[%s3176_s5 + $0x90] ss:$8 sps:$4 sm:$0xff]  }
  0x13   : > { %s2079_s14 = sshll.u32 %s3196_s18, 2  ;;  %v489_v6 = vld [vmem:[%s460_s28] sm:$0x3]  ;;  %s2074_s15 = sshll.u32 %s3196_s18, 4  ;;  %v2372_v9 = vld [vmem:[%s2690_s13 + $0x4] ss:$16 sps:$4 sm:$0xff]  }
  0x14   : > { %s469_s23 = scalar_lea.vmem %s3175_s4, %s2079_s14  ;;  %v519_v7 = vand.u32 %v517_v4, %v489_v6  ;;  %s2701_s25 = sadd.s32 %s2074_s15, %s3198_s24  ;;  %v2370_v11 = vld [vmem:[%s2690_s13] ss:$16 sps:$4 sm:$0xff]   ;;  %v2375_v21 = vld [vmem:[%s2690_s13 + $0x24] ss:$16 sps:$4 sm:$0xff]   ;;  %v2384_v31 = vld [vmem:[%s2690_s13 + $0xc] ss:$16 sps:$4 sm:$0xff]  }
  0x15   : > { %v2695_v8 = vld [vmem:[%s469_s23] sm:$0xf]  ;;  %s2075_s18 = sshll.u32 %s2701_s25, 3  ;;  %v2378_v26 = vld [vmem:[%s2690_s13 + $0x44] ss:$16 sps:$4 sm:$0xff]   ;;  %1324 = vmatpush1.bf16.msra.mxu1 %v2402_v37 }
  0x16   : > { %2262 = vmatprep.subr.bf16.mxu0 %v519_v7  ;;  %v2699_v10 = vrot.slane %v2695_v8, %v626_v5  ;;  %s455_s23 = scalar_lea.vmem %s3171_s0, %s2075_s18  ;;  %v2373_v24 = vld [vmem:[%s2690_s13 + $0x20] ss:$16 sps:$4 sm:$0xff]   ;;  %v2381_v28 = vld [vmem:[%s2690_s13 + $0x64] ss:$16 sps:$4 sm:$0xff]   ;;  %1325 = vmatprep.subr.bf16.mxu1 %v2403_v38  ;;  %v2388_v32 = vld [vmem:[%s2690_s13 + $0x48] ss:$16 sps:$4 sm:$0xff]   ;;  %s3130_s17 = scalar_lea.vmem %s3182_s11, %s2075_s18 }
  0x17   : > { %2263 = vmatpush3.bf16.msra.mxu0 %v519_v7  ;;  %v481_v12 = vld [vmem:[%s455_s23] sm:$0xff]  ;;  %v482_v13 = vld [vmem:[%s455_s23 + $0x8] sm:$0xff]  ;;  %v483_v14 = vld [vmem:[%s455_s23 + $0x10] sm:$0xff] }
  0x18   : > { %729 = vmatprep.subr.bf16.mxu0 %v2372_v9  ;;  %v491_v15 = vpack.c.bf16 %v482_v13, %v481_v12  ;;  %v484_v16 = vld [vmem:[%s455_s23 + $0x18] sm:$0xff]  ;;  %v485_v17 = vld [vmem:[%s455_s23 + $0x20] sm:$0xff]  ;;  %v486_v18 = vld [vmem:[%s455_s23 + $0x28] sm:$0xff] }
  0x19   : > { %v492_v19 = vpack.c.bf16 %v484_v16, %v483_v14  ;;  %v493_v20 = vpack.c.bf16 %v486_v18, %v485_v17  ;;  %v487_v22 = vld [vmem:[%s455_s23 + $0x30] sm:$0xff]  ;;  %v488_v23 = vld [vmem:[%s455_s23 + $0x38] sm:$0xff]  ;;  %1326 = vmatpush1.bf16.msra.mxu1 %v2405_v39  ;;  %v2424_v52 = vld [vmem:[%s3176_s5 + $0xa4] ss:$8 sps:$4 sm:$0xff]  }
  0x1a   : > { %2264 = vmatprep.mubr.msk.bf16.mxu0 %vm501_vm2, %v491_v15  ;;  %v494_v25 = vpack.c.bf16 %v488_v23, %v487_v22  ;;  %v2376_v27 = vld [vmem:[%s2690_s13 + $0x40] ss:$16 sps:$4 sm:$0xff]   ;;  %1327 = vmatprep.subr.bf16.mxu1 %v2406_v40  ;;  %v2427_v54 = vld [vmem:[%s3176_s5 + $0xb4] ss:$8 sps:$4 sm:$0xff]   ;;  %v2430_v56 = vld [vmem:[%s3176_s5 + $0xc4] ss:$8 sps:$4 sm:$0xff]  }
  0x1b   : > { %2265 = vmatmul.mubr.msk.bf16.vlgmr.msra.gmra.mrb[0].mxu0 %vm501_vm2, %v492_v19  ;;  %v2379_v29 = vld [vmem:[%s2690_s13 + $0x60] ss:$16 sps:$4 sm:$0xff]   ;;  %v2433_v58 = vld [vmem:[%s3176_s5 + $0xd4] ss:$8 sps:$4 sm:$0xff]   ;;  %v2382_v13 = vld [vmem:[%s2690_s13 + $0x8] ss:$16 sps:$4 sm:$0xff]  }
  0x1c   : > { %2268 = vmatprep.mubr.msk.bf16.mxu0 %vm501_vm2, %v493_v20  ;;  %730 = vmatpush1.bf16.msra.mxu0 %v2370_v11  ;;  %v2426_v53 = vld [vmem:[%s3176_s5 + $0xa0] ss:$8 sps:$4 sm:$0xff]   ;;  %v2429_v55 = vld [vmem:[%s3176_s5 + $0xb0] ss:$8 sps:$4 sm:$0xff]   ;;  %v2387_v16 = vld [vmem:[%s2690_s13 + $0x2c] ss:$16 sps:$4 sm:$0xff]  }
  0x1d   : > { %731 = vmatprep.subr.bf16.mxu0 %v2375_v21  ;;  %1328 = vmatpush1.bf16.msra.mxu1 %v2408_v41  ;;  %v2432_v57 = vld [vmem:[%s3176_s5 + $0xc0] ss:$8 sps:$4 sm:$0xff]   ;;  %v2435_v59 = vld [vmem:[%s3176_s5 + $0xd0] ss:$8 sps:$4 sm:$0xff]   ;;  %v2393_v34 = vld [vmem:[%s2690_s13 + $0x6c] ss:$16 sps:$4 sm:$0xff]  }
  0x1e   : > { %1329 = vmatprep.subr.bf16.mxu1 %v2409_v42  ;;  %v2083_v60 = vld [vmem:[%s3173_s2] ss:$0 sm:$0xff]  ;;  %v2391_v35 = vld [vmem:[%s2690_s13 + $0x68] ss:$16 sps:$4 sm:$0xff]   ;;  %v2436_v36 = vld [vmem:[%s3176_s5 + $0xe4] ss:$8 sps:$4 sm:$0xff]  }
  0x1f   : > { %v2438_v37 = vld [vmem:[%s3176_s5 + $0xe0] ss:$8 sps:$4 sm:$0xff]   ;;  %v2439_v38 = vld [vmem:[%s3176_s5 + $0xf4] ss:$8 sps:$4 sm:$0xff]   ;;  %v2444_v39 = vld [vmem:[%s3176_s5 + $0x104] ss:$8 sps:$4 sm:$0xff]  }
  0x20   : > { %732 = vmatpush1.bf16.msra.mxu0 %v2373_v24  ;;  %v2385_v24 = vld [vmem:[%s2690_s13 + $0x28] ss:$16 sps:$4 sm:$0xff]   ;;  %v2490_v40 = vld [vmem:[%s3178_s7 + $0x40] sm:$0xff]  }
  0x21   : > { %733 = vmatprep.subr.bf16.mxu0 %v2378_v26  ;;  %1330 = vmatpush1.bf16.msra.mxu1 %v2411_v43  ;;  %v2491_v41 = vld [vmem:[%s3178_s7] sm:$0xff]   ;;  %v2492_v42 = vld [vmem:[%s3178_s7 + $0x48] sm:$0xff]  }
  0x22   : > { %1331 = vmatprep.subr.bf16.mxu1 %v2412_v44  ;;  %v2493_v43 = vld [vmem:[%s3178_s7 + $0x8] sm:$0xff]   ;;  %v2494_v44 = vld [vmem:[%s3178_s7 + $0x50] sm:$0xff]  }
  0x23   : > { %2269 = vmatmul.mubr.msk.bf16.gmra.mrb[4].mxu0 %vm501_vm2, %v494_v25 }
  0x24   : > { %734 = vmatpush1.bf16.msra.mxu0 %v2376_v27  ;;  %761 = vmatprep.mubr.bf16.mxu0 %v2587_v30  ;;  %v2390_v27 = vld [vmem:[%s2690_s13 + $0x4c] ss:$16 sps:$4 sm:$0xff]  }
  0x25   : > { %735 = vmatprep.subr.bf16.mxu0 %v2381_v28  ;;  %1332 = vmatpush1.bf16.msra.mxu1 %v2414_v45  ;;  %v2495_v45 = vld [vmem:[%s3178_s7 + $0x10] sm:$0xff]  }
  0x26   : > { %1333 = vmatprep.subr.bf16.mxu1 %v2415_v46  ;;  %v2496_v46 = vld [vmem:[%s3178_s7 + $0x58] sm:$0xff]  }
  0x28   : > { %736 = vmatpush1.bf16.msra.mxu0 %v2379_v29 }
  0x29   : > { %802 = vmatprep.subr.bf16.mxu0 %v2384_v31  ;;  %1334 = vmatpush1.bf16.msra.mxu1 %v2417_v47  ;;  %v2497_v47 = vld [vmem:[%s3178_s7 + $0x18] sm:$0xff]  }
  0x2a   : > { %1335 = vmatprep.subr.bf16.mxu1 %v2418_v48  ;;  %v2498_v48 = vld [vmem:[%s3178_s7 + $0x60] sm:$0xff]  }
  0x2d   : > { %1336 = vmatpush1.bf16.msra.mxu1 %v2420_v49  ;;  %v2499_v49 = vld [vmem:[%s3178_s7 + $0x20] sm:$0xff]  }
  0x2e   : > { %1337 = vmatprep.subr.bf16.mxu1 %v2421_v50  ;;  %v2500_v50 = vld [vmem:[%s3178_s7 + $0x68] sm:$0xff]  }
  0x31   : > { %1338 = vmatpush1.bf16.msra.mxu1 %v2423_v51  ;;  %v2501_v51 = vld [vmem:[%s3178_s7 + $0x28] sm:$0xff]  }
  0x32   : > { %1339 = vmatprep.subr.bf16.mxu1 %v2424_v52  ;;  %v618_v52 = vsub.s32 0, %v2681_v3 }
  0x35   : > { %1340 = vmatpush1.bf16.msra.mxu1 %v2426_v53  ;;  %v622_v53 = vsub.s32 1, %v2681_v3 }
  0x36   : > { %1341 = vmatprep.subr.bf16.mxu1 %v2427_v54  ;;  %v2887_v54 = vrot.slane %v2695_v8, %v618_v52 }
  0x39   : > { %1342 = vmatpush1.bf16.msra.mxu1 %v2429_v55  ;;  %v2892_v55 = vrot.slane %v2695_v8, %v622_v53 }
  0x3a   : > { %1343 = vmatprep.subr.bf16.mxu1 %v2430_v56 }
  0x3d   : > { %1344 = vmatpush1.bf16.msra.mxu1 %v2432_v57 }
  0x3e   : > { %1345 = vmatprep.subr.bf16.mxu1 %v2433_v58 }
  0x41   : > { %1346 = vmatpush1.bf16.msra.mxu1 %v2435_v59 }
  0x42   : > { %1347 = vmatprep.subr.bf16.mxu1 %v2436_v36 }
  0x45   : > { %1348 = vmatpush1.bf16.msra.mxu1 %v2438_v37 }
  0x46   : > { %1349 = vmatprep.subr.bf16.mxu1 %v2439_v38  ;;  %v2451_v38 = vld [vmem:[%s3176_s5 + $0x130] ss:$8 sps:$4 sm:$0xff]  }
  0xee   : > { %v2266_v61 = vpop.f32.mrb[0].mxu0 }
  0xef   : > { %v564_v62 = vadd.f32 %v2266_v61, %v2083_v60  ;;  %v555_v63 = vpop.f32.mrb[1].mxu0 }
  0xf0   : > { %v556_v0 = vadd.f32 %v2083_v60, %v555_v63  ;;  %v2267_v1 = vpop.f32.mrb[2].mxu0 }
  0xf1   : > { %v567_v2 = vadd.f32 %v2267_v1, %v2083_v60  ;;  %v558_v4 = vpop.f32.mrb[3].mxu0  ;;  %v588_v6 = vmax.f32 %v564_v62, 0.0 }
  0xf2   : > { %v559_v5 = vadd.f32 %v2083_v60, %v558_v4  ;;  %v586_v9 = vmax.f32 %v556_v0, 0.0 }
  0xf3   : > { %v589_v7 = vmax.f32 %v567_v2, 0.0 }
  0xf4   : > { %v587_v11 = vmax.f32 %v559_v5, 0.0 }
  0xf5   : > { %v612_v12 = vpack.c.bf16 %v589_v7, %v588_v6 }
  0xf6   : > { %v611_v14 = vpack.c.bf16 %v587_v11, %v586_v9  ;;  %v2270_v15 = vpop.f32.mrb[4].mxu0  ;;  %v2442_v9 = vld [vmem:[%s3176_s5 + $0x100] ss:$8 sps:$4 sm:$0xff]  }
  0xf7   : > { %v580_v17 = vadd.f32 %v2270_v15, %v2083_v60  ;;  %v571_v18 = vpop.f32.mrb[5].mxu0 }
  0xf8   : > { %2104 = vmatmul.mubr.msk.bf16.vlgmr.msra.gmra.mrb[8].mxu0 %vm716_vm3, %v611_v14  ;;  %v572_v19 = vadd.f32 %v2083_v60, %v571_v18  ;;  %v2271_v20 = vpop.f32.mrb[6].mxu0 }
  0xf9   : > { %v592_v21 = vmax.f32 %v580_v17, 0.0  ;;  %771 = vmatprep.mubr.bf16.mxu0 %v2587_v30  ;;  %v583_v22 = vadd.f32 %v2271_v20, %v2083_v60  ;;  %v574_v23 = vpop.f32.mrb[7].mxu0  ;;  %803 = vmatpush1.bf16.msra.mxu0 %v2382_v13  ;;  %v2447_v13 = vld [vmem:[%s3176_s5 + $0x114] ss:$8 sps:$4 sm:$0xff]  }
  0xfa   : > { %v590_v25 = vmax.f32 %v572_v19, 0.0  ;;  %v575_v26 = vadd.f32 %v2083_v60, %v574_v23  ;;  %804 = vmatprep.subr.bf16.mxu0 %v2387_v16  ;;  %v2445_v19 = vld [vmem:[%s3176_s5 + $0x110] ss:$8 sps:$4 sm:$0xff]  }
  0xfb   : > { %v593_v28 = vmax.f32 %v583_v22, 0.0  ;;  %v2450_v22 = vld [vmem:[%s3176_s5 + $0x124] ss:$8 sps:$4 sm:$0xff]  }
  0xfc   : > { %v591_v29 = vmax.f32 %v575_v26, 0.0 }
  0xfd   : > { %v614_v31 = vpack.c.bf16 %v593_v28, %v592_v21  ;;  %805 = vmatpush1.bf16.msra.mxu0 %v2385_v24 }
  0xfe   : > { %v613_v33 = vpack.c.bf16 %v591_v29, %v590_v25  ;;  %806 = vmatprep.subr.bf16.mxu0 %v2390_v27  ;;  %v2448_v27 = vld [vmem:[%s3176_s5 + $0x120] ss:$8 sps:$4 sm:$0xff]  }
 0x100   : > { %2105 = vmatmul.mubr.msk.bf16.gmra.mrb[12].mxu0 %vm716_vm3, %v612_v12 }
 0x101   : > { %781 = vmatprep.mubr.bf16.mxu0 %v2587_v30  ;;  %807 = vmatpush1.bf16.msra.mxu0 %v2388_v32 }
 0x102   : > { %808 = vmatprep.subr.bf16.mxu0 %v2393_v34 }
 0x105   : > { %809 = vmatpush1.bf16.msra.mxu0 %v2391_v35 }
 0x106   : > { %2210 = vmatprep.subr.bf16.mxu0 %v2490_v40 }
 0x108   : > { %2106 = vmatmul.mubr.msk.bf16.gmra.mrb[16].mxu0 %vm716_vm3, %v613_v33 }
 0x109   : > { %791 = vmatprep.mubr.bf16.mxu0 %v2587_v30 }
 0x110   : > { %2107 = vmatmul.mubr.msk.bf16.gmra.mrb[20].mxu0 %vm716_vm3, %v614_v31 }
 0x111   : > { %834 = vmatprep.mubr.bf16.mxu0 %v2587_v30 }
 0x118   : > { %2108 = vmatmul.mubr.msk.bf16.vlgmr.msra.gmra.mrb[24].mxu0 %vm716_vm3, %v611_v14 }
 0x119   : > { %844 = vmatprep.mubr.bf16.mxu0 %v2587_v30  ;;  %2211 = vmatpush3.bf16.msra.mxu0 %v2491_v41  ;;  %v2456_v41 = vld [vmem:[%s3176_s5 + $0x144] ss:$8 sps:$4 sm:$0xff]  }
 0x11a   : > { %2212 = vmatprep.subr.bf16.mxu0 %v2492_v42 }
 0x11d   : > { %2213 = vmatpush3.bf16.msra.mxu0 %v2493_v43 }
 0x11e   : > { %2214 = vmatprep.subr.bf16.mxu0 %v2494_v44 }
 0x120   : > { %2109 = vmatmul.mubr.msk.bf16.gmra.mrb[28].mxu0 %vm716_vm3, %v612_v12 }
 0x121   : > { %854 = vmatprep.mubr.bf16.mxu0 %v2587_v30  ;;  %2215 = vmatpush3.bf16.msra.mxu0 %v2495_v45  ;;  %v2454_v45 = vld [vmem:[%s3176_s5 + $0x140] ss:$8 sps:$4 sm:$0xff]  }
 0x122   : > { %2216 = vmatprep.subr.bf16.mxu0 %v2496_v46 }
 0x125   : > { %2217 = vmatpush3.bf16.msra.mxu0 %v2497_v47 }
 0x126   : > { %2218 = vmatprep.subr.bf16.mxu0 %v2498_v48 }
 0x128   : > { %2110 = vmatmul.mubr.msk.bf16.gmra.mrb[32].mxu0 %vm716_vm3, %v613_v33 }
 0x129   : > { %864 = vmatprep.mubr.bf16.mxu0 %v2587_v30  ;;  %v2441_v30 = vld [vmem:[%s3176_s5 + $0xf0] ss:$8 sps:$4 sm:$0xff]   ;;  %2219 = vmatpush3.bf16.msra.mxu0 %v2499_v49  ;;  %v2459_v49 = vld [vmem:[%s3176_s5 + $0x154] ss:$8 sps:$4 sm:$0xff]  }
 0x12a   : > { %1350 = vmatpush1.bf16.msra.mxu1 %v2441_v30  ;;  %2220 = vmatprep.subr.bf16.mxu0 %v2500_v50  ;;  %v630_v50 = vsub.s32 3, %v2681_v3 }
 0x12b   : > { %1392 = vmatprep.subr.bf16.mxu1 %v2444_v39 }
 0x12d   : > { %2221 = vmatpush3.bf16.msra.mxu0 %v2501_v51 }
 0x130   : > { %2111 = vmatmul.mubr.msk.bf16.gmra.mrb[36].mxu0 %vm716_vm3, %v614_v31  ;;  %v2453_v31 = vld [vmem:[%s3176_s5 + $0x134] ss:$8 sps:$4 sm:$0xff]  }
 0x1cb   : > { %v763_v56 = vpop.f32.mrb[8].mxu0 }
 0x1cc   : > { %v764_v57 = vadd.f32 %v763_v56, %v2887_v54  ;;  %v765_v58 = vpop.f32.mrb[9].mxu0 }
 0x1cd   : > { %v766_v59 = vadd.f32 %v765_v58, %v2892_v55  ;;  %v767_v60 = vpop.f32.mrb[10].mxu0 }
 0x1ce   : > { %v768_v61 = vadd.f32 %v767_v60, %v2887_v54  ;;  %v769_v62 = vpop.f32.mrb[11].mxu0  ;;  %v875_v0 = vmax.f32 %v764_v57, 0.0 }
 0x1cf   : > { %v770_v63 = vadd.f32 %v769_v62, %v2892_v55  ;;  %v876_v2 = vmax.f32 %v766_v59, 0.0 }
 0x1d0   : > { %v879_v1 = vmax.f32 %v768_v61, 0.0  ;;  %v2457_v61 = vld [vmem:[%s3176_s5 + $0x150] ss:$8 sps:$4 sm:$0xff]  }
 0x1d1   : > { %v880_v4 = vmax.f32 %v770_v63, 0.0 }
 0x1d2   : > { %v972_v5 = vpack.c.bf16 %v879_v1, %v875_v0  ;;  %v2462_v0 = vld [vmem:[%s3176_s5 + $0x164] ss:$8 sps:$4 sm:$0xff]   ;;  %v2948_v1 = vrot.slane %v2695_v8, %v630_v50 }
 0x1d3   : > { %v773_v6 = vpop.f32.mrb[12].mxu0  ;;  %v973_v7 = vpack.c.bf16 %v880_v4, %v876_v2 }
 0x1d4   : > { %v774_v11 = vadd.f32 %v773_v6, %v2887_v54  ;;  %v775_v12 = vpop.f32.mrb[13].mxu0  ;;  %v2460_v6 = vld [vmem:[%s3176_s5 + $0x160] ss:$8 sps:$4 sm:$0xff]  }
 0x1d5   : > { %v776_v14 = vadd.f32 %v775_v12, %v2892_v55  ;;  %v777_v15 = vpop.f32.mrb[14].mxu0  ;;  %1351 = vmatprep.mubr.bf16.mxu1 %v973_v7 }
 0x1d6   : > { %v778_v16 = vadd.f32 %v777_v15, %v2887_v54  ;;  %v779_v17 = vpop.f32.mrb[15].mxu0  ;;  %1352 = vmatmul.mubr.bf16.vlgmr.msra.gmra.mrb[0].mxu1 %v972_v5  ;;  %v883_v20 = vmax.f32 %v774_v11, 0.0  ;;  %v2463_v15 = vld [vmem:[%s3176_s5 + $0x170] ss:$8 sps:$4 sm:$0xff]  }
 0x1d7   : > { %v780_v18 = vadd.f32 %v779_v17, %v2892_v55  ;;  %1393 = vmatpush1.bf16.msra.mxu1 %v2442_v9  ;;  %v884_v23 = vmax.f32 %v776_v14, 0.0  ;;  %v2465_v9 = vld [vmem:[%s3176_s5 + $0x174] ss:$8 sps:$4 sm:$0xff]  }
 0x1d8   : > { %v887_v21 = vmax.f32 %v778_v16, 0.0  ;;  %1394 = vmatprep.subr.bf16.mxu1 %v2447_v13 }
 0x1d9   : > { %v888_v24 = vmax.f32 %v780_v18, 0.0  ;;  %v2468_v18 = vld [vmem:[%s3176_s5 + $0x184] ss:$8 sps:$4 sm:$0xff]  }
 0x1da   : > { %v976_v25 = vpack.c.bf16 %v887_v21, %v883_v20 }
 0x1db   : > { %v977_v26 = vpack.c.bf16 %v888_v24, %v884_v23  ;;  %1395 = vmatpush1.bf16.msra.mxu1 %v2445_v19  ;;  %v783_v28 = vpop.f32.mrb[16].mxu0  ;;  %v2466_v24 = vld [vmem:[%s3176_s5 + $0x180] ss:$8 sps:$4 sm:$0xff]  }
 0x1dc   : > { %1396 = vmatprep.subr.bf16.mxu1 %v2450_v22  ;;  %v784_v29 = vadd.f32 %v783_v28, %v2887_v54  ;;  %v785_v32 = vpop.f32.mrb[17].mxu0 }
 0x1dd   : > { %1361 = vmatprep.mubr.bf16.mxu1 %v977_v26  ;;  %v786_v33 = vadd.f32 %v785_v32, %v2892_v55  ;;  %v787_v34 = vpop.f32.mrb[18].mxu0 }
 0x1de   : > { %1362 = vmatmul.mubr.bf16.gmra.mrb[4].mxu1 %v976_v25  ;;  %v891_v35 = vmax.f32 %v784_v29, 0.0  ;;  %v788_v36 = vadd.f32 %v787_v34, %v2887_v54  ;;  %v789_v37 = vpop.f32.mrb[19].mxu0  ;;  %v2469_v34 = vld [vmem:[%s3176_s5 + $0x190] ss:$8 sps:$4 sm:$0xff]  }
 0x1df   : > { %1397 = vmatpush1.bf16.msra.mxu1 %v2448_v27  ;;  %v892_v30 = vmax.f32 %v786_v33, 0.0  ;;  %v790_v39 = vadd.f32 %v789_v37, %v2892_v55  ;;  %v2471_v27 = vld [vmem:[%s3176_s5 + $0x194] ss:$8 sps:$4 sm:$0xff]   ;;  %v2474_v37 = vld [vmem:[%s3176_s5 + $0x1a4] ss:$8 sps:$4 sm:$0xff]  }
 0x1e0   : > { %1398 = vmatprep.subr.bf16.mxu1 %v2453_v31  ;;  %v895_v40 = vmax.f32 %v788_v36, 0.0 }
 0x1e1   : > { %v896_v42 = vmax.f32 %v790_v39, 0.0 }
 0x1e2   : > { %v980_v43 = vpack.c.bf16 %v895_v40, %v891_v35 }
 0x1e3   : > { %1399 = vmatpush1.bf16.msra.mxu1 %v2451_v38  ;;  %v981_v44 = vpack.c.bf16 %v896_v42, %v892_v30  ;;  %v793_v46 = vpop.f32.mrb[20].mxu0  ;;  %v2472_v42 = vld [vmem:[%s3176_s5 + $0x1a0] ss:$8 sps:$4 sm:$0xff]  }
 0x1e4   : > { %1400 = vmatprep.subr.bf16.mxu1 %v2456_v41  ;;  %v794_v47 = vadd.f32 %v793_v46, %v2887_v54  ;;  %v795_v48 = vpop.f32.mrb[21].mxu0 }
 0x1e5   : > { %v796_v51 = vadd.f32 %v795_v48, %v2892_v55  ;;  %v797_v56 = vpop.f32.mrb[22].mxu0  ;;  %1371 = vmatprep.mubr.bf16.mxu1 %v981_v44 }
 0x1e6   : > { %v899_v57 = vmax.f32 %v794_v47, 0.0  ;;  %v798_v58 = vadd.f32 %v797_v56, %v2887_v54  ;;  %v799_v59 = vpop.f32.mrb[23].mxu0  ;;  %1372 = vmatmul.mubr.bf16.gmra.mrb[8].mxu1 %v980_v43 }
 0x1e7   : > { %1401 = vmatpush1.bf16.msra.mxu1 %v2454_v45  ;;  %v900_v60 = vmax.f32 %v796_v51, 0.0  ;;  %v800_v62 = vadd.f32 %v799_v59, %v2892_v55  ;;  %v2477_v45 = vld [vmem:[%s3176_s5 + $0x1b4] ss:$8 sps:$4 sm:$0xff]   ;;  %v2475_v51 = vld [vmem:[%s3176_s5 + $0x1b0] ss:$8 sps:$4 sm:$0xff]  }
 0x1e8   : > { %v903_v63 = vmax.f32 %v798_v58, 0.0  ;;  %1402 = vmatprep.subr.bf16.mxu1 %v2459_v49  ;;  %v2480_v58 = vld [vmem:[%s3176_s5 + $0x1c4] ss:$8 sps:$4 sm:$0xff]  }
 0x1e9   : > { %v904_v54 = vmax.f32 %v800_v62, 0.0 }
 0x1ea   : > { %v984_v2 = vpack.c.bf16 %v903_v63, %v899_v57 }
 0x1eb   : > { %v985_v4 = vpack.c.bf16 %v904_v54, %v900_v60  ;;  %1403 = vmatpush1.bf16.msra.mxu1 %v2457_v61  ;;  %v836_v5 = vpop.f32.mrb[24].mxu0 }
 0x1ec   : > { %v837_v55 = vadd.f32 %v836_v5, %v2699_v10  ;;  %v838_v7 = vpop.f32.mrb[25].mxu0  ;;  %1404 = vmatprep.subr.bf16.mxu1 %v2462_v0  ;;  %v2478_v0 = vld [vmem:[%s3176_s5 + $0x1c0] ss:$8 sps:$4 sm:$0xff]  }
 0x1ed   : > { %v839_v8 = vadd.f32 %v838_v7, %v2948_v1  ;;  %v840_v11 = vpop.f32.mrb[26].mxu0  ;;  %1381 = vmatprep.mubr.bf16.mxu1 %v985_v4  ;;  %v2483_v4 = vld [vmem:[%s3176_s5 + $0x1d4] ss:$8 sps:$4 sm:$0xff]  }
 0x1ee   : > { %v841_v12 = vadd.f32 %v840_v11, %v2699_v10  ;;  %v842_v13 = vpop.f32.mrb[27].mxu0  ;;  %1382 = vmatmul.mubr.bf16.gmra.mrb[12].mxu1 %v984_v2  ;;  %v877_v16 = vmax.f32 %v837_v55, 0.0 }
 0x1ef   : > { %v843_v14 = vadd.f32 %v842_v13, %v2948_v1  ;;  %1405 = vmatpush1.bf16.msra.mxu1 %v2460_v6  ;;  %v878_v19 = vmax.f32 %v839_v8, 0.0  ;;  %v2481_v8 = vld [vmem:[%s3176_s5 + $0x1d0] ss:$8 sps:$4 sm:$0xff]   ;;  %v2486_v13 = vld [vmem:[%s3176_s5 + $0x1e4] ss:$8 sps:$4 sm:$0xff]  }
 0x1f0   : > { %v881_v17 = vmax.f32 %v841_v12, 0.0  ;;  %1406 = vmatprep.subr.bf16.mxu1 %v2465_v9 }
 0x1f1   : > { %v882_v20 = vmax.f32 %v843_v14, 0.0 }
 0x1f2   : > { %v2966_v21 = vpack.c.bf16 %v881_v17, %v877_v16 }
 0x1f3   : > { %v975_v22 = vpack.c.bf16 %v882_v20, %v878_v19  ;;  %1407 = vmatpush1.bf16.msra.mxu1 %v2463_v15  ;;  %v846_v23 = vpop.f32.mrb[28].mxu0  ;;  %v2502_v19 = vld [vmem:[%s3178_s7 + $0x70] sm:$0xff]  }
 0x1f4   : > { %v847_v25 = vadd.f32 %v846_v23, %v2699_v10  ;;  %v848_v26 = vpop.f32.mrb[29].mxu0  ;;  %1408 = vmatprep.subr.bf16.mxu1 %v2468_v18  ;;  %v2487_v18 = vld [vmem:[%s3176_s5 + $0x1f0] ss:$8 sps:$4 sm:$0xff]   ;;  %2222 = vmatprep.subr.bf16.mxu0 %v2502_v19  ;;  %v2506_v23 = vld [vmem:[%s3180_s9] sm:$0xff]  }
 0x1f5   : > { %v849_v28 = vadd.f32 %v848_v26, %v2948_v1  ;;  %v850_v29 = vpop.f32.mrb[30].mxu0  ;;  %1424 = vmatprep.mubr.bf16.mxu1 %v975_v22  ;;  %v2503_v20 = vld [vmem:[%s3178_s7 + $0x30] sm:$0xff]   ;;  %v2505_v22 = vld [vmem:[%s3178_s7 + $0x38] sm:$0xff]  }
 0x1f6   : > { %v851_v31 = vadd.f32 %v850_v29, %v2699_v10  ;;  %v852_v32 = vpop.f32.mrb[31].mxu0  ;;  %v885_v35 = vmax.f32 %v847_v25, 0.0  ;;  %2223 = vmatpush3.bf16.msra.mxu0 %v2503_v20 }
 0x1f7   : > { %v853_v33 = vadd.f32 %v852_v32, %v2948_v1  ;;  %1409 = vmatpush1.bf16.msra.mxu1 %v2466_v24  ;;  %v886_v38 = vmax.f32 %v849_v28, 0.0  ;;  %v971_v24 = vld [vmem:[%s3177_s6] sm:$0x3] }
 0x1f8   : > { %v889_v36 = vmax.f32 %v851_v31, 0.0  ;;  %1410 = vmatprep.subr.bf16.mxu1 %v2471_v27  ;;  %v992_v25 = vrot.slane %v971_v24, %v618_v52  ;;  %v3048_v26 = vrot.slane %v971_v24, %v622_v53  ;;  %v2512_v24 = vld [vmem:[%s3180_s9 + $0x30] sm:$0xff]  }
 0x1f9   : > { %v890_v30 = vmax.f32 %v853_v33, 0.0 }
 0x1fa   : > { %v978_v39 = vpack.c.bf16 %v889_v36, %v885_v35 }
 0x1fb   : > { %v979_v40 = vpack.c.bf16 %v890_v30, %v886_v38  ;;  %1411 = vmatpush1.bf16.msra.mxu1 %v2469_v34  ;;  %v856_v41 = vpop.f32.mrb[32].mxu0 }
 0x1fc   : > { %v857_v43 = vadd.f32 %v856_v41, %v2699_v10  ;;  %v858_v44 = vpop.f32.mrb[33].mxu0  ;;  %1412 = vmatprep.subr.bf16.mxu1 %v2474_v37  ;;  %v2507_v41 = vld [vmem:[%s3180_s9 + $0x8] sm:$0xff]  }
 0x1fd   : > { %v859_v46 = vadd.f32 %v858_v44, %v2948_v1  ;;  %v860_v47 = vpop.f32.mrb[34].mxu0 }
 0x1fe   : > { %v861_v48 = vadd.f32 %v860_v47, %v2699_v10  ;;  %v862_v49 = vpop.f32.mrb[35].mxu0  ;;  %v893_v56 = vmax.f32 %v857_v43, 0.0 }
 0x1ff   : > { %v863_v50 = vadd.f32 %v862_v49, %v2948_v1  ;;  %1413 = vmatpush1.bf16.msra.mxu1 %v2472_v42  ;;  %v894_v59 = vmax.f32 %v859_v46, 0.0  ;;  %v2508_v49 = vld [vmem:[%s3180_s9 + $0x10] sm:$0xff]  }
 0x200   : > { %v897_v57 = vmax.f32 %v861_v48, 0.0  ;;  %1414 = vmatprep.subr.bf16.mxu1 %v2477_v45 }
 0x201   : > { %v898_v60 = vmax.f32 %v863_v50, 0.0 }
 0x202   : > { %v982_v61 = vpack.c.bf16 %v897_v57, %v893_v56 }
 0x203   : > { %v983_v62 = vpack.c.bf16 %v898_v60, %v894_v59  ;;  %1415 = vmatpush1.bf16.msra.mxu1 %v2475_v51  ;;  %v866_v63 = vpop.f32.mrb[36].mxu0 }
 0x204   : > { %v867_v54 = vadd.f32 %v866_v63, %v2699_v10  ;;  %v868_v2 = vpop.f32.mrb[37].mxu0  ;;  %1416 = vmatprep.subr.bf16.mxu1 %v2480_v58 }
 0x205   : > { %v869_v5 = vadd.f32 %v868_v2, %v2948_v1  ;;  %v870_v6 = vpop.f32.mrb[38].mxu0 }
 0x206   : > { %v871_v55 = vadd.f32 %v870_v6, %v2699_v10  ;;  %v872_v7 = vpop.f32.mrb[39].mxu0  ;;  %v901_v11 = vmax.f32 %v867_v54, 0.0  ;;  %v2484_v10 = vld [vmem:[%s3176_s5 + $0x1e0] ss:$8 sps:$4 sm:$0xff]  }
 0x207   : > { %v873_v9 = vadd.f32 %v872_v7, %v2948_v1  ;;  %1417 = vmatpush1.bf16.msra.mxu1 %v2478_v0  ;;  %v902_v14 = vmax.f32 %v869_v5, 0.0  ;;  %v2489_v1 = vld [vmem:[%s3176_s5 + $0x1f4] ss:$8 sps:$4 sm:$0xff]  }
 0x208   : > { %v905_v12 = vmax.f32 %v871_v55, 0.0  ;;  %1418 = vmatprep.subr.bf16.mxu1 %v2483_v4 }
 0x209   : > { %v906_v15 = vmax.f32 %v873_v9, 0.0 }
 0x20a   : > { %v986_v16 = vpack.c.bf16 %v905_v12, %v901_v11 }
 0x20b   : > { %v987_v17 = vpack.c.bf16 %v906_v15, %v902_v14  ;;  %1419 = vmatpush1.bf16.msra.mxu1 %v2481_v8 }
 0x20c   : > { %1420 = vmatprep.subr.bf16.mxu1 %v2486_v13 }
 0x20f   : > { %1421 = vmatpush1.bf16.msra.mxu1 %v2484_v10 }
 0x210   : > { %1422 = vmatprep.subr.bf16.mxu1 %v2489_v1 }
 0x213   : > { %1423 = vmatpush1.bf16.msra.mxu1 %v2487_v18 }
 0x216   : > { %1425 = vmatmul.mubr.bf16.vlgmr.msra.gmra.mrb[0].mxu1 %v2966_v21  ;;  %v2504_v21 = vld [vmem:[%s3178_s7 + $0x78] sm:$0xff]  }
 0x217   : > { %1434 = vmatprep.mubr.bf16.mxu1 %v979_v40  ;;  %2224 = vmatprep.subr.bf16.mxu0 %v2504_v21  ;;  %v2509_v21 = vld [vmem:[%s3180_s9 + $0x18] sm:$0xff]  }
 0x218   : > { %2225 = vmatpush3.bf16.msra.mxu0 %v2505_v22  ;;  %v2510_v22 = vld [vmem:[%s3180_s9 + $0x20] sm:$0xff]  }
 0x219   : > { %2272 = vmatprep.subr.bf16.mxu0 %v2506_v23 }
 0x21e   : > { %1435 = vmatmul.mubr.bf16.gmra.mrb[4].mxu1 %v978_v39 }
 0x21f   : > { %1444 = vmatprep.mubr.bf16.mxu1 %v983_v62 }
 0x226   : > { %1445 = vmatmul.mubr.bf16.gmra.mrb[8].mxu1 %v982_v61 }
 0x227   : > { %1454 = vmatprep.mubr.bf16.mxu1 %v987_v17 }
 0x22e   : > { %1455 = vmatmul.mubr.bf16.gmra.mrb[12].mxu1 %v986_v16 }
 0x2e9   : > { %v1426_v27 = vpop.f32.mrb[0].mxu1 }
 0x2ea   : > { %v2296_v28 = vadd.f32 %v1426_v27, %v992_v25  ;;  %v1428_v29 = vpop.f32.mrb[1].mxu1  ;;  %v2176_v27 = vld [vmem:[%s3179_s8] ss:$0 sm:$0xff] }
 0x2eb   : > { %v2297_v31 = vadd.f32 %v1428_v29, %v3048_v26  ;;  %v1430_v32 = vpop.f32.mrb[2].mxu1 }
 0x2ec   : > { %v2298_v33 = vadd.f32 %v1430_v32, %v992_v25  ;;  %v1432_v34 = vpop.f32.mrb[3].mxu1  ;;  %v1465_v36 = vmax.f32 %v2296_v28, 0.0 }
 0x2ed   : > { %v2299_v35 = vadd.f32 %v1432_v34, %v3048_v26  ;;  %v1466_v38 = vmax.f32 %v2297_v31, 0.0 }
 0x2ee   : > { %v1467_v37 = vmax.f32 %v2298_v33, 0.0 }
 0x2ef   : > { %v1468_v30 = vmax.f32 %v2299_v35, 0.0 }
 0x2f0   : > { %v1514_v39 = vpack.c.bf16 %v1467_v37, %v1465_v36 }
 0x2f1   : > { %v1515_v52 = vpack.c.bf16 %v1468_v30, %v1466_v38  ;;  %v1436_v40 = vpop.f32.mrb[4].mxu1 }
 0x2f2   : > { %v2300_v3 = vadd.f32 %v1436_v40, %v992_v25  ;;  %v1438_v53 = vpop.f32.mrb[5].mxu1 }
 0x2f3   : > { %v2301_v42 = vadd.f32 %v1438_v53, %v3048_v26  ;;  %v1440_v43 = vpop.f32.mrb[6].mxu1  ;;  %1656 = vmatprep.mubr.bf16.mxu0 %v1515_v52 }
 0x2f4   : > { %v2302_v44 = vadd.f32 %v1440_v43, %v992_v25  ;;  %v1442_v45 = vpop.f32.mrb[7].mxu1  ;;  %1657 = vmatmul.mubr.bf16.vlgmr.msra.gmra.mrb[40].mxu0 %v1514_v39  ;;  %v1469_v47 = vmax.f32 %v2300_v3, 0.0 }
 0x2f5   : > { %v2303_v46 = vadd.f32 %v1442_v45, %v3048_v26  ;;  %2273 = vmatpush3.bf16.msra.mxu0 %v2506_v23  ;;  %v1470_v50 = vmax.f32 %v2301_v42, 0.0  ;;  %v2511_v23 = vld [vmem:[%s3180_s9 + $0x28] sm:$0xff]  }
 0x2f6   : > { %v1471_v48 = vmax.f32 %v2302_v44, 0.0  ;;  %2274 = vmatprep.subr.bf16.mxu0 %v2507_v41 }
 0x2f7   : > { %v1472_v51 = vmax.f32 %v2303_v46, 0.0 }
 0x2f8   : > { %v1516_v56 = vpack.c.bf16 %v1471_v48, %v1469_v47 }
 0x2f9   : > { %v1517_v57 = vpack.c.bf16 %v1472_v51, %v1470_v50  ;;  %v1446_v58 = vpop.f32.mrb[8].mxu1  ;;  %2275 = vmatpush3.bf16.msra.mxu0 %v2507_v41 }
 0x2fa   : > { %v2304_v59 = vadd.f32 %v1446_v58, %v992_v25  ;;  %v1448_v60 = vpop.f32.mrb[9].mxu1  ;;  %2276 = vmatprep.subr.bf16.mxu0 %v2508_v49 }
 0x2fb   : > { %v2305_v61 = vadd.f32 %v1448_v60, %v3048_v26  ;;  %v1450_v62 = vpop.f32.mrb[10].mxu1  ;;  %1664 = vmatprep.mubr.bf16.mxu0 %v1517_v57 }
 0x2fc   : > { %v2306_v63 = vadd.f32 %v1450_v62, %v992_v25  ;;  %v1452_v0 = vpop.f32.mrb[11].mxu1  ;;  %1665 = vmatmul.mubr.bf16.gmra.mrb[44].mxu0 %v1516_v56  ;;  %v1473_v2 = vmax.f32 %v2304_v59, 0.0 }
 0x2fd   : > { %v2307_v54 = vadd.f32 %v1452_v0, %v3048_v26  ;;  %2277 = vmatpush3.bf16.msra.mxu0 %v2508_v49  ;;  %v1474_v5 = vmax.f32 %v2305_v61, 0.0 }
 0x2fe   : > { %v1475_v4 = vmax.f32 %v2306_v63, 0.0  ;;  %2278 = vmatprep.subr.bf16.mxu0 %v2509_v21 }
 0x2ff   : > { %v1476_v6 = vmax.f32 %v2307_v54, 0.0 }
 0x300   : > { %v1518_v55 = vpack.c.bf16 %v1475_v4, %v1473_v2 }
 0x301   : > { %v1519_v7 = vpack.c.bf16 %v1476_v6, %v1474_v5  ;;  %v1456_v9 = vpop.f32.mrb[12].mxu1  ;;  %2279 = vmatpush3.bf16.msra.mxu0 %v2509_v21 }
 0x302   : > { %v2308_v8 = vadd.f32 %v1456_v9, %v992_v25  ;;  %v1458_v11 = vpop.f32.mrb[13].mxu1  ;;  %2280 = vmatprep.subr.bf16.mxu0 %v2510_v22  ;;  %v2193_v9 = vld [vmem:[%s3181_s10] ss:$0 sm:$0xff] }
 0x303   : > { %v2309_v12 = vadd.f32 %v1458_v11, %v3048_v26  ;;  %v1460_v13 = vpop.f32.mrb[14].mxu1  ;;  %1672 = vmatprep.mubr.bf16.mxu0 %v1519_v7 }
 0x304   : > { %v2310_v14 = vadd.f32 %v1460_v13, %v992_v25  ;;  %v1462_v15 = vpop.f32.mrb[15].mxu1  ;;  %1673 = vmatmul.mubr.bf16.gmra.mrb[48].mxu0 %v1518_v55  ;;  %v1477_v17 = vmax.f32 %v2308_v8, 0.0  ;;  %v2513_v25 = vld [vmem:[%s3180_s9 + $0x38] sm:$0xff]  }
 0x305   : > { %v2311_v16 = vadd.f32 %v1462_v15, %v3048_v26  ;;  %v1478_v1 = vmax.f32 %v2309_v12, 0.0  ;;  %2281 = vmatpush3.bf16.msra.mxu0 %v2510_v22 }
 0x306   : > { %v1479_v10 = vmax.f32 %v2310_v14, 0.0  ;;  %2282 = vmatprep.subr.bf16.mxu0 %v2511_v23 }
 0x307   : > { %v1480_v18 = vmax.f32 %v2311_v16, 0.0 }
 0x308   : > { %v1520_v19 = vpack.c.bf16 %v1479_v10, %v1477_v17 }
 0x309   : > { %v1521_v20 = vpack.c.bf16 %v1480_v18, %v1478_v1  ;;  %2283 = vmatpush3.bf16.msra.mxu0 %v2511_v23 }
 0x30a   : > { %2284 = vmatprep.subr.bf16.mxu0 %v2512_v24 }
 0x30b   : > { %1680 = vmatprep.mubr.bf16.mxu0 %v1521_v20 }
 0x30c   : > { %1681 = vmatmul.mubr.bf16.gmra.mrb[52].mxu0 %v1520_v19 }
 0x30d   : > { %2285 = vmatpush3.bf16.msra.mxu0 %v2512_v24 }
 0x30e   : > { %2286 = vmatprep.subr.bf16.mxu0 %v2513_v25 }
 0x311   : > { %2287 = vmatpush3.bf16.msra.mxu0 %v2513_v25 }
 0x3c7   : > { %v2226_v26 = vpop.f32.mrb[40].mxu0 }
 0x3c8   : > { %v2227_v28 = vpop.f32.mrb[41].mxu0 }
 0x3c9   : > { %v2228_v29 = vadd.f32 %v2227_v28, %v2226_v26  ;;  %v2229_v31 = vpop.f32.mrb[42].mxu0 }
 0x3ca   : > { %v2230_v32 = vpop.f32.mrb[43].mxu0 }
 0x3cb   : > { %v1659_v33 = vadd.f32 %v2228_v29, %v2176_v27  ;;  %v2231_v34 = vadd.f32 %v2230_v32, %v2229_v31 }
 0x3cd   : > { %v1662_v35 = vadd.f32 %v2231_v34, %v2176_v27  ;;  %v1689_v36 = vmax.f32 %v1659_v33, 0.0 }
 0x3cf   : > { %v1690_v37 = vmax.f32 %v1662_v35, 0.0  ;;  %v2232_v38 = vpop.f32.mrb[44].mxu0 }
 0x3d0   : > { %v2233_v30 = vpop.f32.mrb[45].mxu0 }
 0x3d1   : > { %v2234_v39 = vadd.f32 %v2233_v30, %v2232_v38  ;;  %v2235_v52 = vpop.f32.mrb[46].mxu0  ;;  %v1714_v40 = vpack.c.bf16 %v1690_v37, %v1689_v36 }
 0x3d2   : > { %v2236_v3 = vpop.f32.mrb[47].mxu0 }
 0x3d3   : > { %v1667_v53 = vadd.f32 %v2234_v39, %v2176_v27  ;;  %v2237_v41 = vadd.f32 %v2236_v3, %v2235_v52  ;;  %2288 = vmatprep.mubr.bf16.mxu0 %v1714_v40 }
 0x3d5   : > { %v1670_v42 = vadd.f32 %v2237_v41, %v2176_v27  ;;  %v1691_v43 = vmax.f32 %v1667_v53, 0.0 }
 0x3d7   : > { %v1692_v44 = vmax.f32 %v1670_v42, 0.0  ;;  %v2238_v45 = vpop.f32.mrb[48].mxu0 }
 0x3d8   : > { %v2239_v46 = vpop.f32.mrb[49].mxu0 }
 0x3d9   : > { %v1715_v47 = vpack.c.bf16 %v1692_v44, %v1691_v43  ;;  %v2240_v48 = vadd.f32 %v2239_v46, %v2238_v45  ;;  %v2241_v49 = vpop.f32.mrb[50].mxu0 }
 0x3da   : > { %v2242_v50 = vpop.f32.mrb[51].mxu0 }
 0x3db   : > { %v1675_v51 = vadd.f32 %v2240_v48, %v2176_v27  ;;  %v2243_v56 = vadd.f32 %v2242_v50, %v2241_v49  ;;  %2289 = vmatmul.mubr.bf16.vlgmr.msra.gmra.mrb[56].mxu0 %v1715_v47 }
 0x3dd   : > { %v1678_v57 = vadd.f32 %v2243_v56, %v2176_v27  ;;  %v1693_v58 = vmax.f32 %v1675_v51, 0.0 }
 0x3df   : > { %v1694_v59 = vmax.f32 %v1678_v57, 0.0  ;;  %v2244_v60 = vpop.f32.mrb[52].mxu0 }
 0x3e0   : > { %v2245_v61 = vpop.f32.mrb[53].mxu0 }
 0x3e1   : > { %v2246_v62 = vadd.f32 %v2245_v61, %v2244_v60  ;;  %v2247_v63 = vpop.f32.mrb[54].mxu0  ;;  %v1716_v0 = vpack.c.bf16 %v1694_v59, %v1693_v58 }
 0x3e2   : > { %v2248_v54 = vpop.f32.mrb[55].mxu0 }
 0x3e3   : > { %v1683_v2 = vadd.f32 %v2246_v62, %v2176_v27  ;;  %v2249_v4 = vadd.f32 %v2248_v54, %v2247_v63  ;;  %2292 = vmatprep.mubr.bf16.mxu0 %v1716_v0 }
 0x3e5   : > { %v1686_v5 = vadd.f32 %v2249_v4, %v2176_v27  ;;  %v1695_v6 = vmax.f32 %v1683_v2, 0.0 }
 0x3e7   : > { %v1696_v55 = vmax.f32 %v1686_v5, 0.0 }
 0x3e9   : > { %v1717_v7 = vpack.c.bf16 %v1696_v55, %v1695_v6 }
 0x3eb   : > { %2293 = vmatmul.mubr.bf16.gmra.mrb[60].mxu0 %v1717_v7 }
 0x4ae   : > { %v2290_v8 = vpop.f32.mrb[56].mxu0 }
 0x4af   : > { %v1815_v11 = vadd.f32 %v2290_v8, %v2193_v9  ;;  %v1806_v12 = vpop.f32.mrb[57].mxu0 }
 0x4b0   : > { %v1807_v13 = vadd.f32 %v2193_v9, %v1806_v12  ;;  %v2291_v14 = vpop.f32.mrb[58].mxu0 }
 0x4b1   : > { %v1818_v15 = vadd.f32 %v2291_v14, %v2193_v9  ;;  %v1809_v16 = vpop.f32.mrb[59].mxu0  ;;  %v1844_v17 = vsel %vm1837_vm4, %v1815_v11, -inf }
 0x4b2   : > { %v1810_v10 = vadd.f32 %v2193_v9, %v1809_v16  ;;  %1845 = vmax.xlane.f32.xlu1 %v1844_v17  ;;  %v1838_v1 = vsel %vm1837_vm4, %v1807_v13, -inf }
 0x4b3   : > { %1839 = vmax.xlane.f32.xlu0 %v1838_v1  ;;  %v1847_v18 = vsel %vm1837_vm4, %v1818_v15, -inf }
 0x4b4   : > { %v1841_v19 = vsel %vm1837_vm4, %v1810_v10, -inf }
 0x4b6   : > { %1848 = vmax.xlane.f32.xlu1 %v1847_v18 }
 0x4b7   : > { %1842 = vmax.xlane.f32.xlu0 %v1841_v19 }
 0x4be   : > { %v2294_v20 = vpop.f32.mrb[60].mxu0 }
 0x4bf   : > { %v1822_v21 = vpop.f32.mrb[61].mxu0  ;;  %v1831_v25 = vadd.f32 %v2294_v20, %v2193_v9 }
 0x4c0   : > { %v1823_v22 = vadd.f32 %v2193_v9, %v1822_v21  ;;  %v2295_v23 = vpop.f32.mrb[62].mxu0 }
 0x4c1   : > { %v1825_v24 = vpop.f32.mrb[63].mxu0  ;;  %v1834_v28 = vadd.f32 %v2295_v23, %v2193_v9  ;;  %v1856_v31 = vsel %vm1837_vm4, %v1831_v25, -inf }
 0x4c2   : > { %v1826_v26 = vadd.f32 %v2193_v9, %v1825_v24  ;;  %v1850_v27 = vsel %vm1837_vm4, %v1823_v22, -inf }
 0x4c3   : > { %1851 = vmax.xlane.f32.xlu0 %v1850_v27  ;;  %v1859_v32 = vsel %vm1837_vm4, %v1834_v28, -inf }
 0x4c4   : > { %v1853_v29 = vsel %vm1837_vm4, %v1826_v26, -inf }
 0x4c5   : > { %1854 = vmax.xlane.f32.xlu1 %v1853_v29 }
 0x4c7   : > { %1857 = vmax.xlane.f32.xlu0 %v1856_v31 }
 0x4c9   : > { %1860 = vmax.xlane.f32.xlu1 %v1859_v32 }
 0x53f   : > { %v1846_v33 = vpop.xlane.xlu1 %1845 }
 0x540   : > { %v3093_v34 = vsub.f32 %v1815_v11, %v1846_v33  ;;  %v1840_v35 = vpop.xlane.xlu0 %1839 }
 0x541   : > { %v3095_v36 = vsub.f32 %v1807_v13, %v1840_v35 }
 0x542   : > { %v1874_v37 = vmul.f32 1.442695, %v3093_v34 }
 0x543   : > { %v1870_v38 = vmul.f32 1.442695, %v3095_v36  ;;  %v1849_v30 = vpop.xlane.xlu1 %1848 }
 0x544   : > { %2514 = vpow2.f32 %v1874_v37  ;;  %v3099_v39 = vsub.f32 %v1818_v15, %v1849_v30  ;;  %v1843_v52 = vpop.xlane.xlu0 %1842 }
 0x545   : > { %v3101_v40 = vsub.f32 %v1810_v10, %v1843_v52  ;;  %2516 = vpow2.f32 %v1870_v38 }
 0x546   : > { %v1876_v3 = vmul.f32 1.442695, %v3099_v39 }
 0x547   : > { %v1872_v53 = vmul.f32 1.442695, %v3101_v40 }
 0x548   : > { %2518 = vpow2.f32 %v1876_v3 }
 0x549   : > { %2520 = vpow2.f32 %v1872_v53 }
 0x54e   : > { %v2515_v41 = vpop.eup %2514 }
 0x54f   : > { %v1892_v42 = vsel %vm1837_vm4, %v2515_v41, 0.0  ;;  %v2517_v43 = vpop.eup %2516 }
 0x550   : > { %1893 = vadd.xlane.f32.xlu0 %v1892_v42  ;;  %v1852_v44 = vpop.xlane.xlu0 %1851  ;;  %v1886_v51 = vsel %vm1837_vm4, %v2517_v43, 0.0 }
 0x551   : > { %v3106_v45 = vsub.f32 %v1823_v22, %v1852_v44 }
 0x552   : > { %v2519_v46 = vpop.eup %2518  ;;  %v1855_v47 = vpop.xlane.xlu1 %1854 }
 0x553   : > { %v1878_v48 = vmul.f32 1.442695, %v3106_v45  ;;  %v3109_v49 = vsub.f32 %v1826_v26, %v1855_v47  ;;  %v1895_v50 = vsel %vm1837_vm4, %v2519_v46, 0.0  ;;  %v2521_v56 = vpop.eup %2520 }
 0x554   : > { %1896 = vadd.xlane.f32.xlu1 %v1895_v50  ;;  %1887 = vadd.xlane.f32.xlu0 %v1886_v51  ;;  %v1858_v57 = vpop.xlane.xlu0 %1857  ;;  %v1889_v63 = vsel %vm1837_vm4, %v2521_v56, 0.0 }
 0x555   : > { %2522 = vpow2.f32 %v1878_v48  ;;  %v1880_v58 = vmul.f32 1.442695, %v3109_v49  ;;  %v3114_v59 = vsub.f32 %v1831_v25, %v1858_v57 }
 0x556   : > { %v1861_v60 = vpop.xlane.xlu1 %1860 }
 0x557   : > { %2524 = vpow2.f32 %v1880_v58  ;;  %v1882_v61 = vmul.f32 1.442695, %v3114_v59  ;;  %v3117_v62 = vsub.f32 %v1834_v28, %v1861_v60 }
 0x558   : > { %1890 = vadd.xlane.f32.xlu1 %v1889_v63 }
 0x559   : > { %2526 = vpow2.f32 %v1882_v61  ;;  %v1884_v0 = vmul.f32 1.442695, %v3117_v62 }
 0x55b   : > { %2528 = vpow2.f32 %v1884_v0 }
 0x55f   : > { %v2523_v54 = vpop.eup %2522 }
 0x560   : > { %v1898_v2 = vsel %vm1837_vm4, %v2523_v54, 0.0 }
 0x561   : > { %v2525_v4 = vpop.eup %2524  ;;  %1899 = vadd.xlane.f32.xlu0 %v1898_v2 }
 0x562   : > { %v1901_v5 = vsel %vm1837_vm4, %v2525_v4, 0.0 }
 0x563   : > { %v2527_v6 = vpop.eup %2526  ;;  %1902 = vadd.xlane.f32.xlu1 %v1901_v5 }
 0x564   : > { %v1904_v55 = vsel %vm1837_vm4, %v2527_v6, 0.0 }
 0x565   : > { %v2529_v7 = vpop.eup %2528  ;;  %1905 = vadd.xlane.f32.xlu0 %v1904_v55 }
 0x566   : > { %v1907_v9 = vsel %vm1837_vm4, %v2529_v7, 0.0 }
 0x567   : > { %1908 = vadd.xlane.f32.xlu1 %v1907_v9 }
 0x5dd   : > { %v1894_v8 = vpop.xlane.xlu0 %1893 }
 0x5de   : > { %2530 = vlog2.f32 %v1894_v8 }
 0x5e1   : > { %v1897_v11 = vpop.xlane.xlu1 %1896  ;;  %v1888_v12 = vpop.xlane.xlu0 %1887 }
 0x5e2   : > { %2532 = vlog2.f32 %v1897_v11 }
 0x5e3   : > { %2534 = vlog2.f32 %v1888_v12 }
 0x5e5   : > { %v1891_v13 = vpop.xlane.xlu1 %1890 }
 0x5e6   : > { %2536 = vlog2.f32 %v1891_v13 }
 0x5e8   : > { %v2531_v14 = vpop.eup %2530 }
 0x5e9   : > { %v1915_v15 = vmul.f32 0.6931472, %v2531_v14 }
 0x5eb   : > { %v1928_v16 = vsub.f32 %v3093_v34, %v1915_v15 }
 0x5ec   : > { %v2533_v17 = vpop.eup %2532 }
 0x5ed   : > { %v2535_v10 = vpop.eup %2534  ;;  %1936 = vst.msk [vmem:[%s3130_s17 + $0x10] sm:$0xff] %vm1837_vm4, %v1928_v16  ;;  %v1917_v1 = vmul.f32 0.6931472, %v2533_v17 }
 0x5ee   : > { %v1911_v18 = vmul.f32 0.6931472, %v2535_v10  ;;  %v1900_v19 = vpop.xlane.xlu0 %1899 }
 0x5ef   : > { %v1929_v20 = vsub.f32 %v3099_v39, %v1917_v1  ;;  %2538 = vlog2.f32 %v1900_v19 }
 0x5f0   : > { %v2537_v21 = vpop.eup %2536  ;;  %v1926_v22 = vsub.f32 %v3095_v36, %v1911_v18  ;;  %v1903_v23 = vpop.xlane.xlu1 %1902 }
 0x5f1   : > { %1937 = vst.msk [vmem:[%s3130_s17 + $0x18] sm:$0xff] %vm1837_vm4, %v1929_v20  ;;  %v1913_v24 = vmul.f32 0.6931472, %v2537_v21  ;;  %2540 = vlog2.f32 %v1903_v23 }
 0x5f2   : > { %1934 = vst.msk [vmem:[%s3130_s17] sm:$0xff] %vm1837_vm4, %v1926_v22  ;;  %v1906_v25 = vpop.xlane.xlu0 %1905 }
 0x5f3   : > { %v1927_v26 = vsub.f32 %v3101_v40, %v1913_v24  ;;  %2542 = vlog2.f32 %v1906_v25 }
 0x5f4   : > { %v1909_v27 = vpop.xlane.xlu1 %1908 }
 0x5f5   : > { %1935 = vst.msk [vmem:[%s3130_s17 + $0x8] sm:$0xff] %vm1837_vm4, %v1927_v26  ;;  %2544 = vlog2.f32 %v1909_v27 }
 0x5f9   : > { %v2539_v28 = vpop.eup %2538 }
 0x5fa   : > { %v1919_v29 = vmul.f32 0.6931472, %v2539_v28 }
 0x5fb   : > { %v2541_v31 = vpop.eup %2540 }
 0x5fc   : > { %v1930_v32 = vsub.f32 %v3106_v45, %v1919_v29  ;;  %v1921_v33 = vmul.f32 0.6931472, %v2541_v31 }
 0x5fd   : > { %v2543_v34 = vpop.eup %2542 }
 0x5fe   : > { %1938 = vst.msk [vmem:[%s3130_s17 + $0x20] sm:$0xff] %vm1837_vm4, %v1930_v32  ;;  %v1931_v35 = vsub.f32 %v3109_v49, %v1921_v33  ;;  %v1923_v36 = vmul.f32 0.6931472, %v2543_v34 }
 0x5ff   : > { %v2545_v37 = vpop.eup %2544 }
 0x600   : > { %1939 = vst.msk [vmem:[%s3130_s17 + $0x28] sm:$0xff] %vm1837_vm4, %v1931_v35  ;;  %v1932_v38 = vsub.f32 %v3114_v59, %v1923_v36  ;;  %v1925_v30 = vmul.f32 0.6931472, %v2545_v37 }
 0x602   : > { %1940 = vst.msk [vmem:[%s3130_s17 + $0x30] sm:$0xff] %vm1837_vm4, %v1932_v38  ;;  %v1933_v39 = vsub.f32 %v3117_v62, %v1925_v30 }
 0x604   : > { %1941 = vst.msk [vmem:[%s3130_s17 + $0x38] sm:$0xff] %vm1837_vm4, %v1933_v39 }
 0x605 PF: > { %s21_s21 = sadd.s32 1, %s2584_s21   ;;  %s3184_s25 = sld [smem:[#allocation2_spill]] }
 0x606   : > { %p18_p7 = scmp.ge.s32.totalorder %s21_s21, 6   ;;  %s3185_s17 = smov %s2576_s19 }
 0x607   : > { %s3186_s18 = smov %s2580_s20  ;;  %s3187_s19 = smov %s3190_s22 }
 0x608   :  { %20 = sbr.rel (!%p18_p7) target bundleno = 3 (0x3), region = 103 }
 0x60b   : > { %s3188_s20 = smov %s3184_s25 }

// kernel: pointnet_forward.9
= control target key start
LH: loop header
LB: loop body
LE: loop exit
PB: predicated region body
PF: predicated region fallthrough
CT: control target
= control target key end

     0   :  { %v7890_v36 = vmov 1983009808   ;;  %v291_v38 = vlaneseq  ;;  %s10725_s1 = inlined_call_operand.vmem [shape: bf16[1024,512], index: 1, kind: input, shape index: {}]   ;;  %s10726_s0 = inlined_call_operand.vmem [shape: f32[2,1024], index: 0, kind: input, shape index: {}]   ;;  %s10727_s3 = inlined_call_operand.vmem [shape: bf16[512,256], index: 3, kind: input, shape index: {}]   ;;  %s10728_s5 = inlined_call_operand.vmem [shape: bf16[256,4096], index: 5, kind: input, shape index: {}]   ;;  %s10729_s2 = inlined_call_operand.vmem [shape: f32[1,512], index: 2, kind: input, shape index: {}]   ;;  %s10730_s4 = inlined_call_operand.vmem [shape: f32[1,256], index: 4, kind: input, shape index: {}]   ;;  %s10731_s6 = inlined_call_operand.vmem [shape: f32[1,4096], index: 6, kind: input, shape index: {}]   ;;  %s10732_s7 = inlined_call_operand.vmem [shape: f32[2,4096], index: 7, kind: output, shape index: {}]  }
   0x1   :  { %v7407_v0 = vld [vmem:[%s10725_s1 + $0x4] ss:$16 sps:$4 sm:$0xff]   ;;  %v7409_v1 = vld [vmem:[%s10725_s1 + $0xc] ss:$16 sps:$4 sm:$0xff]   ;;  %v7411_v2 = vld [vmem:[%s10725_s1] ss:$16 sps:$4 sm:$0xff]   ;;  %v289_v37 = vunpack.c.l.s4 %v7890_v36 }
   0x2   :  { %1638 = vmatprep.subr.bf16.mxu0 %v7407_v0  ;;  %v7412_v3 = vld [vmem:[%s10725_s1 + $0x8] ss:$16 sps:$4 sm:$0xff]   ;;  %1802 = vmatprep.subr.bf16.mxu1 %v7409_v1  ;;  %v7413_v4 = vld [vmem:[%s10725_s1 + $0x24] ss:$16 sps:$4 sm:$0xff]   ;;  %v7415_v5 = vld [vmem:[%s10725_s1 + $0x2c] ss:$16 sps:$4 sm:$0xff]  }
   0x3   :  { %1639 = vmatpush1.bf16.msra.mxu0 %v7411_v2  ;;  %1803 = vmatpush1.bf16.msra.mxu1 %v7412_v3  ;;  %v7417_v6 = vld [vmem:[%s10725_s1 + $0x20] ss:$16 sps:$4 sm:$0xff]   ;;  %v7418_v7 = vld [vmem:[%s10725_s1 + $0x28] ss:$16 sps:$4 sm:$0xff]   ;;  %v7419_v8 = vld [vmem:[%s10725_s1 + $0x44] ss:$16 sps:$4 sm:$0xff]   ;;  %v290_v42 = vunpack.c.0.s8 %v289_v37 }
   0x4   :  { %1640 = vmatprep.subr.bf16.mxu0 %v7413_v4  ;;  %1804 = vmatprep.subr.bf16.mxu1 %v7415_v5  ;;  %v7421_v9 = vld [vmem:[%s10725_s1 + $0x4c] ss:$16 sps:$4 sm:$0xff]   ;;  %v7423_v10 = vld [vmem:[%s10725_s1 + $0x40] ss:$16 sps:$4 sm:$0xff]   ;;  %v7424_v11 = vld [vmem:[%s10725_s1 + $0x48] ss:$16 sps:$4 sm:$0xff]  }
   0x5   :  { %v7425_v12 = vld [vmem:[%s10725_s1 + $0x64] ss:$16 sps:$4 sm:$0xff]   ;;  %v7427_v13 = vld [vmem:[%s10725_s1 + $0x6c] ss:$16 sps:$4 sm:$0xff]   ;;  %v7429_v14 = vld [vmem:[%s10725_s1 + $0x60] ss:$16 sps:$4 sm:$0xff]  }
   0x6   :  { %v7430_v15 = vld [vmem:[%s10725_s1 + $0x68] ss:$16 sps:$4 sm:$0xff]   ;;  %v7431_v16 = vld [vmem:[%s10725_s1 + $0x84] ss:$16 sps:$4 sm:$0xff]   ;;  %v7433_v17 = vld [vmem:[%s10725_s1 + $0x8c] ss:$16 sps:$4 sm:$0xff]  }
   0x7   :  { %1641 = vmatpush1.bf16.msra.mxu0 %v7417_v6  ;;  %1805 = vmatpush1.bf16.msra.mxu1 %v7418_v7  ;;  %v7435_v18 = vld [vmem:[%s10725_s1 + $0x80] ss:$16 sps:$4 sm:$0xff]   ;;  %v7436_v19 = vld [vmem:[%s10725_s1 + $0x88] ss:$16 sps:$4 sm:$0xff]   ;;  %v7437_v20 = vld [vmem:[%s10725_s1 + $0xa4] ss:$16 sps:$4 sm:$0xff]  }
   0x8   :  { %1642 = vmatprep.subr.bf16.mxu0 %v7419_v8  ;;  %1806 = vmatprep.subr.bf16.mxu1 %v7421_v9  ;;  %v7439_v21 = vld [vmem:[%s10725_s1 + $0xac] ss:$16 sps:$4 sm:$0xff]   ;;  %v7441_v22 = vld [vmem:[%s10725_s1 + $0xa0] ss:$16 sps:$4 sm:$0xff]   ;;  %v7442_v23 = vld [vmem:[%s10725_s1 + $0xa8] ss:$16 sps:$4 sm:$0xff]  }
   0x9   :  { %v7443_v24 = vld [vmem:[%s10725_s1 + $0xc4] ss:$16 sps:$4 sm:$0xff]   ;;  %v7445_v25 = vld [vmem:[%s10725_s1 + $0xcc] ss:$16 sps:$4 sm:$0xff]   ;;  %v7447_v26 = vld [vmem:[%s10725_s1 + $0xc0] ss:$16 sps:$4 sm:$0xff]  }
   0xa   :  { %v7448_v27 = vld [vmem:[%s10725_s1 + $0xc8] ss:$16 sps:$4 sm:$0xff]   ;;  %v7449_v28 = vld [vmem:[%s10725_s1 + $0xe4] ss:$16 sps:$4 sm:$0xff]   ;;  %v7451_v29 = vld [vmem:[%s10725_s1 + $0xec] ss:$16 sps:$4 sm:$0xff]  }
   0xb   :  { %1643 = vmatpush1.bf16.msra.mxu0 %v7423_v10  ;;  %1807 = vmatpush1.bf16.msra.mxu1 %v7424_v11  ;;  %v7453_v30 = vld [vmem:[%s10725_s1 + $0xe0] ss:$16 sps:$4 sm:$0xff]   ;;  %v7454_v31 = vld [vmem:[%s10725_s1 + $0xe8] ss:$16 sps:$4 sm:$0xff]   ;;  %v7455_v32 = vld [vmem:[%s10725_s1 + $0x104] ss:$16 sps:$4 sm:$0xff]  }
   0xc   :  { %1644 = vmatprep.subr.bf16.mxu0 %v7425_v12  ;;  %1808 = vmatprep.subr.bf16.mxu1 %v7427_v13  ;;  %v7457_v33 = vld [vmem:[%s10725_s1 + $0x10c] ss:$16 sps:$4 sm:$0xff]   ;;  %v7459_v34 = vld [vmem:[%s10725_s1 + $0x100] ss:$16 sps:$4 sm:$0xff]   ;;  %v7460_v35 = vld [vmem:[%s10725_s1 + $0x108] ss:$16 sps:$4 sm:$0xff]  }
   0xd   :  { %v7461_v39 = vld [vmem:[%s10725_s1 + $0x124] ss:$16 sps:$4 sm:$0xff]   ;;  %v7463_v40 = vld [vmem:[%s10725_s1 + $0x12c] ss:$16 sps:$4 sm:$0xff]   ;;  %v7465_v41 = vld [vmem:[%s10725_s1 + $0x120] ss:$16 sps:$4 sm:$0xff]  }
   0xe   :  { %v8048_v43 = vshrl.u32 %v291_v38, 7  ;;  %v7466_v44 = vld [vmem:[%s10725_s1 + $0x128] ss:$16 sps:$4 sm:$0xff]   ;;  %v7467_v45 = vld [vmem:[%s10725_s1 + $0x144] ss:$16 sps:$4 sm:$0xff]  }
   0xf   :  { %1645 = vmatpush1.bf16.msra.mxu0 %v7429_v14  ;;  %1809 = vmatpush1.bf16.msra.mxu1 %v7430_v15  ;;  %v7469_v46 = vld [vmem:[%s10725_s1 + $0x14c] ss:$16 sps:$4 sm:$0xff]   ;;  %v7471_v47 = vld [vmem:[%s10725_s1 + $0x140] ss:$16 sps:$4 sm:$0xff]   ;;  %v7472_v48 = vld [vmem:[%s10725_s1 + $0x148] ss:$16 sps:$4 sm:$0xff]  }
  0x10   :  { %1646 = vmatprep.subr.bf16.mxu0 %v7431_v16  ;;  %1810 = vmatprep.subr.bf16.mxu1 %v7433_v17  ;;  %v8066_v49 = vsub.s32 %v290_v42, %v8048_v43  ;;  %v7473_v50 = vld [vmem:[%s10725_s1 + $0x164] ss:$16 sps:$4 sm:$0xff]   ;;  %v7475_v51 = vld [vmem:[%s10725_s1 + $0x16c] ss:$16 sps:$4 sm:$0xff]   ;;  %v7477_v54 = vld [vmem:[%s10725_s1 + $0x160] ss:$16 sps:$4 sm:$0xff]  }
  0x11   :  { %v26_v52 = vld [vmem:[%s10726_s0] sm:$0xff]  ;;  %v7478_v55 = vld [vmem:[%s10725_s1 + $0x168] ss:$16 sps:$4 sm:$0xff]   ;;  %v7481_v57 = vld [vmem:[%s10725_s1 + $0x18c] ss:$16 sps:$4 sm:$0xff]  }
  0x12   :  { %v294_v53 = vrot.slane %v26_v52, %v8066_v49  ;;  %v7479_v56 = vld [vmem:[%s10725_s1 + $0x184] ss:$16 sps:$4 sm:$0xff]   ;;  %v7483_v60 = vld [vmem:[%s10725_s1 + $0x180] ss:$16 sps:$4 sm:$0xff]   ;;  %v7484_v61 = vld [vmem:[%s10725_s1 + $0x188] ss:$16 sps:$4 sm:$0xff]   ;;  %v287_v4 = vcombine.high %v26_v52, %v26_v52 }
  0x13   :  { %1647 = vmatpush1.bf16.msra.mxu0 %v7435_v18  ;;  %1811 = vmatpush1.bf16.msra.mxu1 %v7436_v19  ;;  %v7485_v62 = vld [vmem:[%s10725_s1 + $0x1a4] ss:$16 sps:$4 sm:$0xff]   ;;  %v7487_v63 = vld [vmem:[%s10725_s1 + $0x1ac] ss:$16 sps:$4 sm:$0xff]   ;;  %v7489_v0 = vld [vmem:[%s10725_s1 + $0x1a0] ss:$16 sps:$4 sm:$0xff]  }
  0x14   :  { %1648 = vmatprep.subr.bf16.mxu0 %v7437_v20  ;;  %1812 = vmatprep.subr.bf16.mxu1 %v7439_v21  ;;  %v302_v58 = vcombine.high %v294_v53, %v294_v53  ;;  %v7490_v1 = vld [vmem:[%s10725_s1 + $0x1a8] ss:$16 sps:$4 sm:$0xff]   ;;  %v7491_v2 = vld [vmem:[%s10725_s1 + $0x1c4] ss:$16 sps:$4 sm:$0xff]   ;;  %v7493_v3 = vld [vmem:[%s10725_s1 + $0x1cc] ss:$16 sps:$4 sm:$0xff]   ;;  %v8127_v9 = vrot.slane %v287_v4, %v8066_v49  ;;  %v329_v15 = vpack.c.bf16 %v294_v53, %v294_v53 }
  0x15   :  { %v7495_v5 = vld [vmem:[%s10725_s1 + $0x1c0] ss:$16 sps:$4 sm:$0xff]   ;;  %v7496_v6 = vld [vmem:[%s10725_s1 + $0x1c8] ss:$16 sps:$4 sm:$0xff]   ;;  %v7497_v7 = vld [vmem:[%s10725_s1 + $0x1e4] ss:$16 sps:$4 sm:$0xff]  }
  0x16   :  { %v330_v59 = vpack.c.bf16 %v302_v58, %v302_v58  ;;  %v7499_v8 = vld [vmem:[%s10725_s1 + $0x1ec] ss:$16 sps:$4 sm:$0xff]   ;;  %v7501_v10 = vld [vmem:[%s10725_s1 + $0x1e0] ss:$16 sps:$4 sm:$0xff]   ;;  %v7502_v11 = vld [vmem:[%s10725_s1 + $0x1e8] ss:$16 sps:$4 sm:$0xff]   ;;  %v303_v14 = vcombine.high %v8127_v9, %v8127_v9 }
  0x17   :  { %1649 = vmatpush1.bf16.msra.mxu0 %v7441_v22  ;;  %1813 = vmatpush1.bf16.msra.mxu1 %v7442_v23  ;;  %v7507_v12 = vld [vmem:[%s10725_s1 + $0x204] ss:$16 sps:$4 sm:$0xff]   ;;  %v7510_v13 = vld [vmem:[%s10725_s1 + $0x20c] ss:$16 sps:$4 sm:$0xff]   ;;  %v7505_v16 = vld [vmem:[%s10725_s1 + $0x200] ss:$16 sps:$4 sm:$0xff]  }
  0x18   :  { %1650 = vmatprep.subr.bf16.mxu0 %v7443_v24  ;;  %1814 = vmatprep.subr.bf16.mxu1 %v7445_v25  ;;  %v7508_v17 = vld [vmem:[%s10725_s1 + $0x208] ss:$16 sps:$4 sm:$0xff]   ;;  %v7513_v18 = vld [vmem:[%s10725_s1 + $0x224] ss:$16 sps:$4 sm:$0xff]   ;;  %v7516_v19 = vld [vmem:[%s10725_s1 + $0x22c] ss:$16 sps:$4 sm:$0xff]   ;;  %v332_v20 = vpack.c.bf16 %v303_v14, %v303_v14 }
  0x19   :  { %1670 = vmatprep.mubr.bf16.mxu0 %v330_v59  ;;  %1834 = vmatprep.mubr.bf16.mxu1 %v330_v59  ;;  %v7511_v21 = vld [vmem:[%s10725_s1 + $0x220] ss:$16 sps:$4 sm:$0xff]   ;;  %v7514_v22 = vld [vmem:[%s10725_s1 + $0x228] ss:$16 sps:$4 sm:$0xff]   ;;  %v7519_v23 = vld [vmem:[%s10725_s1 + $0x244] ss:$16 sps:$4 sm:$0xff]  }
  0x1a   :  { %v7522_v24 = vld [vmem:[%s10725_s1 + $0x24c] ss:$16 sps:$4 sm:$0xff]   ;;  %v7517_v25 = vld [vmem:[%s10725_s1 + $0x240] ss:$16 sps:$4 sm:$0xff]   ;;  %v7538_v38 = vld [vmem:[%s10725_s1 + $0x2a8] ss:$16 sps:$4 sm:$0xff]  }
  0x1b   :  { %1651 = vmatpush1.bf16.msra.mxu0 %v7447_v26  ;;  %1815 = vmatpush1.bf16.msra.mxu1 %v7448_v27  ;;  %v7520_v26 = vld [vmem:[%s10725_s1 + $0x248] ss:$16 sps:$4 sm:$0xff]   ;;  %v7525_v27 = vld [vmem:[%s10725_s1 + $0x264] ss:$16 sps:$4 sm:$0xff]   ;;  %v7540_v36 = vld [vmem:[%s10725_s1 + $0x2ac] ss:$16 sps:$4 sm:$0xff]  }
  0x1c   :  { %1652 = vmatprep.subr.bf16.mxu0 %v7449_v28  ;;  %1816 = vmatprep.subr.bf16.mxu1 %v7451_v29  ;;  %v7528_v28 = vld [vmem:[%s10725_s1 + $0x26c] ss:$16 sps:$4 sm:$0xff]   ;;  %v7523_v29 = vld [vmem:[%s10725_s1 + $0x260] ss:$16 sps:$4 sm:$0xff]   ;;  %v7544_v42 = vld [vmem:[%s10725_s1 + $0x2c8] ss:$16 sps:$4 sm:$0xff]  }
  0x1d   :  { %v7535_v37 = vld [vmem:[%s10725_s1 + $0x2a0] ss:$16 sps:$4 sm:$0xff]   ;;  %v7556_v52 = vld [vmem:[%s10725_s1 + $0x308] ss:$16 sps:$4 sm:$0xff]   ;;  %v7561_v53 = vld [vmem:[%s10725_s1 + $0x324] ss:$16 sps:$4 sm:$0xff]  }
  0x1e   :  { %v7570_v58 = vld [vmem:[%s10725_s1 + $0x34c] ss:$16 sps:$4 sm:$0xff]   ;;  %v7565_v59 = vld [vmem:[%s10725_s1 + $0x340] ss:$16 sps:$4 sm:$0xff]   ;;  %v7580_v4 = vld [vmem:[%s10725_s1 + $0x388] ss:$16 sps:$4 sm:$0xff]  }
  0x1f   :  { %1653 = vmatpush1.bf16.msra.mxu0 %v7453_v30  ;;  %1817 = vmatpush1.bf16.msra.mxu1 %v7454_v31  ;;  %v7526_v30 = vld [vmem:[%s10725_s1 + $0x268] ss:$16 sps:$4 sm:$0xff]   ;;  %v7531_v31 = vld [vmem:[%s10725_s1 + $0x284] ss:$16 sps:$4 sm:$0xff]  }
  0x20   :  { %1654 = vmatprep.subr.bf16.mxu0 %v7455_v32  ;;  %1818 = vmatprep.subr.bf16.mxu1 %v7457_v33  ;;  %v7534_v32 = vld [vmem:[%s10725_s1 + $0x28c] ss:$16 sps:$4 sm:$0xff]   ;;  %v7529_v33 = vld [vmem:[%s10725_s1 + $0x280] ss:$16 sps:$4 sm:$0xff]   ;;  %v7592_v14 = vld [vmem:[%s10725_s1 + $0x3c8] ss:$16 sps:$4 sm:$0xff]  }
  0x23   :  { %1655 = vmatpush1.bf16.msra.mxu0 %v7459_v34  ;;  %1819 = vmatpush1.bf16.msra.mxu1 %v7460_v35  ;;  %v7532_v34 = vld [vmem:[%s10725_s1 + $0x288] ss:$16 sps:$4 sm:$0xff]   ;;  %v7537_v35 = vld [vmem:[%s10725_s1 + $0x2a4] ss:$16 sps:$4 sm:$0xff]  }
  0x24   :  { %1656 = vmatprep.subr.bf16.mxu0 %v7461_v39  ;;  %1820 = vmatprep.subr.bf16.mxu1 %v7463_v40  ;;  %v7543_v39 = vld [vmem:[%s10725_s1 + $0x2c4] ss:$16 sps:$4 sm:$0xff]   ;;  %v7546_v40 = vld [vmem:[%s10725_s1 + $0x2cc] ss:$16 sps:$4 sm:$0xff]  }
  0x27   :  { %1657 = vmatpush1.bf16.msra.mxu0 %v7465_v41  ;;  %1821 = vmatpush1.bf16.msra.mxu1 %v7466_v44  ;;  %v7541_v41 = vld [vmem:[%s10725_s1 + $0x2c0] ss:$16 sps:$4 sm:$0xff]   ;;  %v7549_v44 = vld [vmem:[%s10725_s1 + $0x2e4] ss:$16 sps:$4 sm:$0xff]  }
  0x28   :  { %1658 = vmatprep.subr.bf16.mxu0 %v7467_v45  ;;  %1822 = vmatprep.subr.bf16.mxu1 %v7469_v46  ;;  %v7552_v45 = vld [vmem:[%s10725_s1 + $0x2ec] ss:$16 sps:$4 sm:$0xff]   ;;  %v7547_v46 = vld [vmem:[%s10725_s1 + $0x2e0] ss:$16 sps:$4 sm:$0xff]  }
  0x2b   :  { %1659 = vmatpush1.bf16.msra.mxu0 %v7471_v47  ;;  %1823 = vmatpush1.bf16.msra.mxu1 %v7472_v48  ;;  %v7550_v47 = vld [vmem:[%s10725_s1 + $0x2e8] ss:$16 sps:$4 sm:$0xff]   ;;  %v7555_v48 = vld [vmem:[%s10725_s1 + $0x304] ss:$16 sps:$4 sm:$0xff]  }
  0x2c   :  { %1660 = vmatprep.subr.bf16.mxu0 %v7473_v50  ;;  %1824 = vmatprep.subr.bf16.mxu1 %v7475_v51  ;;  %v7558_v50 = vld [vmem:[%s10725_s1 + $0x30c] ss:$16 sps:$4 sm:$0xff]   ;;  %v7553_v51 = vld [vmem:[%s10725_s1 + $0x300] ss:$16 sps:$4 sm:$0xff]  }
  0x2f   :  { %1661 = vmatpush1.bf16.msra.mxu0 %v7477_v54  ;;  %1825 = vmatpush1.bf16.msra.mxu1 %v7478_v55  ;;  %v7564_v54 = vld [vmem:[%s10725_s1 + $0x32c] ss:$16 sps:$4 sm:$0xff]   ;;  %v7559_v55 = vld [vmem:[%s10725_s1 + $0x320] ss:$16 sps:$4 sm:$0xff]  }
  0x30   :  { %1662 = vmatprep.subr.bf16.mxu0 %v7479_v56  ;;  %1826 = vmatprep.subr.bf16.mxu1 %v7481_v57  ;;  %v7562_v56 = vld [vmem:[%s10725_s1 + $0x328] ss:$16 sps:$4 sm:$0xff]   ;;  %v7567_v57 = vld [vmem:[%s10725_s1 + $0x344] ss:$16 sps:$4 sm:$0xff]  }
  0x33   :  { %1663 = vmatpush1.bf16.msra.mxu0 %v7483_v60  ;;  %1827 = vmatpush1.bf16.msra.mxu1 %v7484_v61  ;;  %v7568_v60 = vld [vmem:[%s10725_s1 + $0x348] ss:$16 sps:$4 sm:$0xff]   ;;  %v7573_v61 = vld [vmem:[%s10725_s1 + $0x364] ss:$16 sps:$4 sm:$0xff]  }
  0x34   :  { %1664 = vmatprep.subr.bf16.mxu0 %v7485_v62  ;;  %1828 = vmatprep.subr.bf16.mxu1 %v7487_v63  ;;  %v7576_v62 = vld [vmem:[%s10725_s1 + $0x36c] ss:$16 sps:$4 sm:$0xff]   ;;  %v7571_v63 = vld [vmem:[%s10725_s1 + $0x360] ss:$16 sps:$4 sm:$0xff]  }
  0x37   :  { %1665 = vmatpush1.bf16.msra.mxu0 %v7489_v0  ;;  %1829 = vmatpush1.bf16.msra.mxu1 %v7490_v1  ;;  %v7574_v0 = vld [vmem:[%s10725_s1 + $0x368] ss:$16 sps:$4 sm:$0xff]   ;;  %v7579_v1 = vld [vmem:[%s10725_s1 + $0x384] ss:$16 sps:$4 sm:$0xff]  }
  0x38   :  { %1666 = vmatprep.subr.bf16.mxu0 %v7491_v2  ;;  %1830 = vmatprep.subr.bf16.mxu1 %v7493_v3  ;;  %v7582_v2 = vld [vmem:[%s10725_s1 + $0x38c] ss:$16 sps:$4 sm:$0xff]   ;;  %v7577_v3 = vld [vmem:[%s10725_s1 + $0x380] ss:$16 sps:$4 sm:$0xff]  }
  0x3b   :  { %1667 = vmatpush1.bf16.msra.mxu0 %v7495_v5  ;;  %1831 = vmatpush1.bf16.msra.mxu1 %v7496_v6  ;;  %v7585_v5 = vld [vmem:[%s10725_s1 + $0x3a4] ss:$16 sps:$4 sm:$0xff]   ;;  %v7588_v6 = vld [vmem:[%s10725_s1 + $0x3ac] ss:$16 sps:$4 sm:$0xff]  }
  0x3c   :  { %1668 = vmatprep.subr.bf16.mxu0 %v7497_v7  ;;  %1832 = vmatprep.subr.bf16.mxu1 %v7499_v8  ;;  %v7583_v7 = vld [vmem:[%s10725_s1 + $0x3a0] ss:$16 sps:$4 sm:$0xff]   ;;  %v7586_v8 = vld [vmem:[%s10725_s1 + $0x3a8] ss:$16 sps:$4 sm:$0xff]  }
  0x3f   :  { %1669 = vmatpush1.bf16.msra.mxu0 %v7501_v10  ;;  %1833 = vmatpush1.bf16.msra.mxu1 %v7502_v11  ;;  %v7591_v10 = vld [vmem:[%s10725_s1 + $0x3c4] ss:$16 sps:$4 sm:$0xff]   ;;  %v7594_v11 = vld [vmem:[%s10725_s1 + $0x3cc] ss:$16 sps:$4 sm:$0xff]  }
  0x40   :  { %1679 = vmatprep.subr.bf16.mxu0 %v7507_v12  ;;  %1843 = vmatprep.subr.bf16.mxu1 %v7510_v13  ;;  %v8314_v12 = vld [vmem:[%s10726_s0 + $0x8] sm:$0xff]  ;;  %v7589_v13 = vld [vmem:[%s10725_s1 + $0x3c0] ss:$16 sps:$4 sm:$0xff]  }
  0x42   :  { %1671 = vmatmul.mubr.bf16.vlgmr.msra.gmra.mrb[0].mxu0 %v329_v15  ;;  %1835 = vmatmul.mubr.bf16.vlgmr.msra.gmra.mrb[0].mxu1 %v329_v15  ;;  %v7597_v15 = vld [vmem:[%s10725_s1 + $0x3e4] ss:$16 sps:$4 sm:$0xff]  }
  0x43   :  { %1680 = vmatpush1.bf16.msra.mxu0 %v7505_v16  ;;  %1844 = vmatpush1.bf16.msra.mxu1 %v7508_v17  ;;  %v7600_v16 = vld [vmem:[%s10725_s1 + $0x3ec] ss:$16 sps:$4 sm:$0xff]   ;;  %v8330_v17 = vrot.slane %v8314_v12, %v8066_v49 }
  0x44   :  { %1681 = vmatprep.subr.bf16.mxu0 %v7513_v18  ;;  %1845 = vmatprep.subr.bf16.mxu1 %v7516_v19  ;;  %v7595_v18 = vld [vmem:[%s10725_s1 + $0x3e0] ss:$16 sps:$4 sm:$0xff]   ;;  %v7598_v19 = vld [vmem:[%s10725_s1 + $0x3e8] ss:$16 sps:$4 sm:$0xff]  }
  0x45   :  { %1711 = vmatprep.mubr.bf16.mxu0 %v332_v20  ;;  %1875 = vmatprep.mubr.bf16.mxu1 %v332_v20  ;;  %v7603_v20 = vld [vmem:[%s10725_s1 + $0x404] ss:$16 sps:$4 sm:$0xff]  }
  0x47   :  { %1682 = vmatpush1.bf16.msra.mxu0 %v7511_v21  ;;  %1846 = vmatpush1.bf16.msra.mxu1 %v7514_v22  ;;  %v7606_v21 = vld [vmem:[%s10725_s1 + $0x40c] ss:$16 sps:$4 sm:$0xff]   ;;  %v319_v22 = vcombine.high %v8330_v17, %v8330_v17 }
  0x48   :  { %1683 = vmatprep.subr.bf16.mxu0 %v7519_v23  ;;  %1847 = vmatprep.subr.bf16.mxu1 %v7522_v24  ;;  %v331_v23 = vpack.c.bf16 %v8127_v9, %v8127_v9  ;;  %v7601_v24 = vld [vmem:[%s10725_s1 + $0x400] ss:$16 sps:$4 sm:$0xff]   ;;  %v7612_v9 = vld [vmem:[%s10725_s1 + $0x42c] ss:$16 sps:$4 sm:$0xff]  }
  0x4b   :  { %1684 = vmatpush1.bf16.msra.mxu0 %v7517_v25  ;;  %1848 = vmatpush1.bf16.msra.mxu1 %v7520_v26  ;;  %v7604_v25 = vld [vmem:[%s10725_s1 + $0x408] ss:$16 sps:$4 sm:$0xff]   ;;  %v7609_v26 = vld [vmem:[%s10725_s1 + $0x424] ss:$16 sps:$4 sm:$0xff]  }
  0x4c   :  { %1685 = vmatprep.subr.bf16.mxu0 %v7525_v27  ;;  %1849 = vmatprep.subr.bf16.mxu1 %v7528_v28  ;;  %v334_v27 = vpack.c.bf16 %v319_v22, %v319_v22  ;;  %v7607_v28 = vld [vmem:[%s10725_s1 + $0x420] ss:$16 sps:$4 sm:$0xff]  }
  0x4d   :  { %v7685_v22 = vld [vmem:[%s10725_s1 + $0x5c0] ss:$16 sps:$4 sm:$0xff]  }
  0x4f   :  { %1686 = vmatpush1.bf16.msra.mxu0 %v7523_v29  ;;  %1850 = vmatpush1.bf16.msra.mxu1 %v7526_v30  ;;  %v7610_v29 = vld [vmem:[%s10725_s1 + $0x428] ss:$16 sps:$4 sm:$0xff]   ;;  %v7615_v30 = vld [vmem:[%s10725_s1 + $0x444] ss:$16 sps:$4 sm:$0xff]  }
  0x50   :  { %1687 = vmatprep.subr.bf16.mxu0 %v7531_v31  ;;  %1851 = vmatprep.subr.bf16.mxu1 %v7534_v32  ;;  %v7618_v31 = vld [vmem:[%s10725_s1 + $0x44c] ss:$16 sps:$4 sm:$0xff]   ;;  %v7613_v32 = vld [vmem:[%s10725_s1 + $0x440] ss:$16 sps:$4 sm:$0xff]  }
  0x53   :  { %1688 = vmatpush1.bf16.msra.mxu0 %v7529_v33  ;;  %1852 = vmatpush1.bf16.msra.mxu1 %v7532_v34  ;;  %v7616_v33 = vld [vmem:[%s10725_s1 + $0x448] ss:$16 sps:$4 sm:$0xff]   ;;  %v7621_v34 = vld [vmem:[%s10725_s1 + $0x464] ss:$16 sps:$4 sm:$0xff]  }
  0x54   :  { %1689 = vmatprep.subr.bf16.mxu0 %v7537_v35  ;;  %1853 = vmatprep.subr.bf16.mxu1 %v7540_v36  ;;  %v7624_v35 = vld [vmem:[%s10725_s1 + $0x46c] ss:$16 sps:$4 sm:$0xff]   ;;  %v7619_v36 = vld [vmem:[%s10725_s1 + $0x460] ss:$16 sps:$4 sm:$0xff]  }
  0x57   :  { %1690 = vmatpush1.bf16.msra.mxu0 %v7535_v37  ;;  %1854 = vmatpush1.bf16.msra.mxu1 %v7538_v38  ;;  %v7622_v37 = vld [vmem:[%s10725_s1 + $0x468] ss:$16 sps:$4 sm:$0xff]   ;;  %v7627_v38 = vld [vmem:[%s10725_s1 + $0x484] ss:$16 sps:$4 sm:$0xff]  }
  0x58   :  { %1691 = vmatprep.subr.bf16.mxu0 %v7543_v39  ;;  %1855 = vmatprep.subr.bf16.mxu1 %v7546_v40  ;;  %v7630_v39 = vld [vmem:[%s10725_s1 + $0x48c] ss:$16 sps:$4 sm:$0xff]   ;;  %v7625_v40 = vld [vmem:[%s10725_s1 + $0x480] ss:$16 sps:$4 sm:$0xff]  }
  0x5b   :  { %1692 = vmatpush1.bf16.msra.mxu0 %v7541_v41  ;;  %1856 = vmatpush1.bf16.msra.mxu1 %v7544_v42  ;;  %v7628_v41 = vld [vmem:[%s10725_s1 + $0x488] ss:$16 sps:$4 sm:$0xff]   ;;  %v7633_v42 = vld [vmem:[%s10725_s1 + $0x4a4] ss:$16 sps:$4 sm:$0xff]  }
  0x5c   :  { %1693 = vmatprep.subr.bf16.mxu0 %v7549_v44  ;;  %1857 = vmatprep.subr.bf16.mxu1 %v7552_v45  ;;  %v7636_v44 = vld [vmem:[%s10725_s1 + $0x4ac] ss:$16 sps:$4 sm:$0xff]   ;;  %v7631_v45 = vld [vmem:[%s10725_s1 + $0x4a0] ss:$16 sps:$4 sm:$0xff]  }
  0x5f   :  { %1694 = vmatpush1.bf16.msra.mxu0 %v7547_v46  ;;  %1858 = vmatpush1.bf16.msra.mxu1 %v7550_v47  ;;  %v7634_v46 = vld [vmem:[%s10725_s1 + $0x4a8] ss:$16 sps:$4 sm:$0xff]   ;;  %v7639_v47 = vld [vmem:[%s10725_s1 + $0x4c4] ss:$16 sps:$4 sm:$0xff]  }
  0x60   :  { %1695 = vmatprep.subr.bf16.mxu0 %v7555_v48  ;;  %1859 = vmatprep.subr.bf16.mxu1 %v7558_v50  ;;  %v7642_v48 = vld [vmem:[%s10725_s1 + $0x4cc] ss:$16 sps:$4 sm:$0xff]   ;;  %v7637_v50 = vld [vmem:[%s10725_s1 + $0x4c0] ss:$16 sps:$4 sm:$0xff]  }
  0x63   :  { %1696 = vmatpush1.bf16.msra.mxu0 %v7553_v51  ;;  %1860 = vmatpush1.bf16.msra.mxu1 %v7556_v52  ;;  %v7640_v51 = vld [vmem:[%s10725_s1 + $0x4c8] ss:$16 sps:$4 sm:$0xff]   ;;  %v7645_v52 = vld [vmem:[%s10725_s1 + $0x4e4] ss:$16 sps:$4 sm:$0xff]  }
  0x64   :  { %1697 = vmatprep.subr.bf16.mxu0 %v7561_v53  ;;  %1861 = vmatprep.subr.bf16.mxu1 %v7564_v54  ;;  %v7648_v53 = vld [vmem:[%s10725_s1 + $0x4ec] ss:$16 sps:$4 sm:$0xff]   ;;  %v7643_v54 = vld [vmem:[%s10725_s1 + $0x4e0] ss:$16 sps:$4 sm:$0xff]  }
  0x67   :  { %1698 = vmatpush1.bf16.msra.mxu0 %v7559_v55  ;;  %1862 = vmatpush1.bf16.msra.mxu1 %v7562_v56  ;;  %v7646_v55 = vld [vmem:[%s10725_s1 + $0x4e8] ss:$16 sps:$4 sm:$0xff]   ;;  %v7651_v56 = vld [vmem:[%s10725_s1 + $0x504] ss:$16 sps:$4 sm:$0xff]  }
  0x68   :  { %1699 = vmatprep.subr.bf16.mxu0 %v7567_v57  ;;  %1863 = vmatprep.subr.bf16.mxu1 %v7570_v58  ;;  %v7654_v57 = vld [vmem:[%s10725_s1 + $0x50c] ss:$16 sps:$4 sm:$0xff]   ;;  %v7649_v58 = vld [vmem:[%s10725_s1 + $0x500] ss:$16 sps:$4 sm:$0xff]  }
  0x6b   :  { %1700 = vmatpush1.bf16.msra.mxu0 %v7565_v59  ;;  %1864 = vmatpush1.bf16.msra.mxu1 %v7568_v60  ;;  %v7652_v59 = vld [vmem:[%s10725_s1 + $0x508] ss:$16 sps:$4 sm:$0xff]   ;;  %v7657_v60 = vld [vmem:[%s10725_s1 + $0x524] ss:$16 sps:$4 sm:$0xff]  }
  0x6c   :  { %1701 = vmatprep.subr.bf16.mxu0 %v7573_v61  ;;  %1865 = vmatprep.subr.bf16.mxu1 %v7576_v62  ;;  %v7660_v61 = vld [vmem:[%s10725_s1 + $0x52c] ss:$16 sps:$4 sm:$0xff]   ;;  %v7655_v62 = vld [vmem:[%s10725_s1 + $0x520] ss:$16 sps:$4 sm:$0xff]  }
  0x6f   :  { %1702 = vmatpush1.bf16.msra.mxu0 %v7571_v63  ;;  %1866 = vmatpush1.bf16.msra.mxu1 %v7574_v0  ;;  %v7658_v63 = vld [vmem:[%s10725_s1 + $0x528] ss:$16 sps:$4 sm:$0xff]   ;;  %v7663_v0 = vld [vmem:[%s10725_s1 + $0x544] ss:$16 sps:$4 sm:$0xff]  }
  0x70   :  { %1703 = vmatprep.subr.bf16.mxu0 %v7579_v1  ;;  %1867 = vmatprep.subr.bf16.mxu1 %v7582_v2  ;;  %v7666_v1 = vld [vmem:[%s10725_s1 + $0x54c] ss:$16 sps:$4 sm:$0xff]   ;;  %v7661_v2 = vld [vmem:[%s10725_s1 + $0x540] ss:$16 sps:$4 sm:$0xff]  }
  0x73   :  { %1704 = vmatpush1.bf16.msra.mxu0 %v7577_v3  ;;  %1868 = vmatpush1.bf16.msra.mxu1 %v7580_v4  ;;  %v7664_v3 = vld [vmem:[%s10725_s1 + $0x548] ss:$16 sps:$4 sm:$0xff]   ;;  %v7669_v4 = vld [vmem:[%s10725_s1 + $0x564] ss:$16 sps:$4 sm:$0xff]  }
  0x74   :  { %1705 = vmatprep.subr.bf16.mxu0 %v7585_v5  ;;  %1869 = vmatprep.subr.bf16.mxu1 %v7588_v6  ;;  %v7672_v5 = vld [vmem:[%s10725_s1 + $0x56c] ss:$16 sps:$4 sm:$0xff]   ;;  %v7667_v6 = vld [vmem:[%s10725_s1 + $0x560] ss:$16 sps:$4 sm:$0xff]  }
  0x77   :  { %1706 = vmatpush1.bf16.msra.mxu0 %v7583_v7  ;;  %1870 = vmatpush1.bf16.msra.mxu1 %v7586_v8  ;;  %v7670_v7 = vld [vmem:[%s10725_s1 + $0x568] ss:$16 sps:$4 sm:$0xff]   ;;  %v7675_v8 = vld [vmem:[%s10725_s1 + $0x584] ss:$16 sps:$4 sm:$0xff]  }
  0x78   :  { %1707 = vmatprep.subr.bf16.mxu0 %v7591_v10  ;;  %1871 = vmatprep.subr.bf16.mxu1 %v7594_v11  ;;  %v7678_v10 = vld [vmem:[%s10725_s1 + $0x58c] ss:$16 sps:$4 sm:$0xff]   ;;  %v7673_v11 = vld [vmem:[%s10725_s1 + $0x580] ss:$16 sps:$4 sm:$0xff]  }
  0x7b   :  { %1708 = vmatpush1.bf16.msra.mxu0 %v7589_v13  ;;  %1872 = vmatpush1.bf16.msra.mxu1 %v7592_v14  ;;  %v7676_v13 = vld [vmem:[%s10725_s1 + $0x588] ss:$16 sps:$4 sm:$0xff]   ;;  %v7681_v14 = vld [vmem:[%s10725_s1 + $0x5a4] ss:$16 sps:$4 sm:$0xff]  }
  0x7c   :  { %1709 = vmatprep.subr.bf16.mxu0 %v7597_v15  ;;  %1873 = vmatprep.subr.bf16.mxu1 %v7600_v16  ;;  %v7684_v15 = vld [vmem:[%s10725_s1 + $0x5ac] ss:$16 sps:$4 sm:$0xff]   ;;  %v7679_v16 = vld [vmem:[%s10725_s1 + $0x5a0] ss:$16 sps:$4 sm:$0xff]  }
  0x7f   :  { %1710 = vmatpush1.bf16.msra.mxu0 %v7595_v18  ;;  %1874 = vmatpush1.bf16.msra.mxu1 %v7598_v19  ;;  %v7682_v18 = vld [vmem:[%s10725_s1 + $0x5a8] ss:$16 sps:$4 sm:$0xff]   ;;  %v7687_v19 = vld [vmem:[%s10725_s1 + $0x5c4] ss:$16 sps:$4 sm:$0xff]  }
  0x80   :  { %1720 = vmatprep.subr.bf16.mxu0 %v7603_v20  ;;  %1884 = vmatprep.subr.bf16.mxu1 %v7606_v21  ;;  %v7690_v20 = vld [vmem:[%s10725_s1 + $0x5cc] ss:$16 sps:$4 sm:$0xff]   ;;  %v304_v21 = vcombine.high %v8314_v12, %v8314_v12 }
  0x81   :  { %v7696_v12 = vld [vmem:[%s10725_s1 + $0x5ec] ss:$16 sps:$4 sm:$0xff]  }
  0x82   :  { %1712 = vmatmul.mubr.bf16.vlgmr.msra.gmra.mrb[0].mxu0 %v331_v23  ;;  %1876 = vmatmul.mubr.bf16.vlgmr.msra.gmra.mrb[0].mxu1 %v331_v23  ;;  %v7688_v23 = vld [vmem:[%s10725_s1 + $0x5c8] ss:$16 sps:$4 sm:$0xff]  }
  0x83   :  { %1721 = vmatpush1.bf16.msra.mxu0 %v7601_v24  ;;  %1885 = vmatpush1.bf16.msra.mxu1 %v7604_v25  ;;  %v7693_v24 = vld [vmem:[%s10725_s1 + $0x5e4] ss:$16 sps:$4 sm:$0xff]   ;;  %v8531_v25 = vrot.slane %v304_v21, %v8066_v49  ;;  %v7772_v21 = vld [vmem:[%s10725_s1 + $0x788] ss:$16 sps:$4 sm:$0xff]  }
  0x84   :  { %1722 = vmatprep.subr.bf16.mxu0 %v7609_v26  ;;  %1886 = vmatprep.subr.bf16.mxu1 %v7612_v9  ;;  %v7691_v26 = vld [vmem:[%s10725_s1 + $0x5e0] ss:$16 sps:$4 sm:$0xff]   ;;  %v7694_v9 = vld [vmem:[%s10725_s1 + $0x5e8] ss:$16 sps:$4 sm:$0xff]  }
  0x85   :  { %1752 = vmatprep.mubr.bf16.mxu0 %v334_v27  ;;  %1916 = vmatprep.mubr.bf16.mxu1 %v334_v27  ;;  %v7699_v27 = vld [vmem:[%s10725_s1 + $0x604] ss:$16 sps:$4 sm:$0xff]  }
  0x87   :  { %1723 = vmatpush1.bf16.msra.mxu0 %v7607_v28  ;;  %1887 = vmatpush1.bf16.msra.mxu1 %v7610_v29  ;;  %v7702_v28 = vld [vmem:[%s10725_s1 + $0x60c] ss:$16 sps:$4 sm:$0xff]   ;;  %v7697_v29 = vld [vmem:[%s10725_s1 + $0x600] ss:$16 sps:$4 sm:$0xff]  }
  0x88   :  { %1724 = vmatprep.subr.bf16.mxu0 %v7615_v30  ;;  %1888 = vmatprep.subr.bf16.mxu1 %v7618_v31  ;;  %v7700_v30 = vld [vmem:[%s10725_s1 + $0x608] ss:$16 sps:$4 sm:$0xff]   ;;  %v320_v31 = vcombine.high %v8531_v25, %v8531_v25 }
  0x8b   :  { %1725 = vmatpush1.bf16.msra.mxu0 %v7613_v32  ;;  %1889 = vmatpush1.bf16.msra.mxu1 %v7616_v33  ;;  %v333_v32 = vpack.c.bf16 %v8330_v17, %v8330_v17  ;;  %v7705_v33 = vld [vmem:[%s10725_s1 + $0x624] ss:$16 sps:$4 sm:$0xff]   ;;  %v7706_v17 = vld [vmem:[%s10725_s1 + $0x628] ss:$16 sps:$4 sm:$0xff]  }
  0x8c   :  { %1726 = vmatprep.subr.bf16.mxu0 %v7621_v34  ;;  %1890 = vmatprep.subr.bf16.mxu1 %v7624_v35  ;;  %v7708_v34 = vld [vmem:[%s10725_s1 + $0x62c] ss:$16 sps:$4 sm:$0xff]   ;;  %v7703_v35 = vld [vmem:[%s10725_s1 + $0x620] ss:$16 sps:$4 sm:$0xff]  }
  0x8f   :  { %1727 = vmatpush1.bf16.msra.mxu0 %v7619_v36  ;;  %1891 = vmatpush1.bf16.msra.mxu1 %v7622_v37  ;;  %v336_v36 = vpack.c.bf16 %v320_v31, %v320_v31  ;;  %v7711_v37 = vld [vmem:[%s10725_s1 + $0x644] ss:$16 sps:$4 sm:$0xff]   ;;  %v7787_v31 = vld [vmem:[%s10725_s1 + $0x7e0] ss:$16 sps:$4 sm:$0xff]  }
  0x90   :  { %1728 = vmatprep.subr.bf16.mxu0 %v7627_v38  ;;  %1892 = vmatprep.subr.bf16.mxu1 %v7630_v39  ;;  %v7714_v38 = vld [vmem:[%s10725_s1 + $0x64c] ss:$16 sps:$4 sm:$0xff]   ;;  %v7709_v39 = vld [vmem:[%s10725_s1 + $0x640] ss:$16 sps:$4 sm:$0xff]  }
  0x93   :  { %1729 = vmatpush1.bf16.msra.mxu0 %v7625_v40  ;;  %1893 = vmatpush1.bf16.msra.mxu1 %v7628_v41  ;;  %v7712_v40 = vld [vmem:[%s10725_s1 + $0x648] ss:$16 sps:$4 sm:$0xff]   ;;  %v7717_v41 = vld [vmem:[%s10725_s1 + $0x664] ss:$16 sps:$4 sm:$0xff]  }
  0x94   :  { %1730 = vmatprep.subr.bf16.mxu0 %v7633_v42  ;;  %1894 = vmatprep.subr.bf16.mxu1 %v7636_v44  ;;  %v7720_v42 = vld [vmem:[%s10725_s1 + $0x66c] ss:$16 sps:$4 sm:$0xff]   ;;  %v7715_v44 = vld [vmem:[%s10725_s1 + $0x660] ss:$16 sps:$4 sm:$0xff]  }
  0x97   :  { %1731 = vmatpush1.bf16.msra.mxu0 %v7631_v45  ;;  %1895 = vmatpush1.bf16.msra.mxu1 %v7634_v46  ;;  %v7718_v45 = vld [vmem:[%s10725_s1 + $0x668] ss:$16 sps:$4 sm:$0xff]   ;;  %v7723_v46 = vld [vmem:[%s10725_s1 + $0x684] ss:$16 sps:$4 sm:$0xff]  }
  0x98   :  { %1732 = vmatprep.subr.bf16.mxu0 %v7639_v47  ;;  %1896 = vmatprep.subr.bf16.mxu1 %v7642_v48  ;;  %v7726_v47 = vld [vmem:[%s10725_s1 + $0x68c] ss:$16 sps:$4 sm:$0xff]   ;;  %v7721_v48 = vld [vmem:[%s10725_s1 + $0x680] ss:$16 sps:$4 sm:$0xff]  }
  0x9b   :  { %1733 = vmatpush1.bf16.msra.mxu0 %v7637_v50  ;;  %1897 = vmatpush1.bf16.msra.mxu1 %v7640_v51  ;;  %v7724_v50 = vld [vmem:[%s10725_s1 + $0x688] ss:$16 sps:$4 sm:$0xff]   ;;  %v7729_v51 = vld [vmem:[%s10725_s1 + $0x6a4] ss:$16 sps:$4 sm:$0xff]  }
  0x9c   :  { %1734 = vmatprep.subr.bf16.mxu0 %v7645_v52  ;;  %1898 = vmatprep.subr.bf16.mxu1 %v7648_v53  ;;  %v7732_v52 = vld [vmem:[%s10725_s1 + $0x6ac] ss:$16 sps:$4 sm:$0xff]   ;;  %v7727_v53 = vld [vmem:[%s10725_s1 + $0x6a0] ss:$16 sps:$4 sm:$0xff]  }
  0x9f   :  { %1735 = vmatpush1.bf16.msra.mxu0 %v7643_v54  ;;  %1899 = vmatpush1.bf16.msra.mxu1 %v7646_v55  ;;  %v7730_v54 = vld [vmem:[%s10725_s1 + $0x6a8] ss:$16 sps:$4 sm:$0xff]   ;;  %v7735_v55 = vld [vmem:[%s10725_s1 + $0x6c4] ss:$16 sps:$4 sm:$0xff]  }
  0xa0   :  { %1736 = vmatprep.subr.bf16.mxu0 %v7651_v56  ;;  %1900 = vmatprep.subr.bf16.mxu1 %v7654_v57  ;;  %v7738_v56 = vld [vmem:[%s10725_s1 + $0x6cc] ss:$16 sps:$4 sm:$0xff]   ;;  %v7733_v57 = vld [vmem:[%s10725_s1 + $0x6c0] ss:$16 sps:$4 sm:$0xff]  }
  0xa3   :  { %1737 = vmatpush1.bf16.msra.mxu0 %v7649_v58  ;;  %1901 = vmatpush1.bf16.msra.mxu1 %v7652_v59  ;;  %v7736_v58 = vld [vmem:[%s10725_s1 + $0x6c8] ss:$16 sps:$4 sm:$0xff]   ;;  %v7741_v59 = vld [vmem:[%s10725_s1 + $0x6e4] ss:$16 sps:$4 sm:$0xff]  }
  0xa4   :  { %1738 = vmatprep.subr.bf16.mxu0 %v7657_v60  ;;  %1902 = vmatprep.subr.bf16.mxu1 %v7660_v61  ;;  %v7744_v60 = vld [vmem:[%s10725_s1 + $0x6ec] ss:$16 sps:$4 sm:$0xff]   ;;  %v7739_v61 = vld [vmem:[%s10725_s1 + $0x6e0] ss:$16 sps:$4 sm:$0xff]  }
  0xa7   :  { %1739 = vmatpush1.bf16.msra.mxu0 %v7655_v62  ;;  %1903 = vmatpush1.bf16.msra.mxu1 %v7658_v63  ;;  %v7742_v62 = vld [vmem:[%s10725_s1 + $0x6e8] ss:$16 sps:$4 sm:$0xff]   ;;  %v7747_v63 = vld [vmem:[%s10725_s1 + $0x704] ss:$16 sps:$4 sm:$0xff]  }
  0xa8   :  { %1740 = vmatprep.subr.bf16.mxu0 %v7663_v0  ;;  %1904 = vmatprep.subr.bf16.mxu1 %v7666_v1  ;;  %v7750_v0 = vld [vmem:[%s10725_s1 + $0x70c] ss:$16 sps:$4 sm:$0xff]   ;;  %v7745_v1 = vld [vmem:[%s10725_s1 + $0x700] ss:$16 sps:$4 sm:$0xff]  }
  0xab   :  { %1741 = vmatpush1.bf16.msra.mxu0 %v7661_v2  ;;  %1905 = vmatpush1.bf16.msra.mxu1 %v7664_v3  ;;  %v7748_v2 = vld [vmem:[%s10725_s1 + $0x708] ss:$16 sps:$4 sm:$0xff]   ;;  %v7753_v3 = vld [vmem:[%s10725_s1 + $0x724] ss:$16 sps:$4 sm:$0xff]  }
  0xac   :  { %1742 = vmatprep.subr.bf16.mxu0 %v7669_v4  ;;  %1906 = vmatprep.subr.bf16.mxu1 %v7672_v5  ;;  %v7756_v4 = vld [vmem:[%s10725_s1 + $0x72c] ss:$16 sps:$4 sm:$0xff]   ;;  %v7751_v5 = vld [vmem:[%s10725_s1 + $0x720] ss:$16 sps:$4 sm:$0xff]  }
  0xaf   :  { %1743 = vmatpush1.bf16.msra.mxu0 %v7667_v6  ;;  %1907 = vmatpush1.bf16.msra.mxu1 %v7670_v7  ;;  %v7754_v6 = vld [vmem:[%s10725_s1 + $0x728] ss:$16 sps:$4 sm:$0xff]   ;;  %v7759_v7 = vld [vmem:[%s10725_s1 + $0x744] ss:$16 sps:$4 sm:$0xff]  }
  0xb0   :  { %1744 = vmatprep.subr.bf16.mxu0 %v7675_v8  ;;  %1908 = vmatprep.subr.bf16.mxu1 %v7678_v10  ;;  %v7762_v8 = vld [vmem:[%s10725_s1 + $0x74c] ss:$16 sps:$4 sm:$0xff]   ;;  %v7757_v10 = vld [vmem:[%s10725_s1 + $0x740] ss:$16 sps:$4 sm:$0xff]  }
  0xb3   :  { %1745 = vmatpush1.bf16.msra.mxu0 %v7673_v11  ;;  %1909 = vmatpush1.bf16.msra.mxu1 %v7676_v13  ;;  %v7760_v11 = vld [vmem:[%s10725_s1 + $0x748] ss:$16 sps:$4 sm:$0xff]   ;;  %v7765_v13 = vld [vmem:[%s10725_s1 + $0x764] ss:$16 sps:$4 sm:$0xff]  }
  0xb4   :  { %1746 = vmatprep.subr.bf16.mxu0 %v7681_v14  ;;  %1910 = vmatprep.subr.bf16.mxu1 %v7684_v15  ;;  %v7768_v14 = vld [vmem:[%s10725_s1 + $0x76c] ss:$16 sps:$4 sm:$0xff]   ;;  %v7763_v15 = vld [vmem:[%s10725_s1 + $0x760] ss:$16 sps:$4 sm:$0xff]  }
  0xb7   :  { %1747 = vmatpush1.bf16.msra.mxu0 %v7679_v16  ;;  %1911 = vmatpush1.bf16.msra.mxu1 %v7682_v18  ;;  %v7766_v16 = vld [vmem:[%s10725_s1 + $0x768] ss:$16 sps:$4 sm:$0xff]   ;;  %v7771_v18 = vld [vmem:[%s10725_s1 + $0x784] ss:$16 sps:$4 sm:$0xff]  }
  0xb8   :  { %1748 = vmatprep.subr.bf16.mxu0 %v7687_v19  ;;  %1912 = vmatprep.subr.bf16.mxu1 %v7690_v20  ;;  %v7774_v19 = vld [vmem:[%s10725_s1 + $0x78c] ss:$16 sps:$4 sm:$0xff]   ;;  %v7769_v20 = vld [vmem:[%s10725_s1 + $0x780] ss:$16 sps:$4 sm:$0xff]  }
  0xbb   :  { %1749 = vmatpush1.bf16.msra.mxu0 %v7685_v22  ;;  %1913 = vmatpush1.bf16.msra.mxu1 %v7688_v23  ;;  %v7777_v22 = vld [vmem:[%s10725_s1 + $0x7a4] ss:$16 sps:$4 sm:$0xff]   ;;  %v7780_v23 = vld [vmem:[%s10725_s1 + $0x7ac] ss:$16 sps:$4 sm:$0xff]  }
  0xbc   :  { %1750 = vmatprep.subr.bf16.mxu0 %v7693_v24  ;;  %1914 = vmatprep.subr.bf16.mxu1 %v7696_v12  ;;  %v7775_v24 = vld [vmem:[%s10725_s1 + $0x7a0] ss:$16 sps:$4 sm:$0xff]   ;;  %v7778_v12 = vld [vmem:[%s10725_s1 + $0x7a8] ss:$16 sps:$4 sm:$0xff]  }
  0xbf   :  { %1751 = vmatpush1.bf16.msra.mxu0 %v7691_v26  ;;  %1915 = vmatpush1.bf16.msra.mxu1 %v7694_v9  ;;  %v7783_v26 = vld [vmem:[%s10725_s1 + $0x7c4] ss:$16 sps:$4 sm:$0xff]   ;;  %v7786_v9 = vld [vmem:[%s10725_s1 + $0x7cc] ss:$16 sps:$4 sm:$0xff]  }
  0xc0   :  { %1761 = vmatprep.subr.bf16.mxu0 %v7699_v27  ;;  %1925 = vmatprep.subr.bf16.mxu1 %v7702_v28  ;;  %v7781_v27 = vld [vmem:[%s10725_s1 + $0x7c0] ss:$16 sps:$4 sm:$0xff]   ;;  %v7784_v28 = vld [vmem:[%s10725_s1 + $0x7c8] ss:$16 sps:$4 sm:$0xff]  }
  0xc2   :  { %1753 = vmatmul.mubr.bf16.vlgmr.msra.gmra.mrb[0].mxu0 %v333_v32  ;;  %1917 = vmatmul.mubr.bf16.vlgmr.msra.gmra.mrb[0].mxu1 %v333_v32  ;;  %v7790_v32 = vld [vmem:[%s10725_s1 + $0x7e8] ss:$16 sps:$4 sm:$0xff]  }
  0xc3   :  { %1762 = vmatpush1.bf16.msra.mxu0 %v7697_v29  ;;  %1926 = vmatpush1.bf16.msra.mxu1 %v7700_v30  ;;  %v7789_v29 = vld [vmem:[%s10725_s1 + $0x7e4] ss:$16 sps:$4 sm:$0xff]   ;;  %v7792_v30 = vld [vmem:[%s10725_s1 + $0x7ec] ss:$16 sps:$4 sm:$0xff]  }
  0xc4   :  { %1763 = vmatprep.subr.bf16.mxu0 %v7705_v33  ;;  %1927 = vmatprep.subr.bf16.mxu1 %v7708_v34  ;;  %v7795_v33 = vld [vmem:[%s10727_s3 + $0x4] ss:$8 sps:$4 sm:$0xff]   ;;  %v335_v34 = vpack.c.bf16 %v8531_v25, %v8531_v25 }
  0xc5   :  { %1793 = vmatprep.mubr.bf16.mxu0 %v336_v36  ;;  %1957 = vmatprep.mubr.bf16.mxu1 %v336_v36  ;;  %v7796_v36 = vld [vmem:[%s10727_s3 + $0x10] ss:$8 sps:$4 sm:$0xff]   ;;  %v7801_v25 = vld [vmem:[%s10727_s3 + $0x24] ss:$8 sps:$4 sm:$0xff]  }
  0xc7   :  { %1764 = vmatpush1.bf16.msra.mxu0 %v7703_v35  ;;  %1928 = vmatpush1.bf16.msra.mxu1 %v7706_v17  ;;  %v7793_v35 = vld [vmem:[%s10727_s3] ss:$8 sps:$4 sm:$0xff]   ;;  %v7798_v17 = vld [vmem:[%s10727_s3 + $0x14] ss:$8 sps:$4 sm:$0xff]  }
  0xc8   :  { %1765 = vmatprep.subr.bf16.mxu0 %v7711_v37  ;;  %1929 = vmatprep.subr.bf16.mxu1 %v7714_v38  ;;  %v7799_v37 = vld [vmem:[%s10727_s3 + $0x20] ss:$8 sps:$4 sm:$0xff]   ;;  %v7804_v38 = vld [vmem:[%s10727_s3 + $0x34] ss:$8 sps:$4 sm:$0xff]  }
  0xcb   :  { %1766 = vmatpush1.bf16.msra.mxu0 %v7709_v39  ;;  %1930 = vmatpush1.bf16.msra.mxu1 %v7712_v40  ;;  %v7802_v39 = vld [vmem:[%s10727_s3 + $0x30] ss:$8 sps:$4 sm:$0xff]   ;;  %v7807_v40 = vld [vmem:[%s10727_s3 + $0x44] ss:$8 sps:$4 sm:$0xff]  }
  0xcc   :  { %1767 = vmatprep.subr.bf16.mxu0 %v7717_v41  ;;  %1931 = vmatprep.subr.bf16.mxu1 %v7720_v42  ;;  %v7805_v41 = vld [vmem:[%s10727_s3 + $0x40] ss:$8 sps:$4 sm:$0xff]   ;;  %v7810_v42 = vld [vmem:[%s10727_s3 + $0x54] ss:$8 sps:$4 sm:$0xff]  }
  0xcf   :  { %1768 = vmatpush1.bf16.msra.mxu0 %v7715_v44  ;;  %1932 = vmatpush1.bf16.msra.mxu1 %v7718_v45  ;;  %v7808_v44 = vld [vmem:[%s10727_s3 + $0x50] ss:$8 sps:$4 sm:$0xff]   ;;  %v7813_v45 = vld [vmem:[%s10727_s3 + $0x64] ss:$8 sps:$4 sm:$0xff]  }
  0xd0   :  { %1769 = vmatprep.subr.bf16.mxu0 %v7723_v46  ;;  %1933 = vmatprep.subr.bf16.mxu1 %v7726_v47  ;;  %v7811_v46 = vld [vmem:[%s10727_s3 + $0x60] ss:$8 sps:$4 sm:$0xff]   ;;  %v7816_v47 = vld [vmem:[%s10727_s3 + $0x74] ss:$8 sps:$4 sm:$0xff]  }
  0xd3   :  { %1770 = vmatpush1.bf16.msra.mxu0 %v7721_v48  ;;  %1934 = vmatpush1.bf16.msra.mxu1 %v7724_v50  ;;  %v7814_v48 = vld [vmem:[%s10727_s3 + $0x70] ss:$8 sps:$4 sm:$0xff]   ;;  %v7819_v50 = vld [vmem:[%s10727_s3 + $0x84] ss:$8 sps:$4 sm:$0xff]  }
  0xd4   :  { %1771 = vmatprep.subr.bf16.mxu0 %v7729_v51  ;;  %1935 = vmatprep.subr.bf16.mxu1 %v7732_v52  ;;  %v7817_v51 = vld [vmem:[%s10727_s3 + $0x80] ss:$8 sps:$4 sm:$0xff]   ;;  %v7822_v52 = vld [vmem:[%s10727_s3 + $0x94] ss:$8 sps:$4 sm:$0xff]  }
  0xd7   :  { %1772 = vmatpush1.bf16.msra.mxu0 %v7727_v53  ;;  %1936 = vmatpush1.bf16.msra.mxu1 %v7730_v54  ;;  %v7820_v53 = vld [vmem:[%s10727_s3 + $0x90] ss:$8 sps:$4 sm:$0xff]   ;;  %v7825_v54 = vld [vmem:[%s10727_s3 + $0xa4] ss:$8 sps:$4 sm:$0xff]  }
  0xd8   :  { %1773 = vmatprep.subr.bf16.mxu0 %v7735_v55  ;;  %1937 = vmatprep.subr.bf16.mxu1 %v7738_v56  ;;  %v7823_v55 = vld [vmem:[%s10727_s3 + $0xa0] ss:$8 sps:$4 sm:$0xff]   ;;  %v7828_v56 = vld [vmem:[%s10727_s3 + $0xb4] ss:$8 sps:$4 sm:$0xff]  }
  0xdb   :  { %1774 = vmatpush1.bf16.msra.mxu0 %v7733_v57  ;;  %1938 = vmatpush1.bf16.msra.mxu1 %v7736_v58  ;;  %v7826_v57 = vld [vmem:[%s10727_s3 + $0xb0] ss:$8 sps:$4 sm:$0xff]   ;;  %v7831_v58 = vld [vmem:[%s10727_s3 + $0xc4] ss:$8 sps:$4 sm:$0xff]  }
  0xdc   :  { %1775 = vmatprep.subr.bf16.mxu0 %v7741_v59  ;;  %1939 = vmatprep.subr.bf16.mxu1 %v7744_v60  ;;  %v7829_v59 = vld [vmem:[%s10727_s3 + $0xc0] ss:$8 sps:$4 sm:$0xff]   ;;  %v7834_v60 = vld [vmem:[%s10727_s3 + $0xd4] ss:$8 sps:$4 sm:$0xff]  }
  0xdf   :  { %1776 = vmatpush1.bf16.msra.mxu0 %v7739_v61  ;;  %1940 = vmatpush1.bf16.msra.mxu1 %v7742_v62  ;;  %v7832_v61 = vld [vmem:[%s10727_s3 + $0xd0] ss:$8 sps:$4 sm:$0xff]   ;;  %v7837_v62 = vld [vmem:[%s10727_s3 + $0xe4] ss:$8 sps:$4 sm:$0xff]  }
  0xe0   :  { %1777 = vmatprep.subr.bf16.mxu0 %v7747_v63  ;;  %1941 = vmatprep.subr.bf16.mxu1 %v7750_v0  ;;  %v7835_v63 = vld [vmem:[%s10727_s3 + $0xe0] ss:$8 sps:$4 sm:$0xff]   ;;  %v7840_v0 = vld [vmem:[%s10727_s3 + $0xf4] ss:$8 sps:$4 sm:$0xff]  }
  0xe3   :  { %1778 = vmatpush1.bf16.msra.mxu0 %v7745_v1  ;;  %1942 = vmatpush1.bf16.msra.mxu1 %v7748_v2  ;;  %v7838_v1 = vld [vmem:[%s10727_s3 + $0xf0] ss:$8 sps:$4 sm:$0xff]   ;;  %v7843_v2 = vld [vmem:[%s10727_s3 + $0x104] ss:$8 sps:$4 sm:$0xff]  }
  0xe4   :  { %1779 = vmatprep.subr.bf16.mxu0 %v7753_v3  ;;  %1943 = vmatprep.subr.bf16.mxu1 %v7756_v4  ;;  %v2454_v3 = vld [vmem:[%s10728_s5] sm:$0xff] }
  0xe5   :  { %v2470_v4 = vld [vmem:[%s10728_s5 + $0x80] sm:$0xff] }
  0xe7   :  { %1780 = vmatpush1.bf16.msra.mxu0 %v7751_v5  ;;  %1944 = vmatpush1.bf16.msra.mxu1 %v7754_v6  ;;  %v6860_v5 = vcombine.low %v2454_v3, %v2470_v4  ;;  %v6861_v6 = vcombine.high %v2454_v3, %v2470_v4 }
  0xe8   :  { %1781 = vmatprep.subr.bf16.mxu0 %v7759_v7  ;;  %1945 = vmatprep.subr.bf16.mxu1 %v7762_v8  ;;  %v2486_v7 = vld [vmem:[%s10728_s5 + $0x100] sm:$0xff] }
  0xe9   :  { %v2502_v8 = vld [vmem:[%s10728_s5 + $0x180] sm:$0xff] }
  0xeb   :  { %1782 = vmatpush1.bf16.msra.mxu0 %v7757_v10  ;;  %1946 = vmatpush1.bf16.msra.mxu1 %v7760_v11  ;;  %v6893_v10 = vcombine.high %v2486_v7, %v2502_v8  ;;  %v6892_v11 = vcombine.low %v2486_v7, %v2502_v8 }
  0xec   :  { %1783 = vmatprep.subr.bf16.mxu0 %v7765_v13  ;;  %1947 = vmatprep.subr.bf16.mxu1 %v7768_v14  ;;  %v2518_v13 = vld [vmem:[%s10728_s5 + $0x200] sm:$0xff] }
  0xed   :  { %v2534_v14 = vld [vmem:[%s10728_s5 + $0x280] sm:$0xff] }
  0xef   :  { %1784 = vmatpush1.bf16.msra.mxu0 %v7763_v15  ;;  %1948 = vmatpush1.bf16.msra.mxu1 %v7766_v16  ;;  %v6925_v15 = vcombine.high %v2518_v13, %v2534_v14  ;;  %v6924_v16 = vcombine.low %v2518_v13, %v2534_v14 }
  0xf0   :  { %1785 = vmatprep.subr.bf16.mxu0 %v7771_v18  ;;  %1949 = vmatprep.subr.bf16.mxu1 %v7774_v19  ;;  %v2550_v18 = vld [vmem:[%s10728_s5 + $0x300] sm:$0xff] }
  0xf1   :  { %v2566_v19 = vld [vmem:[%s10728_s5 + $0x380] sm:$0xff] }
  0xf3   :  { %1786 = vmatpush1.bf16.msra.mxu0 %v7769_v20  ;;  %1950 = vmatpush1.bf16.msra.mxu1 %v7772_v21  ;;  %v6957_v20 = vcombine.high %v2550_v18, %v2566_v19  ;;  %v6956_v21 = vcombine.low %v2550_v18, %v2566_v19 }
  0xf4   :  { %1787 = vmatprep.subr.bf16.mxu0 %v7777_v22  ;;  %1951 = vmatprep.subr.bf16.mxu1 %v7780_v23  ;;  %v2582_v22 = vld [vmem:[%s10728_s5 + $0x400] sm:$0xff] }
  0xf5   :  { %v2598_v23 = vld [vmem:[%s10728_s5 + $0x480] sm:$0xff] }
  0xf7   :  { %1788 = vmatpush1.bf16.msra.mxu0 %v7775_v24  ;;  %1952 = vmatpush1.bf16.msra.mxu1 %v7778_v12  ;;  %v6989_v24 = vcombine.high %v2582_v22, %v2598_v23  ;;  %v6988_v12 = vcombine.low %v2582_v22, %v2598_v23  ;;  %v7841_v22 = vld [vmem:[%s10727_s3 + $0x100] ss:$8 sps:$4 sm:$0xff]  }
  0xf8   :  { %1789 = vmatprep.subr.bf16.mxu0 %v7783_v26  ;;  %1953 = vmatprep.subr.bf16.mxu1 %v7786_v9  ;;  %v2614_v26 = vld [vmem:[%s10728_s5 + $0x500] sm:$0xff] }
  0xf9   :  { %v2630_v9 = vld [vmem:[%s10728_s5 + $0x580] sm:$0xff] }
  0xfb   :  { %1790 = vmatpush1.bf16.msra.mxu0 %v7781_v27  ;;  %1954 = vmatpush1.bf16.msra.mxu1 %v7784_v28  ;;  %v7021_v27 = vcombine.high %v2614_v26, %v2630_v9  ;;  %v7020_v28 = vcombine.low %v2614_v26, %v2630_v9  ;;  %v7844_v26 = vld [vmem:[%s10727_s3 + $0x110] ss:$8 sps:$4 sm:$0xff]   ;;  %v7849_v9 = vld [vmem:[%s10727_s3 + $0x124] ss:$8 sps:$4 sm:$0xff]  }
  0xfc   :  { %1791 = vmatprep.subr.bf16.mxu0 %v7789_v29  ;;  %1955 = vmatprep.subr.bf16.mxu1 %v7792_v30  ;;  %v2646_v29 = vld [vmem:[%s10728_s5 + $0x600] sm:$0xff] }
  0xfd   :  { %v2662_v30 = vld [vmem:[%s10728_s5 + $0x680] sm:$0xff] }
  0xff   :  { %1792 = vmatpush1.bf16.msra.mxu0 %v7787_v31  ;;  %1956 = vmatpush1.bf16.msra.mxu1 %v7790_v32  ;;  %v7053_v31 = vcombine.high %v2646_v29, %v2662_v30  ;;  %v7052_v32 = vcombine.low %v2646_v29, %v2662_v30  ;;  %v7850_v29 = vld [vmem:[%s10727_s3 + $0x130] ss:$8 sps:$4 sm:$0xff]   ;;  %v7855_v30 = vld [vmem:[%s10727_s3 + $0x144] ss:$8 sps:$4 sm:$0xff]  }
 0x100   :  { %2370 = vmatprep.subr.bf16.mxu0 %v7795_v33  ;;  %5696 = vmatprep.subr.bf16.mxu1 %v6861_v6  ;;  %v2678_v33 = vld [vmem:[%s10728_s5 + $0x700] sm:$0xff] }
 0x102   :  { %1794 = vmatmul.mubr.bf16.vlgmr.msra.gmra.mrb[0].mxu0 %v335_v34  ;;  %1958 = vmatmul.mubr.bf16.vlgmr.msra.gmra.mrb[0].mxu1 %v335_v34  ;;  %v2694_v34 = vld [vmem:[%s10728_s5 + $0x780] sm:$0xff] }
 0x103   :  { %2371 = vmatpush1.bf16.msra.mxu0 %v7793_v35  ;;  %5697 = vmatpush1.bf16.msra.mxu1 %v6860_v5  ;;  %v7085_v35 = vcombine.high %v2678_v33, %v2694_v34 }
 0x104   :  { %2372 = vmatprep.subr.bf16.mxu0 %v7798_v17  ;;  %5698 = vmatprep.subr.bf16.mxu1 %v6893_v10  ;;  %v7084_v17 = vcombine.low %v2678_v33, %v2694_v34  ;;  %v7856_v33 = vld [vmem:[%s10727_s3 + $0x150] ss:$8 sps:$4 sm:$0xff]   ;;  %v7861_v34 = vld [vmem:[%s10727_s3 + $0x164] ss:$8 sps:$4 sm:$0xff]  }
 0x107   :  { %2373 = vmatpush1.bf16.msra.mxu0 %v7796_v36  ;;  %5699 = vmatpush1.bf16.msra.mxu1 %v6892_v11  ;;  %v2710_v36 = vld [vmem:[%s10728_s5 + $0x800] sm:$0xff] }
 0x108   :  { %2374 = vmatprep.subr.bf16.mxu0 %v7801_v25  ;;  %5700 = vmatprep.subr.bf16.mxu1 %v6925_v15  ;;  %v2726_v25 = vld [vmem:[%s10728_s5 + $0x880] sm:$0xff] }
 0x10b   :  { %2375 = vmatpush1.bf16.msra.mxu0 %v7799_v37  ;;  %5701 = vmatpush1.bf16.msra.mxu1 %v6924_v16  ;;  %v7117_v37 = vcombine.high %v2710_v36, %v2726_v25 }
 0x10c   :  { %2376 = vmatprep.subr.bf16.mxu0 %v7804_v38  ;;  %5702 = vmatprep.subr.bf16.mxu1 %v6957_v20  ;;  %v7116_v38 = vcombine.low %v2710_v36, %v2726_v25  ;;  %v7862_v36 = vld [vmem:[%s10727_s3 + $0x170] ss:$8 sps:$4 sm:$0xff]   ;;  %v7867_v25 = vld [vmem:[%s10727_s3 + $0x184] ss:$8 sps:$4 sm:$0xff]  }
 0x10f   :  { %2377 = vmatpush1.bf16.msra.mxu0 %v7802_v39  ;;  %5703 = vmatpush1.bf16.msra.mxu1 %v6956_v21  ;;  %v2742_v39 = vld [vmem:[%s10728_s5 + $0x900] sm:$0xff] }
 0x110   :  { %2378 = vmatprep.subr.bf16.mxu0 %v7807_v40  ;;  %5704 = vmatprep.subr.bf16.mxu1 %v6989_v24  ;;  %v2758_v40 = vld [vmem:[%s10728_s5 + $0x980] sm:$0xff]  ;;  %v7846_v24 = vld [vmem:[%s10727_s3 + $0x114] ss:$8 sps:$4 sm:$0xff]  }
 0x113   :  { %2379 = vmatpush1.bf16.msra.mxu0 %v7805_v41  ;;  %5705 = vmatpush1.bf16.msra.mxu1 %v6988_v12  ;;  %v7149_v41 = vcombine.high %v2742_v39, %v2758_v40 }
 0x114   :  { %2380 = vmatprep.subr.bf16.mxu0 %v7810_v42  ;;  %5706 = vmatprep.subr.bf16.mxu1 %v7021_v27  ;;  %v7148_v42 = vcombine.low %v2742_v39, %v2758_v40  ;;  %v7847_v27 = vld [vmem:[%s10727_s3 + $0x120] ss:$8 sps:$4 sm:$0xff]   ;;  %v7868_v39 = vld [vmem:[%s10727_s3 + $0x190] ss:$8 sps:$4 sm:$0xff]   ;;  %v7873_v40 = vld [vmem:[%s10727_s3 + $0x1a4] ss:$8 sps:$4 sm:$0xff]  }
 0x117   :  { %2381 = vmatpush1.bf16.msra.mxu0 %v7808_v44  ;;  %5707 = vmatpush1.bf16.msra.mxu1 %v7020_v28  ;;  %v2774_v44 = vld [vmem:[%s10728_s5 + $0xa00] sm:$0xff]  ;;  %v7852_v28 = vld [vmem:[%s10727_s3 + $0x134] ss:$8 sps:$4 sm:$0xff]  }
 0x118   :  { %2382 = vmatprep.subr.bf16.mxu0 %v7813_v45  ;;  %5708 = vmatprep.subr.bf16.mxu1 %v7053_v31  ;;  %v2790_v45 = vld [vmem:[%s10728_s5 + $0xa80] sm:$0xff] }
 0x119   :  { %v7853_v31 = vld [vmem:[%s10727_s3 + $0x140] ss:$8 sps:$4 sm:$0xff]  }
 0x11b   :  { %2383 = vmatpush1.bf16.msra.mxu0 %v7811_v46  ;;  %5709 = vmatpush1.bf16.msra.mxu1 %v7052_v32  ;;  %v7181_v46 = vcombine.high %v2774_v44, %v2790_v45  ;;  %v7858_v32 = vld [vmem:[%s10727_s3 + $0x154] ss:$8 sps:$4 sm:$0xff]  }
 0x11c   :  { %2384 = vmatprep.subr.bf16.mxu0 %v7816_v47  ;;  %5710 = vmatprep.subr.bf16.mxu1 %v7085_v35  ;;  %v7180_v47 = vcombine.low %v2774_v44, %v2790_v45  ;;  %v7859_v35 = vld [vmem:[%s10727_s3 + $0x160] ss:$8 sps:$4 sm:$0xff]   ;;  %v7874_v44 = vld [vmem:[%s10727_s3 + $0x1b0] ss:$8 sps:$4 sm:$0xff]   ;;  %v7879_v45 = vld [vmem:[%s10727_s3 + $0x1c4] ss:$8 sps:$4 sm:$0xff]  }
 0x11f   :  { %2385 = vmatpush1.bf16.msra.mxu0 %v7814_v48  ;;  %5711 = vmatpush1.bf16.msra.mxu1 %v7084_v17  ;;  %v2806_v48 = vld [vmem:[%s10728_s5 + $0xb00] sm:$0xff]  ;;  %v7864_v17 = vld [vmem:[%s10727_s3 + $0x174] ss:$8 sps:$4 sm:$0xff]  }
 0x120   :  { %2386 = vmatprep.subr.bf16.mxu0 %v7819_v50  ;;  %5712 = vmatprep.subr.bf16.mxu1 %v7117_v37  ;;  %v2822_v50 = vld [vmem:[%s10728_s5 + $0xb80] sm:$0xff] }
 0x121   :  { %v7865_v37 = vld [vmem:[%s10727_s3 + $0x180] ss:$8 sps:$4 sm:$0xff]  }
 0x123   :  { %2387 = vmatpush1.bf16.msra.mxu0 %v7817_v51  ;;  %5713 = vmatpush1.bf16.msra.mxu1 %v7116_v38  ;;  %v7213_v51 = vcombine.high %v2806_v48, %v2822_v50  ;;  %v7870_v38 = vld [vmem:[%s10727_s3 + $0x194] ss:$8 sps:$4 sm:$0xff]  }
 0x124   :  { %2388 = vmatprep.subr.bf16.mxu0 %v7822_v52  ;;  %5714 = vmatprep.subr.bf16.mxu1 %v7149_v41  ;;  %v7212_v52 = vcombine.low %v2806_v48, %v2822_v50  ;;  %v7871_v41 = vld [vmem:[%s10727_s3 + $0x1a0] ss:$8 sps:$4 sm:$0xff]   ;;  %v7882_v48 = vld [vmem:[%s10727_s3 + $0x1d4] ss:$8 sps:$4 sm:$0xff]   ;;  %v7880_v50 = vld [vmem:[%s10727_s3 + $0x1d0] ss:$8 sps:$4 sm:$0xff]  }
 0x127   :  { %2389 = vmatpush1.bf16.msra.mxu0 %v7820_v53  ;;  %5715 = vmatpush1.bf16.msra.mxu1 %v7148_v42  ;;  %v2838_v53 = vld [vmem:[%s10728_s5 + $0xc00] sm:$0xff]  ;;  %v7876_v42 = vld [vmem:[%s10727_s3 + $0x1b4] ss:$8 sps:$4 sm:$0xff]  }
 0x128   :  { %2390 = vmatprep.subr.bf16.mxu0 %v7825_v54  ;;  %5716 = vmatprep.subr.bf16.mxu1 %v7181_v46  ;;  %v2854_v54 = vld [vmem:[%s10728_s5 + $0xc80] sm:$0xff] }
 0x129   :  { %v7877_v46 = vld [vmem:[%s10727_s3 + $0x1c0] ss:$8 sps:$4 sm:$0xff]  }
 0x12b   :  { %2391 = vmatpush1.bf16.msra.mxu0 %v7823_v55  ;;  %5717 = vmatpush1.bf16.msra.mxu1 %v7180_v47  ;;  %v7245_v55 = vcombine.high %v2838_v53, %v2854_v54  ;;  %v9018_v47 = vsub.s32 2, %v8048_v43 }
 0x12c   :  { %2392 = vmatprep.subr.bf16.mxu0 %v7828_v56  ;;  %5718 = vmatprep.subr.bf16.mxu1 %v7213_v51  ;;  %v8915_v56 = vsub.s32 0, %v8048_v43 }
 0x12f   :  { %2393 = vmatpush1.bf16.msra.mxu0 %v7826_v57  ;;  %v8920_v57 = vld [vmem:[%s10729_s2] sm:$0xf]  ;;  %5719 = vmatpush1.bf16.msra.mxu1 %v7212_v52  ;;  %v7885_v52 = vld [vmem:[%s10727_s3 + $0x1e4] ss:$8 sps:$4 sm:$0xff]  }
 0x130   :  { %2394 = vmatprep.subr.bf16.mxu0 %v7831_v58  ;;  %v8923_v58 = vsub.s32 1, %v8048_v43  ;;  %5720 = vmatprep.subr.bf16.mxu1 %v7245_v55  ;;  %v349_v51 = vrot.slane %v8920_v57, %v9018_v47  ;;  %v7888_v55 = vld [vmem:[%s10727_s3 + $0x1f4] ss:$8 sps:$4 sm:$0xff]  }
 0x133   :  { %2395 = vmatpush1.bf16.msra.mxu0 %v7829_v59  ;;  %v8926_v59 = vsub.s32 3, %v8048_v43 }
 0x134   :  { %2396 = vmatprep.subr.bf16.mxu0 %v7834_v60  ;;  %v7244_v60 = vcombine.low %v2838_v53, %v2854_v54  ;;  %v7883_v53 = vld [vmem:[%s10727_s3 + $0x1e0] ss:$8 sps:$4 sm:$0xff]  }
 0x136   :  { %5721 = vmatpush1.bf16.msra.mxu1 %v7244_v60  ;;  %v2472_v60 = vld [vmem:[%s10728_s5 + $0x90] sm:$0xff] }
 0x137   :  { %2397 = vmatpush1.bf16.msra.mxu0 %v7832_v61  ;;  %v2870_v61 = vld [vmem:[%s10728_s5 + $0xd00] sm:$0xff] }
 0x138   :  { %2398 = vmatprep.subr.bf16.mxu0 %v7837_v62  ;;  %v2886_v62 = vld [vmem:[%s10728_s5 + $0xd80] sm:$0xff] }
 0x139   :  { %v7276_v3 = vcombine.low %v2870_v61, %v2886_v62 }
 0x13b   :  { %2399 = vmatpush1.bf16.msra.mxu0 %v7835_v63  ;;  %v7277_v63 = vcombine.high %v2870_v61, %v2886_v62  ;;  %v7886_v61 = vld [vmem:[%s10727_s3 + $0x1f0] ss:$8 sps:$4 sm:$0xff]  }
 0x13c   :  { %2400 = vmatprep.subr.bf16.mxu0 %v7840_v0  ;;  %v341_v0 = vrot.slane %v8920_v57, %v8915_v56 }
 0x13d   :  { %5722 = vmatprep.subr.bf16.mxu1 %v7277_v63 }
 0x13e   :  { %5723 = vmatpush1.bf16.msra.mxu1 %v7276_v3 }
 0x13f   :  { %2401 = vmatpush1.bf16.msra.mxu0 %v7838_v1  ;;  %v345_v1 = vrot.slane %v8920_v57, %v8923_v58 }
 0x140   :  { %2411 = vmatprep.subr.bf16.mxu0 %v7843_v2  ;;  %v353_v2 = vrot.slane %v8920_v57, %v8926_v59  ;;  %v2456_v57 = vld [vmem:[%s10728_s5 + $0x10] sm:$0xff] }
 0x141   :  { %v6865_v63 = vcombine.high %v2456_v57, %v2472_v60 }
 0x1d5   :  { %v1795_v4 = vpop.f32.mrb[0].mxu0  ;;  %v8940_v5 = vpop.f32.mrb[0].mxu1 }
 0x1d6   :  { %v7372_v6 = vadd.f32 %v1795_v4, %v341_v0  ;;  %v1797_v7 = vpop.f32.mrb[1].mxu0  ;;  %v1961_v8 = vpop.f32.mrb[1].mxu1  ;;  %v7374_v54 = vadd.f32 %v8940_v5, %v349_v51  ;;  %v2488_v0 = vld [vmem:[%s10728_s5 + $0x110] sm:$0xff] }
 0x1d7   :  { %v7373_v10 = vadd.f32 %v1797_v7, %v345_v1  ;;  %v7375_v11 = vadd.f32 %v1961_v8, %v353_v2  ;;  %v1799_v13 = vpop.f32.mrb[2].mxu0  ;;  %v1963_v14 = vpop.f32.mrb[2].mxu1  ;;  %v2504_v1 = vld [vmem:[%s10728_s5 + $0x190] sm:$0xff]  ;;  %v6864_v2 = vcombine.low %v2456_v57, %v2472_v60  ;;  %v2902_v60 = vld [vmem:[%s10728_s5 + $0xe00] sm:$0xff] }
 0x1d8   :  { %v1966_v15 = vmax.f32 %v7372_v6, 0.0  ;;  %v1800_v16 = vpop.f32.mrb[3].mxu0  ;;  %v1964_v18 = vpop.f32.mrb[3].mxu1  ;;  %v1968_v62 = vmax.f32 %v7374_v54, 0.0  ;;  %v6897_v4 = vcombine.high %v2488_v0, %v2504_v1  ;;  %v2520_v5 = vld [vmem:[%s10728_s5 + $0x210] sm:$0xff]  ;;  %v6896_v7 = vcombine.low %v2488_v0, %v2504_v1 }
 0x1d9   :  { %v1967_v19 = vmax.f32 %v7373_v10, 0.0  ;;  %v1969_v20 = vmax.f32 %v7375_v11, 0.0  ;;  %v2536_v6 = vld [vmem:[%s10728_s5 + $0x290] sm:$0xff] }
 0x1da   :  { %v2035_v23 = vpack.c.bf16 %v1966_v15, %v1966_v15  ;;  %v2037_v3 = vpack.c.bf16 %v1968_v62, %v1968_v62  ;;  %v6929_v8 = vcombine.high %v2520_v5, %v2536_v6  ;;  %v2552_v10 = vld [vmem:[%s10728_s5 + $0x310] sm:$0xff]  ;;  %v6928_v13 = vcombine.low %v2520_v5, %v2536_v6  ;;  %v2950_v5 = vld [vmem:[%s10728_s5 + $0xf80] sm:$0xff] }
 0x1db   :  { %v2036_v21 = vpack.c.bf16 %v1967_v19, %v1967_v19  ;;  %v2038_v12 = vpack.c.bf16 %v1969_v20, %v1969_v20  ;;  %v2568_v11 = vld [vmem:[%s10728_s5 + $0x390] sm:$0xff] }
 0x1dc   :  { %v6961_v14 = vcombine.high %v2552_v10, %v2568_v11  ;;  %v2584_v15 = vld [vmem:[%s10728_s5 + $0x410] sm:$0xff]  ;;  %v6960_v18 = vcombine.low %v2552_v10, %v2568_v11 }
 0x1dd   :  { %2402 = vmatprep.mubr.bf16.mxu0 %v2036_v21  ;;  %v2600_v16 = vld [vmem:[%s10728_s5 + $0x490] sm:$0xff] }
 0x1de   :  { %2403 = vmatmul.mubr.bf16.vlgmr.msra.gmra.mrb[4].mxu0 %v2035_v23  ;;  %v6993_v19 = vcombine.high %v2584_v15, %v2600_v16  ;;  %v2616_v20 = vld [vmem:[%s10728_s5 + $0x510] sm:$0xff] }
 0x1df   :  { %2412 = vmatpush1.bf16.msra.mxu0 %v7841_v22  ;;  %2443 = vmatprep.mubr.bf16.mxu0 %v2038_v12  ;;  %v2632_v21 = vld [vmem:[%s10728_s5 + $0x590] sm:$0xff]  ;;  %v6992_v22 = vcombine.low %v2584_v15, %v2600_v16  ;;  %v2471_v15 = vld [vmem:[%s10728_s5 + $0x88] sm:$0xff]  ;;  %v2458_v16 = vld [vmem:[%s10728_s5 + $0x20] sm:$0xff] }
 0x1e0   :  { %2413 = vmatprep.subr.bf16.mxu0 %v7846_v24  ;;  %v7025_v23 = vcombine.high %v2616_v20, %v2632_v21  ;;  %v2648_v24 = vld [vmem:[%s10728_s5 + $0x610] sm:$0xff] }
 0x1e1   :  { %v2664_v12 = vld [vmem:[%s10728_s5 + $0x690] sm:$0xff] }
 0x1e2   :  { %v2904_v62 = vld [vmem:[%s10728_s5 + $0xe10] sm:$0xff] }
 0x1e3   :  { %2414 = vmatpush1.bf16.msra.mxu0 %v7844_v26  ;;  %v7024_v26 = vcombine.low %v2616_v20, %v2632_v21  ;;  %v2920_v0 = vld [vmem:[%s10728_s5 + $0xe90] sm:$0xff] }
 0x1e4   :  { %2415 = vmatprep.subr.bf16.mxu0 %v7849_v9  ;;  %v7057_v9 = vcombine.high %v2648_v24, %v2664_v12  ;;  %v2936_v6 = vld [vmem:[%s10728_s5 + $0xf10] sm:$0xff] }
 0x1e7   :  { %2416 = vmatpush1.bf16.msra.mxu0 %v7847_v27  ;;  %v2680_v27 = vld [vmem:[%s10728_s5 + $0x710] sm:$0xff] }
 0x1e8   :  { %2417 = vmatprep.subr.bf16.mxu0 %v7852_v28  ;;  %v2696_v28 = vld [vmem:[%s10728_s5 + $0x790] sm:$0xff] }
 0x1eb   :  { %2418 = vmatpush1.bf16.msra.mxu0 %v7850_v29  ;;  %v7056_v29 = vcombine.low %v2648_v24, %v2664_v12 }
 0x1ec   :  { %2419 = vmatprep.subr.bf16.mxu0 %v7855_v30  ;;  %v7089_v30 = vcombine.high %v2680_v27, %v2696_v28 }
 0x1ef   :  { %2420 = vmatpush1.bf16.msra.mxu0 %v7853_v31  ;;  %v2712_v31 = vld [vmem:[%s10728_s5 + $0x810] sm:$0xff] }
 0x1f0   :  { %2421 = vmatprep.subr.bf16.mxu0 %v7858_v32  ;;  %v2728_v32 = vld [vmem:[%s10728_s5 + $0x890] sm:$0xff] }
 0x1f3   :  { %2422 = vmatpush1.bf16.msra.mxu0 %v7856_v33  ;;  %v7088_v33 = vcombine.low %v2680_v27, %v2696_v28 }
 0x1f4   :  { %2423 = vmatprep.subr.bf16.mxu0 %v7861_v34  ;;  %v7121_v34 = vcombine.high %v2712_v31, %v2728_v32 }
 0x1f7   :  { %2424 = vmatpush1.bf16.msra.mxu0 %v7859_v35  ;;  %v2744_v35 = vld [vmem:[%s10728_s5 + $0x910] sm:$0xff] }
 0x1f8   :  { %2425 = vmatprep.subr.bf16.mxu0 %v7864_v17  ;;  %v2760_v17 = vld [vmem:[%s10728_s5 + $0x990] sm:$0xff] }
 0x1fb   :  { %2426 = vmatpush1.bf16.msra.mxu0 %v7862_v36  ;;  %v7120_v36 = vcombine.low %v2712_v31, %v2728_v32 }
 0x1fc   :  { %2427 = vmatprep.subr.bf16.mxu0 %v7867_v25  ;;  %v7153_v25 = vcombine.high %v2744_v35, %v2760_v17 }
 0x1ff   :  { %2428 = vmatpush1.bf16.msra.mxu0 %v7865_v37  ;;  %v2776_v37 = vld [vmem:[%s10728_s5 + $0xa10] sm:$0xff] }
 0x200   :  { %2429 = vmatprep.subr.bf16.mxu0 %v7870_v38  ;;  %v2792_v38 = vld [vmem:[%s10728_s5 + $0xa90] sm:$0xff] }
 0x203   :  { %2430 = vmatpush1.bf16.msra.mxu0 %v7868_v39  ;;  %v7152_v39 = vcombine.low %v2744_v35, %v2760_v17  ;;  %v2490_v35 = vld [vmem:[%s10728_s5 + $0x120] sm:$0xff] }
 0x204   :  { %2431 = vmatprep.subr.bf16.mxu0 %v7873_v40  ;;  %v7185_v40 = vcombine.high %v2776_v37, %v2792_v38  ;;  %v2506_v17 = vld [vmem:[%s10728_s5 + $0x1a0] sm:$0xff] }
 0x207   :  { %2432 = vmatpush1.bf16.msra.mxu0 %v7871_v41  ;;  %v2808_v41 = vld [vmem:[%s10728_s5 + $0xb10] sm:$0xff] }
 0x208   :  { %2433 = vmatprep.subr.bf16.mxu0 %v7876_v42  ;;  %v2824_v42 = vld [vmem:[%s10728_s5 + $0xb90] sm:$0xff] }
 0x20b   :  { %2434 = vmatpush1.bf16.msra.mxu0 %v7874_v44  ;;  %v7184_v44 = vcombine.low %v2776_v37, %v2792_v38  ;;  %v2519_v37 = vld [vmem:[%s10728_s5 + $0x208] sm:$0xff] }
 0x20c   :  { %2435 = vmatprep.subr.bf16.mxu0 %v7879_v45  ;;  %v7217_v45 = vcombine.high %v2808_v41, %v2824_v42 }
 0x20f   :  { %2436 = vmatpush1.bf16.msra.mxu0 %v7877_v46  ;;  %v2840_v46 = vld [vmem:[%s10728_s5 + $0xc10] sm:$0xff] }
 0x210   :  { %2437 = vmatprep.subr.bf16.mxu0 %v7882_v48  ;;  %v2856_v48 = vld [vmem:[%s10728_s5 + $0xc90] sm:$0xff] }
 0x211   :  { %v7249_v51 = vcombine.high %v2840_v46, %v2856_v48  ;;  %v7248_v54 = vcombine.low %v2840_v46, %v2856_v48 }
 0x213   :  { %2438 = vmatpush1.bf16.msra.mxu0 %v7880_v50  ;;  %v7216_v50 = vcombine.low %v2808_v41, %v2824_v42  ;;  %v2522_v41 = vld [vmem:[%s10728_s5 + $0x220] sm:$0xff] }
 0x214   :  { %2439 = vmatprep.subr.bf16.mxu0 %v7885_v52  ;;  %v2872_v52 = vld [vmem:[%s10728_s5 + $0xd10] sm:$0xff]  ;;  %v2538_v42 = vld [vmem:[%s10728_s5 + $0x2a0] sm:$0xff] }
 0x215   :  { %v6933_v48 = vcombine.high %v2522_v41, %v2538_v42 }
 0x217   :  { %2440 = vmatpush1.bf16.msra.mxu0 %v7883_v53  ;;  %v2888_v53 = vld [vmem:[%s10728_s5 + $0xd90] sm:$0xff] }
 0x218   :  { %2441 = vmatprep.subr.bf16.mxu0 %v7888_v55  ;;  %v7281_v55 = vcombine.high %v2872_v52, %v2888_v53  ;;  %v7280_v57 = vcombine.low %v2872_v52, %v2888_v53  ;;  %v2554_v52 = vld [vmem:[%s10728_s5 + $0x320] sm:$0xff] }
 0x219   :  { %v2570_v53 = vld [vmem:[%s10728_s5 + $0x3a0] sm:$0xff] }
 0x21b   :  { %2442 = vmatpush1.bf16.msra.mxu0 %v7886_v61  ;;  %v2918_v61 = vld [vmem:[%s10728_s5 + $0xe80] sm:$0xff] }
 0x21c   :  { %5778 = vmatprep.subr.bf16.mxu0 %v6865_v63  ;;  %v7309_v63 = vcombine.high %v2902_v60, %v2918_v61  ;;  %v7308_v1 = vcombine.low %v2902_v60, %v2918_v61  ;;  %v6965_v60 = vcombine.high %v2554_v52, %v2570_v53  ;;  %v2583_v61 = vld [vmem:[%s10728_s5 + $0x408] sm:$0xff] }
 0x21e   :  { %2444 = vmatmul.mubr.bf16.vlgmr.msra.gmra.mrb[4].mxu0 %v2037_v3  ;;  %v7313_v3 = vcombine.high %v2904_v62, %v2920_v0  ;;  %5724 = vmatprep.subr.bf16.mxu1 %v7309_v63  ;;  %v2586_v63 = vld [vmem:[%s10728_s5 + $0x420] sm:$0xff] }
 0x21f   :  { %5779 = vmatpush1.bf16.msra.mxu0 %v6864_v2  ;;  %v7312_v2 = vcombine.low %v2904_v62, %v2920_v0  ;;  %5725 = vmatpush1.bf16.msra.mxu1 %v7308_v1  ;;  %v2599_v62 = vld [vmem:[%s10728_s5 + $0x488] sm:$0xff]  ;;  %v2602_v0 = vld [vmem:[%s10728_s5 + $0x4a0] sm:$0xff] }
 0x220   :  { %5780 = vmatprep.subr.bf16.mxu0 %v6897_v4  ;;  %v2934_v4 = vld [vmem:[%s10728_s5 + $0xf00] sm:$0xff] }
 0x221   :  { %v7340_v10 = vcombine.low %v2934_v4, %v2950_v5 }
 0x223   :  { %5781 = vmatpush1.bf16.msra.mxu0 %v6896_v7  ;;  %v7341_v7 = vcombine.high %v2934_v4, %v2950_v5  ;;  %v6997_v4 = vcombine.high %v2586_v63, %v2602_v0  ;;  %v2615_v5 = vld [vmem:[%s10728_s5 + $0x508] sm:$0xff] }
 0x224   :  { %5782 = vmatprep.subr.bf16.mxu0 %v6929_v8  ;;  %v2952_v8 = vld [vmem:[%s10728_s5 + $0xf90] sm:$0xff] }
 0x225   :  { %v7344_v11 = vcombine.low %v2936_v6, %v2952_v8  ;;  %5726 = vmatprep.subr.bf16.mxu1 %v7341_v7  ;;  %v2618_v7 = vld [vmem:[%s10728_s5 + $0x520] sm:$0xff] }
 0x226   :  { %5727 = vmatpush1.bf16.msra.mxu1 %v7340_v10  ;;  %v6990_v10 = vcombine.low %v2583_v61, %v2599_v62 }
 0x227   :  { %5783 = vmatpush1.bf16.msra.mxu0 %v6928_v13  ;;  %v7345_v13 = vcombine.high %v2936_v6, %v2952_v8  ;;  %v2631_v6 = vld [vmem:[%s10728_s5 + $0x588] sm:$0xff]  ;;  %v2634_v8 = vld [vmem:[%s10728_s5 + $0x5a0] sm:$0xff] }
 0x228   :  { %5784 = vmatprep.subr.bf16.mxu0 %v6961_v14  ;;  %v2455_v14 = vld [vmem:[%s10728_s5 + $0x8] sm:$0xff] }
 0x229   :  { %v6862_v20 = vcombine.low %v2455_v14, %v2471_v15 }
 0x22b   :  { %5785 = vmatpush1.bf16.msra.mxu0 %v6960_v18  ;;  %v6863_v18 = vcombine.high %v2455_v14, %v2471_v15  ;;  %v7029_v14 = vcombine.high %v2618_v7, %v2634_v8  ;;  %v2647_v15 = vld [vmem:[%s10728_s5 + $0x608] sm:$0xff] }
 0x22c   :  { %5786 = vmatprep.subr.bf16.mxu0 %v6993_v19  ;;  %v2474_v19 = vld [vmem:[%s10728_s5 + $0xa0] sm:$0xff] }
 0x22d   :  { %v6868_v21 = vcombine.low %v2458_v16, %v2474_v19  ;;  %5737 = vmatprep.subr.bf16.mxu1 %v6863_v18  ;;  %v2650_v18 = vld [vmem:[%s10728_s5 + $0x620] sm:$0xff] }
 0x22f   :  { %5787 = vmatpush1.bf16.msra.mxu0 %v6992_v22  ;;  %v6869_v22 = vcombine.high %v2458_v16, %v2474_v19  ;;  %v2663_v16 = vld [vmem:[%s10728_s5 + $0x688] sm:$0xff]  ;;  %v2666_v19 = vld [vmem:[%s10728_s5 + $0x6a0] sm:$0xff] }
 0x230   :  { %5788 = vmatprep.subr.bf16.mxu0 %v7025_v23  ;;  %v2034_v23 = vld [vmem:[%s10730_s4] sm:$0x3] }
 0x231   :  { %v2043_v24 = vrot.slane %v2034_v23, %v8915_v56  ;;  %v2047_v12 = vrot.slane %v2034_v23, %v8923_v58  ;;  %v7061_v23 = vcombine.high %v2650_v18, %v2666_v19 }
 0x233   :  { %5789 = vmatpush1.bf16.msra.mxu0 %v7024_v26 }
 0x234   :  { %5790 = vmatprep.subr.bf16.mxu0 %v7057_v9 }
 0x237   :  { %5791 = vmatpush1.bf16.msra.mxu0 %v7056_v29 }
 0x238   :  { %5792 = vmatprep.subr.bf16.mxu0 %v7089_v30 }
 0x23b   :  { %5793 = vmatpush1.bf16.msra.mxu0 %v7088_v33  ;;  %v2487_v33 = vld [vmem:[%s10728_s5 + $0x108] sm:$0xff] }
 0x23c   :  { %5794 = vmatprep.subr.bf16.mxu0 %v7121_v34  ;;  %v2503_v34 = vld [vmem:[%s10728_s5 + $0x188] sm:$0xff] }
 0x23d   :  { %v6895_v38 = vcombine.high %v2487_v33, %v2503_v34 }
 0x23f   :  { %5795 = vmatpush1.bf16.msra.mxu0 %v7120_v36 }
 0x240   :  { %5796 = vmatprep.subr.bf16.mxu0 %v7153_v25 }
 0x243   :  { %5797 = vmatpush1.bf16.msra.mxu0 %v7152_v39  ;;  %v6901_v39 = vcombine.high %v2490_v35, %v2506_v17 }
 0x244   :  { %5798 = vmatprep.subr.bf16.mxu0 %v7185_v40  ;;  %v2535_v40 = vld [vmem:[%s10728_s5 + $0x288] sm:$0xff] }
 0x245   :  { %v6927_v46 = vcombine.high %v2519_v37, %v2535_v40 }
 0x247   :  { %5799 = vmatpush1.bf16.msra.mxu0 %v7184_v44  ;;  %v6894_v44 = vcombine.low %v2487_v33, %v2503_v34  ;;  %v2714_v33 = vld [vmem:[%s10728_s5 + $0x820] sm:$0xff] }
 0x248   :  { %5800 = vmatprep.subr.bf16.mxu0 %v7217_v45  ;;  %v6900_v45 = vcombine.low %v2490_v35, %v2506_v17  ;;  %v2730_v34 = vld [vmem:[%s10728_s5 + $0x8a0] sm:$0xff] }
 0x24b   :  { %5801 = vmatpush1.bf16.msra.mxu0 %v7216_v50  ;;  %v2551_v50 = vld [vmem:[%s10728_s5 + $0x308] sm:$0xff] }
 0x24c   :  { %5802 = vmatprep.subr.bf16.mxu0 %v7249_v51  ;;  %v2567_v51 = vld [vmem:[%s10728_s5 + $0x388] sm:$0xff] }
 0x24d   :  { %v6958_v1 = vcombine.low %v2551_v50, %v2567_v51 }
 0x24f   :  { %5803 = vmatpush1.bf16.msra.mxu0 %v7248_v54  ;;  %v6926_v54 = vcombine.low %v2519_v37, %v2535_v40  ;;  %v2759_v40 = vld [vmem:[%s10728_s5 + $0x988] sm:$0xff] }
 0x250   :  { %5804 = vmatprep.subr.bf16.mxu0 %v7281_v55  ;;  %v6932_v55 = vcombine.low %v2522_v41, %v2538_v42  ;;  %v2746_v41 = vld [vmem:[%s10728_s5 + $0x920] sm:$0xff] }
 0x251   :  { %v2762_v42 = vld [vmem:[%s10728_s5 + $0x9a0] sm:$0xff] }
 0x253   :  { %5805 = vmatpush1.bf16.msra.mxu0 %v7280_v57  ;;  %v6959_v57 = vcombine.high %v2551_v50, %v2567_v51  ;;  %v2775_v50 = vld [vmem:[%s10728_s5 + $0xa08] sm:$0xff] }
 0x254   :  { %5806 = vmatprep.subr.bf16.mxu0 %v7313_v3  ;;  %v6991_v3 = vcombine.high %v2583_v61, %v2599_v62  ;;  %v2791_v51 = vld [vmem:[%s10728_s5 + $0xa88] sm:$0xff] }
 0x255   :  { %v2807_v61 = vld [vmem:[%s10728_s5 + $0xb08] sm:$0xff] }
 0x256   :  { %v2823_v62 = vld [vmem:[%s10728_s5 + $0xb88] sm:$0xff] }
 0x257   :  { %5807 = vmatpush1.bf16.msra.mxu0 %v7312_v2  ;;  %v6964_v2 = vcombine.low %v2554_v52, %v2570_v53  ;;  %v2778_v52 = vld [vmem:[%s10728_s5 + $0xa20] sm:$0xff] }
 0x258   :  { %5808 = vmatprep.subr.bf16.mxu0 %v7345_v13  ;;  %v7023_v13 = vcombine.high %v2615_v5, %v2631_v6  ;;  %v2794_v53 = vld [vmem:[%s10728_s5 + $0xaa0] sm:$0xff] }
 0x25b   :  { %5809 = vmatpush1.bf16.msra.mxu0 %v7344_v11  ;;  %v6996_v11 = vcombine.low %v2586_v63, %v2602_v0  ;;  %v2810_v63 = vld [vmem:[%s10728_s5 + $0xb20] sm:$0xff] }
 0x25c   :  { %5860 = vmatprep.subr.bf16.mxu0 %v6869_v22  ;;  %v7055_v22 = vcombine.high %v2647_v15, %v2663_v16  ;;  %v2826_v0 = vld [vmem:[%s10728_s5 + $0xba0] sm:$0xff] }
 0x2f1   :  { %v2445_v26 = vpop.f32.mrb[4].mxu0 }
 0x2f2   :  { %v7376_v9 = vadd.f32 %v2445_v26, %v2043_v24  ;;  %v2447_v27 = vpop.f32.mrb[5].mxu0  ;;  %v2679_v24 = vld [vmem:[%s10728_s5 + $0x708] sm:$0xff]  ;;  %v2682_v26 = vld [vmem:[%s10728_s5 + $0x720] sm:$0xff] }
 0x2f3   :  { %v7377_v28 = vadd.f32 %v2447_v27, %v2047_v12  ;;  %v2449_v29 = vpop.f32.mrb[6].mxu0  ;;  %v2695_v12 = vld [vmem:[%s10728_s5 + $0x788] sm:$0xff]  ;;  %v7054_v27 = vcombine.low %v2647_v15, %v2663_v16 }
 0x2f4   :  { %v2452_v30 = vmax.f32 %v7376_v9, 0.0  ;;  %v2450_v31 = vpop.f32.mrb[7].mxu0  ;;  %v2698_v9 = vld [vmem:[%s10728_s5 + $0x7a0] sm:$0xff]  ;;  %v7087_v29 = vcombine.high %v2679_v24, %v2695_v12  ;;  %v7086_v35 = vcombine.low %v2679_v24, %v2695_v12  ;;  %v2871_v15 = vld [vmem:[%s10728_s5 + $0xd08] sm:$0xff] }
 0x2f5   :  { %v2453_v32 = vmax.f32 %v7377_v28, 0.0  ;;  %v7060_v28 = vcombine.low %v2650_v18, %v2666_v19  ;;  %v2711_v31 = vld [vmem:[%s10728_s5 + $0x808] sm:$0xff]  ;;  %v7092_v17 = vcombine.low %v2682_v26, %v2698_v9  ;;  %v2874_v18 = vld [vmem:[%s10728_s5 + $0xd20] sm:$0xff] }
 0x2f6   :  { %v9180_v25 = vpack.c.bf16 %v2452_v30, %v2452_v30  ;;  %v7093_v30 = vcombine.high %v2682_v26, %v2698_v9  ;;  %v2887_v16 = vld [vmem:[%s10728_s5 + $0xd88] sm:$0xff]  ;;  %v2890_v19 = vld [vmem:[%s10728_s5 + $0xda0] sm:$0xff] }
 0x2f7   :  { %v9178_v36 = vpack.c.bf16 %v2453_v32, %v2453_v32  ;;  %v2727_v32 = vld [vmem:[%s10728_s5 + $0x888] sm:$0xff]  ;;  %v2906_v26 = vld [vmem:[%s10728_s5 + $0xe20] sm:$0xff] }
 0x2f8   :  { %v7119_v37 = vcombine.high %v2711_v31, %v2727_v32  ;;  %v2903_v24 = vld [vmem:[%s10728_s5 + $0xe08] sm:$0xff]  ;;  %v2922_v9 = vld [vmem:[%s10728_s5 + $0xea0] sm:$0xff] }
 0x2f9   :  { %5728 = vmatprep.mubr.bf16.mxu1 %v9178_v36  ;;  %5810 = vmatprep.mubr.bf16.mxu0 %v9178_v36  ;;  %v2919_v12 = vld [vmem:[%s10728_s5 + $0xe88] sm:$0xff] }
 0x2fa   :  { %5729 = vmatmul.mubr.bf16.vlgmr.msra.gmra.mrb[4].mxu1 %v9180_v25  ;;  %5811 = vmatmul.mubr.bf16.vlgmr.msra.gmra.mrb[8].mxu0 %v9180_v25 }
 0x2fb   :  { %5738 = vmatpush1.bf16.msra.mxu1 %v6862_v20  ;;  %5861 = vmatpush1.bf16.msra.mxu0 %v6868_v21  ;;  %v7022_v20 = vcombine.low %v2615_v5, %v2631_v6  ;;  %v7028_v21 = vcombine.low %v2618_v7, %v2634_v8  ;;  %v2839_v5 = vld [vmem:[%s10728_s5 + $0xc08] sm:$0xff]  ;;  %v2842_v7 = vld [vmem:[%s10728_s5 + $0xc20] sm:$0xff] }
 0x2fc   :  { %5769 = vmatprep.mubr.bf16.mxu1 %v9178_v36  ;;  %5892 = vmatprep.mubr.bf16.mxu0 %v9178_v36  ;;  %v2855_v6 = vld [vmem:[%s10728_s5 + $0xc88] sm:$0xff]  ;;  %v2858_v8 = vld [vmem:[%s10728_s5 + $0xca0] sm:$0xff] }
 0x2fd   :  { %5739 = vmatprep.subr.bf16.mxu1 %v6895_v38  ;;  %5862 = vmatprep.subr.bf16.mxu0 %v6901_v39  ;;  %v7125_v38 = vcombine.high %v2714_v33, %v2730_v34  ;;  %v2743_v39 = vld [vmem:[%s10728_s5 + $0x908] sm:$0xff] }
 0x2ff   :  { %5740 = vmatpush1.bf16.msra.mxu1 %v6894_v44  ;;  %5863 = vmatpush1.bf16.msra.mxu0 %v6900_v45  ;;  %v7118_v44 = vcombine.low %v2711_v31, %v2727_v32  ;;  %v7124_v45 = vcombine.low %v2714_v33, %v2730_v34  ;;  %v2935_v31 = vld [vmem:[%s10728_s5 + $0xf08] sm:$0xff]  ;;  %v2938_v33 = vld [vmem:[%s10728_s5 + $0xf20] sm:$0xff] }
 0x300   :  { %5741 = vmatprep.subr.bf16.mxu1 %v6927_v46  ;;  %5864 = vmatprep.subr.bf16.mxu0 %v6933_v48  ;;  %v7151_v46 = vcombine.high %v2743_v39, %v2759_v40  ;;  %v7157_v48 = vcombine.high %v2746_v41, %v2762_v42  ;;  %v2951_v32 = vld [vmem:[%s10728_s5 + $0xf88] sm:$0xff]  ;;  %v2954_v34 = vld [vmem:[%s10728_s5 + $0xfa0] sm:$0xff] }
 0x303   :  { %5742 = vmatpush1.bf16.msra.mxu1 %v6926_v54  ;;  %5865 = vmatpush1.bf16.msra.mxu0 %v6932_v55  ;;  %v7150_v54 = vcombine.low %v2743_v39, %v2759_v40  ;;  %v7156_v55 = vcombine.low %v2746_v41, %v2762_v42  ;;  %v2457_v39 = vld [vmem:[%s10728_s5 + $0x18] sm:$0xff]  ;;  %v2460_v41 = vld [vmem:[%s10728_s5 + $0x30] sm:$0xff] }
 0x304   :  { %5743 = vmatprep.subr.bf16.mxu1 %v6959_v57  ;;  %5866 = vmatprep.subr.bf16.mxu0 %v6965_v60  ;;  %v7183_v57 = vcombine.high %v2775_v50, %v2791_v51  ;;  %v7189_v60 = vcombine.high %v2778_v52, %v2794_v53  ;;  %v2473_v40 = vld [vmem:[%s10728_s5 + $0x98] sm:$0xff]  ;;  %v2476_v42 = vld [vmem:[%s10728_s5 + $0xb0] sm:$0xff] }
 0x307   :  { %5744 = vmatpush1.bf16.msra.mxu1 %v6958_v1  ;;  %5867 = vmatpush1.bf16.msra.mxu0 %v6964_v2  ;;  %v7182_v1 = vcombine.low %v2775_v50, %v2791_v51  ;;  %v7188_v2 = vcombine.low %v2778_v52, %v2794_v53  ;;  %v2489_v50 = vld [vmem:[%s10728_s5 + $0x118] sm:$0xff]  ;;  %v2492_v52 = vld [vmem:[%s10728_s5 + $0x130] sm:$0xff] }
 0x308   :  { %5745 = vmatprep.subr.bf16.mxu1 %v6991_v3  ;;  %5868 = vmatprep.subr.bf16.mxu0 %v6997_v4  ;;  %v7215_v3 = vcombine.high %v2807_v61, %v2823_v62  ;;  %v7221_v4 = vcombine.high %v2810_v63, %v2826_v0  ;;  %v2505_v51 = vld [vmem:[%s10728_s5 + $0x198] sm:$0xff]  ;;  %v2508_v53 = vld [vmem:[%s10728_s5 + $0x1b0] sm:$0xff] }
 0x30b   :  { %5746 = vmatpush1.bf16.msra.mxu1 %v6990_v10  ;;  %5869 = vmatpush1.bf16.msra.mxu0 %v6996_v11  ;;  %v7214_v10 = vcombine.low %v2807_v61, %v2823_v62  ;;  %v7220_v11 = vcombine.low %v2810_v63, %v2826_v0  ;;  %v2521_v61 = vld [vmem:[%s10728_s5 + $0x218] sm:$0xff]  ;;  %v2524_v63 = vld [vmem:[%s10728_s5 + $0x230] sm:$0xff] }
 0x30c   :  { %5747 = vmatprep.subr.bf16.mxu1 %v7023_v13  ;;  %5870 = vmatprep.subr.bf16.mxu0 %v7029_v14  ;;  %v7247_v13 = vcombine.high %v2839_v5, %v2855_v6  ;;  %v7253_v14 = vcombine.high %v2842_v7, %v2858_v8  ;;  %v2537_v62 = vld [vmem:[%s10728_s5 + $0x298] sm:$0xff]  ;;  %v2540_v0 = vld [vmem:[%s10728_s5 + $0x2b0] sm:$0xff] }
 0x30f   :  { %5748 = vmatpush1.bf16.msra.mxu1 %v7022_v20  ;;  %5871 = vmatpush1.bf16.msra.mxu0 %v7028_v21  ;;  %v7246_v20 = vcombine.low %v2839_v5, %v2855_v6  ;;  %v7252_v21 = vcombine.low %v2842_v7, %v2858_v8  ;;  %v2553_v5 = vld [vmem:[%s10728_s5 + $0x318] sm:$0xff]  ;;  %v2556_v7 = vld [vmem:[%s10728_s5 + $0x330] sm:$0xff] }
 0x310   :  { %5749 = vmatprep.subr.bf16.mxu1 %v7055_v22  ;;  %5872 = vmatprep.subr.bf16.mxu0 %v7061_v23  ;;  %v7279_v22 = vcombine.high %v2871_v15, %v2887_v16  ;;  %v7285_v23 = vcombine.high %v2874_v18, %v2890_v19  ;;  %v2569_v6 = vld [vmem:[%s10728_s5 + $0x398] sm:$0xff]  ;;  %v2572_v8 = vld [vmem:[%s10728_s5 + $0x3b0] sm:$0xff] }
 0x313   :  { %5750 = vmatpush1.bf16.msra.mxu1 %v7054_v27  ;;  %5873 = vmatpush1.bf16.msra.mxu0 %v7060_v28  ;;  %v7278_v27 = vcombine.low %v2871_v15, %v2887_v16  ;;  %v7284_v28 = vcombine.low %v2874_v18, %v2890_v19  ;;  %v2585_v15 = vld [vmem:[%s10728_s5 + $0x418] sm:$0xff]  ;;  %v2588_v18 = vld [vmem:[%s10728_s5 + $0x430] sm:$0xff] }
 0x314   :  { %5751 = vmatprep.subr.bf16.mxu1 %v7087_v29  ;;  %5874 = vmatprep.subr.bf16.mxu0 %v7093_v30  ;;  %v7311_v29 = vcombine.high %v2903_v24, %v2919_v12  ;;  %v7317_v30 = vcombine.high %v2906_v26, %v2922_v9  ;;  %v2601_v16 = vld [vmem:[%s10728_s5 + $0x498] sm:$0xff]  ;;  %v2604_v19 = vld [vmem:[%s10728_s5 + $0x4b0] sm:$0xff] }
 0x317   :  { %5752 = vmatpush1.bf16.msra.mxu1 %v7086_v35  ;;  %5875 = vmatpush1.bf16.msra.mxu0 %v7092_v17  ;;  %v7310_v35 = vcombine.low %v2903_v24, %v2919_v12  ;;  %v7316_v17 = vcombine.low %v2906_v26, %v2922_v9  ;;  %v2617_v24 = vld [vmem:[%s10728_s5 + $0x518] sm:$0xff]  ;;  %v2620_v26 = vld [vmem:[%s10728_s5 + $0x530] sm:$0xff] }
 0x318   :  { %5753 = vmatprep.subr.bf16.mxu1 %v7119_v37  ;;  %5876 = vmatprep.subr.bf16.mxu0 %v7125_v38  ;;  %v7343_v37 = vcombine.high %v2935_v31, %v2951_v32  ;;  %v7349_v38 = vcombine.high %v2938_v33, %v2954_v34  ;;  %v2633_v12 = vld [vmem:[%s10728_s5 + $0x598] sm:$0xff]  ;;  %v2636_v9 = vld [vmem:[%s10728_s5 + $0x5b0] sm:$0xff] }
 0x31b   :  { %5754 = vmatpush1.bf16.msra.mxu1 %v7118_v44  ;;  %5877 = vmatpush1.bf16.msra.mxu0 %v7124_v45  ;;  %v7342_v44 = vcombine.low %v2935_v31, %v2951_v32  ;;  %v7348_v45 = vcombine.low %v2938_v33, %v2954_v34  ;;  %v2649_v31 = vld [vmem:[%s10728_s5 + $0x618] sm:$0xff]  ;;  %v2652_v33 = vld [vmem:[%s10728_s5 + $0x630] sm:$0xff] }
 0x31c   :  { %5755 = vmatprep.subr.bf16.mxu1 %v7151_v46  ;;  %5878 = vmatprep.subr.bf16.mxu0 %v7157_v48  ;;  %v6867_v46 = vcombine.high %v2457_v39, %v2473_v40  ;;  %v6873_v48 = vcombine.high %v2460_v41, %v2476_v42  ;;  %v2665_v32 = vld [vmem:[%s10728_s5 + $0x698] sm:$0xff]  ;;  %v2668_v34 = vld [vmem:[%s10728_s5 + $0x6b0] sm:$0xff] }
 0x31f   :  { %5756 = vmatpush1.bf16.msra.mxu1 %v7150_v54  ;;  %5879 = vmatpush1.bf16.msra.mxu0 %v7156_v55  ;;  %v6866_v54 = vcombine.low %v2457_v39, %v2473_v40  ;;  %v6872_v55 = vcombine.low %v2460_v41, %v2476_v42  ;;  %v2681_v39 = vld [vmem:[%s10728_s5 + $0x718] sm:$0xff]  ;;  %v2684_v41 = vld [vmem:[%s10728_s5 + $0x730] sm:$0xff] }
 0x320   :  { %5757 = vmatprep.subr.bf16.mxu1 %v7183_v57  ;;  %5880 = vmatprep.subr.bf16.mxu0 %v7189_v60  ;;  %v6899_v57 = vcombine.high %v2489_v50, %v2505_v51  ;;  %v6905_v60 = vcombine.high %v2492_v52, %v2508_v53  ;;  %v2697_v40 = vld [vmem:[%s10728_s5 + $0x798] sm:$0xff]  ;;  %v2700_v42 = vld [vmem:[%s10728_s5 + $0x7b0] sm:$0xff] }
 0x323   :  { %5758 = vmatpush1.bf16.msra.mxu1 %v7182_v1  ;;  %5881 = vmatpush1.bf16.msra.mxu0 %v7188_v2  ;;  %v6898_v1 = vcombine.low %v2489_v50, %v2505_v51  ;;  %v6904_v2 = vcombine.low %v2492_v52, %v2508_v53  ;;  %v2713_v50 = vld [vmem:[%s10728_s5 + $0x818] sm:$0xff]  ;;  %v2716_v52 = vld [vmem:[%s10728_s5 + $0x830] sm:$0xff] }
 0x324   :  { %5759 = vmatprep.subr.bf16.mxu1 %v7215_v3  ;;  %5882 = vmatprep.subr.bf16.mxu0 %v7221_v4  ;;  %v6931_v3 = vcombine.high %v2521_v61, %v2537_v62  ;;  %v6937_v4 = vcombine.high %v2524_v63, %v2540_v0  ;;  %v2729_v51 = vld [vmem:[%s10728_s5 + $0x898] sm:$0xff]  ;;  %v2732_v53 = vld [vmem:[%s10728_s5 + $0x8b0] sm:$0xff] }
 0x327   :  { %5760 = vmatpush1.bf16.msra.mxu1 %v7214_v10  ;;  %5883 = vmatpush1.bf16.msra.mxu0 %v7220_v11  ;;  %v6930_v10 = vcombine.low %v2521_v61, %v2537_v62  ;;  %v6936_v11 = vcombine.low %v2524_v63, %v2540_v0  ;;  %v2745_v61 = vld [vmem:[%s10728_s5 + $0x918] sm:$0xff]  ;;  %v2748_v63 = vld [vmem:[%s10728_s5 + $0x930] sm:$0xff] }
 0x328   :  { %5761 = vmatprep.subr.bf16.mxu1 %v7247_v13  ;;  %5884 = vmatprep.subr.bf16.mxu0 %v7253_v14  ;;  %v6963_v13 = vcombine.high %v2553_v5, %v2569_v6  ;;  %v6969_v14 = vcombine.high %v2556_v7, %v2572_v8  ;;  %v2761_v62 = vld [vmem:[%s10728_s5 + $0x998] sm:$0xff]  ;;  %v2764_v0 = vld [vmem:[%s10728_s5 + $0x9b0] sm:$0xff] }
 0x32b   :  { %5762 = vmatpush1.bf16.msra.mxu1 %v7246_v20  ;;  %5885 = vmatpush1.bf16.msra.mxu0 %v7252_v21  ;;  %v6962_v20 = vcombine.low %v2553_v5, %v2569_v6  ;;  %v6968_v21 = vcombine.low %v2556_v7, %v2572_v8  ;;  %v2777_v5 = vld [vmem:[%s10728_s5 + $0xa18] sm:$0xff]  ;;  %v2780_v7 = vld [vmem:[%s10728_s5 + $0xa30] sm:$0xff] }
 0x32c   :  { %5763 = vmatprep.subr.bf16.mxu1 %v7279_v22  ;;  %5886 = vmatprep.subr.bf16.mxu0 %v7285_v23  ;;  %v6995_v22 = vcombine.high %v2585_v15, %v2601_v16  ;;  %v7001_v23 = vcombine.high %v2588_v18, %v2604_v19  ;;  %v2793_v6 = vld [vmem:[%s10728_s5 + $0xa98] sm:$0xff]  ;;  %v2796_v8 = vld [vmem:[%s10728_s5 + $0xab0] sm:$0xff] }
 0x32f   :  { %5764 = vmatpush1.bf16.msra.mxu1 %v7278_v27  ;;  %5887 = vmatpush1.bf16.msra.mxu0 %v7284_v28  ;;  %v6994_v27 = vcombine.low %v2585_v15, %v2601_v16  ;;  %v7000_v28 = vcombine.low %v2588_v18, %v2604_v19  ;;  %v2809_v15 = vld [vmem:[%s10728_s5 + $0xb18] sm:$0xff]  ;;  %v2812_v18 = vld [vmem:[%s10728_s5 + $0xb30] sm:$0xff] }
 0x330   :  { %5765 = vmatprep.subr.bf16.mxu1 %v7311_v29  ;;  %5888 = vmatprep.subr.bf16.mxu0 %v7317_v30  ;;  %v7027_v29 = vcombine.high %v2617_v24, %v2633_v12  ;;  %v7033_v30 = vcombine.high %v2620_v26, %v2636_v9  ;;  %v2825_v16 = vld [vmem:[%s10728_s5 + $0xb98] sm:$0xff]  ;;  %v2828_v19 = vld [vmem:[%s10728_s5 + $0xbb0] sm:$0xff] }
 0x333   :  { %5766 = vmatpush1.bf16.msra.mxu1 %v7310_v35  ;;  %5889 = vmatpush1.bf16.msra.mxu0 %v7316_v17  ;;  %v7026_v35 = vcombine.low %v2617_v24, %v2633_v12  ;;  %v7032_v17 = vcombine.low %v2620_v26, %v2636_v9  ;;  %v2841_v24 = vld [vmem:[%s10728_s5 + $0xc18] sm:$0xff]  ;;  %v2844_v26 = vld [vmem:[%s10728_s5 + $0xc30] sm:$0xff] }
 0x334   :  { %5767 = vmatprep.subr.bf16.mxu1 %v7343_v37  ;;  %5890 = vmatprep.subr.bf16.mxu0 %v7349_v38  ;;  %v7059_v37 = vcombine.high %v2649_v31, %v2665_v32  ;;  %v7065_v38 = vcombine.high %v2652_v33, %v2668_v34  ;;  %v2857_v12 = vld [vmem:[%s10728_s5 + $0xc98] sm:$0xff]  ;;  %v2860_v9 = vld [vmem:[%s10728_s5 + $0xcb0] sm:$0xff] }
 0x337   :  { %5768 = vmatpush1.bf16.msra.mxu1 %v7342_v44  ;;  %5891 = vmatpush1.bf16.msra.mxu0 %v7348_v45  ;;  %v7058_v44 = vcombine.low %v2649_v31, %v2665_v32  ;;  %v7064_v45 = vcombine.low %v2652_v33, %v2668_v34  ;;  %v2873_v31 = vld [vmem:[%s10728_s5 + $0xd18] sm:$0xff]  ;;  %v2876_v33 = vld [vmem:[%s10728_s5 + $0xd30] sm:$0xff] }
 0x338   :  { %5819 = vmatprep.subr.bf16.mxu1 %v6867_v46  ;;  %5942 = vmatprep.subr.bf16.mxu0 %v6873_v48  ;;  %v7091_v46 = vcombine.high %v2681_v39, %v2697_v40  ;;  %v7097_v48 = vcombine.high %v2684_v41, %v2700_v42  ;;  %v2889_v32 = vld [vmem:[%s10728_s5 + $0xd98] sm:$0xff]  ;;  %v2892_v34 = vld [vmem:[%s10728_s5 + $0xdb0] sm:$0xff] }
 0x33a   :  { %5770 = vmatmul.mubr.bf16.vlgmr.msra.gmra.mrb[8].mxu1 %v9180_v25  ;;  %5893 = vmatmul.mubr.bf16.vlgmr.msra.gmra.mrb[12].mxu0 %v9180_v25 }
 0x33b   :  { %5820 = vmatpush1.bf16.msra.mxu1 %v6866_v54  ;;  %5851 = vmatprep.mubr.bf16.mxu1 %v9178_v36  ;;  %v7090_v54 = vcombine.low %v2681_v39, %v2697_v40  ;;  %v2905_v39 = vld [vmem:[%s10728_s5 + $0xe18] sm:$0xff] }
 0x33c   :  { %5943 = vmatpush1.bf16.msra.mxu0 %v6872_v55  ;;  %5974 = vmatprep.mubr.bf16.mxu0 %v9178_v36  ;;  %v7096_v55 = vcombine.low %v2684_v41, %v2700_v42  ;;  %v2921_v40 = vld [vmem:[%s10728_s5 + $0xe98] sm:$0xff]  ;;  %v2908_v41 = vld [vmem:[%s10728_s5 + $0xe30] sm:$0xff] }
 0x33d   :  { %5821 = vmatprep.subr.bf16.mxu1 %v6899_v57  ;;  %5944 = vmatprep.subr.bf16.mxu0 %v6905_v60  ;;  %v7123_v57 = vcombine.high %v2713_v50, %v2729_v51  ;;  %v7129_v60 = vcombine.high %v2716_v52, %v2732_v53  ;;  %v2924_v42 = vld [vmem:[%s10728_s5 + $0xeb0] sm:$0xff] }
 0x33f   :  { %5822 = vmatpush1.bf16.msra.mxu1 %v6898_v1  ;;  %v7122_v1 = vcombine.low %v2713_v50, %v2729_v51  ;;  %v2937_v50 = vld [vmem:[%s10728_s5 + $0xf18] sm:$0xff] }
 0x340   :  { %5945 = vmatpush1.bf16.msra.mxu0 %v6904_v2  ;;  %5823 = vmatprep.subr.bf16.mxu1 %v6931_v3  ;;  %v7128_v2 = vcombine.low %v2716_v52, %v2732_v53  ;;  %v7155_v3 = vcombine.high %v2745_v61, %v2761_v62  ;;  %v2953_v51 = vld [vmem:[%s10728_s5 + $0xf98] sm:$0xff]  ;;  %v2940_v52 = vld [vmem:[%s10728_s5 + $0xf30] sm:$0xff] }
 0x341   :  { %5946 = vmatprep.subr.bf16.mxu0 %v6937_v4  ;;  %v7161_v4 = vcombine.high %v2748_v63, %v2764_v0  ;;  %v2956_v53 = vld [vmem:[%s10728_s5 + $0xfb0] sm:$0xff] }
 0x343   :  { %5824 = vmatpush1.bf16.msra.mxu1 %v6930_v10  ;;  %v7154_v10 = vcombine.low %v2745_v61, %v2761_v62  ;;  %v2459_v61 = vld [vmem:[%s10728_s5 + $0x28] sm:$0xff] }
 0x344   :  { %5947 = vmatpush1.bf16.msra.mxu0 %v6936_v11  ;;  %5825 = vmatprep.subr.bf16.mxu1 %v6963_v13  ;;  %v7160_v11 = vcombine.low %v2748_v63, %v2764_v0  ;;  %v7187_v13 = vcombine.high %v2777_v5, %v2793_v6  ;;  %v2475_v62 = vld [vmem:[%s10728_s5 + $0xa8] sm:$0xff]  ;;  %v2462_v63 = vld [vmem:[%s10728_s5 + $0x40] sm:$0xff] }
 0x345   :  { %5948 = vmatprep.subr.bf16.mxu0 %v6969_v14  ;;  %v7193_v14 = vcombine.high %v2780_v7, %v2796_v8  ;;  %v2478_v0 = vld [vmem:[%s10728_s5 + $0xc0] sm:$0xff] }
 0x347   :  { %5826 = vmatpush1.bf16.msra.mxu1 %v6962_v20  ;;  %v7186_v20 = vcombine.low %v2777_v5, %v2793_v6  ;;  %v2491_v5 = vld [vmem:[%s10728_s5 + $0x128] sm:$0xff] }
 0x348   :  { %5949 = vmatpush1.bf16.msra.mxu0 %v6968_v21  ;;  %5827 = vmatprep.subr.bf16.mxu1 %v6995_v22  ;;  %v7192_v21 = vcombine.low %v2780_v7, %v2796_v8  ;;  %v7219_v22 = vcombine.high %v2809_v15, %v2825_v16  ;;  %v2507_v6 = vld [vmem:[%s10728_s5 + $0x1a8] sm:$0xff]  ;;  %v6870_v7 = vcombine.low %v2459_v61, %v2475_v62  ;;  %v2494_v8 = vld [vmem:[%s10728_s5 + $0x140] sm:$0xff] }
 0x349   :  { %5950 = vmatprep.subr.bf16.mxu0 %v7001_v23  ;;  %v7225_v23 = vcombine.high %v2812_v18, %v2828_v19 }
 0x34b   :  { %5828 = vmatpush1.bf16.msra.mxu1 %v6994_v27  ;;  %v7218_v27 = vcombine.low %v2809_v15, %v2825_v16  ;;  %v2539_v15 = vld [vmem:[%s10728_s5 + $0x2a8] sm:$0xff] }
 0x34c   :  { %5951 = vmatpush1.bf16.msra.mxu0 %v7000_v28  ;;  %5829 = vmatprep.subr.bf16.mxu1 %v7027_v29  ;;  %v7224_v28 = vcombine.low %v2812_v18, %v2828_v19  ;;  %v7251_v29 = vcombine.high %v2841_v24, %v2857_v12  ;;  %v2526_v18 = vld [vmem:[%s10728_s5 + $0x240] sm:$0xff] }
 0x34d   :  { %5952 = vmatprep.subr.bf16.mxu0 %v7033_v30  ;;  %v7257_v30 = vcombine.high %v2844_v26, %v2860_v9  ;;  %v2542_v19 = vld [vmem:[%s10728_s5 + $0x2c0] sm:$0xff] }
 0x34f   :  { %5830 = vmatpush1.bf16.msra.mxu1 %v7026_v35  ;;  %v7250_v35 = vcombine.low %v2841_v24, %v2857_v12  ;;  %v2555_v24 = vld [vmem:[%s10728_s5 + $0x328] sm:$0xff] }
 0x350   :  { %5953 = vmatpush1.bf16.msra.mxu0 %v7032_v17  ;;  %5831 = vmatprep.subr.bf16.mxu1 %v7059_v37  ;;  %v7256_v17 = vcombine.low %v2844_v26, %v2860_v9  ;;  %v7283_v37 = vcombine.high %v2873_v31, %v2889_v32  ;;  %v2571_v12 = vld [vmem:[%s10728_s5 + $0x3a8] sm:$0xff]  ;;  %v2558_v26 = vld [vmem:[%s10728_s5 + $0x340] sm:$0xff] }
 0x351   :  { %5954 = vmatprep.subr.bf16.mxu0 %v7065_v38  ;;  %v7289_v38 = vcombine.high %v2876_v33, %v2892_v34  ;;  %v2574_v9 = vld [vmem:[%s10728_s5 + $0x3c0] sm:$0xff] }
 0x353   :  { %5832 = vmatpush1.bf16.msra.mxu1 %v7058_v44  ;;  %v7282_v44 = vcombine.low %v2873_v31, %v2889_v32  ;;  %v2587_v31 = vld [vmem:[%s10728_s5 + $0x428] sm:$0xff] }
 0x354   :  { %5955 = vmatpush1.bf16.msra.mxu0 %v7064_v45  ;;  %5833 = vmatprep.subr.bf16.mxu1 %v7091_v46  ;;  %v7288_v45 = vcombine.low %v2876_v33, %v2892_v34  ;;  %v7315_v46 = vcombine.high %v2905_v39, %v2921_v40  ;;  %v2603_v32 = vld [vmem:[%s10728_s5 + $0x4a8] sm:$0xff]  ;;  %v2590_v33 = vld [vmem:[%s10728_s5 + $0x440] sm:$0xff] }
 0x355   :  { %5956 = vmatprep.subr.bf16.mxu0 %v7097_v48  ;;  %v7321_v48 = vcombine.high %v2908_v41, %v2924_v42  ;;  %v2606_v34 = vld [vmem:[%s10728_s5 + $0x4c0] sm:$0xff] }
 0x357   :  { %5834 = vmatpush1.bf16.msra.mxu1 %v7090_v54  ;;  %v7314_v54 = vcombine.low %v2905_v39, %v2921_v40  ;;  %v2619_v39 = vld [vmem:[%s10728_s5 + $0x528] sm:$0xff] }
 0x358   :  { %5957 = vmatpush1.bf16.msra.mxu0 %v7096_v55  ;;  %5835 = vmatprep.subr.bf16.mxu1 %v7123_v57  ;;  %v7320_v55 = vcombine.low %v2908_v41, %v2924_v42  ;;  %v7347_v57 = vcombine.high %v2937_v50, %v2953_v51  ;;  %v2635_v40 = vld [vmem:[%s10728_s5 + $0x5a8] sm:$0xff]  ;;  %v2622_v41 = vld [vmem:[%s10728_s5 + $0x540] sm:$0xff] }
 0x359   :  { %5958 = vmatprep.subr.bf16.mxu0 %v7129_v60  ;;  %v7353_v60 = vcombine.high %v2940_v52, %v2956_v53  ;;  %v2638_v42 = vld [vmem:[%s10728_s5 + $0x5c0] sm:$0xff] }
 0x35b   :  { %5836 = vmatpush1.bf16.msra.mxu1 %v7122_v1  ;;  %v7346_v1 = vcombine.low %v2937_v50, %v2953_v51  ;;  %v2651_v50 = vld [vmem:[%s10728_s5 + $0x628] sm:$0xff] }
 0x35c   :  { %5959 = vmatpush1.bf16.msra.mxu0 %v7128_v2  ;;  %5837 = vmatprep.subr.bf16.mxu1 %v7155_v3  ;;  %v7352_v2 = vcombine.low %v2940_v52, %v2956_v53  ;;  %v6871_v3 = vcombine.high %v2459_v61, %v2475_v62  ;;  %v2667_v51 = vld [vmem:[%s10728_s5 + $0x6a8] sm:$0xff]  ;;  %v2654_v52 = vld [vmem:[%s10728_s5 + $0x640] sm:$0xff] }
 0x35d   :  { %5960 = vmatprep.subr.bf16.mxu0 %v7161_v4  ;;  %v6877_v4 = vcombine.high %v2462_v63, %v2478_v0  ;;  %v2670_v53 = vld [vmem:[%s10728_s5 + $0x6c0] sm:$0xff]  ;;  %v2683_v61 = vld [vmem:[%s10728_s5 + $0x728] sm:$0xff] }
 0x35e   :  { %v2699_v62 = vld [vmem:[%s10728_s5 + $0x7a8] sm:$0xff] }
 0x35f   :  { %5838 = vmatpush1.bf16.msra.mxu1 %v7154_v10  ;;  %v2510_v10 = vld [vmem:[%s10728_s5 + $0x1c0] sm:$0xff] }
 0x360   :  { %5961 = vmatpush1.bf16.msra.mxu0 %v7160_v11  ;;  %5839 = vmatprep.subr.bf16.mxu1 %v7187_v13  ;;  %v6876_v11 = vcombine.low %v2462_v63, %v2478_v0  ;;  %v6903_v13 = vcombine.high %v2491_v5, %v2507_v6  ;;  %v6909_v16 = vcombine.high %v2494_v8, %v2510_v10  ;;  %v2686_v63 = vld [vmem:[%s10728_s5 + $0x740] sm:$0xff] }
 0x361   :  { %5962 = vmatprep.subr.bf16.mxu0 %v7193_v14  ;;  %v2523_v14 = vld [vmem:[%s10728_s5 + $0x228] sm:$0xff]  ;;  %v2702_v0 = vld [vmem:[%s10728_s5 + $0x7c0] sm:$0xff] }
 0x363   :  { %5840 = vmatpush1.bf16.msra.mxu1 %v7186_v20  ;;  %v6902_v20 = vcombine.low %v2491_v5, %v2507_v6  ;;  %v2715_v5 = vld [vmem:[%s10728_s5 + $0x828] sm:$0xff] }
 0x364   :  { %5963 = vmatpush1.bf16.msra.mxu0 %v7192_v21  ;;  %5841 = vmatprep.subr.bf16.mxu1 %v7219_v22  ;;  %v6908_v21 = vcombine.low %v2494_v8, %v2510_v10  ;;  %v6935_v22 = vcombine.high %v2523_v14, %v2539_v15  ;;  %v2731_v6 = vld [vmem:[%s10728_s5 + $0x8a8] sm:$0xff]  ;;  %v2734_v8 = vld [vmem:[%s10728_s5 + $0x8c0] sm:$0xff]  ;;  %v7094_v10 = vcombine.low %v2683_v61, %v2699_v62 }
 0x365   :  { %5964 = vmatprep.subr.bf16.mxu0 %v7225_v23  ;;  %v6941_v23 = vcombine.high %v2526_v18, %v2542_v19 }
 0x367   :  { %5842 = vmatpush1.bf16.msra.mxu1 %v7218_v27  ;;  %v6934_v27 = vcombine.low %v2523_v14, %v2539_v15  ;;  %v2747_v15 = vld [vmem:[%s10728_s5 + $0x928] sm:$0xff] }
 0x368   :  { %5965 = vmatpush1.bf16.msra.mxu0 %v7224_v28  ;;  %5843 = vmatprep.subr.bf16.mxu1 %v7251_v29  ;;  %v6940_v28 = vcombine.low %v2526_v18, %v2542_v19  ;;  %v6967_v29 = vcombine.high %v2555_v24, %v2571_v12  ;;  %v2750_v18 = vld [vmem:[%s10728_s5 + $0x940] sm:$0xff] }
 0x369   :  { %5966 = vmatprep.subr.bf16.mxu0 %v7257_v30  ;;  %v6973_v30 = vcombine.high %v2558_v26, %v2574_v9  ;;  %v2766_v19 = vld [vmem:[%s10728_s5 + $0x9c0] sm:$0xff] }
 0x36b   :  { %5844 = vmatpush1.bf16.msra.mxu1 %v7250_v35  ;;  %v6966_v35 = vcombine.low %v2555_v24, %v2571_v12  ;;  %v2779_v24 = vld [vmem:[%s10728_s5 + $0xa28] sm:$0xff] }
 0x36c   :  { %5967 = vmatpush1.bf16.msra.mxu0 %v7256_v17  ;;  %5845 = vmatprep.subr.bf16.mxu1 %v7283_v37  ;;  %v6972_v17 = vcombine.low %v2558_v26, %v2574_v9  ;;  %v6999_v37 = vcombine.high %v2587_v31, %v2603_v32  ;;  %v2795_v12 = vld [vmem:[%s10728_s5 + $0xaa8] sm:$0xff]  ;;  %v2782_v26 = vld [vmem:[%s10728_s5 + $0xa40] sm:$0xff] }
 0x36d   :  { %5968 = vmatprep.subr.bf16.mxu0 %v7289_v38  ;;  %v7005_v38 = vcombine.high %v2590_v33, %v2606_v34  ;;  %v2798_v9 = vld [vmem:[%s10728_s5 + $0xac0] sm:$0xff] }
 0x36f   :  { %5846 = vmatpush1.bf16.msra.mxu1 %v7282_v44  ;;  %v6998_v44 = vcombine.low %v2587_v31, %v2603_v32  ;;  %v2811_v31 = vld [vmem:[%s10728_s5 + $0xb28] sm:$0xff] }
 0x370   :  { %5969 = vmatpush1.bf16.msra.mxu0 %v7288_v45  ;;  %5847 = vmatprep.subr.bf16.mxu1 %v7315_v46  ;;  %v7004_v45 = vcombine.low %v2590_v33, %v2606_v34  ;;  %v7031_v46 = vcombine.high %v2619_v39, %v2635_v40  ;;  %v2827_v32 = vld [vmem:[%s10728_s5 + $0xba8] sm:$0xff]  ;;  %v2814_v33 = vld [vmem:[%s10728_s5 + $0xb40] sm:$0xff] }
 0x371   :  { %5970 = vmatprep.subr.bf16.mxu0 %v7321_v48  ;;  %v7037_v48 = vcombine.high %v2622_v41, %v2638_v42  ;;  %v2830_v34 = vld [vmem:[%s10728_s5 + $0xbc0] sm:$0xff] }
 0x373   :  { %5848 = vmatpush1.bf16.msra.mxu1 %v7314_v54  ;;  %v7030_v54 = vcombine.low %v2619_v39, %v2635_v40  ;;  %v2843_v39 = vld [vmem:[%s10728_s5 + $0xc28] sm:$0xff] }
 0x374   :  { %5971 = vmatpush1.bf16.msra.mxu0 %v7320_v55  ;;  %5849 = vmatprep.subr.bf16.mxu1 %v7347_v57  ;;  %v7036_v55 = vcombine.low %v2622_v41, %v2638_v42  ;;  %v7063_v57 = vcombine.high %v2651_v50, %v2667_v51  ;;  %v2859_v40 = vld [vmem:[%s10728_s5 + $0xca8] sm:$0xff]  ;;  %v2846_v41 = vld [vmem:[%s10728_s5 + $0xc40] sm:$0xff] }
 0x375   :  { %5972 = vmatprep.subr.bf16.mxu0 %v7353_v60  ;;  %v7069_v60 = vcombine.high %v2654_v52, %v2670_v53  ;;  %v2862_v42 = vld [vmem:[%s10728_s5 + $0xcc0] sm:$0xff] }
 0x377   :  { %5850 = vmatpush1.bf16.msra.mxu1 %v7346_v1  ;;  %v7062_v1 = vcombine.low %v2651_v50, %v2667_v51  ;;  %v2875_v50 = vld [vmem:[%s10728_s5 + $0xd28] sm:$0xff] }
 0x378   :  { %5973 = vmatpush1.bf16.msra.mxu0 %v7352_v2  ;;  %5901 = vmatprep.subr.bf16.mxu1 %v6871_v3  ;;  %v7068_v2 = vcombine.low %v2654_v52, %v2670_v53  ;;  %v7095_v3 = vcombine.high %v2683_v61, %v2699_v62  ;;  %v2891_v51 = vld [vmem:[%s10728_s5 + $0xda8] sm:$0xff]  ;;  %v2878_v52 = vld [vmem:[%s10728_s5 + $0xd40] sm:$0xff] }
 0x379   :  { %6024 = vmatprep.subr.bf16.mxu0 %v6877_v4  ;;  %v7101_v4 = vcombine.high %v2686_v63, %v2702_v0  ;;  %v2894_v53 = vld [vmem:[%s10728_s5 + $0xdc0] sm:$0xff]  ;;  %v2907_v61 = vld [vmem:[%s10728_s5 + $0xe28] sm:$0xff] }
 0x37a   :  { %5852 = vmatmul.mubr.bf16.vlgmr.msra.gmra.mrb[12].mxu1 %v9180_v25  ;;  %v2923_v62 = vld [vmem:[%s10728_s5 + $0xea8] sm:$0xff] }
 0x37b   :  { %5975 = vmatmul.mubr.bf16.vlgmr.msra.gmra.mrb[16].mxu0 %v9180_v25  ;;  %5902 = vmatpush1.bf16.msra.mxu1 %v6870_v7  ;;  %v2718_v7 = vld [vmem:[%s10728_s5 + $0x840] sm:$0xff] }
 0x37c   :  { %5933 = vmatprep.mubr.bf16.mxu1 %v9178_v36  ;;  %6025 = vmatpush1.bf16.msra.mxu0 %v6876_v11  ;;  %v7100_v11 = vcombine.low %v2686_v63, %v2702_v0  ;;  %v7133_v14 = vcombine.high %v2718_v7, %v2734_v8  ;;  %v2910_v63 = vld [vmem:[%s10728_s5 + $0xe40] sm:$0xff] }
 0x37d   :  { %6056 = vmatprep.mubr.bf16.mxu0 %v9178_v36  ;;  %5903 = vmatprep.subr.bf16.mxu1 %v6903_v13  ;;  %v7127_v13 = vcombine.high %v2715_v5, %v2731_v6  ;;  %v2926_v0 = vld [vmem:[%s10728_s5 + $0xec0] sm:$0xff] }
 0x37e   :  { %6026 = vmatprep.subr.bf16.mxu0 %v6909_v16  ;;  %v2763_v16 = vld [vmem:[%s10728_s5 + $0x9a8] sm:$0xff] }
 0x37f   :  { %5904 = vmatpush1.bf16.msra.mxu1 %v6902_v20  ;;  %v7126_v20 = vcombine.low %v2715_v5, %v2731_v6  ;;  %v2939_v5 = vld [vmem:[%s10728_s5 + $0xf28] sm:$0xff] }
 0x380   :  { %6027 = vmatpush1.bf16.msra.mxu0 %v6908_v21  ;;  %5905 = vmatprep.subr.bf16.mxu1 %v6935_v22  ;;  %v7132_v21 = vcombine.low %v2718_v7, %v2734_v8  ;;  %v7159_v22 = vcombine.high %v2747_v15, %v2763_v16  ;;  %v2955_v6 = vld [vmem:[%s10728_s5 + $0xfa8] sm:$0xff]  ;;  %v2942_v7 = vld [vmem:[%s10728_s5 + $0xf40] sm:$0xff] }
 0x381   :  { %6028 = vmatprep.subr.bf16.mxu0 %v6941_v23  ;;  %v7165_v23 = vcombine.high %v2750_v18, %v2766_v19  ;;  %v2958_v8 = vld [vmem:[%s10728_s5 + $0xfc0] sm:$0xff] }
 0x383   :  { %5906 = vmatpush1.bf16.msra.mxu1 %v6934_v27  ;;  %v7158_v27 = vcombine.low %v2747_v15, %v2763_v16  ;;  %v2461_v15 = vld [vmem:[%s10728_s5 + $0x38] sm:$0xff] }
 0x384   :  { %6029 = vmatpush1.bf16.msra.mxu0 %v6940_v28  ;;  %5907 = vmatprep.subr.bf16.mxu1 %v6967_v29  ;;  %v7164_v28 = vcombine.low %v2750_v18, %v2766_v19  ;;  %v7191_v29 = vcombine.high %v2779_v24, %v2795_v12  ;;  %v2477_v16 = vld [vmem:[%s10728_s5 + $0xb8] sm:$0xff]  ;;  %v2464_v18 = vld [vmem:[%s10728_s5 + $0x50] sm:$0xff] }
 0x385   :  { %6030 = vmatprep.subr.bf16.mxu0 %v6973_v30  ;;  %v7197_v30 = vcombine.high %v2782_v26, %v2798_v9  ;;  %v2480_v19 = vld [vmem:[%s10728_s5 + $0xd0] sm:$0xff] }
 0x387   :  { %5908 = vmatpush1.bf16.msra.mxu1 %v6966_v35  ;;  %v7190_v35 = vcombine.low %v2779_v24, %v2795_v12  ;;  %v2493_v24 = vld [vmem:[%s10728_s5 + $0x138] sm:$0xff] }
 0x388   :  { %6031 = vmatpush1.bf16.msra.mxu0 %v6972_v17  ;;  %5909 = vmatprep.subr.bf16.mxu1 %v6999_v37  ;;  %v7196_v17 = vcombine.low %v2782_v26, %v2798_v9  ;;  %v7223_v37 = vcombine.high %v2811_v31, %v2827_v32  ;;  %v2509_v12 = vld [vmem:[%s10728_s5 + $0x1b8] sm:$0xff]  ;;  %v6874_v26 = vcombine.low %v2461_v15, %v2477_v16  ;;  %v2496_v9 = vld [vmem:[%s10728_s5 + $0x150] sm:$0xff] }
 0x389   :  { %6032 = vmatprep.subr.bf16.mxu0 %v7005_v38  ;;  %v7229_v38 = vcombine.high %v2814_v33, %v2830_v34 }
 0x38b   :  { %5910 = vmatpush1.bf16.msra.mxu1 %v6998_v44  ;;  %v7222_v44 = vcombine.low %v2811_v31, %v2827_v32  ;;  %v2541_v31 = vld [vmem:[%s10728_s5 + $0x2b8] sm:$0xff] }
 0x38c   :  { %6033 = vmatpush1.bf16.msra.mxu0 %v7004_v45  ;;  %5911 = vmatprep.subr.bf16.mxu1 %v7031_v46  ;;  %v7228_v45 = vcombine.low %v2814_v33, %v2830_v34  ;;  %v7255_v46 = vcombine.high %v2843_v39, %v2859_v40  ;;  %v2528_v33 = vld [vmem:[%s10728_s5 + $0x250] sm:$0xff] }
 0x38d   :  { %6034 = vmatprep.subr.bf16.mxu0 %v7037_v48  ;;  %v7261_v48 = vcombine.high %v2846_v41, %v2862_v42  ;;  %v2544_v34 = vld [vmem:[%s10728_s5 + $0x2d0] sm:$0xff] }
 0x38f   :  { %5912 = vmatpush1.bf16.msra.mxu1 %v7030_v54  ;;  %v7254_v54 = vcombine.low %v2843_v39, %v2859_v40  ;;  %v2557_v39 = vld [vmem:[%s10728_s5 + $0x338] sm:$0xff] }
 0x390   :  { %6035 = vmatpush1.bf16.msra.mxu0 %v7036_v55  ;;  %5913 = vmatprep.subr.bf16.mxu1 %v7063_v57  ;;  %v7260_v55 = vcombine.low %v2846_v41, %v2862_v42  ;;  %v7287_v57 = vcombine.high %v2875_v50, %v2891_v51  ;;  %v2573_v40 = vld [vmem:[%s10728_s5 + $0x3b8] sm:$0xff]  ;;  %v2560_v41 = vld [vmem:[%s10728_s5 + $0x350] sm:$0xff] }
 0x391   :  { %6036 = vmatprep.subr.bf16.mxu0 %v7069_v60  ;;  %v7293_v60 = vcombine.high %v2878_v52, %v2894_v53  ;;  %v2576_v42 = vld [vmem:[%s10728_s5 + $0x3d0] sm:$0xff] }
 0x393   :  { %5914 = vmatpush1.bf16.msra.mxu1 %v7062_v1  ;;  %v7286_v1 = vcombine.low %v2875_v50, %v2891_v51  ;;  %v2589_v50 = vld [vmem:[%s10728_s5 + $0x438] sm:$0xff] }
 0x394   :  { %6037 = vmatpush1.bf16.msra.mxu0 %v7068_v2  ;;  %5915 = vmatprep.subr.bf16.mxu1 %v7095_v3  ;;  %v7292_v2 = vcombine.low %v2878_v52, %v2894_v53  ;;  %v7319_v3 = vcombine.high %v2907_v61, %v2923_v62  ;;  %v2605_v51 = vld [vmem:[%s10728_s5 + $0x4b8] sm:$0xff]  ;;  %v2592_v52 = vld [vmem:[%s10728_s5 + $0x450] sm:$0xff] }
 0x395   :  { %6038 = vmatprep.subr.bf16.mxu0 %v7101_v4  ;;  %v7325_v4 = vcombine.high %v2910_v63, %v2926_v0  ;;  %v2608_v53 = vld [vmem:[%s10728_s5 + $0x4d0] sm:$0xff] }
 0x397   :  { %5916 = vmatpush1.bf16.msra.mxu1 %v7094_v10  ;;  %v7318_v10 = vcombine.low %v2907_v61, %v2923_v62  ;;  %v2621_v61 = vld [vmem:[%s10728_s5 + $0x538] sm:$0xff] }
 0x398   :  { %6039 = vmatpush1.bf16.msra.mxu0 %v7100_v11  ;;  %5917 = vmatprep.subr.bf16.mxu1 %v7127_v13  ;;  %v7324_v11 = vcombine.low %v2910_v63, %v2926_v0  ;;  %v7351_v13 = vcombine.high %v2939_v5, %v2955_v6  ;;  %v2637_v62 = vld [vmem:[%s10728_s5 + $0x5b8] sm:$0xff]  ;;  %v9819_v63 = vsub.s32 4, %v8048_v43  ;;  %v2624_v0 = vld [vmem:[%s10728_s5 + $0x550] sm:$0xff] }
 0x399   :  { %6040 = vmatprep.subr.bf16.mxu0 %v7133_v14  ;;  %v7357_v14 = vcombine.high %v2942_v7, %v2958_v8 }
 0x39b   :  { %5918 = vmatpush1.bf16.msra.mxu1 %v7126_v20  ;;  %v7350_v20 = vcombine.low %v2939_v5, %v2955_v6  ;;  %v7008_v5 = vcombine.low %v2592_v52, %v2608_v53  ;;  %v7035_v6 = vcombine.high %v2621_v61, %v2637_v62 }
 0x39c   :  { %6041 = vmatpush1.bf16.msra.mxu0 %v7132_v21  ;;  %5919 = vmatprep.subr.bf16.mxu1 %v7159_v22  ;;  %v7356_v21 = vcombine.low %v2942_v7, %v2958_v8  ;;  %v6875_v22 = vcombine.high %v2461_v15, %v2477_v16  ;;  %v2653_v8 = vld [vmem:[%s10728_s5 + $0x638] sm:$0xff]  ;;  %v2672_v15 = vld [vmem:[%s10728_s5 + $0x6d0] sm:$0xff]  ;;  %v7034_v16 = vcombine.low %v2621_v61, %v2637_v62 }
 0x39d   :  { %6042 = vmatprep.subr.bf16.mxu0 %v7165_v23  ;;  %v6881_v23 = vcombine.high %v2464_v18, %v2480_v19  ;;  %v2768_v61 = vld [vmem:[%s10728_s5 + $0x9d0] sm:$0xff] }
 0x39f   :  { %5920 = vmatpush1.bf16.msra.mxu1 %v7158_v27  ;;  %v2512_v27 = vld [vmem:[%s10728_s5 + $0x1d0] sm:$0xff] }
 0x3a0   :  { %6043 = vmatpush1.bf16.msra.mxu0 %v7164_v28  ;;  %5921 = vmatprep.subr.bf16.mxu1 %v7191_v29  ;;  %v6880_v28 = vcombine.low %v2464_v18, %v2480_v19  ;;  %v6907_v29 = vcombine.high %v2493_v24, %v2509_v12  ;;  %v6913_v32 = vcombine.high %v2496_v9, %v2512_v27 }
 0x3a1   :  { %6044 = vmatprep.subr.bf16.mxu0 %v7197_v30  ;;  %v2525_v30 = vld [vmem:[%s10728_s5 + $0x238] sm:$0xff] }
 0x3a3   :  { %5922 = vmatpush1.bf16.msra.mxu1 %v7190_v35  ;;  %v6906_v35 = vcombine.low %v2493_v24, %v2509_v12  ;;  %v2685_v12 = vld [vmem:[%s10728_s5 + $0x738] sm:$0xff] }
 0x3a4   :  { %6045 = vmatpush1.bf16.msra.mxu0 %v7196_v17  ;;  %5923 = vmatprep.subr.bf16.mxu1 %v7223_v37  ;;  %v6912_v17 = vcombine.low %v2496_v9, %v2512_v27  ;;  %v6939_v37 = vcombine.high %v2525_v30, %v2541_v31 }
 0x3a5   :  { %6046 = vmatprep.subr.bf16.mxu0 %v7229_v38  ;;  %v6945_v38 = vcombine.high %v2528_v33, %v2544_v34 }
 0x3a7   :  { %5924 = vmatpush1.bf16.msra.mxu1 %v7222_v44  ;;  %v6938_v44 = vcombine.low %v2525_v30, %v2541_v31  ;;  %v2688_v30 = vld [vmem:[%s10728_s5 + $0x750] sm:$0xff] }
 0x3a8   :  { %6047 = vmatpush1.bf16.msra.mxu0 %v7228_v45  ;;  %5925 = vmatprep.subr.bf16.mxu1 %v7255_v46  ;;  %v6944_v45 = vcombine.low %v2528_v33, %v2544_v34  ;;  %v6971_v46 = vcombine.high %v2557_v39, %v2573_v40  ;;  %v2704_v31 = vld [vmem:[%s10728_s5 + $0x7d0] sm:$0xff] }
 0x3a9   :  { %6048 = vmatprep.subr.bf16.mxu0 %v7261_v48  ;;  %v6977_v48 = vcombine.high %v2560_v41, %v2576_v42 }
 0x3ab   :  { %5926 = vmatpush1.bf16.msra.mxu1 %v7254_v54  ;;  %v6970_v54 = vcombine.low %v2557_v39, %v2573_v40 }
 0x3ac   :  { %6049 = vmatpush1.bf16.msra.mxu0 %v7260_v55  ;;  %5927 = vmatprep.subr.bf16.mxu1 %v7287_v57  ;;  %v6976_v55 = vcombine.low %v2560_v41, %v2576_v42  ;;  %v7003_v57 = vcombine.high %v2589_v50, %v2605_v51 }
 0x3ad   :  { %6050 = vmatprep.subr.bf16.mxu0 %v7293_v60  ;;  %v7009_v60 = vcombine.high %v2592_v52, %v2608_v53  ;;  %v7104_v52 = vcombine.low %v2688_v30, %v2704_v31 }
 0x3af   :  { %5928 = vmatpush1.bf16.msra.mxu1 %v7286_v1  ;;  %v2640_v1 = vld [vmem:[%s10728_s5 + $0x5d0] sm:$0xff] }
 0x3b0   :  { %6051 = vmatpush1.bf16.msra.mxu0 %v7292_v2  ;;  %5929 = vmatprep.subr.bf16.mxu1 %v7319_v3  ;;  %v7002_v2 = vcombine.low %v2589_v50, %v2605_v51  ;;  %v9830_v3 = vld [vmem:[%s10731_s6] sm:$0xff]  ;;  %v7041_v7 = vcombine.high %v2624_v0, %v2640_v1  ;;  %v2736_v50 = vld [vmem:[%s10728_s5 + $0x8d0] sm:$0xff] }
 0x3b1   :  { %6052 = vmatprep.subr.bf16.mxu0 %v7325_v4  ;;  %v9833_v4 = vsub.s32 5, %v8048_v43  ;;  %v2983_v18 = vrot.slane %v9830_v3, %v8923_v58 }
 0x3b3   :  { %5930 = vmatpush1.bf16.msra.mxu1 %v7318_v10  ;;  %v2669_v10 = vld [vmem:[%s10728_s5 + $0x6b8] sm:$0xff]  ;;  %v2999_v19 = vrot.slane %v9830_v3, %v9833_v4 }
 0x3b4   :  { %6053 = vmatpush1.bf16.msra.mxu0 %v7324_v11  ;;  %5931 = vmatprep.subr.bf16.mxu1 %v7351_v13  ;;  %v2979_v11 = vrot.slane %v9830_v3, %v8915_v56  ;;  %v2995_v13 = vrot.slane %v9830_v3, %v9819_v63 }
 0x3b5   :  { %6054 = vmatprep.subr.bf16.mxu0 %v7357_v14  ;;  %v2656_v14 = vld [vmem:[%s10728_s5 + $0x650] sm:$0xff] }
 0x3b6   :  { %v7073_v24 = vcombine.high %v2656_v14, %v2672_v15  ;;  %v7072_v39 = vcombine.low %v2656_v14, %v2672_v15  ;;  %v2813_v15 = vld [vmem:[%s10728_s5 + $0xb38] sm:$0xff] }
 0x3b7   :  { %5932 = vmatpush1.bf16.msra.mxu1 %v7350_v20  ;;  %v7040_v20 = vcombine.low %v2624_v0, %v2640_v1 }
 0x3b8   :  { %6055 = vmatpush1.bf16.msra.mxu0 %v7356_v21  ;;  %5983 = vmatprep.subr.bf16.mxu1 %v6875_v22  ;;  %v7067_v21 = vcombine.high %v2653_v8, %v2669_v10 }
 0x3b9   :  { %6106 = vmatprep.subr.bf16.mxu0 %v6881_v23 }
 0x3ba   :  { %5934 = vmatmul.mubr.bf16.vlgmr.msra.gmra.mrb[16].mxu1 %v9180_v25 }
 0x3bb   :  { %6057 = vmatmul.mubr.bf16.vlgmr.msra.gmra.mrb[20].mxu0 %v9180_v25  ;;  %5984 = vmatpush1.bf16.msra.mxu1 %v6874_v26  ;;  %v2701_v26 = vld [vmem:[%s10728_s5 + $0x7b8] sm:$0xff] }
 0x3bc   :  { %6015 = vmatprep.mubr.bf16.mxu1 %v9178_v36  ;;  %6107 = vmatpush1.bf16.msra.mxu0 %v6880_v28  ;;  %v7099_v40 = vcombine.high %v2685_v12, %v2701_v26  ;;  %v7098_v51 = vcombine.low %v2685_v12, %v2701_v26  ;;  %v2861_v12 = vld [vmem:[%s10728_s5 + $0xcb8] sm:$0xff]  ;;  %v2848_v26 = vld [vmem:[%s10728_s5 + $0xc50] sm:$0xff] }
 0x3bd   :  { %6138 = vmatprep.mubr.bf16.mxu0 %v9178_v36  ;;  %5985 = vmatprep.subr.bf16.mxu1 %v6907_v29 }
 0x3be   :  { %6108 = vmatprep.subr.bf16.mxu0 %v6913_v32 }
 0x3bf   :  { %5986 = vmatpush1.bf16.msra.mxu1 %v6906_v35 }
 0x3c0   :  { %6109 = vmatpush1.bf16.msra.mxu0 %v6912_v17  ;;  %5987 = vmatprep.subr.bf16.mxu1 %v6939_v37  ;;  %v7066_v17 = vcombine.low %v2653_v8, %v2669_v10  ;;  %v2800_v8 = vld [vmem:[%s10728_s5 + $0xad0] sm:$0xff] }
 0x3c1   :  { %6110 = vmatprep.subr.bf16.mxu0 %v6945_v38 }
 0x3c3   :  { %5988 = vmatpush1.bf16.msra.mxu1 %v6938_v44  ;;  %v7105_v44 = vcombine.high %v2688_v30, %v2704_v31 }
 0x3c4   :  { %6111 = vmatpush1.bf16.msra.mxu0 %v6944_v45  ;;  %5989 = vmatprep.subr.bf16.mxu1 %v6971_v46  ;;  %v2717_v45 = vld [vmem:[%s10728_s5 + $0x838] sm:$0xff] }
 0x3c5   :  { %6112 = vmatprep.subr.bf16.mxu0 %v6977_v48  ;;  %v2733_v46 = vld [vmem:[%s10728_s5 + $0x8b8] sm:$0xff]  ;;  %v2720_v48 = vld [vmem:[%s10728_s5 + $0x850] sm:$0xff] }
 0x3c6   :  { %v7131_v53 = vcombine.high %v2717_v45, %v2733_v46  ;;  %v7130_v62 = vcombine.low %v2717_v45, %v2733_v46  ;;  %v7136_v0 = vcombine.low %v2720_v48, %v2736_v50  ;;  %v2909_v46 = vld [vmem:[%s10728_s5 + $0xe38] sm:$0xff] }
 0x3c7   :  { %5990 = vmatpush1.bf16.msra.mxu1 %v6970_v54  ;;  %v7137_v54 = vcombine.high %v2720_v48, %v2736_v50  ;;  %v2925_v48 = vld [vmem:[%s10728_s5 + $0xeb8] sm:$0xff]  ;;  %v2912_v50 = vld [vmem:[%s10728_s5 + $0xe50] sm:$0xff] }
 0x3c8   :  { %6113 = vmatpush1.bf16.msra.mxu0 %v6976_v55  ;;  %5991 = vmatprep.subr.bf16.mxu1 %v7003_v57  ;;  %v2749_v55 = vld [vmem:[%s10728_s5 + $0x938] sm:$0xff] }
 0x3c9   :  { %6114 = vmatprep.subr.bf16.mxu0 %v7009_v60  ;;  %v2765_v57 = vld [vmem:[%s10728_s5 + $0x9b8] sm:$0xff]  ;;  %v2752_v60 = vld [vmem:[%s10728_s5 + $0x950] sm:$0xff] }
 0x3ca   :  { %v7163_v1 = vcombine.high %v2749_v55, %v2765_v57  ;;  %v7162_v10 = vcombine.low %v2749_v55, %v2765_v57  ;;  %v2941_v57 = vld [vmem:[%s10728_s5 + $0xf38] sm:$0xff] }
 0x3cb   :  { %5992 = vmatpush1.bf16.msra.mxu1 %v7002_v2  ;;  %v7169_v2 = vcombine.high %v2752_v60, %v2768_v61 }
 0x3cc   :  { %6115 = vmatpush1.bf16.msra.mxu0 %v7008_v5  ;;  %5993 = vmatprep.subr.bf16.mxu1 %v7035_v6  ;;  %v2781_v5 = vld [vmem:[%s10728_s5 + $0xa38] sm:$0xff] }
 0x3cd   :  { %v5730_v22 = vpop.f32.mrb[4].mxu1  ;;  %v5812_v23 = vpop.f32.mrb[8].mxu0  ;;  %6116 = vmatprep.subr.bf16.mxu0 %v7041_v7  ;;  %v2797_v6 = vld [vmem:[%s10728_s5 + $0xab8] sm:$0xff]  ;;  %v2784_v7 = vld [vmem:[%s10728_s5 + $0xa50] sm:$0xff] }
 0x3ce   :  { %v9861_v9 = vadd.f32 %v5730_v22, %v2979_v11  ;;  %v9863_v27 = vadd.f32 %v5812_v23, %v2995_v13  ;;  %v5732_v28 = vpop.f32.mrb[5].mxu1  ;;  %v5814_v29 = vpop.f32.mrb[9].mxu0  ;;  %v7168_v11 = vcombine.low %v2752_v60, %v2768_v61  ;;  %v7195_v13 = vcombine.high %v2781_v5, %v2797_v6  ;;  %v2957_v60 = vld [vmem:[%s10728_s5 + $0xfb8] sm:$0xff]  ;;  %v2944_v61 = vld [vmem:[%s10728_s5 + $0xf50] sm:$0xff] }
 0x3cf   :  { %v9871_v32 = vadd.f32 %v5732_v28, %v2983_v18  ;;  %v9873_v33 = vadd.f32 %v5814_v29, %v2999_v19  ;;  %5994 = vmatpush1.bf16.msra.mxu1 %v7034_v16  ;;  %v5734_v34 = vpop.f32.mrb[6].mxu1  ;;  %v5816_v35 = vpop.f32.mrb[10].mxu0  ;;  %v7201_v14 = vcombine.high %v2784_v7, %v2800_v8  ;;  %v2829_v16 = vld [vmem:[%s10728_s5 + $0xbb8] sm:$0xff]  ;;  %v2816_v18 = vld [vmem:[%s10728_s5 + $0xb50] sm:$0xff] }
 0x3d0   :  { %6117 = vmatpush1.bf16.msra.mxu0 %v7040_v20  ;;  %v5735_v37 = vpop.f32.mrb[7].mxu1  ;;  %v5817_v38 = vpop.f32.mrb[11].mxu0  ;;  %5995 = vmatprep.subr.bf16.mxu1 %v7067_v21  ;;  %v2832_v19 = vld [vmem:[%s10728_s5 + $0xbd0] sm:$0xff]  ;;  %v7194_v20 = vcombine.low %v2781_v5, %v2797_v6  ;;  %v7200_v21 = vcombine.low %v2784_v7, %v2800_v8  ;;  %v7227_v22 = vcombine.high %v2813_v15, %v2829_v16  ;;  %v2877_v35 = vld [vmem:[%s10728_s5 + $0xd38] sm:$0xff]  ;;  %v2463_v6 = vld [vmem:[%s10728_s5 + $0x48] sm:$0xff] }
 0x3d1   :  { %v6384_v41 = vcombine.low %v9861_v9, %v9871_v32  ;;  %v6401_v42 = vcombine.low %v9863_v27, %v9873_v33  ;;  %6118 = vmatprep.subr.bf16.mxu0 %v7073_v24  ;;  %v7233_v23 = vcombine.high %v2816_v18, %v2832_v19  ;;  %v2845_v24 = vld [vmem:[%s10728_s5 + $0xc38] sm:$0xff]  ;;  %v2864_v28 = vld [vmem:[%s10728_s5 + $0xcd0] sm:$0xff]  ;;  %v7226_v29 = vcombine.low %v2813_v15, %v2829_v16  ;;  %v2479_v7 = vld [vmem:[%s10728_s5 + $0xc8] sm:$0xff] }
 0x3d2   :  { %v7232_v30 = vcombine.low %v2816_v18, %v2832_v19  ;;  %v7259_v31 = vcombine.high %v2845_v24, %v2861_v12  ;;  %v7265_v34 = vcombine.high %v2848_v26, %v2864_v28  ;;  %v2880_v37 = vld [vmem:[%s10728_s5 + $0xd50] sm:$0xff]  ;;  %v2466_v8 = vld [vmem:[%s10728_s5 + $0x60] sm:$0xff]  ;;  %v2495_v16 = vld [vmem:[%s10728_s5 + $0x148] sm:$0xff]  ;;  %v6878_v19 = vcombine.low %v2463_v6, %v2479_v7 }
 0x3d3   :  { %5996 = vmatpush1.bf16.msra.mxu1 %v7066_v17  ;;  %v2893_v17 = vld [vmem:[%s10728_s5 + $0xdb8] sm:$0xff]  ;;  %v2896_v38 = vld [vmem:[%s10728_s5 + $0xdd0] sm:$0xff]  ;;  %v2511_v18 = vld [vmem:[%s10728_s5 + $0x1c8] sm:$0xff] }
 0x3d4   :  { %6119 = vmatpush1.bf16.msra.mxu0 %v7072_v39  ;;  %5997 = vmatprep.subr.bf16.mxu1 %v7099_v40  ;;  %v7258_v39 = vcombine.low %v2845_v24, %v2861_v12  ;;  %v7264_v40 = vcombine.low %v2848_v26, %v2864_v28  ;;  %v7297_v45 = vcombine.high %v2880_v37, %v2896_v38  ;;  %v2527_v24 = vld [vmem:[%s10728_s5 + $0x248] sm:$0xff]  ;;  %v2530_v28 = vld [vmem:[%s10728_s5 + $0x260] sm:$0xff]  ;;  %v2769_v27 = vld [vmem:[%s10728_s5 + $0x9d8] sm:$0xff] }
 0x3d5   :  { %6120 = vmatprep.subr.bf16.mxu0 %v7105_v44  ;;  %v7291_v44 = vcombine.high %v2877_v35, %v2893_v17  ;;  %v2543_v12 = vld [vmem:[%s10728_s5 + $0x2c8] sm:$0xff]  ;;  %v2754_v32 = vld [vmem:[%s10728_s5 + $0x960] sm:$0xff]  ;;  %v2756_v33 = vld [vmem:[%s10728_s5 + $0x970] sm:$0xff] }
 0x3d6   :  { %v2767_v9 = vld [vmem:[%s10728_s5 + $0x9c8] sm:$0xff] }
 0x3d7   :  { %5998 = vmatpush1.bf16.msra.mxu1 %v7098_v51  ;;  %v2928_v51 = vld [vmem:[%s10728_s5 + $0xed0] sm:$0xff] }
 0x3d8   :  { %6121 = vmatpush1.bf16.msra.mxu0 %v7104_v52  ;;  %5999 = vmatprep.subr.bf16.mxu1 %v7131_v53  ;;  %v7290_v52 = vcombine.low %v2877_v35, %v2893_v17  ;;  %v7296_v53 = vcombine.low %v2880_v37, %v2896_v38  ;;  %v7329_v55 = vcombine.high %v2912_v50, %v2928_v51  ;;  %v2559_v17 = vld [vmem:[%s10728_s5 + $0x348] sm:$0xff]  ;;  %v2562_v38 = vld [vmem:[%s10728_s5 + $0x360] sm:$0xff] }
 0x3d9   :  { %6122 = vmatprep.subr.bf16.mxu0 %v7137_v54  ;;  %v7323_v54 = vcombine.high %v2909_v46, %v2925_v48  ;;  %v2575_v37 = vld [vmem:[%s10728_s5 + $0x3c8] sm:$0xff] }
 0x3db   :  { %6000 = vmatpush1.bf16.msra.mxu1 %v7130_v62  ;;  %v2960_v62 = vld [vmem:[%s10728_s5 + $0xfd0] sm:$0xff] }
 0x3dc   :  { %6123 = vmatpush1.bf16.msra.mxu0 %v7136_v0  ;;  %6001 = vmatprep.subr.bf16.mxu1 %v7163_v1  ;;  %v7322_v0 = vcombine.low %v2909_v46, %v2925_v48  ;;  %v7328_v1 = vcombine.low %v2912_v50, %v2928_v51  ;;  %v7361_v5 = vcombine.high %v2944_v61, %v2960_v62  ;;  %v2591_v48 = vld [vmem:[%s10728_s5 + $0x448] sm:$0xff]  ;;  %v2594_v51 = vld [vmem:[%s10728_s5 + $0x460] sm:$0xff] }
 0x3dd   :  { %6124 = vmatprep.subr.bf16.mxu0 %v7169_v2  ;;  %v7355_v2 = vcombine.high %v2941_v57, %v2957_v60  ;;  %v2607_v50 = vld [vmem:[%s10728_s5 + $0x4c8] sm:$0xff] }
 0x3df   :  { %6002 = vmatpush1.bf16.msra.mxu1 %v7162_v10  ;;  %v2482_v10 = vld [vmem:[%s10728_s5 + $0xe0] sm:$0xff] }
 0x3e0   :  { %6125 = vmatpush1.bf16.msra.mxu0 %v7168_v11  ;;  %6003 = vmatprep.subr.bf16.mxu1 %v7195_v13  ;;  %v7354_v11 = vcombine.low %v2941_v57, %v2957_v60  ;;  %v7360_v13 = vcombine.low %v2944_v61, %v2960_v62  ;;  %v6885_v15 = vcombine.high %v2466_v8, %v2482_v10  ;;  %v2623_v60 = vld [vmem:[%s10728_s5 + $0x548] sm:$0xff]  ;;  %v2626_v62 = vld [vmem:[%s10728_s5 + $0x560] sm:$0xff] }
 0x3e1   :  { %6126 = vmatprep.subr.bf16.mxu0 %v7201_v14  ;;  %v6879_v14 = vcombine.high %v2463_v6, %v2479_v7  ;;  %v2639_v61 = vld [vmem:[%s10728_s5 + $0x5c8] sm:$0xff] }
 0x3e2   :  { %v7039_v6 = vcombine.high %v2623_v60, %v2639_v61 }
 0x3e3   :  { %6004 = vmatpush1.bf16.msra.mxu1 %v7194_v20  ;;  %v2498_v20 = vld [vmem:[%s10728_s5 + $0x160] sm:$0xff] }
 0x3e4   :  { %6127 = vmatpush1.bf16.msra.mxu0 %v7200_v21  ;;  %6005 = vmatprep.subr.bf16.mxu1 %v7227_v22  ;;  %v2514_v21 = vld [vmem:[%s10728_s5 + $0x1e0] sm:$0xff]  ;;  %v6884_v22 = vcombine.low %v2466_v8, %v2482_v10  ;;  %v2655_v8 = vld [vmem:[%s10728_s5 + $0x648] sm:$0xff] }
 0x3e5   :  { %6128 = vmatprep.subr.bf16.mxu0 %v7233_v23  ;;  %v6911_v23 = vcombine.high %v2495_v16, %v2511_v18  ;;  %v6917_v26 = vcombine.high %v2498_v20, %v2514_v21  ;;  %v2671_v10 = vld [vmem:[%s10728_s5 + $0x6c8] sm:$0xff] }
 0x3e7   :  { %6006 = vmatpush1.bf16.msra.mxu1 %v7226_v29  ;;  %v2546_v29 = vld [vmem:[%s10728_s5 + $0x2e0] sm:$0xff] }
 0x3e8   :  { %6129 = vmatpush1.bf16.msra.mxu0 %v7232_v30  ;;  %6007 = vmatprep.subr.bf16.mxu1 %v7259_v31  ;;  %v6910_v30 = vcombine.low %v2495_v16, %v2511_v18  ;;  %v6916_v31 = vcombine.low %v2498_v20, %v2514_v21  ;;  %v6949_v35 = vcombine.high %v2530_v28, %v2546_v29 }
 0x3e9   :  { %6130 = vmatprep.subr.bf16.mxu0 %v7265_v34  ;;  %v6943_v34 = vcombine.high %v2527_v24, %v2543_v12  ;;  %v2991_v16 = vrot.slane %v9830_v3, %v8926_v59  ;;  %v7071_v21 = vcombine.high %v2655_v8, %v2671_v10 }
 0x3eb   :  { %6008 = vmatpush1.bf16.msra.mxu1 %v7258_v39  ;;  %v2578_v39 = vld [vmem:[%s10728_s5 + $0x3e0] sm:$0xff] }
 0x3ec   :  { %6131 = vmatpush1.bf16.msra.mxu0 %v7264_v40  ;;  %6009 = vmatprep.subr.bf16.mxu1 %v7291_v44  ;;  %v6942_v40 = vcombine.low %v2527_v24, %v2543_v12  ;;  %v6948_v44 = vcombine.low %v2530_v28, %v2546_v29  ;;  %v6981_v46 = vcombine.high %v2562_v38, %v2578_v39  ;;  %v2687_v12 = vld [vmem:[%s10728_s5 + $0x748] sm:$0xff] }
 0x3ed   :  { %6132 = vmatprep.subr.bf16.mxu0 %v7297_v45  ;;  %v6975_v45 = vcombine.high %v2559_v17, %v2575_v37 }
 0x3ef   :  { %6010 = vmatpush1.bf16.msra.mxu1 %v7290_v52  ;;  %v2610_v52 = vld [vmem:[%s10728_s5 + $0x4e0] sm:$0xff] }
 0x3f0   :  { %6133 = vmatpush1.bf16.msra.mxu0 %v7296_v53  ;;  %6011 = vmatprep.subr.bf16.mxu1 %v7323_v54  ;;  %v6974_v53 = vcombine.low %v2559_v17, %v2575_v37  ;;  %v6980_v54 = vcombine.low %v2562_v38, %v2578_v39  ;;  %v7013_v57 = vcombine.high %v2594_v51, %v2610_v52 }
 0x3f1   :  { %6134 = vmatprep.subr.bf16.mxu0 %v7329_v55  ;;  %v7007_v55 = vcombine.high %v2591_v48, %v2607_v50 }
 0x3f3   :  { %6012 = vmatpush1.bf16.msra.mxu1 %v7322_v0  ;;  %v2642_v0 = vld [vmem:[%s10728_s5 + $0x5e0] sm:$0xff] }
 0x3f4   :  { %6135 = vmatpush1.bf16.msra.mxu0 %v7328_v1  ;;  %6013 = vmatprep.subr.bf16.mxu1 %v7355_v2  ;;  %v7006_v1 = vcombine.low %v2591_v48, %v2607_v50  ;;  %v10054_v2 = vld [vmem:[%s10731_s6 + $0x8] sm:$0xff]  ;;  %v7045_v7 = vcombine.high %v2626_v62, %v2642_v0  ;;  %v7044_v20 = vcombine.low %v2626_v62, %v2642_v0 }
 0x3f5   :  { %6136 = vmatprep.subr.bf16.mxu0 %v7361_v5  ;;  %v7012_v5 = vcombine.low %v2594_v51, %v2610_v52  ;;  %v3015_v18 = vrot.slane %v10054_v2, %v8923_v58 }
 0x3f7   :  { %6014 = vmatpush1.bf16.msra.mxu1 %v7354_v11  ;;  %v2987_v11 = vrot.slane %v9830_v3, %v9018_v47 }
 0x3f8   :  { %6137 = vmatpush1.bf16.msra.mxu0 %v7360_v13  ;;  %6065 = vmatprep.subr.bf16.mxu1 %v6879_v14  ;;  %v3011_v13 = vrot.slane %v10054_v2, %v8915_v56  ;;  %v2658_v14 = vld [vmem:[%s10728_s5 + $0x660] sm:$0xff] }
 0x3f9   :  { %6188 = vmatprep.subr.bf16.mxu0 %v6885_v15  ;;  %v2674_v15 = vld [vmem:[%s10728_s5 + $0x6e0] sm:$0xff] }
 0x3fa   :  { %6016 = vmatmul.mubr.bf16.vlgmr.msra.gmra.mrb[20].mxu1 %v9180_v25  ;;  %v7077_v24 = vcombine.high %v2658_v14, %v2674_v15 }
 0x3fb   :  { %6139 = vmatmul.mubr.bf16.vlgmr.msra.gmra.mrb[24].mxu0 %v9180_v25  ;;  %6066 = vmatpush1.bf16.msra.mxu1 %v6878_v19  ;;  %v7038_v19 = vcombine.low %v2623_v60, %v2639_v61  ;;  %v6392_v60 = vrot.slane %v6384_v41, %v8066_v49  ;;  %v2770_v41 = vld [vmem:[%s10728_s5 + $0x9e0] sm:$0xff] }
 0x3fc   :  { %6097 = vmatprep.mubr.bf16.mxu1 %v9178_v36  ;;  %6189 = vmatpush1.bf16.msra.mxu0 %v6884_v22 }
 0x3fd   :  { %6220 = vmatprep.mubr.bf16.mxu0 %v9178_v36  ;;  %6067 = vmatprep.subr.bf16.mxu1 %v6911_v23 }
 0x3fe   :  { %6190 = vmatprep.subr.bf16.mxu0 %v6917_v26  ;;  %v2703_v26 = vld [vmem:[%s10728_s5 + $0x7c8] sm:$0xff] }
 0x3ff   :  { %6068 = vmatpush1.bf16.msra.mxu1 %v6910_v30  ;;  %v7103_v48 = vcombine.high %v2687_v12, %v2703_v26  ;;  %v7102_v62 = vcombine.low %v2687_v12, %v2703_v26  ;;  %v2818_v12 = vld [vmem:[%s10728_s5 + $0xb60] sm:$0xff] }
 0x400   :  { %6191 = vmatpush1.bf16.msra.mxu0 %v6916_v31  ;;  %6069 = vmatprep.subr.bf16.mxu1 %v6943_v34  ;;  %v2690_v34 = vld [vmem:[%s10728_s5 + $0x760] sm:$0xff] }
 0x401   :  { %6192 = vmatprep.subr.bf16.mxu0 %v6949_v35  ;;  %v2706_v35 = vld [vmem:[%s10728_s5 + $0x7e0] sm:$0xff] }
 0x402   :  { %v7109_v52 = vcombine.high %v2690_v34, %v2706_v35  ;;  %v7108_v0 = vcombine.low %v2690_v34, %v2706_v35  ;;  %v2834_v26 = vld [vmem:[%s10728_s5 + $0xbe0] sm:$0xff]  ;;  %v2847_v35 = vld [vmem:[%s10728_s5 + $0xc48] sm:$0xff] }
 0x403   :  { %6070 = vmatpush1.bf16.msra.mxu1 %v6942_v40  ;;  %v7070_v40 = vcombine.low %v2655_v8, %v2671_v10  ;;  %v7237_v34 = vcombine.high %v2818_v12, %v2834_v26 }
 0x404   :  { %6193 = vmatpush1.bf16.msra.mxu0 %v6948_v44  ;;  %6071 = vmatprep.subr.bf16.mxu1 %v6975_v45 }
 0x405   :  { %6194 = vmatprep.subr.bf16.mxu0 %v6981_v46  ;;  %v7076_v46 = vcombine.low %v2658_v14, %v2674_v15  ;;  %v2783_v14 = vld [vmem:[%s10728_s5 + $0xa48] sm:$0xff] }
 0x406   :  { %v2799_v15 = vld [vmem:[%s10728_s5 + $0xac8] sm:$0xff] }
 0x407   :  { %6072 = vmatpush1.bf16.msra.mxu1 %v6974_v53  ;;  %v2719_v53 = vld [vmem:[%s10728_s5 + $0x848] sm:$0xff] }
 0x408   :  { %6195 = vmatpush1.bf16.msra.mxu0 %v6980_v54  ;;  %6073 = vmatprep.subr.bf16.mxu1 %v7007_v55  ;;  %v2735_v54 = vld [vmem:[%s10728_s5 + $0x8c8] sm:$0xff]  ;;  %v2722_v55 = vld [vmem:[%s10728_s5 + $0x860] sm:$0xff] }
 0x409   :  { %6196 = vmatprep.subr.bf16.mxu0 %v7013_v57  ;;  %v2738_v57 = vld [vmem:[%s10728_s5 + $0x8e0] sm:$0xff]  ;;  %v7134_v8 = vcombine.low %v2719_v53, %v2735_v54 }
 0x40a   :  { %v7140_v10 = vcombine.low %v2722_v55, %v2738_v57 }
 0x40b   :  { %6074 = vmatpush1.bf16.msra.mxu1 %v7006_v1  ;;  %v7135_v1 = vcombine.high %v2719_v53, %v2735_v54  ;;  %v2898_v53 = vld [vmem:[%s10728_s5 + $0xde0] sm:$0xff] }
 0x40c   :  { %6197 = vmatpush1.bf16.msra.mxu0 %v7012_v5  ;;  %6075 = vmatprep.subr.bf16.mxu1 %v7039_v6  ;;  %v7141_v6 = vcombine.high %v2722_v55, %v2738_v57 }
 0x40d   :  { %v5771_v22 = vpop.f32.mrb[8].mxu1  ;;  %v5894_v23 = vpop.f32.mrb[12].mxu0  ;;  %6198 = vmatprep.subr.bf16.mxu0 %v7045_v7  ;;  %v2751_v7 = vld [vmem:[%s10728_s5 + $0x948] sm:$0xff] }
 0x40e   :  { %v5772_v28 = vadd.f32 %v5771_v22, %v2987_v11  ;;  %v10082_v29 = vadd.f32 %v5894_v23, %v3011_v13  ;;  %v5773_v30 = vpop.f32.mrb[9].mxu1  ;;  %v5896_v31 = vpop.f32.mrb[13].mxu0  ;;  %v7167_v11 = vcombine.high %v2751_v7, %v2767_v9  ;;  %v7173_v13 = vcombine.high %v2754_v32, %v2770_v41  ;;  %v2815_v23 = vld [vmem:[%s10728_s5 + $0xb48] sm:$0xff] }
 0x40f   :  { %v5774_v17 = vadd.f32 %v5773_v30, %v2991_v16  ;;  %v10090_v37 = vadd.f32 %v5896_v31, %v3015_v18  ;;  %v5775_v38 = vpop.f32.mrb[10].mxu1  ;;  %v5898_v39 = vpop.f32.mrb[14].mxu0  ;;  %6076 = vmatpush1.bf16.msra.mxu1 %v7038_v19  ;;  %v2786_v16 = vld [vmem:[%s10728_s5 + $0xa60] sm:$0xff]  ;;  %v7166_v19 = vcombine.low %v2751_v7, %v2767_v9 }
 0x410   :  { %6199 = vmatpush1.bf16.msra.mxu0 %v7044_v20  ;;  %v5776_v44 = vpop.f32.mrb[11].mxu1  ;;  %v5899_v45 = vpop.f32.mrb[15].mxu0  ;;  %6077 = vmatprep.subr.bf16.mxu1 %v7071_v21  ;;  %v2802_v18 = vld [vmem:[%s10728_s5 + $0xae0] sm:$0xff]  ;;  %v7172_v20 = vcombine.low %v2754_v32, %v2770_v41  ;;  %v7199_v21 = vcombine.high %v2783_v14, %v2799_v15  ;;  %v2943_v32 = vld [vmem:[%s10728_s5 + $0xf48] sm:$0xff] }
 0x411   :  { %v6385_v50 = vcombine.low %v5772_v28, %v5774_v17  ;;  %v6418_v51 = vcombine.low %v10082_v29, %v10090_v37  ;;  %6200 = vmatprep.subr.bf16.mxu0 %v7077_v24  ;;  %v7205_v22 = vcombine.high %v2786_v16, %v2802_v18  ;;  %v2831_v24 = vld [vmem:[%s10728_s5 + $0xbc8] sm:$0xff]  ;;  %v7198_v28 = vcombine.low %v2783_v14, %v2799_v15  ;;  %v2850_v38 = vld [vmem:[%s10728_s5 + $0xc60] sm:$0xff] }
 0x412   :  { %v7204_v30 = vcombine.low %v2786_v16, %v2802_v18  ;;  %v7231_v31 = vcombine.high %v2815_v23, %v2831_v24  ;;  %v2863_v17 = vld [vmem:[%s10728_s5 + $0xcc8] sm:$0xff]  ;;  %v2866_v39 = vld [vmem:[%s10728_s5 + $0xce0] sm:$0xff]  ;;  %v7236_v44 = vcombine.low %v2818_v12, %v2834_v26  ;;  %v2465_v16 = vld [vmem:[%s10728_s5 + $0x58] sm:$0xff] }
 0x413   :  { %v6399_v61 = vrot.slane %v6385_v50, %v8066_v49  ;;  %6078 = vmatpush1.bf16.msra.mxu1 %v7070_v40  ;;  %v7230_v40 = vcombine.low %v2815_v23, %v2831_v24  ;;  %v7263_v45 = vcombine.high %v2847_v35, %v2863_v17  ;;  %v2895_v50 = vld [vmem:[%s10728_s5 + $0xdc8] sm:$0xff]  ;;  %v7262_v54 = vcombine.low %v2847_v35, %v2863_v17  ;;  %v2481_v18 = vld [vmem:[%s10728_s5 + $0xd8] sm:$0xff] }
 0x414   :  { %6201 = vmatpush1.bf16.msra.mxu0 %v7076_v46  ;;  %6079 = vmatprep.subr.bf16.mxu1 %v7103_v48  ;;  %v7269_v46 = vcombine.high %v2850_v38, %v2866_v39  ;;  %v2879_v48 = vld [vmem:[%s10728_s5 + $0xd48] sm:$0xff]  ;;  %v7268_v55 = vcombine.low %v2850_v38, %v2866_v39  ;;  %v6883_v23 = vcombine.high %v2465_v16, %v2481_v18  ;;  %v2497_v12 = vld [vmem:[%s10728_s5 + $0x158] sm:$0xff] }
 0x415   :  { %v6400_v5 = vcombine.low %v6392_v60, %v6399_v61  ;;  %6202 = vmatprep.subr.bf16.mxu0 %v7109_v52  ;;  %v2882_v52 = vld [vmem:[%s10728_s5 + $0xd60] sm:$0xff]  ;;  %v7295_v57 = vcombine.high %v2879_v48, %v2895_v50  ;;  %v2911_v61 = vld [vmem:[%s10728_s5 + $0xe48] sm:$0xff]  ;;  %v2513_v26 = vld [vmem:[%s10728_s5 + $0x1d8] sm:$0xff] }
 0x416   :  { %v7301_v60 = vcombine.high %v2882_v52, %v2898_v53  ;;  %v2959_v41 = vld [vmem:[%s10728_s5 + $0xfc8] sm:$0xff]  ;;  %v6915_v35 = vcombine.high %v2497_v12, %v2513_v26  ;;  %v2529_v17 = vld [vmem:[%s10728_s5 + $0x258] sm:$0xff] }
 0x417   :  { %6528 = vst [vmem:[%s10732_s7] sm:$0xff] %v6400_v5  ;;  %6080 = vmatpush1.bf16.msra.mxu1 %v7102_v62  ;;  %v2927_v62 = vld [vmem:[%s10728_s5 + $0xec8] sm:$0xff]  ;;  %v7294_v5 = vcombine.low %v2879_v48, %v2895_v50  ;;  %v7359_v14 = vcombine.high %v2943_v32, %v2959_v41  ;;  %v2545_v38 = vld [vmem:[%s10728_s5 + $0x2d8] sm:$0xff] }
 0x418   :  { %6203 = vmatpush1.bf16.msra.mxu0 %v7108_v0  ;;  %6081 = vmatprep.subr.bf16.mxu1 %v7135_v1  ;;  %v2914_v0 = vld [vmem:[%s10728_s5 + $0xe60] sm:$0xff]  ;;  %v7327_v7 = vcombine.high %v2911_v61, %v2927_v62  ;;  %v6947_v48 = vcombine.high %v2529_v17, %v2545_v38 }
 0x419   :  { %6204 = vmatprep.subr.bf16.mxu0 %v7141_v6  ;;  %v2930_v1 = vld [vmem:[%s10728_s5 + $0xee0] sm:$0xff]  ;;  %v7300_v6 = vcombine.low %v2882_v52, %v2898_v53  ;;  %v2561_v52 = vld [vmem:[%s10728_s5 + $0x358] sm:$0xff] }
 0x41a   :  { %v7333_v9 = vcombine.high %v2914_v0, %v2930_v1  ;;  %v2577_v53 = vld [vmem:[%s10728_s5 + $0x3d8] sm:$0xff] }
 0x41b   :  { %6082 = vmatpush1.bf16.msra.mxu1 %v7134_v8  ;;  %v2946_v8 = vld [vmem:[%s10728_s5 + $0xf60] sm:$0xff] }
 0x41c   :  { %6205 = vmatpush1.bf16.msra.mxu0 %v7140_v10  ;;  %6083 = vmatprep.subr.bf16.mxu1 %v7167_v11  ;;  %v2962_v10 = vld [vmem:[%s10728_s5 + $0xfe0] sm:$0xff]  ;;  %v7326_v11 = vcombine.low %v2911_v61, %v2927_v62  ;;  %v6979_v61 = vcombine.high %v2561_v52, %v2577_v53 }
 0x41d   :  { %6206 = vmatprep.subr.bf16.mxu0 %v7173_v13  ;;  %v7332_v13 = vcombine.low %v2914_v0, %v2930_v1  ;;  %v7365_v15 = vcombine.high %v2946_v8, %v2962_v10  ;;  %v2593_v0 = vld [vmem:[%s10728_s5 + $0x458] sm:$0xff] }
 0x41e   :  { %v2609_v1 = vld [vmem:[%s10728_s5 + $0x4d8] sm:$0xff] }
 0x41f   :  { %6084 = vmatpush1.bf16.msra.mxu1 %v7166_v19  ;;  %v2468_v19 = vld [vmem:[%s10728_s5 + $0x70] sm:$0xff] }
 0x420   :  { %6207 = vmatpush1.bf16.msra.mxu0 %v7172_v20  ;;  %6085 = vmatprep.subr.bf16.mxu1 %v7199_v21  ;;  %v2484_v20 = vld [vmem:[%s10728_s5 + $0xf0] sm:$0xff]  ;;  %v7358_v21 = vcombine.low %v2943_v32, %v2959_v41  ;;  %v7011_v32 = vcombine.high %v2593_v0, %v2609_v1 }
 0x421   :  { %6208 = vmatprep.subr.bf16.mxu0 %v7205_v22  ;;  %v7364_v22 = vcombine.low %v2946_v8, %v2962_v10  ;;  %v6889_v24 = vcombine.high %v2468_v19, %v2484_v20  ;;  %v2625_v8 = vld [vmem:[%s10728_s5 + $0x558] sm:$0xff] }
 0x422   :  { %v2641_v10 = vld [vmem:[%s10728_s5 + $0x5d8] sm:$0xff] }
 0x423   :  { %6086 = vmatpush1.bf16.msra.mxu1 %v7198_v28  ;;  %v6882_v28 = vcombine.low %v2465_v16, %v2481_v18  ;;  %v10278_v16 = vsub.s32 7, %v8048_v43 }
 0x424   :  { %6209 = vmatpush1.bf16.msra.mxu0 %v7204_v30  ;;  %6087 = vmatprep.subr.bf16.mxu1 %v7231_v31  ;;  %v2500_v30 = vld [vmem:[%s10728_s5 + $0x170] sm:$0xff] }
 0x425   :  { %6210 = vmatprep.subr.bf16.mxu0 %v7237_v34  ;;  %v2516_v31 = vld [vmem:[%s10728_s5 + $0x1f0] sm:$0xff]  ;;  %v6888_v34 = vcombine.low %v2468_v19, %v2484_v20  ;;  %v7043_v19 = vcombine.high %v2625_v8, %v2641_v10 }
 0x426   :  { %v6921_v39 = vcombine.high %v2500_v30, %v2516_v31 }
 0x427   :  { %6088 = vmatpush1.bf16.msra.mxu1 %v7230_v40  ;;  %v2532_v40 = vld [vmem:[%s10728_s5 + $0x270] sm:$0xff] }
 0x428   :  { %6211 = vmatpush1.bf16.msra.mxu0 %v7236_v44  ;;  %6089 = vmatprep.subr.bf16.mxu1 %v7263_v45  ;;  %v2548_v44 = vld [vmem:[%s10728_s5 + $0x2f0] sm:$0xff]  ;;  %v6914_v45 = vcombine.low %v2497_v12, %v2513_v26  ;;  %v3027_v12 = vrot.slane %v10054_v2, %v9819_v63  ;;  %v3007_v26 = vrot.slane %v9830_v3, %v10278_v16 }
 0x429   :  { %6212 = vmatprep.subr.bf16.mxu0 %v7269_v46  ;;  %v6920_v46 = vcombine.low %v2500_v30, %v2516_v31  ;;  %v6953_v50 = vcombine.high %v2532_v40, %v2548_v44  ;;  %v3031_v30 = vrot.slane %v10054_v2, %v9833_v4 }
 0x42b   :  { %6090 = vmatpush1.bf16.msra.mxu1 %v7262_v54  ;;  %v2564_v54 = vld [vmem:[%s10728_s5 + $0x370] sm:$0xff] }
 0x42c   :  { %6213 = vmatpush1.bf16.msra.mxu0 %v7268_v55  ;;  %6091 = vmatprep.subr.bf16.mxu1 %v7295_v57  ;;  %v2580_v55 = vld [vmem:[%s10728_s5 + $0x3f0] sm:$0xff]  ;;  %v6946_v57 = vcombine.low %v2529_v17, %v2545_v38  ;;  %v2689_v38 = vld [vmem:[%s10728_s5 + $0x758] sm:$0xff] }
 0x42d   :  { %6214 = vmatprep.subr.bf16.mxu0 %v7301_v60  ;;  %v6952_v60 = vcombine.low %v2532_v40, %v2548_v44  ;;  %v6985_v62 = vcombine.high %v2564_v54, %v2580_v55 }
 0x42f   :  { %6092 = vmatpush1.bf16.msra.mxu1 %v7294_v5  ;;  %v2596_v5 = vld [vmem:[%s10728_s5 + $0x470] sm:$0xff] }
 0x430   :  { %6215 = vmatpush1.bf16.msra.mxu0 %v7300_v6  ;;  %6093 = vmatprep.subr.bf16.mxu1 %v7327_v7  ;;  %v2612_v6 = vld [vmem:[%s10728_s5 + $0x4f0] sm:$0xff]  ;;  %v6978_v7 = vcombine.low %v2561_v52, %v2577_v53 }
 0x431   :  { %6216 = vmatprep.subr.bf16.mxu0 %v7333_v9  ;;  %v6984_v9 = vcombine.low %v2564_v54, %v2580_v55  ;;  %v7017_v41 = vcombine.high %v2596_v5, %v2612_v6  ;;  %v7016_v18 = vcombine.low %v2596_v5, %v2612_v6  ;;  %v2721_v6 = vld [vmem:[%s10728_s5 + $0x858] sm:$0xff] }
 0x433   :  { %6094 = vmatpush1.bf16.msra.mxu1 %v7326_v11  ;;  %v10269_v11 = vsub.s32 6, %v8048_v43  ;;  %v2660_v43 = vld [vmem:[%s10728_s5 + $0x670] sm:$0xff] }
 0x434   :  { %6217 = vmatpush1.bf16.msra.mxu0 %v7332_v13  ;;  %6095 = vmatprep.subr.bf16.mxu1 %v7359_v14  ;;  %v2628_v13 = vld [vmem:[%s10728_s5 + $0x570] sm:$0xff] }
 0x435   :  { %6218 = vmatprep.subr.bf16.mxu0 %v7365_v15  ;;  %v2644_v14 = vld [vmem:[%s10728_s5 + $0x5f0] sm:$0xff]  ;;  %v7010_v15 = vcombine.low %v2593_v0, %v2609_v1 }
 0x436   :  { %v7049_v20 = vcombine.high %v2628_v13, %v2644_v14  ;;  %v7048_v31 = vcombine.low %v2628_v13, %v2644_v14 }
 0x437   :  { %6096 = vmatpush1.bf16.msra.mxu1 %v7358_v21  ;;  %v2657_v21 = vld [vmem:[%s10728_s5 + $0x658] sm:$0xff] }
 0x438   :  { %6219 = vmatpush1.bf16.msra.mxu0 %v7364_v22  ;;  %6147 = vmatprep.subr.bf16.mxu1 %v6883_v23  ;;  %v2673_v22 = vld [vmem:[%s10728_s5 + $0x6d8] sm:$0xff]  ;;  %v3003_v23 = vrot.slane %v9830_v3, %v10269_v11 }
 0x439   :  { %6270 = vmatprep.subr.bf16.mxu0 %v6889_v24  ;;  %v2676_v24 = vld [vmem:[%s10728_s5 + $0x6f0] sm:$0xff]  ;;  %v7074_v54 = vcombine.low %v2657_v21, %v2673_v22 }
 0x43a   :  { %6098 = vmatmul.mubr.bf16.vlgmr.msra.gmra.mrb[24].mxu1 %v9180_v25  ;;  %v7081_v17 = vcombine.high %v2660_v43, %v2676_v24 }
 0x43b   :  { %6221 = vmatmul.mubr.bf16.vlgmr.msra.gmra.mrb[28].mxu0 %v9180_v25  ;;  %6148 = vmatpush1.bf16.msra.mxu1 %v6882_v28  ;;  %v7042_v28 = vcombine.low %v2625_v8, %v2641_v10  ;;  %v6409_v8 = vrot.slane %v6401_v42, %v8066_v49  ;;  %v2772_v42 = vld [vmem:[%s10728_s5 + $0x9f0] sm:$0xff] }
 0x43c   :  { %6179 = vmatprep.mubr.bf16.mxu1 %v9178_v36  ;;  %6271 = vmatpush1.bf16.msra.mxu0 %v6888_v34  ;;  %v7075_v34 = vcombine.high %v2657_v21, %v2673_v22 }
 0x43d   :  { %6302 = vmatprep.mubr.bf16.mxu0 %v9178_v36  ;;  %6149 = vmatprep.subr.bf16.mxu1 %v6915_v35 }
 0x43e   :  { %6272 = vmatprep.subr.bf16.mxu0 %v6921_v39  ;;  %v2705_v39 = vld [vmem:[%s10728_s5 + $0x7d8] sm:$0xff] }
 0x43f   :  { %6150 = vmatpush1.bf16.msra.mxu1 %v6914_v45  ;;  %v2692_v45 = vld [vmem:[%s10728_s5 + $0x770] sm:$0xff]  ;;  %v7106_v13 = vcombine.low %v2689_v38, %v2705_v39 }
 0x440   :  { %6273 = vmatpush1.bf16.msra.mxu0 %v6920_v46  ;;  %6151 = vmatprep.subr.bf16.mxu1 %v6947_v48  ;;  %v2708_v46 = vld [vmem:[%s10728_s5 + $0x7f0] sm:$0xff] }
 0x441   :  { %6274 = vmatprep.subr.bf16.mxu0 %v6953_v50  ;;  %v7113_v5 = vcombine.high %v2692_v45, %v2708_v46  ;;  %v7112_v14 = vcombine.low %v2692_v45, %v2708_v46 }
 0x443   :  { %6152 = vmatpush1.bf16.msra.mxu1 %v6946_v57 }
 0x444   :  { %6275 = vmatpush1.bf16.msra.mxu0 %v6952_v60  ;;  %6153 = vmatprep.subr.bf16.mxu1 %v6979_v61  ;;  %v7080_v61 = vcombine.low %v2660_v43, %v2676_v24  ;;  %v7177_v43 = vcombine.high %v2756_v33, %v2772_v42  ;;  %v2785_v24 = vld [vmem:[%s10728_s5 + $0xa58] sm:$0xff] }
 0x445   :  { %6276 = vmatprep.subr.bf16.mxu0 %v6985_v62  ;;  %v7107_v62 = vcombine.high %v2689_v38, %v2705_v39  ;;  %v2833_v38 = vld [vmem:[%s10728_s5 + $0xbd8] sm:$0xff]  ;;  %v2820_v39 = vld [vmem:[%s10728_s5 + $0xb70] sm:$0xff] }
 0x447   :  { %6154 = vmatpush1.bf16.msra.mxu1 %v6978_v7  ;;  %v2737_v7 = vld [vmem:[%s10728_s5 + $0x8d8] sm:$0xff] }
 0x448   :  { %6277 = vmatpush1.bf16.msra.mxu0 %v6984_v9  ;;  %6155 = vmatprep.subr.bf16.mxu1 %v7011_v32  ;;  %v2724_v32 = vld [vmem:[%s10728_s5 + $0x870] sm:$0xff]  ;;  %v7138_v21 = vcombine.low %v2721_v6, %v2737_v7 }
 0x449   :  { %6278 = vmatprep.subr.bf16.mxu0 %v7017_v41  ;;  %v2740_v41 = vld [vmem:[%s10728_s5 + $0x8f0] sm:$0xff] }
 0x44a   :  { %v7144_v22 = vcombine.low %v2724_v32, %v2740_v41 }
 0x44b   :  { %6156 = vmatpush1.bf16.msra.mxu1 %v7010_v15  ;;  %v7139_v15 = vcombine.high %v2721_v6, %v2737_v7  ;;  %v2900_v6 = vld [vmem:[%s10728_s5 + $0xdf0] sm:$0xff] }
 0x44c   :  { %6279 = vmatpush1.bf16.msra.mxu0 %v7016_v18  ;;  %6157 = vmatprep.subr.bf16.mxu1 %v7043_v19  ;;  %v7145_v19 = vcombine.high %v2724_v32, %v2740_v41 }
 0x44d   :  { %v5853_v35 = vpop.f32.mrb[12].mxu1  ;;  %6280 = vmatprep.subr.bf16.mxu0 %v7049_v20  ;;  %v2753_v20 = vld [vmem:[%s10728_s5 + $0x958] sm:$0xff] }
 0x44e   :  { %v5854_v3 = vadd.f32 %v5853_v35, %v3003_v23  ;;  %v5976_v40 = vpop.f32.mrb[16].mxu0  ;;  %v5855_v44 = vpop.f32.mrb[13].mxu1  ;;  %v7171_v23 = vcombine.high %v2753_v20, %v2769_v27 }
 0x44f   :  { %v10312_v48 = vadd.f32 %v5976_v40, %v3027_v12  ;;  %v5856_v50 = vadd.f32 %v5855_v44, %v3007_v26  ;;  %v5978_v52 = vpop.f32.mrb[17].mxu0  ;;  %v5857_v53 = vpop.f32.mrb[14].mxu1  ;;  %6158 = vmatpush1.bf16.msra.mxu1 %v7042_v28  ;;  %v2801_v12 = vld [vmem:[%s10728_s5 + $0xad8] sm:$0xff]  ;;  %v2788_v26 = vld [vmem:[%s10728_s5 + $0xa70] sm:$0xff] }
 0x450   :  { %v10314_v55 = vadd.f32 %v5978_v52, %v3031_v30  ;;  %v5980_v57 = vpop.f32.mrb[18].mxu0  ;;  %6281 = vmatpush1.bf16.msra.mxu0 %v7048_v31  ;;  %v5858_v60 = vpop.f32.mrb[15].mxu1  ;;  %6159 = vmatprep.subr.bf16.mxu1 %v7075_v34  ;;  %v2804_v28 = vld [vmem:[%s10728_s5 + $0xaf0] sm:$0xff]  ;;  %v7170_v30 = vcombine.low %v2753_v20, %v2769_v27  ;;  %v7176_v31 = vcombine.low %v2756_v33, %v2772_v42  ;;  %v2865_v52 = vld [vmem:[%s10728_s5 + $0xcd8] sm:$0xff] }
 0x451   :  { %v6402_v0 = vcombine.low %v5854_v3, %v5856_v50  ;;  %v5981_v1 = vpop.f32.mrb[19].mxu0  ;;  %6282 = vmatprep.subr.bf16.mxu0 %v7081_v17  ;;  %v7203_v34 = vcombine.high %v2785_v24, %v2801_v12  ;;  %v7209_v35 = vcombine.high %v2788_v26, %v2804_v28  ;;  %v2817_v17 = vld [vmem:[%s10728_s5 + $0xb58] sm:$0xff]  ;;  %v2836_v3 = vld [vmem:[%s10728_s5 + $0xbf0] sm:$0xff]  ;;  %v7202_v40 = vcombine.low %v2785_v24, %v2801_v12 }
 0x452   :  { %v6435_v9 = vcombine.low %v10312_v48, %v10314_v55  ;;  %v7208_v44 = vcombine.low %v2788_v26, %v2804_v28  ;;  %v7235_v45 = vcombine.high %v2817_v17, %v2833_v38  ;;  %v7241_v46 = vcombine.high %v2820_v39, %v2836_v3  ;;  %v2849_v50 = vld [vmem:[%s10728_s5 + $0xc58] sm:$0xff]  ;;  %v2852_v53 = vld [vmem:[%s10728_s5 + $0xc70] sm:$0xff]  ;;  %v2467_v26 = vld [vmem:[%s10728_s5 + $0x68] sm:$0xff] }
 0x453   :  { %v6416_v10 = vrot.slane %v6402_v0, %v8066_v49  ;;  %6160 = vmatpush1.bf16.msra.mxu1 %v7074_v54  ;;  %v2868_v54 = vld [vmem:[%s10728_s5 + $0xcf0] sm:$0xff]  ;;  %v7234_v57 = vcombine.low %v2817_v17, %v2833_v38  ;;  %v7240_v60 = vcombine.low %v2820_v39, %v2836_v3  ;;  %v2881_v0 = vld [vmem:[%s10728_s5 + $0xd58] sm:$0xff]  ;;  %v7266_v7 = vcombine.low %v2849_v50, %v2865_v52  ;;  %v2483_v28 = vld [vmem:[%s10728_s5 + $0xe8] sm:$0xff] }
 0x454   :  { %6283 = vmatpush1.bf16.msra.mxu0 %v7080_v61  ;;  %6161 = vmatprep.subr.bf16.mxu1 %v7107_v62  ;;  %v7267_v61 = vcombine.high %v2849_v50, %v2865_v52  ;;  %v7273_v62 = vcombine.high %v2852_v53, %v2868_v54  ;;  %v2897_v1 = vld [vmem:[%s10728_s5 + $0xdd8] sm:$0xff]  ;;  %v7272_v32 = vcombine.low %v2852_v53, %v2868_v54  ;;  %v2515_v17 = vld [vmem:[%s10728_s5 + $0x1e8] sm:$0xff] }
 0x455   :  { %v6417_v18 = vcombine.low %v6409_v8, %v6416_v10  ;;  %6284 = vmatprep.subr.bf16.mxu0 %v7113_v5  ;;  %v2884_v5 = vld [vmem:[%s10728_s5 + $0xd70] sm:$0xff]  ;;  %v7299_v41 = vcombine.high %v2881_v0, %v2897_v1  ;;  %v2913_v10 = vld [vmem:[%s10728_s5 + $0xe58] sm:$0xff]  ;;  %v6886_v38 = vcombine.low %v2467_v26, %v2483_v28  ;;  %v2531_v3 = vld [vmem:[%s10728_s5 + $0x268] sm:$0xff] }
 0x456   :  { %v7305_v8 = vcombine.high %v2884_v5, %v2900_v6  ;;  %v2945_v33 = vld [vmem:[%s10728_s5 + $0xf58] sm:$0xff]  ;;  %v2579_v50 = vld [vmem:[%s10728_s5 + $0x3e8] sm:$0xff] }
 0x457   :  { %6529 = vst [vmem:[%s10732_s7 + $0x8] sm:$0xff] %v6417_v18  ;;  %6162 = vmatpush1.bf16.msra.mxu1 %v7106_v13  ;;  %v2929_v13 = vld [vmem:[%s10728_s5 + $0xed8] sm:$0xff]  ;;  %v7298_v18 = vcombine.low %v2881_v0, %v2897_v1  ;;  %v2595_v54 = vld [vmem:[%s10728_s5 + $0x468] sm:$0xff] }
 0x458   :  { %6285 = vmatpush1.bf16.msra.mxu0 %v7112_v14  ;;  %6163 = vmatprep.subr.bf16.mxu1 %v7139_v15  ;;  %v2916_v14 = vld [vmem:[%s10728_s5 + $0xe70] sm:$0xff]  ;;  %v7331_v20 = vcombine.high %v2913_v10, %v2929_v13  ;;  %v2961_v42 = vld [vmem:[%s10728_s5 + $0xfd8] sm:$0xff]  ;;  %v2643_v0 = vld [vmem:[%s10728_s5 + $0x5e8] sm:$0xff] }
 0x459   :  { %6286 = vmatprep.subr.bf16.mxu0 %v7145_v19  ;;  %v2932_v15 = vld [vmem:[%s10728_s5 + $0xef0] sm:$0xff]  ;;  %v7304_v19 = vcombine.low %v2884_v5, %v2900_v6  ;;  %v7363_v24 = vcombine.high %v2945_v33, %v2961_v42 }
 0x45a   :  { %v7337_v27 = vcombine.high %v2916_v14, %v2932_v15  ;;  %v10464_v5 = vld [vmem:[%s10731_s6 + $0x10] sm:$0xff] }
 0x45b   :  { %6164 = vmatpush1.bf16.msra.mxu1 %v7138_v21  ;;  %v2948_v21 = vld [vmem:[%s10728_s5 + $0xf70] sm:$0xff] }
 0x45c   :  { %6287 = vmatpush1.bf16.msra.mxu0 %v7144_v22  ;;  %6165 = vmatprep.subr.bf16.mxu1 %v7171_v23  ;;  %v2964_v22 = vld [vmem:[%s10728_s5 + $0xff0] sm:$0xff]  ;;  %v7330_v23 = vcombine.low %v2913_v10, %v2929_v13  ;;  %v3023_v10 = vrot.slane %v10054_v2, %v8926_v59 }
 0x45d   :  { %6288 = vmatprep.subr.bf16.mxu0 %v7177_v43  ;;  %v7336_v43 = vcombine.low %v2916_v14, %v2932_v15  ;;  %v7369_v12 = vcombine.high %v2948_v21, %v2964_v22  ;;  %v3047_v14 = vrot.slane %v10464_v5, %v8923_v58 }
 0x45f   :  { %6166 = vmatpush1.bf16.msra.mxu1 %v7170_v30  ;;  %v7362_v30 = vcombine.low %v2945_v33, %v2961_v42 }
 0x460   :  { %6289 = vmatpush1.bf16.msra.mxu0 %v7176_v31  ;;  %6167 = vmatprep.subr.bf16.mxu1 %v7203_v34  ;;  %v7368_v31 = vcombine.low %v2948_v21, %v2964_v22  ;;  %v6887_v34 = vcombine.high %v2467_v26, %v2483_v28 }
 0x461   :  { %6290 = vmatprep.subr.bf16.mxu0 %v7209_v35  ;;  %v2499_v35 = vld [vmem:[%s10728_s5 + $0x168] sm:$0xff] }
 0x462   :  { %v6919_v39 = vcombine.high %v2499_v35, %v2515_v17 }
 0x463   :  { %6168 = vmatpush1.bf16.msra.mxu1 %v7202_v40  ;;  %v2547_v40 = vld [vmem:[%s10728_s5 + $0x2e8] sm:$0xff] }
 0x464   :  { %6291 = vmatpush1.bf16.msra.mxu0 %v7208_v44  ;;  %6169 = vmatprep.subr.bf16.mxu1 %v7235_v45  ;;  %v6918_v44 = vcombine.low %v2499_v35, %v2515_v17  ;;  %v6951_v45 = vcombine.high %v2531_v3, %v2547_v40  ;;  %v6950_v52 = vcombine.low %v2531_v3, %v2547_v40  ;;  %v2739_v35 = vld [vmem:[%s10728_s5 + $0x8e8] sm:$0xff] }
 0x465   :  { %6292 = vmatprep.subr.bf16.mxu0 %v7241_v46  ;;  %v2563_v46 = vld [vmem:[%s10728_s5 + $0x368] sm:$0xff] }
 0x466   :  { %v6983_v53 = vcombine.high %v2563_v46, %v2579_v50 }
 0x467   :  { %6170 = vmatpush1.bf16.msra.mxu1 %v7234_v57  ;;  %v2611_v57 = vld [vmem:[%s10728_s5 + $0x4e8] sm:$0xff] }
 0x468   :  { %6293 = vmatpush1.bf16.msra.mxu0 %v7240_v60  ;;  %6171 = vmatprep.subr.bf16.mxu1 %v7267_v61  ;;  %v6982_v60 = vcombine.low %v2563_v46, %v2579_v50  ;;  %v7015_v61 = vcombine.high %v2595_v54, %v2611_v57  ;;  %v7014_v1 = vcombine.low %v2595_v54, %v2611_v57  ;;  %v2771_v46 = vld [vmem:[%s10728_s5 + $0x9e8] sm:$0xff] }
 0x469   :  { %6294 = vmatprep.subr.bf16.mxu0 %v7273_v62  ;;  %v2627_v62 = vld [vmem:[%s10728_s5 + $0x568] sm:$0xff] }
 0x46a   :  { %v7047_v6 = vcombine.high %v2627_v62, %v2643_v0  ;;  %v7046_v13 = vcombine.low %v2627_v62, %v2643_v0  ;;  %v2803_v50 = vld [vmem:[%s10728_s5 + $0xae8] sm:$0xff] }
 0x46b   :  { %6172 = vmatpush1.bf16.msra.mxu1 %v7266_v7  ;;  %v2659_v7 = vld [vmem:[%s10728_s5 + $0x668] sm:$0xff] }
 0x46c   :  { %6295 = vmatpush1.bf16.msra.mxu0 %v7272_v32  ;;  %6173 = vmatprep.subr.bf16.mxu1 %v7299_v41  ;;  %v2675_v32 = vld [vmem:[%s10728_s5 + $0x6e8] sm:$0xff]  ;;  %v3019_v41 = vrot.slane %v10054_v2, %v9018_v47 }
 0x46d   :  { %6296 = vmatprep.subr.bf16.mxu0 %v7305_v8  ;;  %v3043_v8 = vrot.slane %v10464_v5, %v8915_v56  ;;  %v7079_v15 = vcombine.high %v2659_v7, %v2675_v32  ;;  %v2819_v54 = vld [vmem:[%s10728_s5 + $0xb68] sm:$0xff] }
 0x46e   :  { %v2835_v57 = vld [vmem:[%s10728_s5 + $0xbe8] sm:$0xff] }
 0x46f   :  { %6174 = vmatpush1.bf16.msra.mxu1 %v7298_v18  ;;  %v2851_v62 = vld [vmem:[%s10728_s5 + $0xc68] sm:$0xff] }
 0x470   :  { %6297 = vmatpush1.bf16.msra.mxu0 %v7304_v19  ;;  %6175 = vmatprep.subr.bf16.mxu1 %v7331_v20  ;;  %v2691_v19 = vld [vmem:[%s10728_s5 + $0x768] sm:$0xff] }
 0x471   :  { %6298 = vmatprep.subr.bf16.mxu0 %v7337_v27  ;;  %v2707_v20 = vld [vmem:[%s10728_s5 + $0x7e8] sm:$0xff] }
 0x472   :  { %v7111_v28 = vcombine.high %v2691_v19, %v2707_v20  ;;  %v7110_v3 = vcombine.low %v2691_v19, %v2707_v20  ;;  %v2867_v0 = vld [vmem:[%s10728_s5 + $0xce8] sm:$0xff] }
 0x473   :  { %6176 = vmatpush1.bf16.msra.mxu1 %v7330_v23  ;;  %v2963_v19 = vld [vmem:[%s10728_s5 + $0xfe8] sm:$0xff] }
 0x474   :  { %6299 = vmatpush1.bf16.msra.mxu0 %v7336_v43  ;;  %6177 = vmatprep.subr.bf16.mxu1 %v7363_v24  ;;  %v7078_v43 = vcombine.low %v2659_v7, %v2675_v32  ;;  %v2883_v7 = vld [vmem:[%s10728_s5 + $0xd68] sm:$0xff] }
 0x475   :  { %6300 = vmatprep.subr.bf16.mxu0 %v7369_v12  ;;  %v2899_v32 = vld [vmem:[%s10728_s5 + $0xde8] sm:$0xff] }
 0x477   :  { %6178 = vmatpush1.bf16.msra.mxu1 %v7362_v30 }
 0x478   :  { %6301 = vmatpush1.bf16.msra.mxu0 %v7368_v31  ;;  %6229 = vmatprep.subr.bf16.mxu1 %v6887_v34  ;;  %v2723_v34 = vld [vmem:[%s10728_s5 + $0x868] sm:$0xff] }
 0x479   :  { %v7143_v40 = vcombine.high %v2723_v34, %v2739_v35  ;;  %v7142_v29 = vcombine.low %v2723_v34, %v2739_v35  ;;  %v2565_v35 = vld [vmem:[%s10728_s5 + $0x378] sm:$0xff] }
 0x47a   :  { %6180 = vmatmul.mubr.bf16.vlgmr.msra.gmra.mrb[28].mxu1 %v9180_v25 }
 0x47b   :  { %6303 = vmatmul.mubr.bf16.vlgmr.msra.gmra.mrb[32].mxu0 %v9180_v25  ;;  %6230 = vmatpush1.bf16.msra.mxu1 %v6886_v38  ;;  %v6426_v38 = vrot.slane %v6418_v51, %v8066_v49  ;;  %v2787_v51 = vld [vmem:[%s10728_s5 + $0xa68] sm:$0xff] }
 0x47c   :  { %6261 = vmatprep.mubr.bf16.mxu1 %v9178_v36  ;;  %6231 = vmatprep.subr.bf16.mxu1 %v6919_v39 }
 0x47f   :  { %6232 = vmatpush1.bf16.msra.mxu1 %v6918_v44 }
 0x480   :  { %6233 = vmatprep.subr.bf16.mxu1 %v6951_v45  ;;  %v2755_v45 = vld [vmem:[%s10728_s5 + $0x968] sm:$0xff] }
 0x481   :  { %v7175_v37 = vcombine.high %v2755_v45, %v2771_v46 }
 0x483   :  { %6234 = vmatpush1.bf16.msra.mxu1 %v6950_v52  ;;  %v7174_v52 = vcombine.low %v2755_v45, %v2771_v46  ;;  %v2629_v46 = vld [vmem:[%s10728_s5 + $0x578] sm:$0xff] }
 0x484   :  { %6235 = vmatprep.subr.bf16.mxu1 %v6983_v53  ;;  %v7207_v53 = vcombine.high %v2787_v51, %v2803_v50 }
 0x487   :  { %6236 = vmatpush1.bf16.msra.mxu1 %v6982_v60  ;;  %v7206_v60 = vcombine.low %v2787_v51, %v2803_v50  ;;  %v2661_v50 = vld [vmem:[%s10728_s5 + $0x678] sm:$0xff] }
 0x488   :  { %6237 = vmatprep.subr.bf16.mxu1 %v7015_v61  ;;  %v7239_v61 = vcombine.high %v2819_v54, %v2835_v57 }
 0x48b   :  { %6238 = vmatpush1.bf16.msra.mxu1 %v7014_v1  ;;  %v7238_v1 = vcombine.low %v2819_v54, %v2835_v57  ;;  %v3059_v57 = vrot.slane %v10464_v5, %v9819_v63 }
 0x48c   :  { %6239 = vmatprep.subr.bf16.mxu1 %v7047_v6  ;;  %v7271_v6 = vcombine.high %v2851_v62, %v2867_v0 }
 0x48d   :  { %v5935_v18 = vpop.f32.mrb[16].mxu1 }
 0x48e   :  { %v5936_v27 = vadd.f32 %v5935_v18, %v3019_v41  ;;  %v6058_v33 = vpop.f32.mrb[20].mxu0  ;;  %v5937_v42 = vpop.f32.mrb[17].mxu1  ;;  %v7270_v41 = vcombine.low %v2851_v62, %v2867_v0  ;;  %v2947_v18 = vld [vmem:[%s10728_s5 + $0xf68] sm:$0xff]  ;;  %v3063_v62 = vrot.slane %v10464_v5, %v9833_v4 }
 0x48f   :  { %v10486_v21 = vadd.f32 %v6058_v33, %v3043_v8  ;;  %v5938_v2 = vadd.f32 %v5937_v42, %v3023_v10  ;;  %v6060_v22 = vpop.f32.mrb[21].mxu0  ;;  %v5939_v23 = vpop.f32.mrb[18].mxu1  ;;  %6240 = vmatpush1.bf16.msra.mxu1 %v7046_v13  ;;  %v7303_v8 = vcombine.high %v2883_v7, %v2899_v32  ;;  %v2915_v10 = vld [vmem:[%s10728_s5 + $0xe68] sm:$0xff]  ;;  %v2469_v33 = vld [vmem:[%s10728_s5 + $0x78] sm:$0xff] }
 0x490   :  { %v10488_v24 = vadd.f32 %v6060_v22, %v3047_v14  ;;  %v6062_v12 = vpop.f32.mrb[22].mxu0  ;;  %v5940_v26 = vpop.f32.mrb[19].mxu1  ;;  %6241 = vmatprep.subr.bf16.mxu1 %v7079_v15  ;;  %v2931_v13 = vld [vmem:[%s10728_s5 + $0xee8] sm:$0xff]  ;;  %v7302_v14 = vcombine.low %v2883_v7, %v2899_v32  ;;  %v2485_v42 = vld [vmem:[%s10728_s5 + $0xf8] sm:$0xff] }
 0x491   :  { %v6419_v30 = vcombine.low %v5936_v27, %v5938_v2  ;;  %v6063_v31 = vpop.f32.mrb[23].mxu0  ;;  %v7335_v15 = vcombine.high %v2915_v10, %v2931_v13  ;;  %v7334_v20 = vcombine.low %v2915_v10, %v2931_v13  ;;  %v7367_v27 = vcombine.high %v2947_v18, %v2963_v19  ;;  %v2501_v23 = vld [vmem:[%s10728_s5 + $0x178] sm:$0xff] }
 0x492   :  { %v6452_v17 = vcombine.low %v10486_v21, %v10488_v24  ;;  %v7366_v2 = vcombine.low %v2947_v18, %v2963_v19  ;;  %v6891_v22 = vcombine.high %v2469_v33, %v2485_v42  ;;  %v6890_v12 = vcombine.low %v2469_v33, %v2485_v42  ;;  %v2709_v7 = vld [vmem:[%s10728_s5 + $0x7f8] sm:$0xff] }
 0x493   :  { %v6433_v39 = vrot.slane %v6419_v30, %v8066_v49  ;;  %6242 = vmatpush1.bf16.msra.mxu1 %v7078_v43  ;;  %v2517_v43 = vld [vmem:[%s10728_s5 + $0x1f8] sm:$0xff] }
 0x494   :  { %6243 = vmatprep.subr.bf16.mxu1 %v7111_v28  ;;  %v6923_v26 = vcombine.high %v2501_v23, %v2517_v43  ;;  %v2533_v28 = vld [vmem:[%s10728_s5 + $0x278] sm:$0xff]  ;;  %v6922_v31 = vcombine.low %v2501_v23, %v2517_v43 }
 0x495   :  { %v6434_v44 = vcombine.low %v6426_v38, %v6433_v39  ;;  %v2549_v30 = vld [vmem:[%s10728_s5 + $0x2f8] sm:$0xff] }
 0x496   :  { %v6955_v34 = vcombine.high %v2533_v28, %v2549_v30  ;;  %v2581_v38 = vld [vmem:[%s10728_s5 + $0x3f8] sm:$0xff]  ;;  %v6954_v39 = vcombine.low %v2533_v28, %v2549_v30 }
 0x497   :  { %6530 = vst [vmem:[%s10732_s7 + $0x10] sm:$0xff] %v6434_v44  ;;  %6244 = vmatpush1.bf16.msra.mxu1 %v7110_v3  ;;  %v6987_v3 = vcombine.high %v2565_v35, %v2581_v38  ;;  %v6986_v44 = vcombine.low %v2565_v35, %v2581_v38  ;;  %v2741_v23 = vld [vmem:[%s10728_s5 + $0x8f8] sm:$0xff] }
 0x498   :  { %6245 = vmatprep.subr.bf16.mxu1 %v7143_v40  ;;  %v2597_v40 = vld [vmem:[%s10728_s5 + $0x478] sm:$0xff] }
 0x499   :  { %v2773_v35 = vld [vmem:[%s10728_s5 + $0x9f8] sm:$0xff] }
 0x49a   :  { %v2805_v38 = vld [vmem:[%s10728_s5 + $0xaf8] sm:$0xff] }
 0x49b   :  { %6246 = vmatpush1.bf16.msra.mxu1 %v7142_v29  ;;  %v2645_v29 = vld [vmem:[%s10728_s5 + $0x5f8] sm:$0xff] }
 0x49c   :  { %6247 = vmatprep.subr.bf16.mxu1 %v7175_v37  ;;  %v7051_v51 = vcombine.high %v2629_v46, %v2645_v29 }
 0x49f   :  { %6248 = vmatpush1.bf16.msra.mxu1 %v7174_v52  ;;  %v2677_v52 = vld [vmem:[%s10728_s5 + $0x6f8] sm:$0xff] }
 0x4a0   :  { %6249 = vmatprep.subr.bf16.mxu1 %v7207_v53  ;;  %v7889_v53 = vld [vmem:[%s10731_s6 + $0x8] sm:$0xff]  ;;  %v7083_v0 = vcombine.high %v2661_v50, %v2677_v52  ;;  %v7082_v18 = vcombine.low %v2661_v50, %v2677_v52  ;;  %v2885_v50 = vld [vmem:[%s10728_s5 + $0xd78] sm:$0xff] }
 0x4a1   :  { %v3035_v54 = vrot.slane %v7889_v53, %v10269_v11  ;;  %v2901_v52 = vld [vmem:[%s10728_s5 + $0xdf8] sm:$0xff] }
 0x4a3   :  { %6250 = vmatpush1.bf16.msra.mxu1 %v7206_v60  ;;  %v3039_v60 = vrot.slane %v7889_v53, %v10278_v16 }
 0x4a4   :  { %6251 = vmatprep.subr.bf16.mxu1 %v7239_v61  ;;  %v7050_v61 = vcombine.low %v2629_v46, %v2645_v29  ;;  %v2853_v46 = vld [vmem:[%s10728_s5 + $0xc78] sm:$0xff] }
 0x4a5   :  { %v2869_v29 = vld [vmem:[%s10728_s5 + $0xcf8] sm:$0xff] }
 0x4a6   :  { %v7274_v53 = vcombine.low %v2853_v46, %v2869_v29 }
 0x4a7   :  { %6252 = vmatpush1.bf16.msra.mxu1 %v7238_v1 }
 0x4a8   :  { %6253 = vmatprep.subr.bf16.mxu1 %v7271_v6  ;;  %v2693_v6 = vld [vmem:[%s10728_s5 + $0x778] sm:$0xff] }
 0x4a9   :  { %v7115_v33 = vcombine.high %v2693_v6, %v2709_v7  ;;  %v7114_v28 = vcombine.low %v2693_v6, %v2709_v7 }
 0x4ab   :  { %6254 = vmatpush1.bf16.msra.mxu1 %v7270_v41 }
 0x4ac   :  { %6255 = vmatprep.subr.bf16.mxu1 %v7303_v8 }
 0x4af   :  { %6256 = vmatpush1.bf16.msra.mxu1 %v7302_v14 }
 0x4b0   :  { %6257 = vmatprep.subr.bf16.mxu1 %v7335_v15 }
 0x4b3   :  { %6258 = vmatpush1.bf16.msra.mxu1 %v7334_v20 }
 0x4b4   :  { %6259 = vmatprep.subr.bf16.mxu1 %v7367_v27 }
 0x4b7   :  { %6260 = vmatpush1.bf16.msra.mxu1 %v7366_v2 }
 0x4b8   :  { %6311 = vmatprep.subr.bf16.mxu1 %v6891_v22  ;;  %v2725_v22 = vld [vmem:[%s10728_s5 + $0x878] sm:$0xff] }
 0x4b9   :  { %v7147_v30 = vcombine.high %v2725_v22, %v2741_v23  ;;  %v7146_v48 = vcombine.low %v2725_v22, %v2741_v23 }
 0x4ba   :  { %6262 = vmatmul.mubr.bf16.vlgmr.msra.gmra.mrb[32].mxu1 %v9180_v25 }
 0x4bb   :  { %6312 = vmatpush1.bf16.msra.mxu1 %v6890_v12  ;;  %6343 = vmatprep.mubr.bf16.mxu1 %v9178_v36  ;;  %v2613_v36 = vld [vmem:[%s10728_s5 + $0x4f8] sm:$0xff]  ;;  %v6443_v12 = vrot.slane %v6435_v9, %v8066_v49 }
 0x4bc   :  { %6313 = vmatprep.subr.bf16.mxu1 %v6923_v26  ;;  %v7019_v45 = vcombine.high %v2597_v40, %v2613_v36  ;;  %v7018_v37 = vcombine.low %v2597_v40, %v2613_v36  ;;  %v2789_v9 = vld [vmem:[%s10728_s5 + $0xa78] sm:$0xff] }
 0x4bd   :  { %v2821_v40 = vld [vmem:[%s10728_s5 + $0xb78] sm:$0xff] }
 0x4be   :  { %v2837_v36 = vld [vmem:[%s10728_s5 + $0xbf8] sm:$0xff] }
 0x4bf   :  { %6314 = vmatpush1.bf16.msra.mxu1 %v6922_v31 }
 0x4c0   :  { %6315 = vmatprep.subr.bf16.mxu1 %v6955_v34  ;;  %v2757_v34 = vld [vmem:[%s10728_s5 + $0x978] sm:$0xff] }
 0x4c1   :  { %v7179_v55 = vcombine.high %v2757_v34, %v2773_v35 }
 0x4c3   :  { %6316 = vmatpush1.bf16.msra.mxu1 %v6954_v39  ;;  %v7178_v39 = vcombine.low %v2757_v34, %v2773_v35  ;;  %v3067_v35 = vrot.slane %v10464_v5, %v10269_v11 }
 0x4c4   :  { %6317 = vmatprep.subr.bf16.mxu1 %v6987_v3  ;;  %v7211_v3 = vcombine.high %v2789_v9, %v2805_v38 }
 0x4c7   :  { %6318 = vmatpush1.bf16.msra.mxu1 %v6986_v44  ;;  %v7210_v44 = vcombine.low %v2789_v9, %v2805_v38 }
 0x4c8   :  { %6319 = vmatprep.subr.bf16.mxu1 %v7019_v45  ;;  %v7243_v45 = vcombine.high %v2821_v40, %v2837_v36 }
 0x4cb   :  { %6320 = vmatpush1.bf16.msra.mxu1 %v7018_v37  ;;  %v7242_v37 = vcombine.low %v2821_v40, %v2837_v36 }
 0x4cc   :  { %6321 = vmatprep.subr.bf16.mxu1 %v7051_v51  ;;  %v7275_v51 = vcombine.high %v2853_v46, %v2869_v29 }
 0x4cd   :  { %v6017_v1 = vpop.f32.mrb[20].mxu1 }
 0x4ce   :  { %v6018_v32 = vadd.f32 %v6017_v1, %v3035_v54  ;;  %v6140_v41 = vpop.f32.mrb[24].mxu0  ;;  %v6019_v8 = vpop.f32.mrb[21].mxu1  ;;  %v7307_v54 = vcombine.high %v2885_v50, %v2901_v52  ;;  %v2965_v1 = vld [vmem:[%s10728_s5 + $0xff8] sm:$0xff] }
 0x4cf   :  { %v10607_v10 = vadd.f32 %v6140_v41, %v3059_v57  ;;  %v6020_v13 = vadd.f32 %v6019_v8, %v3039_v60  ;;  %v6142_v14 = vpop.f32.mrb[25].mxu0  ;;  %v6021_v15 = vpop.f32.mrb[22].mxu1  ;;  %6322 = vmatpush1.bf16.msra.mxu1 %v7050_v61  ;;  %v2917_v57 = vld [vmem:[%s10728_s5 + $0xe78] sm:$0xff]  ;;  %v7306_v61 = vcombine.low %v2885_v50, %v2901_v52  ;;  %v3051_v8 = vrot.slane %v10464_v5, %v9018_v47 }
 0x4d0   :  { %v10609_v19 = vadd.f32 %v6142_v14, %v3063_v62  ;;  %v6144_v20 = vpop.f32.mrb[26].mxu0  ;;  %v6022_v27 = vpop.f32.mrb[23].mxu1  ;;  %6323 = vmatprep.subr.bf16.mxu1 %v7083_v0  ;;  %v2933_v60 = vld [vmem:[%s10728_s5 + $0xef8] sm:$0xff]  ;;  %v3055_v14 = vrot.slane %v10464_v5, %v8926_v59 }
 0x4d1   :  { %v6436_v42 = vcombine.low %v6018_v32, %v6020_v13  ;;  %v6145_v2 = vpop.f32.mrb[27].mxu0  ;;  %v7339_v62 = vcombine.high %v2917_v57, %v2933_v60  ;;  %v2949_v0 = vld [vmem:[%s10728_s5 + $0xf78] sm:$0xff]  ;;  %v7338_v6 = vcombine.low %v2917_v57, %v2933_v60 }
 0x4d2   :  { %v6469_v43 = vcombine.low %v10607_v10, %v10609_v19  ;;  %v7371_v7 = vcombine.high %v2949_v0, %v2965_v1  ;;  %v7370_v32 = vcombine.low %v2949_v0, %v2965_v1  ;;  %v10673_v41 = vld [vmem:[%s10731_s6 + $0x18] sm:$0xff] }
 0x4d3   :  { %v6450_v26 = vrot.slane %v6436_v42, %v8066_v49  ;;  %6324 = vmatpush1.bf16.msra.mxu1 %v7082_v18  ;;  %v3075_v13 = vrot.slane %v10673_v41, %v8915_v56  ;;  %v3079_v15 = vrot.slane %v10673_v41, %v8923_v58  ;;  %v3095_v21 = vrot.slane %v10673_v41, %v9833_v4 }
 0x4d4   :  { %6325 = vmatprep.subr.bf16.mxu1 %v7115_v33  ;;  %v3083_v50 = vrot.slane %v10673_v41, %v9018_v47  ;;  %v3087_v52 = vrot.slane %v10673_v41, %v8926_v59  ;;  %v3099_v47 = vrot.slane %v10673_v41, %v10269_v11  ;;  %v3103_v59 = vrot.slane %v10673_v41, %v10278_v16 }
 0x4d5   :  { %v6451_v31 = vcombine.low %v6443_v12, %v6450_v26 }
 0x4d7   :  { %6531 = vst [vmem:[%s10732_s7 + $0x18] sm:$0xff] %v6451_v31  ;;  %6326 = vmatpush1.bf16.msra.mxu1 %v7114_v28  ;;  %v6460_v31 = vrot.slane %v6452_v17, %v8066_v49 }
 0x4d8   :  { %6327 = vmatprep.subr.bf16.mxu1 %v7147_v30 }
 0x4db   :  { %6328 = vmatpush1.bf16.msra.mxu1 %v7146_v48  ;;  %v3091_v48 = vrot.slane %v10673_v41, %v9819_v63 }
 0x4dc   :  { %6329 = vmatprep.subr.bf16.mxu1 %v7179_v55  ;;  %v3071_v55 = vrot.slane %v10464_v5, %v10278_v16  ;;  %v6477_v5 = vrot.slane %v6469_v43, %v8066_v49 }
 0x4df   :  { %6330 = vmatpush1.bf16.msra.mxu1 %v7178_v39 }
 0x4e0   :  { %6331 = vmatprep.subr.bf16.mxu1 %v7211_v3 }
 0x4e3   :  { %6332 = vmatpush1.bf16.msra.mxu1 %v7210_v44 }
 0x4e4   :  { %6333 = vmatprep.subr.bf16.mxu1 %v7243_v45 }
 0x4e7   :  { %6334 = vmatpush1.bf16.msra.mxu1 %v7242_v37 }
 0x4e8   :  { %6335 = vmatprep.subr.bf16.mxu1 %v7275_v51 }
 0x4eb   :  { %6336 = vmatpush1.bf16.msra.mxu1 %v7274_v53 }
 0x4ec   :  { %6337 = vmatprep.subr.bf16.mxu1 %v7307_v54 }
 0x4ef   :  { %6338 = vmatpush1.bf16.msra.mxu1 %v7306_v61 }
 0x4f0   :  { %6339 = vmatprep.subr.bf16.mxu1 %v7339_v62 }
 0x4f3   :  { %6340 = vmatpush1.bf16.msra.mxu1 %v7338_v6 }
 0x4f4   :  { %6341 = vmatprep.subr.bf16.mxu1 %v7371_v7 }
 0x4f7   :  { %6342 = vmatpush1.bf16.msra.mxu1 %v7370_v32 }
 0x4fa   :  { %6344 = vmatmul.mubr.bf16.vlgmr.msra.gmra.mrb[36].mxu1 %v9180_v25 }
 0x50d   :  { %v6099_v18 = vpop.f32.mrb[24].mxu1 }
 0x50e   :  { %v6100_v20 = vadd.f32 %v6099_v18, %v3051_v8  ;;  %v6222_v25 = vpop.f32.mrb[28].mxu0  ;;  %v6101_v27 = vpop.f32.mrb[25].mxu1 }
 0x50f   :  { %v6223_v33 = vadd.f32 %v6222_v25, %v3075_v13  ;;  %v6102_v42 = vadd.f32 %v6101_v27, %v3055_v14  ;;  %v6224_v2 = vpop.f32.mrb[29].mxu0  ;;  %v6103_v22 = vpop.f32.mrb[26].mxu1 }
 0x510   :  { %v6225_v23 = vadd.f32 %v6224_v2, %v3079_v15  ;;  %v6226_v12 = vpop.f32.mrb[30].mxu0  ;;  %v6104_v26 = vpop.f32.mrb[27].mxu1 }
 0x511   :  { %v6453_v28 = vcombine.low %v6100_v20, %v6102_v42  ;;  %v6227_v30 = vpop.f32.mrb[31].mxu0 }
 0x512   :  { %v6486_v56 = vcombine.low %v6223_v33, %v6225_v23 }
 0x513   :  { %v6467_v58 = vrot.slane %v6453_v28, %v8066_v49 }
 0x514   :  { %v6494_v43 = vrot.slane %v6486_v56, %v8066_v49 }
 0x515   :  { %v6468_v34 = vcombine.low %v6460_v31, %v6467_v58 }
 0x517   :  { %6532 = vst [vmem:[%s10732_s7 + $0x20] sm:$0xff] %v6468_v34 }
 0x54d   :  { %v6181_v24 = vpop.f32.mrb[28].mxu1 }
 0x54e   :  { %v6182_v17 = vadd.f32 %v6181_v24, %v3067_v35  ;;  %v6304_v9 = vpop.f32.mrb[32].mxu0  ;;  %v6183_v38 = vpop.f32.mrb[29].mxu1 }
 0x54f   :  { %v6305_v39 = vadd.f32 %v6304_v9, %v3091_v48  ;;  %v6184_v3 = vadd.f32 %v6183_v38, %v3071_v55  ;;  %v6306_v40 = vpop.f32.mrb[33].mxu0  ;;  %v6185_v36 = vpop.f32.mrb[30].mxu1 }
 0x550   :  { %v6307_v44 = vadd.f32 %v6306_v40, %v3095_v21  ;;  %v6308_v45 = vpop.f32.mrb[34].mxu0  ;;  %v6186_v46 = vpop.f32.mrb[31].mxu1 }
 0x551   :  { %v6470_v29 = vcombine.low %v6182_v17, %v6184_v3  ;;  %v6309_v37 = vpop.f32.mrb[35].mxu0 }
 0x552   :  { %v6503_v63 = vcombine.low %v6305_v39, %v6307_v44 }
 0x553   :  { %v6484_v4 = vrot.slane %v6470_v29, %v8066_v49 }
 0x554   :  { %v6511_v15 = vrot.slane %v6503_v63, %v8066_v49 }
 0x555   :  { %v6485_v51 = vcombine.low %v6477_v5, %v6484_v4 }
 0x557   :  { %6533 = vst [vmem:[%s10732_s7 + $0x28] sm:$0xff] %v6485_v51 }
 0x58d   :  { %v6263_v53 = vpop.f32.mrb[32].mxu1 }
 0x58e   :  { %v6264_v54 = vadd.f32 %v6263_v53, %v3083_v50  ;;  %v6265_v57 = vpop.f32.mrb[33].mxu1 }
 0x58f   :  { %v6266_v60 = vadd.f32 %v6265_v57, %v3087_v52  ;;  %v6267_v61 = vpop.f32.mrb[34].mxu1 }
 0x590   :  { %v6268_v10 = vpop.f32.mrb[35].mxu1 }
 0x591   :  { %v6487_v19 = vcombine.low %v6264_v54, %v6266_v60 }
 0x593   :  { %v6501_v62 = vrot.slane %v6487_v19, %v8066_v49 }
 0x595   :  { %v6502_v0 = vcombine.low %v6494_v43, %v6501_v62 }
 0x597   :  { %6534 = vst [vmem:[%s10732_s7 + $0x30] sm:$0xff] %v6502_v0 }
 0x5cd   :  { %v6345_v1 = vpop.f32.mrb[36].mxu1 }
 0x5ce   :  { %v6346_v6 = vadd.f32 %v6345_v1, %v3099_v47  ;;  %v6347_v7 = vpop.f32.mrb[37].mxu1 }
 0x5cf   :  { %v6348_v32 = vadd.f32 %v6347_v7, %v3103_v59  ;;  %v6349_v8 = vpop.f32.mrb[38].mxu1 }
 0x5d0   :  { %v6350_v13 = vpop.f32.mrb[39].mxu1 }
 0x5d1   :  { %v6504_v14 = vcombine.low %v6346_v6, %v6348_v32 }
 0x5d3   :  { %v6518_v18 = vrot.slane %v6504_v14, %v8066_v49 }
 0x5d5   :  { %v6519_v20 = vcombine.low %v6511_v15, %v6518_v18 }
 0x5d7   :  { %6535 = vst [vmem:[%s10732_s7 + $0x38] sm:$0xff] %v6519_v20 }

</bundles_post_ra>
